<compile_context>
chip_gen: v7x
topology: tpu7x:2x2x1
jax: 0.10.0
libtpu: 0.0.40
codegen_flags: <defaults>
</compile_context>

<pallas_src>
import functools

import numpy as np
import jax
import jax.numpy as jnp
from jax.experimental import pallas as pl
from jax.experimental.pallas import tpu as pltpu  # noqa: F401  (kept for TPU-specific tuning hooks)

# ----------------------------- hyper-parameters ------------------------------
IFZ = 32                      # in_features (sequence embedding dim)
HFZ = 32                      # hidden_features
AHZ = 4                       # attention_heads
QPZ = 4                       # query_points
KZ = 4                        # num_neighbours
NUM_LAYERS = 2
CANONICAL_NUM_RESIDUES = 20
AA = CANONICAL_NUM_RESIDUES
DH = HFZ // AHZ               # per-head dim
HP = AHZ * QPZ                # heads * points
TOR = (CANONICAL_NUM_RESIDUES * 5 + 3) * 2
NEG_INF = -1e9
LN_EPS = 1e-5
ATT_SCALE = 1.0 / float(np.sqrt(DH))

# Idealized local N, CA, C coordinates (Angstrom) in the residue frame.
IDEAL_NCAC = np.array(
    [[-0.525, 1.363, 0.0],
     [0.0, 0.0, 0.0],
     [1.526, 0.0, 0.0]], dtype=np.float32)

# Column permutation mapping the natural (head, point, coord) point-projection
# layout to a coordinate-grouped layout [x(H*P) | y(H*P) | z(H*P)] (head-major,
# point-minor inside each coordinate block) so the in-kernel frame transform
# only needs contiguous lane slices.
_PT_PERM = np.arange(AHZ * QPZ * 3).reshape(AHZ, QPZ, 3).transpose(2, 0, 1).reshape(-1)


# --------------------------- in-kernel building blocks ------------------------
def _layer_norm(y, g, b):
    mu = jnp.mean(y, axis=-1, keepdims=True)
    var = jnp.mean((y - mu) ** 2, axis=-1, keepdims=True)
    return (y - mu) * jax.lax.rsqrt(var + LN_EPS) * g + b


def _softmax(logits):
    m = jnp.max(logits, axis=-1, keepdims=True)
    e = jnp.exp(logits - m)
    return e * pl.reciprocal(jnp.sum(e, axis=-1, keepdims=True), approx=True)


def _res_block(h, w1, b1, w2, b2, g, bt):
    # FcResBlock: LN(h + fc2(relu(fc1(h)))) * g + bt
    a = jnp.dot(h, w1, preferred_element_type=jnp.float32) + b1
    a = jnp.maximum(a, 0.0)
    a = jnp.dot(a, w2, preferred_element_type=jnp.float32) + b2
    return _layer_norm(h + a, g, bt)


def _global_points(p_cg, r, t, whs):
    # p_cg: (N, 3*HP) coordinate-grouped local points; r: (N, 9); t: (N, 3)
    # whs: (1, HP) per-head sqrt(point-weight) (folds the IPA head weighting
    # into the point coordinates so the kernel needs no per-head scalars).
    px = p_cg[:, 0:HP]
    py = p_cg[:, HP:2 * HP]
    pz = p_cg[:, 2 * HP:3 * HP]
    gx = r[:, 0:1] * px + r[:, 1:2] * py + r[:, 2:3] * pz + t[:, 0:1]
    gy = r[:, 3:4] * px + r[:, 4:5] * py + r[:, 5:6] * pz + t[:, 1:2]
    gz = r[:, 6:7] * px + r[:, 7:8] * py + r[:, 8:9] * pz + t[:, 2:3]
    return gx * whs, gy * whs, gz * whs


def _ipa_attention(x, r, t, whs, nb_bias, wqkvp, bqkvp, wo,
                   *, two_point_sets, accumulate_probs):
    """Fused multi-head IPA-style attention.

    Returns (proj, probs_sum) where proj = concat_h(attn_h) @ Wo (accumulated
    per head, so heads are never materialized/concatenated) and probs_sum is
    the sum of the per-head attention probabilities (or None).
    """
    n = x.shape[0]
    qkvp = jnp.dot(x, wqkvp, preferred_element_type=jnp.float32) + bqkvp
    q = qkvp[:, 0:HFZ]
    k = qkvp[:, HFZ:2 * HFZ]
    v = qkvp[:, 2 * HFZ:3 * HFZ]
    off = 3 * HFZ
    qg = _global_points(qkvp[:, off:off + 3 * HP], r, t, whs)
    if two_point_sets:
        kg = _global_points(qkvp[:, off + 3 * HP:off + 6 * HP], r, t, whs)
    else:
        kg = qg

    ones_p = jnp.ones((1, QPZ), jnp.float32)
    proj = jnp.zeros((n, wo.shape[1]), jnp.float32)
    probs_sum = jnp.zeros((n, n), jnp.float32) if accumulate_probs else None

    for h in range(AHZ):
        hs = slice(h * DH, (h + 1) * DH)
        ps = slice(h * QPZ, (h + 1) * QPZ)
        qx, qy, qz = qg[0][:, ps], qg[1][:, ps], qg[2][:, ps]
        kx, ky, kz = kg[0][:, ps], kg[1][:, ps], kg[2][:, ps]

        # squared point distances via ||q||^2 + ||k||^2 - 2 q.k (all 2-D ops)
        qk_pts = (jnp.dot(qx, kx.T, preferred_element_type=jnp.float32)
                  + jnp.dot(qy, ky.T, preferred_element_type=jnp.float32)
                  + jnp.dot(qz, kz.T, preferred_element_type=jnp.float32))
        qq = jnp.sum(qx * qx + qy * qy + qz * qz, axis=-1, keepdims=True)   # (N,1)
        kk_row = jnp.dot(ones_p, (kx * kx + ky * ky + kz * kz).T,
                         preferred_element_type=jnp.float32)                # (1,N)
        d2 = qq + kk_row - 2.0 * qk_pts                                     # (N,N)

        logits = (jnp.dot(q[:, hs], k[:, hs].T,
                          preferred_element_type=jnp.float32) * ATT_SCALE
                  + nb_bias - 0.5 * d2)
        p = _softmax(logits)
        if accumulate_probs:
            probs_sum = probs_sum + p
        out_h = jnp.dot(p, v[:, hs], preferred_element_type=jnp.float32)
        proj = proj + jnp.dot(out_h, wo[hs, :],
                              preferred_element_type=jnp.float32)
    return proj, probs_sum


# ------------------------------ Pallas kernels --------------------------------
def _cryo_attn_kernel(x_ref, r_ref, t_ref, whs_ref, nb_ref,
                      wqkvp_ref, bqkvp_ref, wo_ref, bo_ref, g_ref, bt_ref,
                      waa_ref, baa_ref, o_ref):
    x = x_ref[...]
    proj, probs_sum = _ipa_attention(
        x, r_ref[...], t_ref[...], whs_ref[...], nb_ref[...],
        wqkvp_ref[...], bqkvp_ref[...], wo_ref[...],
        two_point_sets=False, accumulate_probs=True)
    xn = _layer_norm(proj + bo_ref[...] + x, g_ref[...], bt_ref[...])
    aa = jnp.dot(xn, waa_ref[...], preferred_element_type=jnp.float32) + baa_ref[...]
    o_ref[:, 0:HFZ] = xn.astype(o_ref.dtype)
    o_ref[:, HFZ:HFZ + AA] = aa.astype(o_ref.dtype)
    o_ref[:, HFZ + AA:] = (probs_sum * (1.0 / AHZ)).astype(o_ref.dtype)


def _spatial_ipa_kernel(x_ref, r_ref, t_ref, whs_ref, nb_ref,
                        wqkvp_ref, bqkvp_ref, wo_ref, bo_ref, g_ref, bt_ref,
                        o_ref):
    x = x_ref[...]
    proj, _ = _ipa_attention(
        x, r_ref[...], t_ref[...], whs_ref[...], nb_ref[...],
        wqkvp_ref[...], bqkvp_ref[...], wo_ref[...],
        two_point_sets=True, accumulate_probs=False)
    o_ref[...] = _layer_norm(proj + bo_ref[...] + x,
                             g_ref[...], bt_ref[...]).astype(o_ref.dtype)


def _seq_attn_kernel(x_ref, seq_ref, mask_ref,
                     wq_ref, bq_ref, wkv_ref, bkv_ref,
                     wo_ref, bo_ref, g_ref, bt_ref, waa_ref, baa_ref,
                     o_ref, probs_ref):
    x = x_ref[...]
    seq = seq_ref[...]
    q = jnp.dot(x, wq_ref[...], preferred_element_type=jnp.float32) + bq_ref[...]
    kv = jnp.dot(seq, wkv_ref[...], preferred_element_type=jnp.float32) + bkv_ref[...]
    k = kv[:, 0:HFZ]
    v = kv[:, HFZ:2 * HFZ]
    mask_bias = mask_ref[...]                                    # (1, S), broadcast in-kernel
    n = x.shape[0]
    wo = wo_ref[...]
    proj = jnp.zeros((n, HFZ), jnp.float32)
    for h in range(AHZ):
        hs = slice(h * DH, (h + 1) * DH)
        logits = (jnp.dot(q[:, hs], k[:, hs].T,
                          preferred_element_type=jnp.float32) * ATT_SCALE
                  + mask_bias)
        p = _softmax(logits)
        probs_ref[h] = p.astype(probs_ref.dtype)
        out_h = jnp.dot(p, v[:, hs], preferred_element_type=jnp.float32)
        proj = proj + jnp.dot(out_h, wo[hs, :],
                              preferred_element_type=jnp.float32)
    xn = _layer_norm(proj + bo_ref[...] + x, g_ref[...], bt_ref[...])
    aa = jnp.dot(xn, waa_ref[...], preferred_element_type=jnp.float32) + baa_ref[...]
    o_ref[:, 0:HFZ] = xn.astype(o_ref.dtype)
    o_ref[:, HFZ:] = aa.astype(o_ref.dtype)


def _transition_backbone_kernel(x_ref, w1_ref, b1_ref, w2_ref, b2_ref,
                                g_ref, bt_ref, wbo_ref, bbo_ref, o_ref):
    # Blocks 0..2: transition FcResBlocks; block 3: BackboneFrameNet res block.
    h = x_ref[...]
    for i in range(3):
        h = _res_block(h, w1_ref[i], b1_ref[i], w2_ref[i], b2_ref[i],
                       g_ref[i], bt_ref[i])
    x_new = h
    hb = _res_block(x_new, w1_ref[3], b1_ref[3], w2_ref[3], b2_ref[3],
                    g_ref[3], bt_ref[3])
    upd = jnp.dot(hb, wbo_ref[...], preferred_element_type=jnp.float32) + bbo_ref[...]
    o_ref[:, 0:HFZ] = x_new.astype(o_ref.dtype)
    o_ref[:, HFZ:] = upd.astype(o_ref.dtype)


def _heads_kernel(x_ref, w1_ref, b1_ref, w2_ref, b2_ref, g_ref, bt_ref,
                  wt_ref, bt_out_ref, wc_ref, bc_ref, we_ref, be_ref, o_ref):
    # Stacked res blocks: 0..2 torsion chain, 3..5 confidence, 6..8 existence.
    x = x_ref[...]

    def chain(start):
        h = x
        for i in range(start, start + 3):
            h = _res_block(h, w1_ref[i], b1_ref[i], w2_ref[i], b2_ref[i],
                           g_ref[i], bt_ref[i])
        return h

    ht = chain(0)
    hc = chain(3)
    he = chain(6)
    o_ref[:, 0:TOR] = (jnp.dot(ht, wt_ref[...],
                               preferred_element_type=jnp.float32)
                       + bt_out_ref[...]).astype(o_ref.dtype)
    o_ref[:, TOR:TOR + 1] = (jnp.dot(hc, wc_ref[...],
                                     preferred_element_type=jnp.float32)
                             + bc_ref[...]).astype(o_ref.dtype)
    o_ref[:, TOR + 1:TOR + 2] = (jnp.dot(he, we_ref[...],
                                         preferred_element_type=jnp.float32)
                                 + be_ref[...]).astype(o_ref.dtype)


# --------------------------------- XLA glue -----------------------------------
def knn_bias(t, kz):
    """Additive bias restricting attention to the kz nearest neighbours."""
    n = t.shape[0]
    d2 = jnp.sum((t[:, None, :] - t[None, :, :]) ** 2, axis=-1)      # (N,N)
    nbr_idx = jnp.argsort(d2, axis=-1)[:, :kz]                       # (N,KZ)
    mask = jnp.zeros((n, n), dtype=bool).at[
        jnp.arange(n)[:, None], nbr_idx].set(True)
    return jnp.where(mask, 0.0, NEG_INF).astype(jnp.float32), nbr_idx


def _head_point_scale(gamma_raw):
    # sqrt(softplus(gamma) * sqrt(2/(9P))) repeated per point -> (1, H*P)
    w = jax.nn.softplus(gamma_raw) * np.sqrt(2.0 / (9.0 * QPZ))
    return jnp.repeat(jnp.sqrt(w), QPZ)[None, :]


def quat_to_rot(a, b, c, d):
    row0 = jnp.stack([a * a + b * b - c * c - d * d,
                      2 * (b * c - a * d), 2 * (b * d + a * c)], axis=-1)
    row1 = jnp.stack([2 * (b * c + a * d),
                      a * a - b * b + c * c - d * d, 2 * (c * d - a * b)], axis=-1)
    row2 = jnp.stack([2 * (b * d - a * c), 2 * (c * d + a * b),
                      a * a - b * b - c * c + d * d], axis=-1)
    return jnp.stack([row0, row1, row2], axis=-2)                    # (N,3,3)


# ------------------------------ block wrappers ---------------------------------
def cryo_attention_block(p, x, R, t, nb_bias, nbr_idx):
    n = x.shape[0]
    slab = pl.pallas_call(
        _cryo_attn_kernel,
        out_shape=jax.ShapeDtypeStruct((n, HFZ + AA + n), jnp.float32),
    )(x, R.reshape(n, 9), t, _head_point_scale(p["gamma"]), nb_bias,
      p["wqkvp"], p["bqkvp"], p["wo"], p["bo"], p["g"], p["bt"],
      p["waa"], p["baa"])
    x_new = slab[:, :HFZ]
    aa = slab[:, HFZ:HFZ + AA]
    mean_probs = slab[:, HFZ + AA:]
    edge_logits = jnp.take_along_axis(mean_probs, nbr_idx, axis=1)
    edges = jnp.stack([jnp.repeat(jnp.arange(n, dtype=jnp.int32), KZ),
                       nbr_idx.reshape(-1).astype(jnp.int32)], axis=0)
    return x_new, edges, edge_logits, aa


def sequence_attention_block(p, x, seq_emb, mask_bias):
    n = x.shape[0]
    s = seq_emb.shape[0]
    slab, probs = pl.pallas_call(
        _seq_attn_kernel,
        out_shape=(jax.ShapeDtypeStruct((n, HFZ + AA), jnp.float32),
                   jax.ShapeDtypeStruct((AHZ, n, s), jnp.float32)),
    )(x, seq_emb, mask_bias, p["wq"], p["bq"], p["wkv"], p["bkv"],
      p["wo"], p["bo"], p["g"], p["bt"], p["waa"], p["baa"])
    return slab[:, :HFZ], slab[:, HFZ:], probs


def spatial_ipa_block(p, x, R, t, nb_bias):
    n = x.shape[0]
    return pl.pallas_call(
        _spatial_ipa_kernel,
        out_shape=jax.ShapeDtypeStruct((n, HFZ), jnp.float32),
    )(x, R.reshape(n, 9), t, _head_point_scale(p["gamma"]), nb_bias,
      p["wqkvp"], p["bqkvp"], p["wo"], p["bo"], p["g"], p["bt"])


def transition_backbone_block(p, x, R, t):
    n = x.shape[0]
    slab = pl.pallas_call(
        _transition_backbone_kernel,
        out_shape=jax.ShapeDtypeStruct((n, HFZ + 6), jnp.float32),
    )(x, p["w1"], p["b1"], p["w2"], p["b2"], p["g"], p["bt"],
      p["wout"], p["bout"])
    x_new = slab[:, :HFZ]
    upd = slab[:, HFZ:]
    b, c, d = upd[:, 0], upd[:, 1], upd[:, 2]
    inv = jax.lax.rsqrt(1.0 + b * b + c * c + d * d)
    dR = quat_to_rot(inv, b * inv, c * inv, d * inv)
    R_new = jnp.einsum("nij,njk->nik", R, dR)
    t_new = jnp.einsum("nij,nj->ni", R, upd[:, 3:6]) + t
    ideal = jnp.asarray(IDEAL_NCAC)
    ncac = jnp.einsum("nij,kj->nki", R_new, ideal) + t_new[:, None, :]
    return x_new, ncac, R_new, t_new


def prediction_heads_block(p, x):
    n = x.shape[0]
    slab = pl.pallas_call(
        _heads_kernel,
        out_shape=jax.ShapeDtypeStruct((n, TOR + 2), jnp.float32),
    )(x, p["w1"], p["b1"], p["w2"], p["b2"], p["g"], p["bt"],
      p["wt"], p["bt_out"], p["wc"], p["bc"], p["we"], p["be"])
    torsions = slab[:, :TOR].reshape(n, CANONICAL_NUM_RESIDUES * 5 + 3, 2)
    return torsions, slab[:, TOR:TOR + 1], slab[:, TOR + 1:TOR + 2]


# ------------------------------- forward pass ----------------------------------
def forward(params, sequence, sequence_mask, prot_mask, positions, run_iters=1):
    n = positions.shape[0]
    # GNNOutput initialization: zero hidden features, identity rotations,
    # translations = input CA positions.
    x = jnp.zeros((n, HFZ), jnp.float32)
    R = jnp.broadcast_to(jnp.eye(3, dtype=jnp.float32), (n, 3, 3))
    t = positions.astype(jnp.float32)

    mask_bias = jnp.where(sequence_mask, 0.0, NEG_INF).astype(jnp.float32)[None, :]
    aa_contrib = 1.0 + prot_mask.astype(jnp.float32)[:, None]
    result = None

    for run_iter in range(run_iters):
        not_last_iter = run_iter != run_iters - 1
        for idx in range(NUM_LAYERS):
            # One argsort per layer (cryo and IPA share the same affine here).
            nb_bias, nbr_idx = knn_bias(t, KZ)

            x, cryo_edges, cryo_edge_logits, cryo_aa = cryo_attention_block(
                params["cryo"][idx], x, R, t, nb_bias, nbr_idx)

            x, seq_aa, seq_attention_scores = sequence_attention_block(
                params["seq"][idx], x, sequence, mask_bias)

            x = spatial_ipa_block(params["ipa"][idx], x, R, t, nb_bias)

            cryo_aa = (cryo_aa + seq_aa) / aa_contrib

            x, ncac, R, t = transition_backbone_block(params["trans_bb"], x, R, t)

        # Confidence / existence / torsion heads hoisted out of the layer loop:
        # only the final layer's x reaches the returned result.
        torsions, local_confidence_score, pred_existence_mask = \
            prediction_heads_block(params["heads"], x)

        result = {
            "x": x,
            "pred_ncac": ncac,
            "pred_affines": (R, t),
            "pred_positions": ncac[..., 1, :],
            "cryo_edges": cryo_edges,
            "cryo_edge_logits": cryo_edge_logits,
            "cryo_aa_logits": cryo_aa,
            "local_confidence_score": local_confidence_score,
            "pred_existence_mask": pred_existence_mask,
            "pred_torsions": torsions,
            "seq_attention_scores": seq_attention_scores,
        }

        if not_last_iter:
            # Re-init GNNOutput with init_affine = last predicted affine.
            x = jnp.zeros((n, HFZ), jnp.float32)
    return result


# --------------------------- parameter construction ----------------------------
def _init_linear(key, fin, fout, scale=0.1):
    kw, kb = jax.random.split(key)
    return (scale * jax.random.normal(kw, (fin, fout), jnp.float32),
            scale * jax.random.normal(kb, (1, fout), jnp.float32))


def _init_point_proj(key, fin):
    w, b = _init_linear(key, fin, AHZ * QPZ * 3)
    return w[:, _PT_PERM], b[:, _PT_PERM]


def _init_res_block(key):
    k1, k2 = jax.random.split(key)
    w1, b1 = _init_linear(k1, HFZ, HFZ)
    w2, b2 = _init_linear(k2, HFZ, HFZ)
    return (w1, b1, w2, b2,
            jnp.ones((1, HFZ), jnp.float32), jnp.zeros((1, HFZ), jnp.float32))


def _stack_res_blocks(blocks):
    return {name: jnp.stack([blk[i] for blk in blocks])
            for i, name in enumerate(("w1", "b1", "w2", "b2", "g", "bt"))}


def init_params(key):
    keys = iter(jax.random.split(key, 256))
    nk = lambda: next(keys)

    def ln_affine():
        return jnp.ones((1, HFZ), jnp.float32), jnp.zeros((1, HFZ), jnp.float32)

    params = {"cryo": [], "seq": [], "ipa": []}
    for _ in range(NUM_LAYERS):
        # CryoAttention: concatenated [Wq | Wk | Wv | Wpoints] -> one MXU pass.
        wq, bq = _init_linear(nk(), HFZ, HFZ)
        wk, bk = _init_linear(nk(), HFZ, HFZ)
        wv, bv = _init_linear(nk(), HFZ, HFZ)
        wp, bp = _init_point_proj(nk(), HFZ)
        wo, bo = _init_linear(nk(), HFZ, HFZ)
        waa, baa = _init_linear(nk(), HFZ, AA)
        g, bt = ln_affine()
        params["cryo"].append({
            "wqkvp": jnp.concatenate([wq, wk, wv, wp], axis=1),
            "bqkvp": jnp.concatenate([bq, bk, bv, bp], axis=1),
            "wo": wo, "bo": bo, "g": g, "bt": bt, "waa": waa, "baa": baa,
            "gamma": jnp.zeros((AHZ,), jnp.float32)})

        # SequenceAttention: Wq from hidden, [Wk | Wv] from sequence embedding.
        wq, bq = _init_linear(nk(), HFZ, HFZ)
        wk, bk = _init_linear(nk(), IFZ, HFZ)
        wv, bv = _init_linear(nk(), IFZ, HFZ)
        wo, bo = _init_linear(nk(), HFZ, HFZ)
        waa, baa = _init_linear(nk(), HFZ, AA)
        g, bt = ln_affine()
        params["seq"].append({
            "wq": wq, "bq": bq,
            "wkv": jnp.concatenate([wk, wv], axis=1),
            "bkv": jnp.concatenate([bk, bv], axis=1),
            "wo": wo, "bo": bo, "g": g, "bt": bt, "waa": waa, "baa": baa})

        # SpatialIPA: concatenated [Wq | Wk | Wv | Wqpoints | Wkpoints].
        wq, bq = _init_linear(nk(), HFZ, HFZ)
        wk, bk = _init_linear(nk(), HFZ, HFZ)
        wv, bv = _init_linear(nk(), HFZ, HFZ)
        wqp, bqp = _init_point_proj(nk(), HFZ)
        wkp, bkp = _init_point_proj(nk(), HFZ)
        wo, bo = _init_linear(nk(), HFZ, HFZ)
        g, bt = ln_affine()
        params["ipa"].append({
            "wqkvp": jnp.concatenate([wq, wk, wv, wqp, wkp], axis=1),
            "bqkvp": jnp.concatenate([bq, bk, bv, bqp, bkp], axis=1),
            "wo": wo, "bo": bo, "g": g, "bt": bt,
            "gamma": jnp.zeros((AHZ,), jnp.float32)})

    # transition_layer (3 FcResBlocks) + BackboneFrameNet (res block + 6-wide out)
    tb_blocks = [_init_res_block(nk()) for _ in range(4)]
    wout, bout = _init_linear(nk(), HFZ, 6, scale=0.02)
    params["trans_bb"] = {**_stack_res_blocks(tb_blocks),
                          "wout": wout, "bout": bout}

    # torsion / confidence / existence heads (9 res blocks + 3 out linears)
    head_blocks = [_init_res_block(nk()) for _ in range(9)]
    wt, bt_out = _init_linear(nk(), HFZ, TOR)
    wc, bc = _init_linear(nk(), HFZ, 1)
    we, be = _init_linear(nk(), HFZ, 1)
    params["heads"] = {**_stack_res_blocks(head_blocks),
                       "wt": wt, "bt_out": bt_out,
                       "wc": wc, "bc": bc, "we": we, "be": be}
    return params


# ----------------------------------- main ---------------------------------------
if __name__ == "__main__":
    key = jax.random.PRNGKey(0)
    kp, kpos, kseq, kmask = jax.random.split(key, 4)

    N_RES, SEQ_LEN = 16, 16
    params = init_params(kp)
    positions = 3.8 * jax.random.normal(kpos, (N_RES, 3), jnp.float32)
    sequence = jax.random.normal(kseq, (SEQ_LEN, IFZ), jnp.float32)
    sequence_mask = jnp.ones((SEQ_LEN,), bool).at[-2:].set(False)
    prot_mask = jax.random.uniform(kmask, (N_RES,)) > 0.3

    fwd = jax.jit(functools.partial(forward, run_iters=1))
    out = fwd(params, sequence, sequence_mask, prot_mask, positions)
    jax.block_until_ready(out)
    print("KERNEL_OK")
</pallas_src>

<mosaic_0001>
module attributes {stable_mosaic.version = 11 : i64} {
  func.func @_cryo_attn_kernel(%arg0: memref<16x32xf32, #tpu.memory_space<vmem>>, %arg1: memref<16x9xf32, #tpu.memory_space<vmem>>, %arg2: memref<16x3xf32, #tpu.memory_space<vmem>>, %arg3: memref<1x16xf32, #tpu.memory_space<vmem>>, %arg4: memref<16x16xf32, #tpu.memory_space<vmem>>, %arg5: memref<32x144xf32, #tpu.memory_space<vmem>>, %arg6: memref<1x144xf32, #tpu.memory_space<vmem>>, %arg7: memref<32x32xf32, #tpu.memory_space<vmem>>, %arg8: memref<1x32xf32, #tpu.memory_space<vmem>>, %arg9: memref<1x32xf32, #tpu.memory_space<vmem>>, %arg10: memref<1x32xf32, #tpu.memory_space<vmem>>, %arg11: memref<32x20xf32, #tpu.memory_space<vmem>>, %arg12: memref<1x20xf32, #tpu.memory_space<vmem>>, %arg13: memref<16x68xf32, #tpu.memory_space<vmem>>) attributes {dimension_semantics = [], scalar_prefetch = 0 : i64, scratch_operands = 0 : i64, tpu.core_type = #tpu.core_type<tc>} {
    %c0 = arith.constant 0 : index
    %c0_0 = arith.constant 0 : index
    %0 = vector.load %arg0[%c0, %c0_0] : memref<16x32xf32, #tpu.memory_space<vmem>>, vector<16x32xf32>
    %c0_1 = arith.constant 0 : index
    %c0_2 = arith.constant 0 : index
    %1 = vector.load %arg1[%c0_1, %c0_2] : memref<16x9xf32, #tpu.memory_space<vmem>>, vector<16x9xf32>
    %c0_3 = arith.constant 0 : index
    %c0_4 = arith.constant 0 : index
    %2 = vector.load %arg2[%c0_3, %c0_4] : memref<16x3xf32, #tpu.memory_space<vmem>>, vector<16x3xf32>
    %c0_5 = arith.constant 0 : index
    %c0_6 = arith.constant 0 : index
    %3 = vector.load %arg3[%c0_5, %c0_6] : memref<1x16xf32, #tpu.memory_space<vmem>>, vector<1x16xf32>
    %c0_7 = arith.constant 0 : index
    %c0_8 = arith.constant 0 : index
    %4 = vector.load %arg4[%c0_7, %c0_8] : memref<16x16xf32, #tpu.memory_space<vmem>>, vector<16x16xf32>
    %c0_9 = arith.constant 0 : index
    %c0_10 = arith.constant 0 : index
    %5 = vector.load %arg5[%c0_9, %c0_10] : memref<32x144xf32, #tpu.memory_space<vmem>>, vector<32x144xf32>
    %c0_11 = arith.constant 0 : index
    %c0_12 = arith.constant 0 : index
    %6 = vector.load %arg6[%c0_11, %c0_12] : memref<1x144xf32, #tpu.memory_space<vmem>>, vector<1x144xf32>
    %c0_13 = arith.constant 0 : index
    %c0_14 = arith.constant 0 : index
    %7 = vector.load %arg7[%c0_13, %c0_14] : memref<32x32xf32, #tpu.memory_space<vmem>>, vector<32x32xf32>
    %cst = arith.constant dense<0.000000e+00> : vector<16x144xf32>
    %8 = tpu.matmul %0, %5, %cst {dimension_numbers = #tpu.dot_dimension_numbers<[1], [0], [0], [1], [0, 0, 1, 1], [], []>} : vector<16x32xf32>, vector<32x144xf32>, vector<16x144xf32> -> vector<16x144xf32>
    %9 = vector.broadcast %6 : vector<1x144xf32> to vector<16x144xf32>
    %10 = arith.addf %8, %9 : vector<16x144xf32>
    %11 = vector.extract_strided_slice %10 {offsets = [0, 0], sizes = [16, 32], strides = [1, 1]} : vector<16x144xf32> to vector<16x32xf32>
    %12 = vector.extract_strided_slice %10 {offsets = [0, 32], sizes = [16, 32], strides = [1, 1]} : vector<16x144xf32> to vector<16x32xf32>
    %13 = vector.extract_strided_slice %10 {offsets = [0, 64], sizes = [16, 32], strides = [1, 1]} : vector<16x144xf32> to vector<16x32xf32>
    %14 = vector.extract_strided_slice %10 {offsets = [0, 96], sizes = [16, 48], strides = [1, 1]} : vector<16x144xf32> to vector<16x48xf32>
    %15 = vector.extract_strided_slice %14 {offsets = [0, 0], sizes = [16, 16], strides = [1, 1]} : vector<16x48xf32> to vector<16x16xf32>
    %16 = vector.extract_strided_slice %14 {offsets = [0, 16], sizes = [16, 16], strides = [1, 1]} : vector<16x48xf32> to vector<16x16xf32>
    %17 = vector.extract_strided_slice %14 {offsets = [0, 32], sizes = [16, 16], strides = [1, 1]} : vector<16x48xf32> to vector<16x16xf32>
    %18 = vector.extract_strided_slice %1 {offsets = [0, 0], sizes = [16, 1], strides = [1, 1]} : vector<16x9xf32> to vector<16x1xf32>
    %19 = vector.broadcast %18 : vector<16x1xf32> to vector<16x16xf32>
    %20 = arith.mulf %19, %15 : vector<16x16xf32>
    %21 = vector.extract_strided_slice %1 {offsets = [0, 1], sizes = [16, 1], strides = [1, 1]} : vector<16x9xf32> to vector<16x1xf32>
    %22 = vector.broadcast %21 : vector<16x1xf32> to vector<16x16xf32>
    %23 = arith.mulf %22, %16 : vector<16x16xf32>
    %24 = arith.addf %20, %23 : vector<16x16xf32>
    %25 = vector.extract_strided_slice %1 {offsets = [0, 2], sizes = [16, 1], strides = [1, 1]} : vector<16x9xf32> to vector<16x1xf32>
    %26 = vector.broadcast %25 : vector<16x1xf32> to vector<16x16xf32>
    %27 = arith.mulf %26, %17 : vector<16x16xf32>
    %28 = arith.addf %24, %27 : vector<16x16xf32>
    %29 = vector.extract_strided_slice %2 {offsets = [0, 0], sizes = [16, 1], strides = [1, 1]} : vector<16x3xf32> to vector<16x1xf32>
    %30 = vector.broadcast %29 : vector<16x1xf32> to vector<16x16xf32>
    %31 = arith.addf %28, %30 : vector<16x16xf32>
    %32 = vector.extract_strided_slice %1 {offsets = [0, 3], sizes = [16, 1], strides = [1, 1]} : vector<16x9xf32> to vector<16x1xf32>
    %33 = vector.broadcast %32 : vector<16x1xf32> to vector<16x16xf32>
    %34 = arith.mulf %33, %15 : vector<16x16xf32>
    %35 = vector.extract_strided_slice %1 {offsets = [0, 4], sizes = [16, 1], strides = [1, 1]} : vector<16x9xf32> to vector<16x1xf32>
    %36 = vector.broadcast %35 : vector<16x1xf32> to vector<16x16xf32>
    %37 = arith.mulf %36, %16 : vector<16x16xf32>
    %38 = arith.addf %34, %37 : vector<16x16xf32>
    %39 = vector.extract_strided_slice %1 {offsets = [0, 5], sizes = [16, 1], strides = [1, 1]} : vector<16x9xf32> to vector<16x1xf32>
    %40 = vector.broadcast %39 : vector<16x1xf32> to vector<16x16xf32>
    %41 = arith.mulf %40, %17 : vector<16x16xf32>
    %42 = arith.addf %38, %41 : vector<16x16xf32>
    %43 = vector.extract_strided_slice %2 {offsets = [0, 1], sizes = [16, 1], strides = [1, 1]} : vector<16x3xf32> to vector<16x1xf32>
    %44 = vector.broadcast %43 : vector<16x1xf32> to vector<16x16xf32>
    %45 = arith.addf %42, %44 : vector<16x16xf32>
    %46 = vector.extract_strided_slice %1 {offsets = [0, 6], sizes = [16, 1], strides = [1, 1]} : vector<16x9xf32> to vector<16x1xf32>
    %47 = vector.broadcast %46 : vector<16x1xf32> to vector<16x16xf32>
    %48 = arith.mulf %47, %15 : vector<16x16xf32>
    %49 = vector.extract_strided_slice %1 {offsets = [0, 7], sizes = [16, 1], strides = [1, 1]} : vector<16x9xf32> to vector<16x1xf32>
    %50 = vector.broadcast %49 : vector<16x1xf32> to vector<16x16xf32>
    %51 = arith.mulf %50, %16 : vector<16x16xf32>
    %52 = arith.addf %48, %51 : vector<16x16xf32>
    %53 = vector.extract_strided_slice %1 {offsets = [0, 8], sizes = [16, 1], strides = [1, 1]} : vector<16x9xf32> to vector<16x1xf32>
    %54 = vector.broadcast %53 : vector<16x1xf32> to vector<16x16xf32>
    %55 = arith.mulf %54, %17 : vector<16x16xf32>
    %56 = arith.addf %52, %55 : vector<16x16xf32>
    %57 = vector.extract_strided_slice %2 {offsets = [0, 2], sizes = [16, 1], strides = [1, 1]} : vector<16x3xf32> to vector<16x1xf32>
    %58 = vector.broadcast %57 : vector<16x1xf32> to vector<16x16xf32>
    %59 = arith.addf %56, %58 : vector<16x16xf32>
    %60 = vector.broadcast %3 : vector<1x16xf32> to vector<16x16xf32>
    %61 = arith.mulf %31, %60 : vector<16x16xf32>
    %62 = vector.broadcast %3 : vector<1x16xf32> to vector<16x16xf32>
    %63 = arith.mulf %45, %62 : vector<16x16xf32>
    %64 = vector.broadcast %3 : vector<1x16xf32> to vector<16x16xf32>
    %65 = arith.mulf %59, %64 : vector<16x16xf32>
    %cst_15 = arith.constant 1.000000e+00 : f32
    %66 = vector.broadcast %cst_15 : f32 to vector<1x4xf32>
    %cst_16 = arith.constant 0.000000e+00 : f32
    %67 = vector.broadcast %cst_16 : f32 to vector<16x32xf32>
    %cst_17 = arith.constant 0.000000e+00 : f32
    %68 = vector.broadcast %cst_17 : f32 to vector<16x16xf32>
    %69 = vector.extract_strided_slice %61 {offsets = [0, 0], sizes = [16, 4], strides = [1, 1]} : vector<16x16xf32> to vector<16x4xf32>
    %70 = vector.extract_strided_slice %63 {offsets = [0, 0], sizes = [16, 4], strides = [1, 1]} : vector<16x16xf32> to vector<16x4xf32>
    %71 = vector.extract_strided_slice %65 {offsets = [0, 0], sizes = [16, 4], strides = [1, 1]} : vector<16x16xf32> to vector<16x4xf32>
    %72 = vector.extract_strided_slice %61 {offsets = [0, 0], sizes = [16, 4], strides = [1, 1]} : vector<16x16xf32> to vector<16x4xf32>
    %73 = vector.extract_strided_slice %63 {offsets = [0, 0], sizes = [16, 4], strides = [1, 1]} : vector<16x16xf32> to vector<16x4xf32>
    %74 = vector.extract_strided_slice %65 {offsets = [0, 0], sizes = [16, 4], strides = [1, 1]} : vector<16x16xf32> to vector<16x4xf32>
    %75 = tpu.transpose %72, [1, 0] : vector<16x4xf32> -> vector<4x16xf32>
    %cst_18 = arith.constant dense<0.000000e+00> : vector<16x16xf32>
    %76 = tpu.matmul %69, %75, %cst_18 {dimension_numbers = #tpu.dot_dimension_numbers<[1], [0], [0], [1], [0, 0, 1, 1], [], []>} : vector<16x4xf32>, vector<4x16xf32>, vector<16x16xf32> -> vector<16x16xf32>
    %77 = tpu.transpose %73, [1, 0] : vector<16x4xf32> -> vector<4x16xf32>
    %cst_19 = arith.constant dense<0.000000e+00> : vector<16x16xf32>
    %78 = tpu.matmul %70, %77, %cst_19 {dimension_numbers = #tpu.dot_dimension_numbers<[1], [0], [0], [1], [0, 0, 1, 1], [], []>} : vector<16x4xf32>, vector<4x16xf32>, vector<16x16xf32> -> vector<16x16xf32>
    %79 = arith.addf %76, %78 : vector<16x16xf32>
    %80 = tpu.transpose %74, [1, 0] : vector<16x4xf32> -> vector<4x16xf32>
    %cst_20 = arith.constant dense<0.000000e+00> : vector<16x16xf32>
    %81 = tpu.matmul %71, %80, %cst_20 {dimension_numbers = #tpu.dot_dimension_numbers<[1], [0], [0], [1], [0, 0, 1, 1], [], []>} : vector<16x4xf32>, vector<4x16xf32>, vector<16x16xf32> -> vector<16x16xf32>
    %82 = arith.addf %79, %81 : vector<16x16xf32>
    %83 = arith.mulf %69, %69 : vector<16x4xf32>
    %84 = arith.mulf %70, %70 : vector<16x4xf32>
    %85 = arith.addf %83, %84 : vector<16x4xf32>
    %86 = arith.mulf %71, %71 : vector<16x4xf32>
    %87 = arith.addf %85, %86 : vector<16x4xf32>
    %cst_21 = arith.constant dense<0.000000e+00> : vector<16xf32>
    %88 = vector.multi_reduction <add>, %87, %cst_21 [1] : vector<16x4xf32> to vector<16xf32>
    %89 = vector.shape_cast %88 : vector<16xf32> to vector<16x1xf32>
    %90 = arith.mulf %72, %72 : vector<16x4xf32>
    %91 = arith.mulf %73, %73 : vector<16x4xf32>
    %92 = arith.addf %90, %91 : vector<16x4xf32>
    %93 = arith.mulf %74, %74 : vector<16x4xf32>
    %94 = arith.addf %92, %93 : vector<16x4xf32>
    %95 = tpu.transpose %94, [1, 0] : vector<16x4xf32> -> vector<4x16xf32>
    %cst_22 = arith.constant dense<0.000000e+00> : vector<1x16xf32>
    %96 = tpu.matmul %66, %95, %cst_22 {dimension_numbers = #tpu.dot_dimension_numbers<[1], [0], [0], [1], [0, 0, 1, 1], [], []>} : vector<1x4xf32>, vector<4x16xf32>, vector<1x16xf32> -> vector<1x16xf32>
    %97 = vector.broadcast %89 : vector<16x1xf32> to vector<16x16xf32>
    %98 = vector.broadcast %96 : vector<1x16xf32> to vector<16x16xf32>
    %99 = arith.addf %97, %98 : vector<16x16xf32>
    %cst_23 = arith.constant 2.000000e+00 : f32
    %100 = vector.broadcast %cst_23 : f32 to vector<16x16xf32>
    %101 = arith.mulf %100, %82 : vector<16x16xf32>
    %102 = arith.subf %99, %101 : vector<16x16xf32>
    %103 = vector.extract_strided_slice %11 {offsets = [0, 0], sizes = [16, 8], strides = [1, 1]} : vector<16x32xf32> to vector<16x8xf32>
    %104 = vector.extract_strided_slice %12 {offsets = [0, 0], sizes = [16, 8], strides = [1, 1]} : vector<16x32xf32> to vector<16x8xf32>
    %105 = tpu.transpose %104, [1, 0] : vector<16x8xf32> -> vector<8x16xf32>
    %cst_24 = arith.constant dense<0.000000e+00> : vector<16x16xf32>
    %106 = tpu.matmul %103, %105, %cst_24 {dimension_numbers = #tpu.dot_dimension_numbers<[1], [0], [0], [1], [0, 0, 1, 1], [], []>} : vector<16x8xf32>, vector<8x16xf32>, vector<16x16xf32> -> vector<16x16xf32>
    %cst_25 = arith.constant 0.353553385 : f32
    %107 = vector.broadcast %cst_25 : f32 to vector<16x16xf32>
    %108 = arith.mulf %106, %107 : vector<16x16xf32>
    %109 = arith.addf %108, %4 : vector<16x16xf32>
    %cst_26 = arith.constant 5.000000e-01 : f32
    %110 = vector.broadcast %cst_26 : f32 to vector<16x16xf32>
    %111 = arith.mulf %110, %102 : vector<16x16xf32>
    %112 = arith.subf %109, %111 : vector<16x16xf32>
    %cst_27 = arith.constant dense<0xFF800000> : vector<16xf32>
    %113 = vector.multi_reduction <maximumf>, %112, %cst_27 [1] : vector<16x16xf32> to vector<16xf32>
    %114 = vector.shape_cast %113 : vector<16xf32> to vector<16x1xf32>
    %115 = vector.broadcast %114 : vector<16x1xf32> to vector<16x16xf32>
    %116 = arith.subf %112, %115 : vector<16x16xf32>
    %117 = math.exp %116 : vector<16x16xf32>
    %cst_28 = arith.constant dense<0.000000e+00> : vector<16xf32>
    %118 = vector.multi_reduction <add>, %117, %cst_28 [1] : vector<16x16xf32> to vector<16xf32>
    %119 = vector.shape_cast %118 : vector<16xf32> to vector<16x1xf32>
    %120 = tpu.reciprocal %119 {approx = true} : vector<16x1xf32> -> vector<16x1xf32>
    %121 = vector.broadcast %120 : vector<16x1xf32> to vector<16x16xf32>
    %122 = arith.mulf %117, %121 : vector<16x16xf32>
    %123 = arith.addf %68, %122 : vector<16x16xf32>
    %124 = vector.extract_strided_slice %13 {offsets = [0, 0], sizes = [16, 8], strides = [1, 1]} : vector<16x32xf32> to vector<16x8xf32>
    %cst_29 = arith.constant dense<0.000000e+00> : vector<16x8xf32>
    %125 = tpu.matmul %122, %124, %cst_29 {dimension_numbers = #tpu.dot_dimension_numbers<[1], [0], [0], [1], [0, 0, 1, 1], [], []>} : vector<16x16xf32>, vector<16x8xf32>, vector<16x8xf32> -> vector<16x8xf32>
    %126 = vector.extract_strided_slice %7 {offsets = [0, 0], sizes = [8, 32], strides = [1, 1]} : vector<32x32xf32> to vector<8x32xf32>
    %cst_30 = arith.constant dense<0.000000e+00> : vector<16x32xf32>
    %127 = tpu.matmul %125, %126, %cst_30 {dimension_numbers = #tpu.dot_dimension_numbers<[1], [0], [0], [1], [0, 0, 1, 1], [], []>} : vector<16x8xf32>, vector<8x32xf32>, vector<16x32xf32> -> vector<16x32xf32>
    %128 = arith.addf %67, %127 : vector<16x32xf32>
    %129 = vector.extract_strided_slice %61 {offsets = [0, 4], sizes = [16, 4], strides = [1, 1]} : vector<16x16xf32> to vector<16x4xf32>
    %130 = vector.extract_strided_slice %63 {offsets = [0, 4], sizes = [16, 4], strides = [1, 1]} : vector<16x16xf32> to vector<16x4xf32>
    %131 = vector.extract_strided_slice %65 {offsets = [0, 4], sizes = [16, 4], strides = [1, 1]} : vector<16x16xf32> to vector<16x4xf32>
    %132 = vector.extract_strided_slice %61 {offsets = [0, 4], sizes = [16, 4], strides = [1, 1]} : vector<16x16xf32> to vector<16x4xf32>
    %133 = vector.extract_strided_slice %63 {offsets = [0, 4], sizes = [16, 4], strides = [1, 1]} : vector<16x16xf32> to vector<16x4xf32>
    %134 = vector.extract_strided_slice %65 {offsets = [0, 4], sizes = [16, 4], strides = [1, 1]} : vector<16x16xf32> to vector<16x4xf32>
    %135 = tpu.transpose %132, [1, 0] : vector<16x4xf32> -> vector<4x16xf32>
    %cst_31 = arith.constant dense<0.000000e+00> : vector<16x16xf32>
    %136 = tpu.matmul %129, %135, %cst_31 {dimension_numbers = #tpu.dot_dimension_numbers<[1], [0], [0], [1], [0, 0, 1, 1], [], []>} : vector<16x4xf32>, vector<4x16xf32>, vector<16x16xf32> -> vector<16x16xf32>
    %137 = tpu.transpose %133, [1, 0] : vector<16x4xf32> -> vector<4x16xf32>
    %cst_32 = arith.constant dense<0.000000e+00> : vector<16x16xf32>
    %138 = tpu.matmul %130, %137, %cst_32 {dimension_numbers = #tpu.dot_dimension_numbers<[1], [0], [0], [1], [0, 0, 1, 1], [], []>} : vector<16x4xf32>, vector<4x16xf32>, vector<16x16xf32> -> vector<16x16xf32>
    %139 = arith.addf %136, %138 : vector<16x16xf32>
    %140 = tpu.transpose %134, [1, 0] : vector<16x4xf32> -> vector<4x16xf32>
    %cst_33 = arith.constant dense<0.000000e+00> : vector<16x16xf32>
    %141 = tpu.matmul %131, %140, %cst_33 {dimension_numbers = #tpu.dot_dimension_numbers<[1], [0], [0], [1], [0, 0, 1, 1], [], []>} : vector<16x4xf32>, vector<4x16xf32>, vector<16x16xf32> -> vector<16x16xf32>
    %142 = arith.addf %139, %141 : vector<16x16xf32>
    %143 = arith.mulf %129, %129 : vector<16x4xf32>
    %144 = arith.mulf %130, %130 : vector<16x4xf32>
    %145 = arith.addf %143, %144 : vector<16x4xf32>
    %146 = arith.mulf %131, %131 : vector<16x4xf32>
    %147 = arith.addf %145, %146 : vector<16x4xf32>
    %cst_34 = arith.constant dense<0.000000e+00> : vector<16xf32>
    %148 = vector.multi_reduction <add>, %147, %cst_34 [1] : vector<16x4xf32> to vector<16xf32>
    %149 = vector.shape_cast %148 : vector<16xf32> to vector<16x1xf32>
    %150 = arith.mulf %132, %132 : vector<16x4xf32>
    %151 = arith.mulf %133, %133 : vector<16x4xf32>
    %152 = arith.addf %150, %151 : vector<16x4xf32>
    %153 = arith.mulf %134, %134 : vector<16x4xf32>
    %154 = arith.addf %152, %153 : vector<16x4xf32>
    %155 = tpu.transpose %154, [1, 0] : vector<16x4xf32> -> vector<4x16xf32>
    %cst_35 = arith.constant dense<0.000000e+00> : vector<1x16xf32>
    %156 = tpu.matmul %66, %155, %cst_35 {dimension_numbers = #tpu.dot_dimension_numbers<[1], [0], [0], [1], [0, 0, 1, 1], [], []>} : vector<1x4xf32>, vector<4x16xf32>, vector<1x16xf32> -> vector<1x16xf32>
    %157 = vector.broadcast %149 : vector<16x1xf32> to vector<16x16xf32>
    %158 = vector.broadcast %156 : vector<1x16xf32> to vector<16x16xf32>
    %159 = arith.addf %157, %158 : vector<16x16xf32>
    %cst_36 = arith.constant 2.000000e+00 : f32
    %160 = vector.broadcast %cst_36 : f32 to vector<16x16xf32>
    %161 = arith.mulf %160, %142 : vector<16x16xf32>
    %162 = arith.subf %159, %161 : vector<16x16xf32>
    %163 = vector.extract_strided_slice %11 {offsets = [0, 8], sizes = [16, 8], strides = [1, 1]} : vector<16x32xf32> to vector<16x8xf32>
    %164 = vector.extract_strided_slice %12 {offsets = [0, 8], sizes = [16, 8], strides = [1, 1]} : vector<16x32xf32> to vector<16x8xf32>
    %165 = tpu.transpose %164, [1, 0] : vector<16x8xf32> -> vector<8x16xf32>
    %cst_37 = arith.constant dense<0.000000e+00> : vector<16x16xf32>
    %166 = tpu.matmul %163, %165, %cst_37 {dimension_numbers = #tpu.dot_dimension_numbers<[1], [0], [0], [1], [0, 0, 1, 1], [], []>} : vector<16x8xf32>, vector<8x16xf32>, vector<16x16xf32> -> vector<16x16xf32>
    %cst_38 = arith.constant 0.353553385 : f32
    %167 = vector.broadcast %cst_38 : f32 to vector<16x16xf32>
    %168 = arith.mulf %166, %167 : vector<16x16xf32>
    %169 = arith.addf %168, %4 : vector<16x16xf32>
    %cst_39 = arith.constant 5.000000e-01 : f32
    %170 = vector.broadcast %cst_39 : f32 to vector<16x16xf32>
    %171 = arith.mulf %170, %162 : vector<16x16xf32>
    %172 = arith.subf %169, %171 : vector<16x16xf32>
    %cst_40 = arith.constant dense<0xFF800000> : vector<16xf32>
    %173 = vector.multi_reduction <maximumf>, %172, %cst_40 [1] : vector<16x16xf32> to vector<16xf32>
    %174 = vector.shape_cast %173 : vector<16xf32> to vector<16x1xf32>
    %175 = vector.broadcast %174 : vector<16x1xf32> to vector<16x16xf32>
    %176 = arith.subf %172, %175 : vector<16x16xf32>
    %177 = math.exp %176 : vector<16x16xf32>
    %cst_41 = arith.constant dense<0.000000e+00> : vector<16xf32>
    %178 = vector.multi_reduction <add>, %177, %cst_41 [1] : vector<16x16xf32> to vector<16xf32>
    %179 = vector.shape_cast %178 : vector<16xf32> to vector<16x1xf32>
    %180 = tpu.reciprocal %179 {approx = true} : vector<16x1xf32> -> vector<16x1xf32>
    %181 = vector.broadcast %180 : vector<16x1xf32> to vector<16x16xf32>
    %182 = arith.mulf %177, %181 : vector<16x16xf32>
    %183 = arith.addf %123, %182 : vector<16x16xf32>
    %184 = vector.extract_strided_slice %13 {offsets = [0, 8], sizes = [16, 8], strides = [1, 1]} : vector<16x32xf32> to vector<16x8xf32>
    %cst_42 = arith.constant dense<0.000000e+00> : vector<16x8xf32>
    %185 = tpu.matmul %182, %184, %cst_42 {dimension_numbers = #tpu.dot_dimension_numbers<[1], [0], [0], [1], [0, 0, 1, 1], [], []>} : vector<16x16xf32>, vector<16x8xf32>, vector<16x8xf32> -> vector<16x8xf32>
    %186 = vector.extract_strided_slice %7 {offsets = [8, 0], sizes = [8, 32], strides = [1, 1]} : vector<32x32xf32> to vector<8x32xf32>
    %cst_43 = arith.constant dense<0.000000e+00> : vector<16x32xf32>
    %187 = tpu.matmul %185, %186, %cst_43 {dimension_numbers = #tpu.dot_dimension_numbers<[1], [0], [0], [1], [0, 0, 1, 1], [], []>} : vector<16x8xf32>, vector<8x32xf32>, vector<16x32xf32> -> vector<16x32xf32>
    %188 = arith.addf %128, %187 : vector<16x32xf32>
    %189 = vector.extract_strided_slice %61 {offsets = [0, 8], sizes = [16, 4], strides = [1, 1]} : vector<16x16xf32> to vector<16x4xf32>
    %190 = vector.extract_strided_slice %63 {offsets = [0, 8], sizes = [16, 4], strides = [1, 1]} : vector<16x16xf32> to vector<16x4xf32>
    %191 = vector.extract_strided_slice %65 {offsets = [0, 8], sizes = [16, 4], strides = [1, 1]} : vector<16x16xf32> to vector<16x4xf32>
    %192 = vector.extract_strided_slice %61 {offsets = [0, 8], sizes = [16, 4], strides = [1, 1]} : vector<16x16xf32> to vector<16x4xf32>
    %193 = vector.extract_strided_slice %63 {offsets = [0, 8], sizes = [16, 4], strides = [1, 1]} : vector<16x16xf32> to vector<16x4xf32>
    %194 = vector.extract_strided_slice %65 {offsets = [0, 8], sizes = [16, 4], strides = [1, 1]} : vector<16x16xf32> to vector<16x4xf32>
    %195 = tpu.transpose %192, [1, 0] : vector<16x4xf32> -> vector<4x16xf32>
    %cst_44 = arith.constant dense<0.000000e+00> : vector<16x16xf32>
    %196 = tpu.matmul %189, %195, %cst_44 {dimension_numbers = #tpu.dot_dimension_numbers<[1], [0], [0], [1], [0, 0, 1, 1], [], []>} : vector<16x4xf32>, vector<4x16xf32>, vector<16x16xf32> -> vector<16x16xf32>
    %197 = tpu.transpose %193, [1, 0] : vector<16x4xf32> -> vector<4x16xf32>
    %cst_45 = arith.constant dense<0.000000e+00> : vector<16x16xf32>
    %198 = tpu.matmul %190, %197, %cst_45 {dimension_numbers = #tpu.dot_dimension_numbers<[1], [0], [0], [1], [0, 0, 1, 1], [], []>} : vector<16x4xf32>, vector<4x16xf32>, vector<16x16xf32> -> vector<16x16xf32>
    %199 = arith.addf %196, %198 : vector<16x16xf32>
    %200 = tpu.transpose %194, [1, 0] : vector<16x4xf32> -> vector<4x16xf32>
    %cst_46 = arith.constant dense<0.000000e+00> : vector<16x16xf32>
    %201 = tpu.matmul %191, %200, %cst_46 {dimension_numbers = #tpu.dot_dimension_numbers<[1], [0], [0], [1], [0, 0, 1, 1], [], []>} : vector<16x4xf32>, vector<4x16xf32>, vector<16x16xf32> -> vector<16x16xf32>
    %202 = arith.addf %199, %201 : vector<16x16xf32>
    %203 = arith.mulf %189, %189 : vector<16x4xf32>
    %204 = arith.mulf %190, %190 : vector<16x4xf32>
    %205 = arith.addf %203, %204 : vector<16x4xf32>
    %206 = arith.mulf %191, %191 : vector<16x4xf32>
    %207 = arith.addf %205, %206 : vector<16x4xf32>
    %cst_47 = arith.constant dense<0.000000e+00> : vector<16xf32>
    %208 = vector.multi_reduction <add>, %207, %cst_47 [1] : vector<16x4xf32> to vector<16xf32>
    %209 = vector.shape_cast %208 : vector<16xf32> to vector<16x1xf32>
    %210 = arith.mulf %192, %192 : vector<16x4xf32>
    %211 = arith.mulf %193, %193 : vector<16x4xf32>
    %212 = arith.addf %210, %211 : vector<16x4xf32>
    %213 = arith.mulf %194, %194 : vector<16x4xf32>
    %214 = arith.addf %212, %213 : vector<16x4xf32>
    %215 = tpu.transpose %214, [1, 0] : vector<16x4xf32> -> vector<4x16xf32>
    %cst_48 = arith.constant dense<0.000000e+00> : vector<1x16xf32>
    %216 = tpu.matmul %66, %215, %cst_48 {dimension_numbers = #tpu.dot_dimension_numbers<[1], [0], [0], [1], [0, 0, 1, 1], [], []>} : vector<1x4xf32>, vector<4x16xf32>, vector<1x16xf32> -> vector<1x16xf32>
    %217 = vector.broadcast %209 : vector<16x1xf32> to vector<16x16xf32>
    %218 = vector.broadcast %216 : vector<1x16xf32> to vector<16x16xf32>
    %219 = arith.addf %217, %218 : vector<16x16xf32>
    %cst_49 = arith.constant 2.000000e+00 : f32
    %220 = vector.broadcast %cst_49 : f32 to vector<16x16xf32>
    %221 = arith.mulf %220, %202 : vector<16x16xf32>
    %222 = arith.subf %219, %221 : vector<16x16xf32>
    %223 = vector.extract_strided_slice %11 {offsets = [0, 16], sizes = [16, 8], strides = [1, 1]} : vector<16x32xf32> to vector<16x8xf32>
    %224 = vector.extract_strided_slice %12 {offsets = [0, 16], sizes = [16, 8], strides = [1, 1]} : vector<16x32xf32> to vector<16x8xf32>
    %225 = tpu.transpose %224, [1, 0] : vector<16x8xf32> -> vector<8x16xf32>
    %cst_50 = arith.constant dense<0.000000e+00> : vector<16x16xf32>
    %226 = tpu.matmul %223, %225, %cst_50 {dimension_numbers = #tpu.dot_dimension_numbers<[1], [0], [0], [1], [0, 0, 1, 1], [], []>} : vector<16x8xf32>, vector<8x16xf32>, vector<16x16xf32> -> vector<16x16xf32>
    %cst_51 = arith.constant 0.353553385 : f32
    %227 = vector.broadcast %cst_51 : f32 to vector<16x16xf32>
    %228 = arith.mulf %226, %227 : vector<16x16xf32>
    %229 = arith.addf %228, %4 : vector<16x16xf32>
    %cst_52 = arith.constant 5.000000e-01 : f32
    %230 = vector.broadcast %cst_52 : f32 to vector<16x16xf32>
    %231 = arith.mulf %230, %222 : vector<16x16xf32>
    %232 = arith.subf %229, %231 : vector<16x16xf32>
    %cst_53 = arith.constant dense<0xFF800000> : vector<16xf32>
    %233 = vector.multi_reduction <maximumf>, %232, %cst_53 [1] : vector<16x16xf32> to vector<16xf32>
    %234 = vector.shape_cast %233 : vector<16xf32> to vector<16x1xf32>
    %235 = vector.broadcast %234 : vector<16x1xf32> to vector<16x16xf32>
    %236 = arith.subf %232, %235 : vector<16x16xf32>
    %237 = math.exp %236 : vector<16x16xf32>
    %cst_54 = arith.constant dense<0.000000e+00> : vector<16xf32>
    %238 = vector.multi_reduction <add>, %237, %cst_54 [1] : vector<16x16xf32> to vector<16xf32>
    %239 = vector.shape_cast %238 : vector<16xf32> to vector<16x1xf32>
    %240 = tpu.reciprocal %239 {approx = true} : vector<16x1xf32> -> vector<16x1xf32>
    %241 = vector.broadcast %240 : vector<16x1xf32> to vector<16x16xf32>
    %242 = arith.mulf %237, %241 : vector<16x16xf32>
    %243 = arith.addf %183, %242 : vector<16x16xf32>
    %244 = vector.extract_strided_slice %13 {offsets = [0, 16], sizes = [16, 8], strides = [1, 1]} : vector<16x32xf32> to vector<16x8xf32>
    %cst_55 = arith.constant dense<0.000000e+00> : vector<16x8xf32>
    %245 = tpu.matmul %242, %244, %cst_55 {dimension_numbers = #tpu.dot_dimension_numbers<[1], [0], [0], [1], [0, 0, 1, 1], [], []>} : vector<16x16xf32>, vector<16x8xf32>, vector<16x8xf32> -> vector<16x8xf32>
    %246 = vector.extract_strided_slice %7 {offsets = [16, 0], sizes = [8, 32], strides = [1, 1]} : vector<32x32xf32> to vector<8x32xf32>
    %cst_56 = arith.constant dense<0.000000e+00> : vector<16x32xf32>
    %247 = tpu.matmul %245, %246, %cst_56 {dimension_numbers = #tpu.dot_dimension_numbers<[1], [0], [0], [1], [0, 0, 1, 1], [], []>} : vector<16x8xf32>, vector<8x32xf32>, vector<16x32xf32> -> vector<16x32xf32>
    %248 = arith.addf %188, %247 : vector<16x32xf32>
    %249 = vector.extract_strided_slice %61 {offsets = [0, 12], sizes = [16, 4], strides = [1, 1]} : vector<16x16xf32> to vector<16x4xf32>
    %250 = vector.extract_strided_slice %63 {offsets = [0, 12], sizes = [16, 4], strides = [1, 1]} : vector<16x16xf32> to vector<16x4xf32>
    %251 = vector.extract_strided_slice %65 {offsets = [0, 12], sizes = [16, 4], strides = [1, 1]} : vector<16x16xf32> to vector<16x4xf32>
    %252 = vector.extract_strided_slice %61 {offsets = [0, 12], sizes = [16, 4], strides = [1, 1]} : vector<16x16xf32> to vector<16x4xf32>
    %253 = vector.extract_strided_slice %63 {offsets = [0, 12], sizes = [16, 4], strides = [1, 1]} : vector<16x16xf32> to vector<16x4xf32>
    %254 = vector.extract_strided_slice %65 {offsets = [0, 12], sizes = [16, 4], strides = [1, 1]} : vector<16x16xf32> to vector<16x4xf32>
    %255 = tpu.transpose %252, [1, 0] : vector<16x4xf32> -> vector<4x16xf32>
    %cst_57 = arith.constant dense<0.000000e+00> : vector<16x16xf32>
    %256 = tpu.matmul %249, %255, %cst_57 {dimension_numbers = #tpu.dot_dimension_numbers<[1], [0], [0], [1], [0, 0, 1, 1], [], []>} : vector<16x4xf32>, vector<4x16xf32>, vector<16x16xf32> -> vector<16x16xf32>
    %257 = tpu.transpose %253, [1, 0] : vector<16x4xf32> -> vector<4x16xf32>
    %cst_58 = arith.constant dense<0.000000e+00> : vector<16x16xf32>
    %258 = tpu.matmul %250, %257, %cst_58 {dimension_numbers = #tpu.dot_dimension_numbers<[1], [0], [0], [1], [0, 0, 1, 1], [], []>} : vector<16x4xf32>, vector<4x16xf32>, vector<16x16xf32> -> vector<16x16xf32>
    %259 = arith.addf %256, %258 : vector<16x16xf32>
    %260 = tpu.transpose %254, [1, 0] : vector<16x4xf32> -> vector<4x16xf32>
    %cst_59 = arith.constant dense<0.000000e+00> : vector<16x16xf32>
    %261 = tpu.matmul %251, %260, %cst_59 {dimension_numbers = #tpu.dot_dimension_numbers<[1], [0], [0], [1], [0, 0, 1, 1], [], []>} : vector<16x4xf32>, vector<4x16xf32>, vector<16x16xf32> -> vector<16x16xf32>
    %262 = arith.addf %259, %261 : vector<16x16xf32>
    %263 = arith.mulf %249, %249 : vector<16x4xf32>
    %264 = arith.mulf %250, %250 : vector<16x4xf32>
    %265 = arith.addf %263, %264 : vector<16x4xf32>
    %266 = arith.mulf %251, %251 : vector<16x4xf32>
    %267 = arith.addf %265, %266 : vector<16x4xf32>
    %cst_60 = arith.constant dense<0.000000e+00> : vector<16xf32>
    %268 = vector.multi_reduction <add>, %267, %cst_60 [1] : vector<16x4xf32> to vector<16xf32>
    %269 = vector.shape_cast %268 : vector<16xf32> to vector<16x1xf32>
    %270 = arith.mulf %252, %252 : vector<16x4xf32>
    %271 = arith.mulf %253, %253 : vector<16x4xf32>
    %272 = arith.addf %270, %271 : vector<16x4xf32>
    %273 = arith.mulf %254, %254 : vector<16x4xf32>
    %274 = arith.addf %272, %273 : vector<16x4xf32>
    %275 = tpu.transpose %274, [1, 0] : vector<16x4xf32> -> vector<4x16xf32>
    %cst_61 = arith.constant dense<0.000000e+00> : vector<1x16xf32>
    %276 = tpu.matmul %66, %275, %cst_61 {dimension_numbers = #tpu.dot_dimension_numbers<[1], [0], [0], [1], [0, 0, 1, 1], [], []>} : vector<1x4xf32>, vector<4x16xf32>, vector<1x16xf32> -> vector<1x16xf32>
    %277 = vector.broadcast %269 : vector<16x1xf32> to vector<16x16xf32>
    %278 = vector.broadcast %276 : vector<1x16xf32> to vector<16x16xf32>
    %279 = arith.addf %277, %278 : vector<16x16xf32>
    %cst_62 = arith.constant 2.000000e+00 : f32
    %280 = vector.broadcast %cst_62 : f32 to vector<16x16xf32>
    %281 = arith.mulf %280, %262 : vector<16x16xf32>
    %282 = arith.subf %279, %281 : vector<16x16xf32>
    %283 = vector.extract_strided_slice %11 {offsets = [0, 24], sizes = [16, 8], strides = [1, 1]} : vector<16x32xf32> to vector<16x8xf32>
    %284 = vector.extract_strided_slice %12 {offsets = [0, 24], sizes = [16, 8], strides = [1, 1]} : vector<16x32xf32> to vector<16x8xf32>
    %285 = tpu.transpose %284, [1, 0] : vector<16x8xf32> -> vector<8x16xf32>
    %cst_63 = arith.constant dense<0.000000e+00> : vector<16x16xf32>
    %286 = tpu.matmul %283, %285, %cst_63 {dimension_numbers = #tpu.dot_dimension_numbers<[1], [0], [0], [1], [0, 0, 1, 1], [], []>} : vector<16x8xf32>, vector<8x16xf32>, vector<16x16xf32> -> vector<16x16xf32>
    %cst_64 = arith.constant 0.353553385 : f32
    %287 = vector.broadcast %cst_64 : f32 to vector<16x16xf32>
    %288 = arith.mulf %286, %287 : vector<16x16xf32>
    %289 = arith.addf %288, %4 : vector<16x16xf32>
    %cst_65 = arith.constant 5.000000e-01 : f32
    %290 = vector.broadcast %cst_65 : f32 to vector<16x16xf32>
    %291 = arith.mulf %290, %282 : vector<16x16xf32>
    %292 = arith.subf %289, %291 : vector<16x16xf32>
    %cst_66 = arith.constant dense<0xFF800000> : vector<16xf32>
    %293 = vector.multi_reduction <maximumf>, %292, %cst_66 [1] : vector<16x16xf32> to vector<16xf32>
    %294 = vector.shape_cast %293 : vector<16xf32> to vector<16x1xf32>
    %295 = vector.broadcast %294 : vector<16x1xf32> to vector<16x16xf32>
    %296 = arith.subf %292, %295 : vector<16x16xf32>
    %297 = math.exp %296 : vector<16x16xf32>
    %cst_67 = arith.constant dense<0.000000e+00> : vector<16xf32>
    %298 = vector.multi_reduction <add>, %297, %cst_67 [1] : vector<16x16xf32> to vector<16xf32>
    %299 = vector.shape_cast %298 : vector<16xf32> to vector<16x1xf32>
    %300 = tpu.reciprocal %299 {approx = true} : vector<16x1xf32> -> vector<16x1xf32>
    %301 = vector.broadcast %300 : vector<16x1xf32> to vector<16x16xf32>
    %302 = arith.mulf %297, %301 : vector<16x16xf32>
    %303 = arith.addf %243, %302 : vector<16x16xf32>
    %304 = vector.extract_strided_slice %13 {offsets = [0, 24], sizes = [16, 8], strides = [1, 1]} : vector<16x32xf32> to vector<16x8xf32>
    %cst_68 = arith.constant dense<0.000000e+00> : vector<16x8xf32>
    %305 = tpu.matmul %302, %304, %cst_68 {dimension_numbers = #tpu.dot_dimension_numbers<[1], [0], [0], [1], [0, 0, 1, 1], [], []>} : vector<16x16xf32>, vector<16x8xf32>, vector<16x8xf32> -> vector<16x8xf32>
    %306 = vector.extract_strided_slice %7 {offsets = [24, 0], sizes = [8, 32], strides = [1, 1]} : vector<32x32xf32> to vector<8x32xf32>
    %cst_69 = arith.constant dense<0.000000e+00> : vector<16x32xf32>
    %307 = tpu.matmul %305, %306, %cst_69 {dimension_numbers = #tpu.dot_dimension_numbers<[1], [0], [0], [1], [0, 0, 1, 1], [], []>} : vector<16x8xf32>, vector<8x32xf32>, vector<16x32xf32> -> vector<16x32xf32>
    %308 = arith.addf %248, %307 : vector<16x32xf32>
    %c0_70 = arith.constant 0 : index
    %c0_71 = arith.constant 0 : index
    %309 = vector.load %arg8[%c0_70, %c0_71] : memref<1x32xf32, #tpu.memory_space<vmem>>, vector<1x32xf32>
    %310 = vector.broadcast %309 : vector<1x32xf32> to vector<16x32xf32>
    %311 = arith.addf %308, %310 : vector<16x32xf32>
    %312 = arith.addf %311, %0 : vector<16x32xf32>
    %c0_72 = arith.constant 0 : index
    %c0_73 = arith.constant 0 : index
    %313 = vector.load %arg9[%c0_72, %c0_73] : memref<1x32xf32, #tpu.memory_space<vmem>>, vector<1x32xf32>
    %c0_74 = arith.constant 0 : index
    %c0_75 = arith.constant 0 : index
    %314 = vector.load %arg10[%c0_74, %c0_75] : memref<1x32xf32, #tpu.memory_space<vmem>>, vector<1x32xf32>
    %cst_76 = arith.constant dense<0.000000e+00> : vector<16xf32>
    %315 = vector.multi_reduction <add>, %312, %cst_76 [1] : vector<16x32xf32> to vector<16xf32>
    %316 = vector.shape_cast %315 : vector<16xf32> to vector<16x1xf32>
    %cst_77 = arith.constant 3.200000e+01 : f32
    %317 = vector.broadcast %cst_77 : f32 to vector<16x1xf32>
    %318 = arith.divf %316, %317 : vector<16x1xf32>
    %319 = vector.broadcast %318 : vector<16x1xf32> to vector<16x32xf32>
    %320 = arith.subf %312, %319 : vector<16x32xf32>
    %321 = arith.mulf %320, %320 : vector<16x32xf32>
    %cst_78 = arith.constant dense<0.000000e+00> : vector<16xf32>
    %322 = vector.multi_reduction <add>, %321, %cst_78 [1] : vector<16x32xf32> to vector<16xf32>
    %323 = vector.shape_cast %322 : vector<16xf32> to vector<16x1xf32>
    %cst_79 = arith.constant 3.200000e+01 : f32
    %324 = vector.broadcast %cst_79 : f32 to vector<16x1xf32>
    %325 = arith.divf %323, %324 : vector<16x1xf32>
    %326 = vector.broadcast %318 : vector<16x1xf32> to vector<16x32xf32>
    %327 = arith.subf %312, %326 : vector<16x32xf32>
    %cst_80 = arith.constant 9.99999974E-6 : f32
    %328 = vector.broadcast %cst_80 : f32 to vector<16x1xf32>
    %329 = arith.addf %325, %328 : vector<16x1xf32>
    %330 = math.rsqrt %329 : vector<16x1xf32>
    %331 = vector.broadcast %330 : vector<16x1xf32> to vector<16x32xf32>
    %332 = arith.mulf %327, %331 : vector<16x32xf32>
    %333 = vector.broadcast %313 : vector<1x32xf32> to vector<16x32xf32>
    %334 = arith.mulf %332, %333 : vector<16x32xf32>
    %335 = vector.broadcast %314 : vector<1x32xf32> to vector<16x32xf32>
    %336 = arith.addf %334, %335 : vector<16x32xf32>
    %c0_81 = arith.constant 0 : index
    %c0_82 = arith.constant 0 : index
    %337 = vector.load %arg11[%c0_81, %c0_82] : memref<32x20xf32, #tpu.memory_space<vmem>>, vector<32x20xf32>
    %cst_83 = arith.constant dense<0.000000e+00> : vector<16x20xf32>
    %338 = tpu.matmul %336, %337, %cst_83 {dimension_numbers = #tpu.dot_dimension_numbers<[1], [0], [0], [1], [0, 0, 1, 1], [], []>} : vector<16x32xf32>, vector<32x20xf32>, vector<16x20xf32> -> vector<16x20xf32>
    %c0_84 = arith.constant 0 : index
    %c0_85 = arith.constant 0 : index
    %339 = vector.load %arg12[%c0_84, %c0_85] : memref<1x20xf32, #tpu.memory_space<vmem>>, vector<1x20xf32>
    %340 = vector.broadcast %339 : vector<1x20xf32> to vector<16x20xf32>
    %341 = arith.addf %338, %340 : vector<16x20xf32>
    %c0_86 = arith.constant 0 : index
    %c0_87 = arith.constant 0 : index
    %342 = vector.load %arg13[%c0_86, %c0_87] : memref<16x68xf32, #tpu.memory_space<vmem>>, vector<16x32xf32>
    tpu.vector_store %arg13[%c0_86, %c0_87], %336 {strides = array<i32>} : memref<16x68xf32, #tpu.memory_space<vmem>>, vector<16x32xf32>,
    %c0_88 = arith.constant 0 : index
    %c32 = arith.constant 32 : index
    %343 = vector.load %arg13[%c0_88, %c32] : memref<16x68xf32, #tpu.memory_space<vmem>>, vector<16x20xf32>
    tpu.vector_store %arg13[%c0_88, %c32], %341 {strides = array<i32>} : memref<16x68xf32, #tpu.memory_space<vmem>>, vector<16x20xf32>,
    %cst_89 = arith.constant 2.500000e-01 : f32
    %344 = vector.broadcast %cst_89 : f32 to vector<16x16xf32>
    %345 = arith.mulf %303, %344 : vector<16x16xf32>
    %c0_90 = arith.constant 0 : index
    %c52 = arith.constant 52 : index
    %346 = vector.load %arg13[%c0_90, %c52] : memref<16x68xf32, #tpu.memory_space<vmem>>, vector<16x16xf32>
    tpu.vector_store %arg13[%c0_90, %c52], %345 {strides = array<i32>} : memref<16x68xf32, #tpu.memory_space<vmem>>, vector<16x16xf32>,
    return
  }
}

module attributes {stable_mosaic.version = 11 : i64} {
  func.func @_seq_attn_kernel(%arg0: memref<16x32xf32, #tpu.memory_space<vmem>>, %arg1: memref<16x32xf32, #tpu.memory_space<vmem>>, %arg2: memref<1x16xf32, #tpu.memory_space<vmem>>, %arg3: memref<32x32xf32, #tpu.memory_space<vmem>>, %arg4: memref<1x32xf32, #tpu.memory_space<vmem>>, %arg5: memref<32x64xf32, #tpu.memory_space<vmem>>, %arg6: memref<1x64xf32, #tpu.memory_space<vmem>>, %arg7: memref<32x32xf32, #tpu.memory_space<vmem>>, %arg8: memref<1x32xf32, #tpu.memory_space<vmem>>, %arg9: memref<1x32xf32, #tpu.memory_space<vmem>>, %arg10: memref<1x32xf32, #tpu.memory_space<vmem>>, %arg11: memref<32x20xf32, #tpu.memory_space<vmem>>, %arg12: memref<1x20xf32, #tpu.memory_space<vmem>>, %arg13: memref<16x52xf32, #tpu.memory_space<vmem>>, %arg14: memref<4x16x16xf32, #tpu.memory_space<vmem>>) attributes {dimension_semantics = [], scalar_prefetch = 0 : i64, scratch_operands = 0 : i64, tpu.core_type = #tpu.core_type<tc>} {
    %c0 = arith.constant 0 : index
    %c0_0 = arith.constant 0 : index
    %0 = vector.load %arg0[%c0, %c0_0] : memref<16x32xf32, #tpu.memory_space<vmem>>, vector<16x32xf32>
    %c0_1 = arith.constant 0 : index
    %c0_2 = arith.constant 0 : index
    %1 = vector.load %arg1[%c0_1, %c0_2] : memref<16x32xf32, #tpu.memory_space<vmem>>, vector<16x32xf32>
    %c0_3 = arith.constant 0 : index
    %c0_4 = arith.constant 0 : index
    %2 = vector.load %arg3[%c0_3, %c0_4] : memref<32x32xf32, #tpu.memory_space<vmem>>, vector<32x32xf32>
    %cst = arith.constant dense<0.000000e+00> : vector<16x32xf32>
    %3 = tpu.matmul %0, %2, %cst {dimension_numbers = #tpu.dot_dimension_numbers<[1], [0], [0], [1], [0, 0, 1, 1], [], []>} : vector<16x32xf32>, vector<32x32xf32>, vector<16x32xf32> -> vector<16x32xf32>
    %c0_5 = arith.constant 0 : index
    %c0_6 = arith.constant 0 : index
    %4 = vector.load %arg4[%c0_5, %c0_6] : memref<1x32xf32, #tpu.memory_space<vmem>>, vector<1x32xf32>
    %5 = vector.broadcast %4 : vector<1x32xf32> to vector<16x32xf32>
    %6 = arith.addf %3, %5 : vector<16x32xf32>
    %c0_7 = arith.constant 0 : index
    %c0_8 = arith.constant 0 : index
    %7 = vector.load %arg5[%c0_7, %c0_8] : memref<32x64xf32, #tpu.memory_space<vmem>>, vector<32x64xf32>
    %cst_9 = arith.constant dense<0.000000e+00> : vector<16x64xf32>
    %8 = tpu.matmul %1, %7, %cst_9 {dimension_numbers = #tpu.dot_dimension_numbers<[1], [0], [0], [1], [0, 0, 1, 1], [], []>} : vector<16x32xf32>, vector<32x64xf32>, vector<16x64xf32> -> vector<16x64xf32>
    %c0_10 = arith.constant 0 : index
    %c0_11 = arith.constant 0 : index
    %9 = vector.load %arg6[%c0_10, %c0_11] : memref<1x64xf32, #tpu.memory_space<vmem>>, vector<1x64xf32>
    %10 = vector.broadcast %9 : vector<1x64xf32> to vector<16x64xf32>
    %11 = arith.addf %8, %10 : vector<16x64xf32>
    %12 = vector.extract_strided_slice %11 {offsets = [0, 0], sizes = [16, 32], strides = [1, 1]} : vector<16x64xf32> to vector<16x32xf32>
    %13 = vector.extract_strided_slice %11 {offsets = [0, 32], sizes = [16, 32], strides = [1, 1]} : vector<16x64xf32> to vector<16x32xf32>
    %c0_12 = arith.constant 0 : index
    %c0_13 = arith.constant 0 : index
    %14 = vector.load %arg2[%c0_12, %c0_13] : memref<1x16xf32, #tpu.memory_space<vmem>>, vector<1x16xf32>
    %c0_14 = arith.constant 0 : index
    %c0_15 = arith.constant 0 : index
    %15 = vector.load %arg7[%c0_14, %c0_15] : memref<32x32xf32, #tpu.memory_space<vmem>>, vector<32x32xf32>
    %cst_16 = arith.constant 0.000000e+00 : f32
    %16 = vector.broadcast %cst_16 : f32 to vector<16x32xf32>
    %17 = vector.extract_strided_slice %6 {offsets = [0, 0], sizes = [16, 8], strides = [1, 1]} : vector<16x32xf32> to vector<16x8xf32>
    %18 = vector.extract_strided_slice %12 {offsets = [0, 0], sizes = [16, 8], strides = [1, 1]} : vector<16x32xf32> to vector<16x8xf32>
    %19 = tpu.transpose %18, [1, 0] : vector<16x8xf32> -> vector<8x16xf32>
    %cst_17 = arith.constant dense<0.000000e+00> : vector<16x16xf32>
    %20 = tpu.matmul %17, %19, %cst_17 {dimension_numbers = #tpu.dot_dimension_numbers<[1], [0], [0], [1], [0, 0, 1, 1], [], []>} : vector<16x8xf32>, vector<8x16xf32>, vector<16x16xf32> -> vector<16x16xf32>
    %cst_18 = arith.constant 0.353553385 : f32
    %21 = vector.broadcast %cst_18 : f32 to vector<16x16xf32>
    %22 = arith.mulf %20, %21 : vector<16x16xf32>
    %23 = vector.broadcast %14 : vector<1x16xf32> to vector<16x16xf32>
    %24 = arith.addf %22, %23 : vector<16x16xf32>
    %cst_19 = arith.constant dense<0xFF800000> : vector<16xf32>
    %25 = vector.multi_reduction <maximumf>, %24, %cst_19 [1] : vector<16x16xf32> to vector<16xf32>
    %26 = vector.shape_cast %25 : vector<16xf32> to vector<16x1xf32>
    %27 = vector.broadcast %26 : vector<16x1xf32> to vector<16x16xf32>
    %28 = arith.subf %24, %27 : vector<16x16xf32>
    %29 = math.exp %28 : vector<16x16xf32>
    %cst_20 = arith.constant dense<0.000000e+00> : vector<16xf32>
    %30 = vector.multi_reduction <add>, %29, %cst_20 [1] : vector<16x16xf32> to vector<16xf32>
    %31 = vector.shape_cast %30 : vector<16xf32> to vector<16x1xf32>
    %32 = tpu.reciprocal %31 {approx = true} : vector<16x1xf32> -> vector<16x1xf32>
    %33 = vector.broadcast %32 : vector<16x1xf32> to vector<16x16xf32>
    %34 = arith.mulf %29, %33 : vector<16x16xf32>
    %c0_21 = arith.constant 0 : index
    %c0_22 = arith.constant 0 : index
    %c0_23 = arith.constant 0 : index
    %35 = vector.load %arg14[%c0_21, %c0_22, %c0_23] : memref<4x16x16xf32, #tpu.memory_space<vmem>>, vector<1x16x16xf32>
    %36 = vector.shape_cast %35 : vector<1x16x16xf32> to vector<16x16xf32>
    %37 = vector.shape_cast %34 : vector<16x16xf32> to vector<1x16x16xf32>
    tpu.vector_store %arg14[%c0_21, %c0_22, %c0_23], %37 {strides = array<i32>} : memref<4x16x16xf32, #tpu.memory_space<vmem>>, vector<1x16x16xf32>,
    %38 = vector.extract_strided_slice %13 {offsets = [0, 0], sizes = [16, 8], strides = [1, 1]} : vector<16x32xf32> to vector<16x8xf32>
    %cst_24 = arith.constant dense<0.000000e+00> : vector<16x8xf32>
    %39 = tpu.matmul %34, %38, %cst_24 {dimension_numbers = #tpu.dot_dimension_numbers<[1], [0], [0], [1], [0, 0, 1, 1], [], []>} : vector<16x16xf32>, vector<16x8xf32>, vector<16x8xf32> -> vector<16x8xf32>
    %40 = vector.extract_strided_slice %15 {offsets = [0, 0], sizes = [8, 32], strides = [1, 1]} : vector<32x32xf32> to vector<8x32xf32>
    %cst_25 = arith.constant dense<0.000000e+00> : vector<16x32xf32>
    %41 = tpu.matmul %39, %40, %cst_25 {dimension_numbers = #tpu.dot_dimension_numbers<[1], [0], [0], [1], [0, 0, 1, 1], [], []>} : vector<16x8xf32>, vector<8x32xf32>, vector<16x32xf32> -> vector<16x32xf32>
    %42 = arith.addf %16, %41 : vector<16x32xf32>
    %43 = vector.extract_strided_slice %6 {offsets = [0, 8], sizes = [16, 8], strides = [1, 1]} : vector<16x32xf32> to vector<16x8xf32>
    %44 = vector.extract_strided_slice %12 {offsets = [0, 8], sizes = [16, 8], strides = [1, 1]} : vector<16x32xf32> to vector<16x8xf32>
    %45 = tpu.transpose %44, [1, 0] : vector<16x8xf32> -> vector<8x16xf32>
    %cst_26 = arith.constant dense<0.000000e+00> : vector<16x16xf32>
    %46 = tpu.matmul %43, %45, %cst_26 {dimension_numbers = #tpu.dot_dimension_numbers<[1], [0], [0], [1], [0, 0, 1, 1], [], []>} : vector<16x8xf32>, vector<8x16xf32>, vector<16x16xf32> -> vector<16x16xf32>
    %cst_27 = arith.constant 0.353553385 : f32
    %47 = vector.broadcast %cst_27 : f32 to vector<16x16xf32>
    %48 = arith.mulf %46, %47 : vector<16x16xf32>
    %49 = vector.broadcast %14 : vector<1x16xf32> to vector<16x16xf32>
    %50 = arith.addf %48, %49 : vector<16x16xf32>
    %cst_28 = arith.constant dense<0xFF800000> : vector<16xf32>
    %51 = vector.multi_reduction <maximumf>, %50, %cst_28 [1] : vector<16x16xf32> to vector<16xf32>
    %52 = vector.shape_cast %51 : vector<16xf32> to vector<16x1xf32>
    %53 = vector.broadcast %52 : vector<16x1xf32> to vector<16x16xf32>
    %54 = arith.subf %50, %53 : vector<16x16xf32>
    %55 = math.exp %54 : vector<16x16xf32>
    %cst_29 = arith.constant dense<0.000000e+00> : vector<16xf32>
    %56 = vector.multi_reduction <add>, %55, %cst_29 [1] : vector<16x16xf32> to vector<16xf32>
    %57 = vector.shape_cast %56 : vector<16xf32> to vector<16x1xf32>
    %58 = tpu.reciprocal %57 {approx = true} : vector<16x1xf32> -> vector<16x1xf32>
    %59 = vector.broadcast %58 : vector<16x1xf32> to vector<16x16xf32>
    %60 = arith.mulf %55, %59 : vector<16x16xf32>
    %c1 = arith.constant 1 : index
    %c0_30 = arith.constant 0 : index
    %c0_31 = arith.constant 0 : index
    %61 = vector.load %arg14[%c1, %c0_30, %c0_31] : memref<4x16x16xf32, #tpu.memory_space<vmem>>, vector<1x16x16xf32>
    %62 = vector.shape_cast %61 : vector<1x16x16xf32> to vector<16x16xf32>
    %63 = vector.shape_cast %60 : vector<16x16xf32> to vector<1x16x16xf32>
    tpu.vector_store %arg14[%c1, %c0_30, %c0_31], %63 {strides = array<i32>} : memref<4x16x16xf32, #tpu.memory_space<vmem>>, vector<1x16x16xf32>,
    %64 = vector.extract_strided_slice %13 {offsets = [0, 8], sizes = [16, 8], strides = [1, 1]} : vector<16x32xf32> to vector<16x8xf32>
    %cst_32 = arith.constant dense<0.000000e+00> : vector<16x8xf32>
    %65 = tpu.matmul %60, %64, %cst_32 {dimension_numbers = #tpu.dot_dimension_numbers<[1], [0], [0], [1], [0, 0, 1, 1], [], []>} : vector<16x16xf32>, vector<16x8xf32>, vector<16x8xf32> -> vector<16x8xf32>
    %66 = vector.extract_strided_slice %15 {offsets = [8, 0], sizes = [8, 32], strides = [1, 1]} : vector<32x32xf32> to vector<8x32xf32>
    %cst_33 = arith.constant dense<0.000000e+00> : vector<16x32xf32>
    %67 = tpu.matmul %65, %66, %cst_33 {dimension_numbers = #tpu.dot_dimension_numbers<[1], [0], [0], [1], [0, 0, 1, 1], [], []>} : vector<16x8xf32>, vector<8x32xf32>, vector<16x32xf32> -> vector<16x32xf32>
    %68 = arith.addf %42, %67 : vector<16x32xf32>
    %69 = vector.extract_strided_slice %6 {offsets = [0, 16], sizes = [16, 8], strides = [1, 1]} : vector<16x32xf32> to vector<16x8xf32>
    %70 = vector.extract_strided_slice %12 {offsets = [0, 16], sizes = [16, 8], strides = [1, 1]} : vector<16x32xf32> to vector<16x8xf32>
    %71 = tpu.transpose %70, [1, 0] : vector<16x8xf32> -> vector<8x16xf32>
    %cst_34 = arith.constant dense<0.000000e+00> : vector<16x16xf32>
    %72 = tpu.matmul %69, %71, %cst_34 {dimension_numbers = #tpu.dot_dimension_numbers<[1], [0], [0], [1], [0, 0, 1, 1], [], []>} : vector<16x8xf32>, vector<8x16xf32>, vector<16x16xf32> -> vector<16x16xf32>
    %cst_35 = arith.constant 0.353553385 : f32
    %73 = vector.broadcast %cst_35 : f32 to vector<16x16xf32>
    %74 = arith.mulf %72, %73 : vector<16x16xf32>
    %75 = vector.broadcast %14 : vector<1x16xf32> to vector<16x16xf32>
    %76 = arith.addf %74, %75 : vector<16x16xf32>
    %cst_36 = arith.constant dense<0xFF800000> : vector<16xf32>
    %77 = vector.multi_reduction <maximumf>, %76, %cst_36 [1] : vector<16x16xf32> to vector<16xf32>
    %78 = vector.shape_cast %77 : vector<16xf32> to vector<16x1xf32>
    %79 = vector.broadcast %78 : vector<16x1xf32> to vector<16x16xf32>
    %80 = arith.subf %76, %79 : vector<16x16xf32>
    %81 = math.exp %80 : vector<16x16xf32>
    %cst_37 = arith.constant dense<0.000000e+00> : vector<16xf32>
    %82 = vector.multi_reduction <add>, %81, %cst_37 [1] : vector<16x16xf32> to vector<16xf32>
    %83 = vector.shape_cast %82 : vector<16xf32> to vector<16x1xf32>
    %84 = tpu.reciprocal %83 {approx = true} : vector<16x1xf32> -> vector<16x1xf32>
    %85 = vector.broadcast %84 : vector<16x1xf32> to vector<16x16xf32>
    %86 = arith.mulf %81, %85 : vector<16x16xf32>
    %c2 = arith.constant 2 : index
    %c0_38 = arith.constant 0 : index
    %c0_39 = arith.constant 0 : index
    %87 = vector.load %arg14[%c2, %c0_38, %c0_39] : memref<4x16x16xf32, #tpu.memory_space<vmem>>, vector<1x16x16xf32>
    %88 = vector.shape_cast %87 : vector<1x16x16xf32> to vector<16x16xf32>
    %89 = vector.shape_cast %86 : vector<16x16xf32> to vector<1x16x16xf32>
    tpu.vector_store %arg14[%c2, %c0_38, %c0_39], %89 {strides = array<i32>} : memref<4x16x16xf32, #tpu.memory_space<vmem>>, vector<1x16x16xf32>,
    %90 = vector.extract_strided_slice %13 {offsets = [0, 16], sizes = [16, 8], strides = [1, 1]} : vector<16x32xf32> to vector<16x8xf32>
    %cst_40 = arith.constant dense<0.000000e+00> : vector<16x8xf32>
    %91 = tpu.matmul %86, %90, %cst_40 {dimension_numbers = #tpu.dot_dimension_numbers<[1], [0], [0], [1], [0, 0, 1, 1], [], []>} : vector<16x16xf32>, vector<16x8xf32>, vector<16x8xf32> -> vector<16x8xf32>
    %92 = vector.extract_strided_slice %15 {offsets = [16, 0], sizes = [8, 32], strides = [1, 1]} : vector<32x32xf32> to vector<8x32xf32>
    %cst_41 = arith.constant dense<0.000000e+00> : vector<16x32xf32>
    %93 = tpu.matmul %91, %92, %cst_41 {dimension_numbers = #tpu.dot_dimension_numbers<[1], [0], [0], [1], [0, 0, 1, 1], [], []>} : vector<16x8xf32>, vector<8x32xf32>, vector<16x32xf32> -> vector<16x32xf32>
    %94 = arith.addf %68, %93 : vector<16x32xf32>
    %95 = vector.extract_strided_slice %6 {offsets = [0, 24], sizes = [16, 8], strides = [1, 1]} : vector<16x32xf32> to vector<16x8xf32>
    %96 = vector.extract_strided_slice %12 {offsets = [0, 24], sizes = [16, 8], strides = [1, 1]} : vector<16x32xf32> to vector<16x8xf32>
    %97 = tpu.transpose %96, [1, 0] : vector<16x8xf32> -> vector<8x16xf32>
    %cst_42 = arith.constant dense<0.000000e+00> : vector<16x16xf32>
    %98 = tpu.matmul %95, %97, %cst_42 {dimension_numbers = #tpu.dot_dimension_numbers<[1], [0], [0], [1], [0, 0, 1, 1], [], []>} : vector<16x8xf32>, vector<8x16xf32>, vector<16x16xf32> -> vector<16x16xf32>
    %cst_43 = arith.constant 0.353553385 : f32
    %99 = vector.broadcast %cst_43 : f32 to vector<16x16xf32>
    %100 = arith.mulf %98, %99 : vector<16x16xf32>
    %101 = vector.broadcast %14 : vector<1x16xf32> to vector<16x16xf32>
    %102 = arith.addf %100, %101 : vector<16x16xf32>
    %cst_44 = arith.constant dense<0xFF800000> : vector<16xf32>
    %103 = vector.multi_reduction <maximumf>, %102, %cst_44 [1] : vector<16x16xf32> to vector<16xf32>
    %104 = vector.shape_cast %103 : vector<16xf32> to vector<16x1xf32>
    %105 = vector.broadcast %104 : vector<16x1xf32> to vector<16x16xf32>
    %106 = arith.subf %102, %105 : vector<16x16xf32>
    %107 = math.exp %106 : vector<16x16xf32>
    %cst_45 = arith.constant dense<0.000000e+00> : vector<16xf32>
    %108 = vector.multi_reduction <add>, %107, %cst_45 [1] : vector<16x16xf32> to vector<16xf32>
    %109 = vector.shape_cast %108 : vector<16xf32> to vector<16x1xf32>
    %110 = tpu.reciprocal %109 {approx = true} : vector<16x1xf32> -> vector<16x1xf32>
    %111 = vector.broadcast %110 : vector<16x1xf32> to vector<16x16xf32>
    %112 = arith.mulf %107, %111 : vector<16x16xf32>
    %c3 = arith.constant 3 : index
    %c0_46 = arith.constant 0 : index
    %c0_47 = arith.constant 0 : index
    %113 = vector.load %arg14[%c3, %c0_46, %c0_47] : memref<4x16x16xf32, #tpu.memory_space<vmem>>, vector<1x16x16xf32>
    %114 = vector.shape_cast %113 : vector<1x16x16xf32> to vector<16x16xf32>
    %115 = vector.shape_cast %112 : vector<16x16xf32> to vector<1x16x16xf32>
    tpu.vector_store %arg14[%c3, %c0_46, %c0_47], %115 {strides = array<i32>} : memref<4x16x16xf32, #tpu.memory_space<vmem>>, vector<1x16x16xf32>,
    %116 = vector.extract_strided_slice %13 {offsets = [0, 24], sizes = [16, 8], strides = [1, 1]} : vector<16x32xf32> to vector<16x8xf32>
    %cst_48 = arith.constant dense<0.000000e+00> : vector<16x8xf32>
    %117 = tpu.matmul %112, %116, %cst_48 {dimension_numbers = #tpu.dot_dimension_numbers<[1], [0], [0], [1], [0, 0, 1, 1], [], []>} : vector<16x16xf32>, vector<16x8xf32>, vector<16x8xf32> -> vector<16x8xf32>
    %118 = vector.extract_strided_slice %15 {offsets = [24, 0], sizes = [8, 32], strides = [1, 1]} : vector<32x32xf32> to vector<8x32xf32>
    %cst_49 = arith.constant dense<0.000000e+00> : vector<16x32xf32>
    %119 = tpu.matmul %117, %118, %cst_49 {dimension_numbers = #tpu.dot_dimension_numbers<[1], [0], [0], [1], [0, 0, 1, 1], [], []>} : vector<16x8xf32>, vector<8x32xf32>, vector<16x32xf32> -> vector<16x32xf32>
    %120 = arith.addf %94, %119 : vector<16x32xf32>
    %c0_50 = arith.constant 0 : index
    %c0_51 = arith.constant 0 : index
    %121 = vector.load %arg8[%c0_50, %c0_51] : memref<1x32xf32, #tpu.memory_space<vmem>>, vector<1x32xf32>
    %122 = vector.broadcast %121 : vector<1x32xf32> to vector<16x32xf32>
    %123 = arith.addf %120, %122 : vector<16x32xf32>
    %124 = arith.addf %123, %0 : vector<16x32xf32>
    %c0_52 = arith.constant 0 : index
    %c0_53 = arith.constant 0 : index
    %125 = vector.load %arg9[%c0_52, %c0_53] : memref<1x32xf32, #tpu.memory_space<vmem>>, vector<1x32xf32>
    %c0_54 = arith.constant 0 : index
    %c0_55 = arith.constant 0 : index
    %126 = vector.load %arg10[%c0_54, %c0_55] : memref<1x32xf32, #tpu.memory_space<vmem>>, vector<1x32xf32>
    %cst_56 = arith.constant dense<0.000000e+00> : vector<16xf32>
    %127 = vector.multi_reduction <add>, %124, %cst_56 [1] : vector<16x32xf32> to vector<16xf32>
    %128 = vector.shape_cast %127 : vector<16xf32> to vector<16x1xf32>
    %cst_57 = arith.constant 3.200000e+01 : f32
    %129 = vector.broadcast %cst_57 : f32 to vector<16x1xf32>
    %130 = arith.divf %128, %129 : vector<16x1xf32>
    %131 = vector.broadcast %130 : vector<16x1xf32> to vector<16x32xf32>
    %132 = arith.subf %124, %131 : vector<16x32xf32>
    %133 = arith.mulf %132, %132 : vector<16x32xf32>
    %cst_58 = arith.constant dense<0.000000e+00> : vector<16xf32>
    %134 = vector.multi_reduction <add>, %133, %cst_58 [1] : vector<16x32xf32> to vector<16xf32>
    %135 = vector.shape_cast %134 : vector<16xf32> to vector<16x1xf32>
    %cst_59 = arith.constant 3.200000e+01 : f32
    %136 = vector.broadcast %cst_59 : f32 to vector<16x1xf32>
    %137 = arith.divf %135, %136 : vector<16x1xf32>
    %138 = vector.broadcast %130 : vector<16x1xf32> to vector<16x32xf32>
    %139 = arith.subf %124, %138 : vector<16x32xf32>
    %cst_60 = arith.constant 9.99999974E-6 : f32
    %140 = vector.broadcast %cst_60 : f32 to vector<16x1xf32>
    %141 = arith.addf %137, %140 : vector<16x1xf32>
    %142 = math.rsqrt %141 : vector<16x1xf32>
    %143 = vector.broadcast %142 : vector<16x1xf32> to vector<16x32xf32>
    %144 = arith.mulf %139, %143 : vector<16x32xf32>
    %145 = vector.broadcast %125 : vector<1x32xf32> to vector<16x32xf32>
    %146 = arith.mulf %144, %145 : vector<16x32xf32>
    %147 = vector.broadcast %126 : vector<1x32xf32> to vector<16x32xf32>
    %148 = arith.addf %146, %147 : vector<16x32xf32>
    %c0_61 = arith.constant 0 : index
    %c0_62 = arith.constant 0 : index
    %149 = vector.load %arg11[%c0_61, %c0_62] : memref<32x20xf32, #tpu.memory_space<vmem>>, vector<32x20xf32>
    %cst_63 = arith.constant dense<0.000000e+00> : vector<16x20xf32>
    %150 = tpu.matmul %148, %149, %cst_63 {dimension_numbers = #tpu.dot_dimension_numbers<[1], [0], [0], [1], [0, 0, 1, 1], [], []>} : vector<16x32xf32>, vector<32x20xf32>, vector<16x20xf32> -> vector<16x20xf32>
    %c0_64 = arith.constant 0 : index
    %c0_65 = arith.constant 0 : index
    %151 = vector.load %arg12[%c0_64, %c0_65] : memref<1x20xf32, #tpu.memory_space<vmem>>, vector<1x20xf32>
    %152 = vector.broadcast %151 : vector<1x20xf32> to vector<16x20xf32>
    %153 = arith.addf %150, %152 : vector<16x20xf32>
    %c0_66 = arith.constant 0 : index
    %c0_67 = arith.constant 0 : index
    %154 = vector.load %arg13[%c0_66, %c0_67] : memref<16x52xf32, #tpu.memory_space<vmem>>, vector<16x32xf32>
    tpu.vector_store %arg13[%c0_66, %c0_67], %148 {strides = array<i32>} : memref<16x52xf32, #tpu.memory_space<vmem>>, vector<16x32xf32>,
    %c0_68 = arith.constant 0 : index
    %c32 = arith.constant 32 : index
    %155 = vector.load %arg13[%c0_68, %c32] : memref<16x52xf32, #tpu.memory_space<vmem>>, vector<16x20xf32>
    tpu.vector_store %arg13[%c0_68, %c32], %153 {strides = array<i32>} : memref<16x52xf32, #tpu.memory_space<vmem>>, vector<16x20xf32>,
    return
  }
}

module attributes {stable_mosaic.version = 11 : i64} {
  func.func @_spatial_ipa_kernel(%arg0: memref<16x32xf32, #tpu.memory_space<vmem>>, %arg1: memref<16x9xf32, #tpu.memory_space<vmem>>, %arg2: memref<16x3xf32, #tpu.memory_space<vmem>>, %arg3: memref<1x16xf32, #tpu.memory_space<vmem>>, %arg4: memref<16x16xf32, #tpu.memory_space<vmem>>, %arg5: memref<32x192xf32, #tpu.memory_space<vmem>>, %arg6: memref<1x192xf32, #tpu.memory_space<vmem>>, %arg7: memref<32x32xf32, #tpu.memory_space<vmem>>, %arg8: memref<1x32xf32, #tpu.memory_space<vmem>>, %arg9: memref<1x32xf32, #tpu.memory_space<vmem>>, %arg10: memref<1x32xf32, #tpu.memory_space<vmem>>, %arg11: memref<16x32xf32, #tpu.memory_space<vmem>>) attributes {dimension_semantics = [], scalar_prefetch = 0 : i64, scratch_operands = 0 : i64, tpu.core_type = #tpu.core_type<tc>} {
    %c0 = arith.constant 0 : index
    %c0_0 = arith.constant 0 : index
    %0 = vector.load %arg0[%c0, %c0_0] : memref<16x32xf32, #tpu.memory_space<vmem>>, vector<16x32xf32>
    %c0_1 = arith.constant 0 : index
    %c0_2 = arith.constant 0 : index
    %1 = vector.load %arg1[%c0_1, %c0_2] : memref<16x9xf32, #tpu.memory_space<vmem>>, vector<16x9xf32>
    %c0_3 = arith.constant 0 : index
    %c0_4 = arith.constant 0 : index
    %2 = vector.load %arg2[%c0_3, %c0_4] : memref<16x3xf32, #tpu.memory_space<vmem>>, vector<16x3xf32>
    %c0_5 = arith.constant 0 : index
    %c0_6 = arith.constant 0 : index
    %3 = vector.load %arg3[%c0_5, %c0_6] : memref<1x16xf32, #tpu.memory_space<vmem>>, vector<1x16xf32>
    %c0_7 = arith.constant 0 : index
    %c0_8 = arith.constant 0 : index
    %4 = vector.load %arg4[%c0_7, %c0_8] : memref<16x16xf32, #tpu.memory_space<vmem>>, vector<16x16xf32>
    %c0_9 = arith.constant 0 : index
    %c0_10 = arith.constant 0 : index
    %5 = vector.load %arg5[%c0_9, %c0_10] : memref<32x192xf32, #tpu.memory_space<vmem>>, vector<32x192xf32>
    %c0_11 = arith.constant 0 : index
    %c0_12 = arith.constant 0 : index
    %6 = vector.load %arg6[%c0_11, %c0_12] : memref<1x192xf32, #tpu.memory_space<vmem>>, vector<1x192xf32>
    %c0_13 = arith.constant 0 : index
    %c0_14 = arith.constant 0 : index
    %7 = vector.load %arg7[%c0_13, %c0_14] : memref<32x32xf32, #tpu.memory_space<vmem>>, vector<32x32xf32>
    %cst = arith.constant dense<0.000000e+00> : vector<16x192xf32>
    %8 = tpu.matmul %0, %5, %cst {dimension_numbers = #tpu.dot_dimension_numbers<[1], [0], [0], [1], [0, 0, 1, 1], [], []>} : vector<16x32xf32>, vector<32x192xf32>, vector<16x192xf32> -> vector<16x192xf32>
    %9 = vector.broadcast %6 : vector<1x192xf32> to vector<16x192xf32>
    %10 = arith.addf %8, %9 : vector<16x192xf32>
    %11 = vector.extract_strided_slice %10 {offsets = [0, 0], sizes = [16, 32], strides = [1, 1]} : vector<16x192xf32> to vector<16x32xf32>
    %12 = vector.extract_strided_slice %10 {offsets = [0, 32], sizes = [16, 32], strides = [1, 1]} : vector<16x192xf32> to vector<16x32xf32>
    %13 = vector.extract_strided_slice %10 {offsets = [0, 64], sizes = [16, 32], strides = [1, 1]} : vector<16x192xf32> to vector<16x32xf32>
    %14 = vector.extract_strided_slice %10 {offsets = [0, 96], sizes = [16, 48], strides = [1, 1]} : vector<16x192xf32> to vector<16x48xf32>
    %15 = vector.extract_strided_slice %14 {offsets = [0, 0], sizes = [16, 16], strides = [1, 1]} : vector<16x48xf32> to vector<16x16xf32>
    %16 = vector.extract_strided_slice %14 {offsets = [0, 16], sizes = [16, 16], strides = [1, 1]} : vector<16x48xf32> to vector<16x16xf32>
    %17 = vector.extract_strided_slice %14 {offsets = [0, 32], sizes = [16, 16], strides = [1, 1]} : vector<16x48xf32> to vector<16x16xf32>
    %18 = vector.extract_strided_slice %1 {offsets = [0, 0], sizes = [16, 1], strides = [1, 1]} : vector<16x9xf32> to vector<16x1xf32>
    %19 = vector.broadcast %18 : vector<16x1xf32> to vector<16x16xf32>
    %20 = arith.mulf %19, %15 : vector<16x16xf32>
    %21 = vector.extract_strided_slice %1 {offsets = [0, 1], sizes = [16, 1], strides = [1, 1]} : vector<16x9xf32> to vector<16x1xf32>
    %22 = vector.broadcast %21 : vector<16x1xf32> to vector<16x16xf32>
    %23 = arith.mulf %22, %16 : vector<16x16xf32>
    %24 = arith.addf %20, %23 : vector<16x16xf32>
    %25 = vector.extract_strided_slice %1 {offsets = [0, 2], sizes = [16, 1], strides = [1, 1]} : vector<16x9xf32> to vector<16x1xf32>
    %26 = vector.broadcast %25 : vector<16x1xf32> to vector<16x16xf32>
    %27 = arith.mulf %26, %17 : vector<16x16xf32>
    %28 = arith.addf %24, %27 : vector<16x16xf32>
    %29 = vector.extract_strided_slice %2 {offsets = [0, 0], sizes = [16, 1], strides = [1, 1]} : vector<16x3xf32> to vector<16x1xf32>
    %30 = vector.broadcast %29 : vector<16x1xf32> to vector<16x16xf32>
    %31 = arith.addf %28, %30 : vector<16x16xf32>
    %32 = vector.extract_strided_slice %1 {offsets = [0, 3], sizes = [16, 1], strides = [1, 1]} : vector<16x9xf32> to vector<16x1xf32>
    %33 = vector.broadcast %32 : vector<16x1xf32> to vector<16x16xf32>
    %34 = arith.mulf %33, %15 : vector<16x16xf32>
    %35 = vector.extract_strided_slice %1 {offsets = [0, 4], sizes = [16, 1], strides = [1, 1]} : vector<16x9xf32> to vector<16x1xf32>
    %36 = vector.broadcast %35 : vector<16x1xf32> to vector<16x16xf32>
    %37 = arith.mulf %36, %16 : vector<16x16xf32>
    %38 = arith.addf %34, %37 : vector<16x16xf32>
    %39 = vector.extract_strided_slice %1 {offsets = [0, 5], sizes = [16, 1], strides = [1, 1]} : vector<16x9xf32> to vector<16x1xf32>
    %40 = vector.broadcast %39 : vector<16x1xf32> to vector<16x16xf32>
    %41 = arith.mulf %40, %17 : vector<16x16xf32>
    %42 = arith.addf %38, %41 : vector<16x16xf32>
    %43 = vector.extract_strided_slice %2 {offsets = [0, 1], sizes = [16, 1], strides = [1, 1]} : vector<16x3xf32> to vector<16x1xf32>
    %44 = vector.broadcast %43 : vector<16x1xf32> to vector<16x16xf32>
    %45 = arith.addf %42, %44 : vector<16x16xf32>
    %46 = vector.extract_strided_slice %1 {offsets = [0, 6], sizes = [16, 1], strides = [1, 1]} : vector<16x9xf32> to vector<16x1xf32>
    %47 = vector.broadcast %46 : vector<16x1xf32> to vector<16x16xf32>
    %48 = arith.mulf %47, %15 : vector<16x16xf32>
    %49 = vector.extract_strided_slice %1 {offsets = [0, 7], sizes = [16, 1], strides = [1, 1]} : vector<16x9xf32> to vector<16x1xf32>
    %50 = vector.broadcast %49 : vector<16x1xf32> to vector<16x16xf32>
    %51 = arith.mulf %50, %16 : vector<16x16xf32>
    %52 = arith.addf %48, %51 : vector<16x16xf32>
    %53 = vector.extract_strided_slice %1 {offsets = [0, 8], sizes = [16, 1], strides = [1, 1]} : vector<16x9xf32> to vector<16x1xf32>
    %54 = vector.broadcast %53 : vector<16x1xf32> to vector<16x16xf32>
    %55 = arith.mulf %54, %17 : vector<16x16xf32>
    %56 = arith.addf %52, %55 : vector<16x16xf32>
    %57 = vector.extract_strided_slice %2 {offsets = [0, 2], sizes = [16, 1], strides = [1, 1]} : vector<16x3xf32> to vector<16x1xf32>
    %58 = vector.broadcast %57 : vector<16x1xf32> to vector<16x16xf32>
    %59 = arith.addf %56, %58 : vector<16x16xf32>
    %60 = vector.broadcast %3 : vector<1x16xf32> to vector<16x16xf32>
    %61 = arith.mulf %31, %60 : vector<16x16xf32>
    %62 = vector.broadcast %3 : vector<1x16xf32> to vector<16x16xf32>
    %63 = arith.mulf %45, %62 : vector<16x16xf32>
    %64 = vector.broadcast %3 : vector<1x16xf32> to vector<16x16xf32>
    %65 = arith.mulf %59, %64 : vector<16x16xf32>
    %66 = vector.extract_strided_slice %10 {offsets = [0, 144], sizes = [16, 48], strides = [1, 1]} : vector<16x192xf32> to vector<16x48xf32>
    %67 = vector.extract_strided_slice %66 {offsets = [0, 0], sizes = [16, 16], strides = [1, 1]} : vector<16x48xf32> to vector<16x16xf32>
    %68 = vector.extract_strided_slice %66 {offsets = [0, 16], sizes = [16, 16], strides = [1, 1]} : vector<16x48xf32> to vector<16x16xf32>
    %69 = vector.extract_strided_slice %66 {offsets = [0, 32], sizes = [16, 16], strides = [1, 1]} : vector<16x48xf32> to vector<16x16xf32>
    %70 = vector.extract_strided_slice %1 {offsets = [0, 0], sizes = [16, 1], strides = [1, 1]} : vector<16x9xf32> to vector<16x1xf32>
    %71 = vector.broadcast %70 : vector<16x1xf32> to vector<16x16xf32>
    %72 = arith.mulf %71, %67 : vector<16x16xf32>
    %73 = vector.extract_strided_slice %1 {offsets = [0, 1], sizes = [16, 1], strides = [1, 1]} : vector<16x9xf32> to vector<16x1xf32>
    %74 = vector.broadcast %73 : vector<16x1xf32> to vector<16x16xf32>
    %75 = arith.mulf %74, %68 : vector<16x16xf32>
    %76 = arith.addf %72, %75 : vector<16x16xf32>
    %77 = vector.extract_strided_slice %1 {offsets = [0, 2], sizes = [16, 1], strides = [1, 1]} : vector<16x9xf32> to vector<16x1xf32>
    %78 = vector.broadcast %77 : vector<16x1xf32> to vector<16x16xf32>
    %79 = arith.mulf %78, %69 : vector<16x16xf32>
    %80 = arith.addf %76, %79 : vector<16x16xf32>
    %81 = vector.extract_strided_slice %2 {offsets = [0, 0], sizes = [16, 1], strides = [1, 1]} : vector<16x3xf32> to vector<16x1xf32>
    %82 = vector.broadcast %81 : vector<16x1xf32> to vector<16x16xf32>
    %83 = arith.addf %80, %82 : vector<16x16xf32>
    %84 = vector.extract_strided_slice %1 {offsets = [0, 3], sizes = [16, 1], strides = [1, 1]} : vector<16x9xf32> to vector<16x1xf32>
    %85 = vector.broadcast %84 : vector<16x1xf32> to vector<16x16xf32>
    %86 = arith.mulf %85, %67 : vector<16x16xf32>
    %87 = vector.extract_strided_slice %1 {offsets = [0, 4], sizes = [16, 1], strides = [1, 1]} : vector<16x9xf32> to vector<16x1xf32>
    %88 = vector.broadcast %87 : vector<16x1xf32> to vector<16x16xf32>
    %89 = arith.mulf %88, %68 : vector<16x16xf32>
    %90 = arith.addf %86, %89 : vector<16x16xf32>
    %91 = vector.extract_strided_slice %1 {offsets = [0, 5], sizes = [16, 1], strides = [1, 1]} : vector<16x9xf32> to vector<16x1xf32>
    %92 = vector.broadcast %91 : vector<16x1xf32> to vector<16x16xf32>
    %93 = arith.mulf %92, %69 : vector<16x16xf32>
    %94 = arith.addf %90, %93 : vector<16x16xf32>
    %95 = vector.extract_strided_slice %2 {offsets = [0, 1], sizes = [16, 1], strides = [1, 1]} : vector<16x3xf32> to vector<16x1xf32>
    %96 = vector.broadcast %95 : vector<16x1xf32> to vector<16x16xf32>
    %97 = arith.addf %94, %96 : vector<16x16xf32>
    %98 = vector.extract_strided_slice %1 {offsets = [0, 6], sizes = [16, 1], strides = [1, 1]} : vector<16x9xf32> to vector<16x1xf32>
    %99 = vector.broadcast %98 : vector<16x1xf32> to vector<16x16xf32>
    %100 = arith.mulf %99, %67 : vector<16x16xf32>
    %101 = vector.extract_strided_slice %1 {offsets = [0, 7], sizes = [16, 1], strides = [1, 1]} : vector<16x9xf32> to vector<16x1xf32>
    %102 = vector.broadcast %101 : vector<16x1xf32> to vector<16x16xf32>
    %103 = arith.mulf %102, %68 : vector<16x16xf32>
    %104 = arith.addf %100, %103 : vector<16x16xf32>
    %105 = vector.extract_strided_slice %1 {offsets = [0, 8], sizes = [16, 1], strides = [1, 1]} : vector<16x9xf32> to vector<16x1xf32>
    %106 = vector.broadcast %105 : vector<16x1xf32> to vector<16x16xf32>
    %107 = arith.mulf %106, %69 : vector<16x16xf32>
    %108 = arith.addf %104, %107 : vector<16x16xf32>
    %109 = vector.extract_strided_slice %2 {offsets = [0, 2], sizes = [16, 1], strides = [1, 1]} : vector<16x3xf32> to vector<16x1xf32>
    %110 = vector.broadcast %109 : vector<16x1xf32> to vector<16x16xf32>
    %111 = arith.addf %108, %110 : vector<16x16xf32>
    %112 = vector.broadcast %3 : vector<1x16xf32> to vector<16x16xf32>
    %113 = arith.mulf %83, %112 : vector<16x16xf32>
    %114 = vector.broadcast %3 : vector<1x16xf32> to vector<16x16xf32>
    %115 = arith.mulf %97, %114 : vector<16x16xf32>
    %116 = vector.broadcast %3 : vector<1x16xf32> to vector<16x16xf32>
    %117 = arith.mulf %111, %116 : vector<16x16xf32>
    %cst_15 = arith.constant 1.000000e+00 : f32
    %118 = vector.broadcast %cst_15 : f32 to vector<1x4xf32>
    %cst_16 = arith.constant 0.000000e+00 : f32
    %119 = vector.broadcast %cst_16 : f32 to vector<16x32xf32>
    %120 = vector.extract_strided_slice %61 {offsets = [0, 0], sizes = [16, 4], strides = [1, 1]} : vector<16x16xf32> to vector<16x4xf32>
    %121 = vector.extract_strided_slice %63 {offsets = [0, 0], sizes = [16, 4], strides = [1, 1]} : vector<16x16xf32> to vector<16x4xf32>
    %122 = vector.extract_strided_slice %65 {offsets = [0, 0], sizes = [16, 4], strides = [1, 1]} : vector<16x16xf32> to vector<16x4xf32>
    %123 = vector.extract_strided_slice %113 {offsets = [0, 0], sizes = [16, 4], strides = [1, 1]} : vector<16x16xf32> to vector<16x4xf32>
    %124 = vector.extract_strided_slice %115 {offsets = [0, 0], sizes = [16, 4], strides = [1, 1]} : vector<16x16xf32> to vector<16x4xf32>
    %125 = vector.extract_strided_slice %117 {offsets = [0, 0], sizes = [16, 4], strides = [1, 1]} : vector<16x16xf32> to vector<16x4xf32>
    %126 = tpu.transpose %123, [1, 0] : vector<16x4xf32> -> vector<4x16xf32>
    %cst_17 = arith.constant dense<0.000000e+00> : vector<16x16xf32>
    %127 = tpu.matmul %120, %126, %cst_17 {dimension_numbers = #tpu.dot_dimension_numbers<[1], [0], [0], [1], [0, 0, 1, 1], [], []>} : vector<16x4xf32>, vector<4x16xf32>, vector<16x16xf32> -> vector<16x16xf32>
    %128 = tpu.transpose %124, [1, 0] : vector<16x4xf32> -> vector<4x16xf32>
    %cst_18 = arith.constant dense<0.000000e+00> : vector<16x16xf32>
    %129 = tpu.matmul %121, %128, %cst_18 {dimension_numbers = #tpu.dot_dimension_numbers<[1], [0], [0], [1], [0, 0, 1, 1], [], []>} : vector<16x4xf32>, vector<4x16xf32>, vector<16x16xf32> -> vector<16x16xf32>
    %130 = arith.addf %127, %129 : vector<16x16xf32>
    %131 = tpu.transpose %125, [1, 0] : vector<16x4xf32> -> vector<4x16xf32>
    %cst_19 = arith.constant dense<0.000000e+00> : vector<16x16xf32>
    %132 = tpu.matmul %122, %131, %cst_19 {dimension_numbers = #tpu.dot_dimension_numbers<[1], [0], [0], [1], [0, 0, 1, 1], [], []>} : vector<16x4xf32>, vector<4x16xf32>, vector<16x16xf32> -> vector<16x16xf32>
    %133 = arith.addf %130, %132 : vector<16x16xf32>
    %134 = arith.mulf %120, %120 : vector<16x4xf32>
    %135 = arith.mulf %121, %121 : vector<16x4xf32>
    %136 = arith.addf %134, %135 : vector<16x4xf32>
    %137 = arith.mulf %122, %122 : vector<16x4xf32>
    %138 = arith.addf %136, %137 : vector<16x4xf32>
    %cst_20 = arith.constant dense<0.000000e+00> : vector<16xf32>
    %139 = vector.multi_reduction <add>, %138, %cst_20 [1] : vector<16x4xf32> to vector<16xf32>
    %140 = vector.shape_cast %139 : vector<16xf32> to vector<16x1xf32>
    %141 = arith.mulf %123, %123 : vector<16x4xf32>
    %142 = arith.mulf %124, %124 : vector<16x4xf32>
    %143 = arith.addf %141, %142 : vector<16x4xf32>
    %144 = arith.mulf %125, %125 : vector<16x4xf32>
    %145 = arith.addf %143, %144 : vector<16x4xf32>
    %146 = tpu.transpose %145, [1, 0] : vector<16x4xf32> -> vector<4x16xf32>
    %cst_21 = arith.constant dense<0.000000e+00> : vector<1x16xf32>
    %147 = tpu.matmul %118, %146, %cst_21 {dimension_numbers = #tpu.dot_dimension_numbers<[1], [0], [0], [1], [0, 0, 1, 1], [], []>} : vector<1x4xf32>, vector<4x16xf32>, vector<1x16xf32> -> vector<1x16xf32>
    %148 = vector.broadcast %140 : vector<16x1xf32> to vector<16x16xf32>
    %149 = vector.broadcast %147 : vector<1x16xf32> to vector<16x16xf32>
    %150 = arith.addf %148, %149 : vector<16x16xf32>
    %cst_22 = arith.constant 2.000000e+00 : f32
    %151 = vector.broadcast %cst_22 : f32 to vector<16x16xf32>
    %152 = arith.mulf %151, %133 : vector<16x16xf32>
    %153 = arith.subf %150, %152 : vector<16x16xf32>
    %154 = vector.extract_strided_slice %11 {offsets = [0, 0], sizes = [16, 8], strides = [1, 1]} : vector<16x32xf32> to vector<16x8xf32>
    %155 = vector.extract_strided_slice %12 {offsets = [0, 0], sizes = [16, 8], strides = [1, 1]} : vector<16x32xf32> to vector<16x8xf32>
    %156 = tpu.transpose %155, [1, 0] : vector<16x8xf32> -> vector<8x16xf32>
    %cst_23 = arith.constant dense<0.000000e+00> : vector<16x16xf32>
    %157 = tpu.matmul %154, %156, %cst_23 {dimension_numbers = #tpu.dot_dimension_numbers<[1], [0], [0], [1], [0, 0, 1, 1], [], []>} : vector<16x8xf32>, vector<8x16xf32>, vector<16x16xf32> -> vector<16x16xf32>
    %cst_24 = arith.constant 0.353553385 : f32
    %158 = vector.broadcast %cst_24 : f32 to vector<16x16xf32>
    %159 = arith.mulf %157, %158 : vector<16x16xf32>
    %160 = arith.addf %159, %4 : vector<16x16xf32>
    %cst_25 = arith.constant 5.000000e-01 : f32
    %161 = vector.broadcast %cst_25 : f32 to vector<16x16xf32>
    %162 = arith.mulf %161, %153 : vector<16x16xf32>
    %163 = arith.subf %160, %162 : vector<16x16xf32>
    %cst_26 = arith.constant dense<0xFF800000> : vector<16xf32>
    %164 = vector.multi_reduction <maximumf>, %163, %cst_26 [1] : vector<16x16xf32> to vector<16xf32>
    %165 = vector.shape_cast %164 : vector<16xf32> to vector<16x1xf32>
    %166 = vector.broadcast %165 : vector<16x1xf32> to vector<16x16xf32>
    %167 = arith.subf %163, %166 : vector<16x16xf32>
    %168 = math.exp %167 : vector<16x16xf32>
    %cst_27 = arith.constant dense<0.000000e+00> : vector<16xf32>
    %169 = vector.multi_reduction <add>, %168, %cst_27 [1] : vector<16x16xf32> to vector<16xf32>
    %170 = vector.shape_cast %169 : vector<16xf32> to vector<16x1xf32>
    %171 = tpu.reciprocal %170 {approx = true} : vector<16x1xf32> -> vector<16x1xf32>
    %172 = vector.broadcast %171 : vector<16x1xf32> to vector<16x16xf32>
    %173 = arith.mulf %168, %172 : vector<16x16xf32>
    %174 = vector.extract_strided_slice %13 {offsets = [0, 0], sizes = [16, 8], strides = [1, 1]} : vector<16x32xf32> to vector<16x8xf32>
    %cst_28 = arith.constant dense<0.000000e+00> : vector<16x8xf32>
    %175 = tpu.matmul %173, %174, %cst_28 {dimension_numbers = #tpu.dot_dimension_numbers<[1], [0], [0], [1], [0, 0, 1, 1], [], []>} : vector<16x16xf32>, vector<16x8xf32>, vector<16x8xf32> -> vector<16x8xf32>
    %176 = vector.extract_strided_slice %7 {offsets = [0, 0], sizes = [8, 32], strides = [1, 1]} : vector<32x32xf32> to vector<8x32xf32>
    %cst_29 = arith.constant dense<0.000000e+00> : vector<16x32xf32>
    %177 = tpu.matmul %175, %176, %cst_29 {dimension_numbers = #tpu.dot_dimension_numbers<[1], [0], [0], [1], [0, 0, 1, 1], [], []>} : vector<16x8xf32>, vector<8x32xf32>, vector<16x32xf32> -> vector<16x32xf32>
    %178 = arith.addf %119, %177 : vector<16x32xf32>
    %179 = vector.extract_strided_slice %61 {offsets = [0, 4], sizes = [16, 4], strides = [1, 1]} : vector<16x16xf32> to vector<16x4xf32>
    %180 = vector.extract_strided_slice %63 {offsets = [0, 4], sizes = [16, 4], strides = [1, 1]} : vector<16x16xf32> to vector<16x4xf32>
    %181 = vector.extract_strided_slice %65 {offsets = [0, 4], sizes = [16, 4], strides = [1, 1]} : vector<16x16xf32> to vector<16x4xf32>
    %182 = vector.extract_strided_slice %113 {offsets = [0, 4], sizes = [16, 4], strides = [1, 1]} : vector<16x16xf32> to vector<16x4xf32>
    %183 = vector.extract_strided_slice %115 {offsets = [0, 4], sizes = [16, 4], strides = [1, 1]} : vector<16x16xf32> to vector<16x4xf32>
    %184 = vector.extract_strided_slice %117 {offsets = [0, 4], sizes = [16, 4], strides = [1, 1]} : vector<16x16xf32> to vector<16x4xf32>
    %185 = tpu.transpose %182, [1, 0] : vector<16x4xf32> -> vector<4x16xf32>
    %cst_30 = arith.constant dense<0.000000e+00> : vector<16x16xf32>
    %186 = tpu.matmul %179, %185, %cst_30 {dimension_numbers = #tpu.dot_dimension_numbers<[1], [0], [0], [1], [0, 0, 1, 1], [], []>} : vector<16x4xf32>, vector<4x16xf32>, vector<16x16xf32> -> vector<16x16xf32>
    %187 = tpu.transpose %183, [1, 0] : vector<16x4xf32> -> vector<4x16xf32>
    %cst_31 = arith.constant dense<0.000000e+00> : vector<16x16xf32>
    %188 = tpu.matmul %180, %187, %cst_31 {dimension_numbers = #tpu.dot_dimension_numbers<[1], [0], [0], [1], [0, 0, 1, 1], [], []>} : vector<16x4xf32>, vector<4x16xf32>, vector<16x16xf32> -> vector<16x16xf32>
    %189 = arith.addf %186, %188 : vector<16x16xf32>
    %190 = tpu.transpose %184, [1, 0] : vector<16x4xf32> -> vector<4x16xf32>
    %cst_32 = arith.constant dense<0.000000e+00> : vector<16x16xf32>
    %191 = tpu.matmul %181, %190, %cst_32 {dimension_numbers = #tpu.dot_dimension_numbers<[1], [0], [0], [1], [0, 0, 1, 1], [], []>} : vector<16x4xf32>, vector<4x16xf32>, vector<16x16xf32> -> vector<16x16xf32>
    %192 = arith.addf %189, %191 : vector<16x16xf32>
    %193 = arith.mulf %179, %179 : vector<16x4xf32>
    %194 = arith.mulf %180, %180 : vector<16x4xf32>
    %195 = arith.addf %193, %194 : vector<16x4xf32>
    %196 = arith.mulf %181, %181 : vector<16x4xf32>
    %197 = arith.addf %195, %196 : vector<16x4xf32>
    %cst_33 = arith.constant dense<0.000000e+00> : vector<16xf32>
    %198 = vector.multi_reduction <add>, %197, %cst_33 [1] : vector<16x4xf32> to vector<16xf32>
    %199 = vector.shape_cast %198 : vector<16xf32> to vector<16x1xf32>
    %200 = arith.mulf %182, %182 : vector<16x4xf32>
    %201 = arith.mulf %183, %183 : vector<16x4xf32>
    %202 = arith.addf %200, %201 : vector<16x4xf32>
    %203 = arith.mulf %184, %184 : vector<16x4xf32>
    %204 = arith.addf %202, %203 : vector<16x4xf32>
    %205 = tpu.transpose %204, [1, 0] : vector<16x4xf32> -> vector<4x16xf32>
    %cst_34 = arith.constant dense<0.000000e+00> : vector<1x16xf32>
    %206 = tpu.matmul %118, %205, %cst_34 {dimension_numbers = #tpu.dot_dimension_numbers<[1], [0], [0], [1], [0, 0, 1, 1], [], []>} : vector<1x4xf32>, vector<4x16xf32>, vector<1x16xf32> -> vector<1x16xf32>
    %207 = vector.broadcast %199 : vector<16x1xf32> to vector<16x16xf32>
    %208 = vector.broadcast %206 : vector<1x16xf32> to vector<16x16xf32>
    %209 = arith.addf %207, %208 : vector<16x16xf32>
    %cst_35 = arith.constant 2.000000e+00 : f32
    %210 = vector.broadcast %cst_35 : f32 to vector<16x16xf32>
    %211 = arith.mulf %210, %192 : vector<16x16xf32>
    %212 = arith.subf %209, %211 : vector<16x16xf32>
    %213 = vector.extract_strided_slice %11 {offsets = [0, 8], sizes = [16, 8], strides = [1, 1]} : vector<16x32xf32> to vector<16x8xf32>
    %214 = vector.extract_strided_slice %12 {offsets = [0, 8], sizes = [16, 8], strides = [1, 1]} : vector<16x32xf32> to vector<16x8xf32>
    %215 = tpu.transpose %214, [1, 0] : vector<16x8xf32> -> vector<8x16xf32>
    %cst_36 = arith.constant dense<0.000000e+00> : vector<16x16xf32>
    %216 = tpu.matmul %213, %215, %cst_36 {dimension_numbers = #tpu.dot_dimension_numbers<[1], [0], [0], [1], [0, 0, 1, 1], [], []>} : vector<16x8xf32>, vector<8x16xf32>, vector<16x16xf32> -> vector<16x16xf32>
    %cst_37 = arith.constant 0.353553385 : f32
    %217 = vector.broadcast %cst_37 : f32 to vector<16x16xf32>
    %218 = arith.mulf %216, %217 : vector<16x16xf32>
    %219 = arith.addf %218, %4 : vector<16x16xf32>
    %cst_38 = arith.constant 5.000000e-01 : f32
    %220 = vector.broadcast %cst_38 : f32 to vector<16x16xf32>
    %221 = arith.mulf %220, %212 : vector<16x16xf32>
    %222 = arith.subf %219, %221 : vector<16x16xf32>
    %cst_39 = arith.constant dense<0xFF800000> : vector<16xf32>
    %223 = vector.multi_reduction <maximumf>, %222, %cst_39 [1] : vector<16x16xf32> to vector<16xf32>
    %224 = vector.shape_cast %223 : vector<16xf32> to vector<16x1xf32>
    %225 = vector.broadcast %224 : vector<16x1xf32> to vector<16x16xf32>
    %226 = arith.subf %222, %225 : vector<16x16xf32>
    %227 = math.exp %226 : vector<16x16xf32>
    %cst_40 = arith.constant dense<0.000000e+00> : vector<16xf32>
    %228 = vector.multi_reduction <add>, %227, %cst_40 [1] : vector<16x16xf32> to vector<16xf32>
    %229 = vector.shape_cast %228 : vector<16xf32> to vector<16x1xf32>
    %230 = tpu.reciprocal %229 {approx = true} : vector<16x1xf32> -> vector<16x1xf32>
    %231 = vector.broadcast %230 : vector<16x1xf32> to vector<16x16xf32>
    %232 = arith.mulf %227, %231 : vector<16x16xf32>
    %233 = vector.extract_strided_slice %13 {offsets = [0, 8], sizes = [16, 8], strides = [1, 1]} : vector<16x32xf32> to vector<16x8xf32>
    %cst_41 = arith.constant dense<0.000000e+00> : vector<16x8xf32>
    %234 = tpu.matmul %232, %233, %cst_41 {dimension_numbers = #tpu.dot_dimension_numbers<[1], [0], [0], [1], [0, 0, 1, 1], [], []>} : vector<16x16xf32>, vector<16x8xf32>, vector<16x8xf32> -> vector<16x8xf32>
    %235 = vector.extract_strided_slice %7 {offsets = [8, 0], sizes = [8, 32], strides = [1, 1]} : vector<32x32xf32> to vector<8x32xf32>
    %cst_42 = arith.constant dense<0.000000e+00> : vector<16x32xf32>
    %236 = tpu.matmul %234, %235, %cst_42 {dimension_numbers = #tpu.dot_dimension_numbers<[1], [0], [0], [1], [0, 0, 1, 1], [], []>} : vector<16x8xf32>, vector<8x32xf32>, vector<16x32xf32> -> vector<16x32xf32>
    %237 = arith.addf %178, %236 : vector<16x32xf32>
    %238 = vector.extract_strided_slice %61 {offsets = [0, 8], sizes = [16, 4], strides = [1, 1]} : vector<16x16xf32> to vector<16x4xf32>
    %239 = vector.extract_strided_slice %63 {offsets = [0, 8], sizes = [16, 4], strides = [1, 1]} : vector<16x16xf32> to vector<16x4xf32>
    %240 = vector.extract_strided_slice %65 {offsets = [0, 8], sizes = [16, 4], strides = [1, 1]} : vector<16x16xf32> to vector<16x4xf32>
    %241 = vector.extract_strided_slice %113 {offsets = [0, 8], sizes = [16, 4], strides = [1, 1]} : vector<16x16xf32> to vector<16x4xf32>
    %242 = vector.extract_strided_slice %115 {offsets = [0, 8], sizes = [16, 4], strides = [1, 1]} : vector<16x16xf32> to vector<16x4xf32>
    %243 = vector.extract_strided_slice %117 {offsets = [0, 8], sizes = [16, 4], strides = [1, 1]} : vector<16x16xf32> to vector<16x4xf32>
    %244 = tpu.transpose %241, [1, 0] : vector<16x4xf32> -> vector<4x16xf32>
    %cst_43 = arith.constant dense<0.000000e+00> : vector<16x16xf32>
    %245 = tpu.matmul %238, %244, %cst_43 {dimension_numbers = #tpu.dot_dimension_numbers<[1], [0], [0], [1], [0, 0, 1, 1], [], []>} : vector<16x4xf32>, vector<4x16xf32>, vector<16x16xf32> -> vector<16x16xf32>
    %246 = tpu.transpose %242, [1, 0] : vector<16x4xf32> -> vector<4x16xf32>
    %cst_44 = arith.constant dense<0.000000e+00> : vector<16x16xf32>
    %247 = tpu.matmul %239, %246, %cst_44 {dimension_numbers = #tpu.dot_dimension_numbers<[1], [0], [0], [1], [0, 0, 1, 1], [], []>} : vector<16x4xf32>, vector<4x16xf32>, vector<16x16xf32> -> vector<16x16xf32>
    %248 = arith.addf %245, %247 : vector<16x16xf32>
    %249 = tpu.transpose %243, [1, 0] : vector<16x4xf32> -> vector<4x16xf32>
    %cst_45 = arith.constant dense<0.000000e+00> : vector<16x16xf32>
    %250 = tpu.matmul %240, %249, %cst_45 {dimension_numbers = #tpu.dot_dimension_numbers<[1], [0], [0], [1], [0, 0, 1, 1], [], []>} : vector<16x4xf32>, vector<4x16xf32>, vector<16x16xf32> -> vector<16x16xf32>
    %251 = arith.addf %248, %250 : vector<16x16xf32>
    %252 = arith.mulf %238, %238 : vector<16x4xf32>
    %253 = arith.mulf %239, %239 : vector<16x4xf32>
    %254 = arith.addf %252, %253 : vector<16x4xf32>
    %255 = arith.mulf %240, %240 : vector<16x4xf32>
    %256 = arith.addf %254, %255 : vector<16x4xf32>
    %cst_46 = arith.constant dense<0.000000e+00> : vector<16xf32>
    %257 = vector.multi_reduction <add>, %256, %cst_46 [1] : vector<16x4xf32> to vector<16xf32>
    %258 = vector.shape_cast %257 : vector<16xf32> to vector<16x1xf32>
    %259 = arith.mulf %241, %241 : vector<16x4xf32>
    %260 = arith.mulf %242, %242 : vector<16x4xf32>
    %261 = arith.addf %259, %260 : vector<16x4xf32>
    %262 = arith.mulf %243, %243 : vector<16x4xf32>
    %263 = arith.addf %261, %262 : vector<16x4xf32>
    %264 = tpu.transpose %263, [1, 0] : vector<16x4xf32> -> vector<4x16xf32>
    %cst_47 = arith.constant dense<0.000000e+00> : vector<1x16xf32>
    %265 = tpu.matmul %118, %264, %cst_47 {dimension_numbers = #tpu.dot_dimension_numbers<[1], [0], [0], [1], [0, 0, 1, 1], [], []>} : vector<1x4xf32>, vector<4x16xf32>, vector<1x16xf32> -> vector<1x16xf32>
    %266 = vector.broadcast %258 : vector<16x1xf32> to vector<16x16xf32>
    %267 = vector.broadcast %265 : vector<1x16xf32> to vector<16x16xf32>
    %268 = arith.addf %266, %267 : vector<16x16xf32>
    %cst_48 = arith.constant 2.000000e+00 : f32
    %269 = vector.broadcast %cst_48 : f32 to vector<16x16xf32>
    %270 = arith.mulf %269, %251 : vector<16x16xf32>
    %271 = arith.subf %268, %270 : vector<16x16xf32>
    %272 = vector.extract_strided_slice %11 {offsets = [0, 16], sizes = [16, 8], strides = [1, 1]} : vector<16x32xf32> to vector<16x8xf32>
    %273 = vector.extract_strided_slice %12 {offsets = [0, 16], sizes = [16, 8], strides = [1, 1]} : vector<16x32xf32> to vector<16x8xf32>
    %274 = tpu.transpose %273, [1, 0] : vector<16x8xf32> -> vector<8x16xf32>
    %cst_49 = arith.constant dense<0.000000e+00> : vector<16x16xf32>
    %275 = tpu.matmul %272, %274, %cst_49 {dimension_numbers = #tpu.dot_dimension_numbers<[1], [0], [0], [1], [0, 0, 1, 1], [], []>} : vector<16x8xf32>, vector<8x16xf32>, vector<16x16xf32> -> vector<16x16xf32>
    %cst_50 = arith.constant 0.353553385 : f32
    %276 = vector.broadcast %cst_50 : f32 to vector<16x16xf32>
    %277 = arith.mulf %275, %276 : vector<16x16xf32>
    %278 = arith.addf %277, %4 : vector<16x16xf32>
    %cst_51 = arith.constant 5.000000e-01 : f32
    %279 = vector.broadcast %cst_51 : f32 to vector<16x16xf32>
    %280 = arith.mulf %279, %271 : vector<16x16xf32>
    %281 = arith.subf %278, %280 : vector<16x16xf32>
    %cst_52 = arith.constant dense<0xFF800000> : vector<16xf32>
    %282 = vector.multi_reduction <maximumf>, %281, %cst_52 [1] : vector<16x16xf32> to vector<16xf32>
    %283 = vector.shape_cast %282 : vector<16xf32> to vector<16x1xf32>
    %284 = vector.broadcast %283 : vector<16x1xf32> to vector<16x16xf32>
    %285 = arith.subf %281, %284 : vector<16x16xf32>
    %286 = math.exp %285 : vector<16x16xf32>
    %cst_53 = arith.constant dense<0.000000e+00> : vector<16xf32>
    %287 = vector.multi_reduction <add>, %286, %cst_53 [1] : vector<16x16xf32> to vector<16xf32>
    %288 = vector.shape_cast %287 : vector<16xf32> to vector<16x1xf32>
    %289 = tpu.reciprocal %288 {approx = true} : vector<16x1xf32> -> vector<16x1xf32>
    %290 = vector.broadcast %289 : vector<16x1xf32> to vector<16x16xf32>
    %291 = arith.mulf %286, %290 : vector<16x16xf32>
    %292 = vector.extract_strided_slice %13 {offsets = [0, 16], sizes = [16, 8], strides = [1, 1]} : vector<16x32xf32> to vector<16x8xf32>
    %cst_54 = arith.constant dense<0.000000e+00> : vector<16x8xf32>
    %293 = tpu.matmul %291, %292, %cst_54 {dimension_numbers = #tpu.dot_dimension_numbers<[1], [0], [0], [1], [0, 0, 1, 1], [], []>} : vector<16x16xf32>, vector<16x8xf32>, vector<16x8xf32> -> vector<16x8xf32>
    %294 = vector.extract_strided_slice %7 {offsets = [16, 0], sizes = [8, 32], strides = [1, 1]} : vector<32x32xf32> to vector<8x32xf32>
    %cst_55 = arith.constant dense<0.000000e+00> : vector<16x32xf32>
    %295 = tpu.matmul %293, %294, %cst_55 {dimension_numbers = #tpu.dot_dimension_numbers<[1], [0], [0], [1], [0, 0, 1, 1], [], []>} : vector<16x8xf32>, vector<8x32xf32>, vector<16x32xf32> -> vector<16x32xf32>
    %296 = arith.addf %237, %295 : vector<16x32xf32>
    %297 = vector.extract_strided_slice %61 {offsets = [0, 12], sizes = [16, 4], strides = [1, 1]} : vector<16x16xf32> to vector<16x4xf32>
    %298 = vector.extract_strided_slice %63 {offsets = [0, 12], sizes = [16, 4], strides = [1, 1]} : vector<16x16xf32> to vector<16x4xf32>
    %299 = vector.extract_strided_slice %65 {offsets = [0, 12], sizes = [16, 4], strides = [1, 1]} : vector<16x16xf32> to vector<16x4xf32>
    %300 = vector.extract_strided_slice %113 {offsets = [0, 12], sizes = [16, 4], strides = [1, 1]} : vector<16x16xf32> to vector<16x4xf32>
    %301 = vector.extract_strided_slice %115 {offsets = [0, 12], sizes = [16, 4], strides = [1, 1]} : vector<16x16xf32> to vector<16x4xf32>
    %302 = vector.extract_strided_slice %117 {offsets = [0, 12], sizes = [16, 4], strides = [1, 1]} : vector<16x16xf32> to vector<16x4xf32>
    %303 = tpu.transpose %300, [1, 0] : vector<16x4xf32> -> vector<4x16xf32>
    %cst_56 = arith.constant dense<0.000000e+00> : vector<16x16xf32>
    %304 = tpu.matmul %297, %303, %cst_56 {dimension_numbers = #tpu.dot_dimension_numbers<[1], [0], [0], [1], [0, 0, 1, 1], [], []>} : vector<16x4xf32>, vector<4x16xf32>, vector<16x16xf32> -> vector<16x16xf32>
    %305 = tpu.transpose %301, [1, 0] : vector<16x4xf32> -> vector<4x16xf32>
    %cst_57 = arith.constant dense<0.000000e+00> : vector<16x16xf32>
    %306 = tpu.matmul %298, %305, %cst_57 {dimension_numbers = #tpu.dot_dimension_numbers<[1], [0], [0], [1], [0, 0, 1, 1], [], []>} : vector<16x4xf32>, vector<4x16xf32>, vector<16x16xf32> -> vector<16x16xf32>
    %307 = arith.addf %304, %306 : vector<16x16xf32>
    %308 = tpu.transpose %302, [1, 0] : vector<16x4xf32> -> vector<4x16xf32>
    %cst_58 = arith.constant dense<0.000000e+00> : vector<16x16xf32>
    %309 = tpu.matmul %299, %308, %cst_58 {dimension_numbers = #tpu.dot_dimension_numbers<[1], [0], [0], [1], [0, 0, 1, 1], [], []>} : vector<16x4xf32>, vector<4x16xf32>, vector<16x16xf32> -> vector<16x16xf32>
    %310 = arith.addf %307, %309 : vector<16x16xf32>
    %311 = arith.mulf %297, %297 : vector<16x4xf32>
    %312 = arith.mulf %298, %298 : vector<16x4xf32>
    %313 = arith.addf %311, %312 : vector<16x4xf32>
    %314 = arith.mulf %299, %299 : vector<16x4xf32>
    %315 = arith.addf %313, %314 : vector<16x4xf32>
    %cst_59 = arith.constant dense<0.000000e+00> : vector<16xf32>
    %316 = vector.multi_reduction <add>, %315, %cst_59 [1] : vector<16x4xf32> to vector<16xf32>
    %317 = vector.shape_cast %316 : vector<16xf32> to vector<16x1xf32>
    %318 = arith.mulf %300, %300 : vector<16x4xf32>
    %319 = arith.mulf %301, %301 : vector<16x4xf32>
    %320 = arith.addf %318, %319 : vector<16x4xf32>
    %321 = arith.mulf %302, %302 : vector<16x4xf32>
    %322 = arith.addf %320, %321 : vector<16x4xf32>
    %323 = tpu.transpose %322, [1, 0] : vector<16x4xf32> -> vector<4x16xf32>
    %cst_60 = arith.constant dense<0.000000e+00> : vector<1x16xf32>
    %324 = tpu.matmul %118, %323, %cst_60 {dimension_numbers = #tpu.dot_dimension_numbers<[1], [0], [0], [1], [0, 0, 1, 1], [], []>} : vector<1x4xf32>, vector<4x16xf32>, vector<1x16xf32> -> vector<1x16xf32>
    %325 = vector.broadcast %317 : vector<16x1xf32> to vector<16x16xf32>
    %326 = vector.broadcast %324 : vector<1x16xf32> to vector<16x16xf32>
    %327 = arith.addf %325, %326 : vector<16x16xf32>
    %cst_61 = arith.constant 2.000000e+00 : f32
    %328 = vector.broadcast %cst_61 : f32 to vector<16x16xf32>
    %329 = arith.mulf %328, %310 : vector<16x16xf32>
    %330 = arith.subf %327, %329 : vector<16x16xf32>
    %331 = vector.extract_strided_slice %11 {offsets = [0, 24], sizes = [16, 8], strides = [1, 1]} : vector<16x32xf32> to vector<16x8xf32>
    %332 = vector.extract_strided_slice %12 {offsets = [0, 24], sizes = [16, 8], strides = [1, 1]} : vector<16x32xf32> to vector<16x8xf32>
    %333 = tpu.transpose %332, [1, 0] : vector<16x8xf32> -> vector<8x16xf32>
    %cst_62 = arith.constant dense<0.000000e+00> : vector<16x16xf32>
    %334 = tpu.matmul %331, %333, %cst_62 {dimension_numbers = #tpu.dot_dimension_numbers<[1], [0], [0], [1], [0, 0, 1, 1], [], []>} : vector<16x8xf32>, vector<8x16xf32>, vector<16x16xf32> -> vector<16x16xf32>
    %cst_63 = arith.constant 0.353553385 : f32
    %335 = vector.broadcast %cst_63 : f32 to vector<16x16xf32>
    %336 = arith.mulf %334, %335 : vector<16x16xf32>
    %337 = arith.addf %336, %4 : vector<16x16xf32>
    %cst_64 = arith.constant 5.000000e-01 : f32
    %338 = vector.broadcast %cst_64 : f32 to vector<16x16xf32>
    %339 = arith.mulf %338, %330 : vector<16x16xf32>
    %340 = arith.subf %337, %339 : vector<16x16xf32>
    %cst_65 = arith.constant dense<0xFF800000> : vector<16xf32>
    %341 = vector.multi_reduction <maximumf>, %340, %cst_65 [1] : vector<16x16xf32> to vector<16xf32>
    %342 = vector.shape_cast %341 : vector<16xf32> to vector<16x1xf32>
    %343 = vector.broadcast %342 : vector<16x1xf32> to vector<16x16xf32>
    %344 = arith.subf %340, %343 : vector<16x16xf32>
    %345 = math.exp %344 : vector<16x16xf32>
    %cst_66 = arith.constant dense<0.000000e+00> : vector<16xf32>
    %346 = vector.multi_reduction <add>, %345, %cst_66 [1] : vector<16x16xf32> to vector<16xf32>
    %347 = vector.shape_cast %346 : vector<16xf32> to vector<16x1xf32>
    %348 = tpu.reciprocal %347 {approx = true} : vector<16x1xf32> -> vector<16x1xf32>
    %349 = vector.broadcast %348 : vector<16x1xf32> to vector<16x16xf32>
    %350 = arith.mulf %345, %349 : vector<16x16xf32>
    %351 = vector.extract_strided_slice %13 {offsets = [0, 24], sizes = [16, 8], strides = [1, 1]} : vector<16x32xf32> to vector<16x8xf32>
    %cst_67 = arith.constant dense<0.000000e+00> : vector<16x8xf32>
    %352 = tpu.matmul %350, %351, %cst_67 {dimension_numbers = #tpu.dot_dimension_numbers<[1], [0], [0], [1], [0, 0, 1, 1], [], []>} : vector<16x16xf32>, vector<16x8xf32>, vector<16x8xf32> -> vector<16x8xf32>
    %353 = vector.extract_strided_slice %7 {offsets = [24, 0], sizes = [8, 32], strides = [1, 1]} : vector<32x32xf32> to vector<8x32xf32>
    %cst_68 = arith.constant dense<0.000000e+00> : vector<16x32xf32>
    %354 = tpu.matmul %352, %353, %cst_68 {dimension_numbers = #tpu.dot_dimension_numbers<[1], [0], [0], [1], [0, 0, 1, 1], [], []>} : vector<16x8xf32>, vector<8x32xf32>, vector<16x32xf32> -> vector<16x32xf32>
    %355 = arith.addf %296, %354 : vector<16x32xf32>
    %c0_69 = arith.constant 0 : index
    %c0_70 = arith.constant 0 : index
    %356 = vector.load %arg8[%c0_69, %c0_70] : memref<1x32xf32, #tpu.memory_space<vmem>>, vector<1x32xf32>
    %357 = vector.broadcast %356 : vector<1x32xf32> to vector<16x32xf32>
    %358 = arith.addf %355, %357 : vector<16x32xf32>
    %359 = arith.addf %358, %0 : vector<16x32xf32>
    %c0_71 = arith.constant 0 : index
    %c0_72 = arith.constant 0 : index
    %360 = vector.load %arg9[%c0_71, %c0_72] : memref<1x32xf32, #tpu.memory_space<vmem>>, vector<1x32xf32>
    %c0_73 = arith.constant 0 : index
    %c0_74 = arith.constant 0 : index
    %361 = vector.load %arg10[%c0_73, %c0_74] : memref<1x32xf32, #tpu.memory_space<vmem>>, vector<1x32xf32>
    %cst_75 = arith.constant dense<0.000000e+00> : vector<16xf32>
    %362 = vector.multi_reduction <add>, %359, %cst_75 [1] : vector<16x32xf32> to vector<16xf32>
    %363 = vector.shape_cast %362 : vector<16xf32> to vector<16x1xf32>
    %cst_76 = arith.constant 3.200000e+01 : f32
    %364 = vector.broadcast %cst_76 : f32 to vector<16x1xf32>
    %365 = arith.divf %363, %364 : vector<16x1xf32>
    %366 = vector.broadcast %365 : vector<16x1xf32> to vector<16x32xf32>
    %367 = arith.subf %359, %366 : vector<16x32xf32>
    %368 = arith.mulf %367, %367 : vector<16x32xf32>
    %cst_77 = arith.constant dense<0.000000e+00> : vector<16xf32>
    %369 = vector.multi_reduction <add>, %368, %cst_77 [1] : vector<16x32xf32> to vector<16xf32>
    %370 = vector.shape_cast %369 : vector<16xf32> to vector<16x1xf32>
    %cst_78 = arith.constant 3.200000e+01 : f32
    %371 = vector.broadcast %cst_78 : f32 to vector<16x1xf32>
    %372 = arith.divf %370, %371 : vector<16x1xf32>
    %373 = vector.broadcast %365 : vector<16x1xf32> to vector<16x32xf32>
    %374 = arith.subf %359, %373 : vector<16x32xf32>
    %cst_79 = arith.constant 9.99999974E-6 : f32
    %375 = vector.broadcast %cst_79 : f32 to vector<16x1xf32>
    %376 = arith.addf %372, %375 : vector<16x1xf32>
    %377 = math.rsqrt %376 : vector<16x1xf32>
    %378 = vector.broadcast %377 : vector<16x1xf32> to vector<16x32xf32>
    %379 = arith.mulf %374, %378 : vector<16x32xf32>
    %380 = vector.broadcast %360 : vector<1x32xf32> to vector<16x32xf32>
    %381 = arith.mulf %379, %380 : vector<16x32xf32>
    %382 = vector.broadcast %361 : vector<1x32xf32> to vector<16x32xf32>
    %383 = arith.addf %381, %382 : vector<16x32xf32>
    %c0_80 = arith.constant 0 : index
    %c0_81 = arith.constant 0 : index
    %384 = vector.load %arg11[%c0_80, %c0_81] : memref<16x32xf32, #tpu.memory_space<vmem>>, vector<16x32xf32>
    tpu.vector_store %arg11[%c0_80, %c0_81], %383 {strides = array<i32>} : memref<16x32xf32, #tpu.memory_space<vmem>>, vector<16x32xf32>,
    return
  }
}

module attributes {stable_mosaic.version = 11 : i64} {
  func.func @_transition_backbone_kernel(%arg0: memref<16x32xf32, #tpu.memory_space<vmem>>, %arg1: memref<4x32x32xf32, #tpu.memory_space<vmem>>, %arg2: memref<4x1x32xf32, #tpu.memory_space<vmem>>, %arg3: memref<4x32x32xf32, #tpu.memory_space<vmem>>, %arg4: memref<4x1x32xf32, #tpu.memory_space<vmem>>, %arg5: memref<4x1x32xf32, #tpu.memory_space<vmem>>, %arg6: memref<4x1x32xf32, #tpu.memory_space<vmem>>, %arg7: memref<32x6xf32, #tpu.memory_space<vmem>>, %arg8: memref<1x6xf32, #tpu.memory_space<vmem>>, %arg9: memref<16x38xf32, #tpu.memory_space<vmem>>) attributes {dimension_semantics = [], scalar_prefetch = 0 : i64, scratch_operands = 0 : i64, tpu.core_type = #tpu.core_type<tc>} {
    %c0 = arith.constant 0 : index
    %c0_0 = arith.constant 0 : index
    %0 = vector.load %arg0[%c0, %c0_0] : memref<16x32xf32, #tpu.memory_space<vmem>>, vector<16x32xf32>
    %c0_1 = arith.constant 0 : index
    %c0_2 = arith.constant 0 : index
    %c0_3 = arith.constant 0 : index
    %1 = vector.load %arg1[%c0_1, %c0_2, %c0_3] : memref<4x32x32xf32, #tpu.memory_space<vmem>>, vector<1x32x32xf32>
    %2 = vector.shape_cast %1 : vector<1x32x32xf32> to vector<32x32xf32>
    %c0_4 = arith.constant 0 : index
    %c0_5 = arith.constant 0 : index
    %c0_6 = arith.constant 0 : index
    %3 = vector.load %arg2[%c0_4, %c0_5, %c0_6] : memref<4x1x32xf32, #tpu.memory_space<vmem>>, vector<1x1x32xf32>
    %4 = vector.shape_cast %3 : vector<1x1x32xf32> to vector<1x32xf32>
    %c0_7 = arith.constant 0 : index
    %c0_8 = arith.constant 0 : index
    %c0_9 = arith.constant 0 : index
    %5 = vector.load %arg3[%c0_7, %c0_8, %c0_9] : memref<4x32x32xf32, #tpu.memory_space<vmem>>, vector<1x32x32xf32>
    %6 = vector.shape_cast %5 : vector<1x32x32xf32> to vector<32x32xf32>
    %c0_10 = arith.constant 0 : index
    %c0_11 = arith.constant 0 : index
    %c0_12 = arith.constant 0 : index
    %7 = vector.load %arg4[%c0_10, %c0_11, %c0_12] : memref<4x1x32xf32, #tpu.memory_space<vmem>>, vector<1x1x32xf32>
    %8 = vector.shape_cast %7 : vector<1x1x32xf32> to vector<1x32xf32>
    %c0_13 = arith.constant 0 : index
    %c0_14 = arith.constant 0 : index
    %c0_15 = arith.constant 0 : index
    %9 = vector.load %arg5[%c0_13, %c0_14, %c0_15] : memref<4x1x32xf32, #tpu.memory_space<vmem>>, vector<1x1x32xf32>
    %10 = vector.shape_cast %9 : vector<1x1x32xf32> to vector<1x32xf32>
    %c0_16 = arith.constant 0 : index
    %c0_17 = arith.constant 0 : index
    %c0_18 = arith.constant 0 : index
    %11 = vector.load %arg6[%c0_16, %c0_17, %c0_18] : memref<4x1x32xf32, #tpu.memory_space<vmem>>, vector<1x1x32xf32>
    %12 = vector.shape_cast %11 : vector<1x1x32xf32> to vector<1x32xf32>
    %cst = arith.constant dense<0.000000e+00> : vector<16x32xf32>
    %13 = tpu.matmul %0, %2, %cst {dimension_numbers = #tpu.dot_dimension_numbers<[1], [0], [0], [1], [0, 0, 1, 1], [], []>} : vector<16x32xf32>, vector<32x32xf32>, vector<16x32xf32> -> vector<16x32xf32>
    %14 = vector.broadcast %4 : vector<1x32xf32> to vector<16x32xf32>
    %15 = arith.addf %13, %14 : vector<16x32xf32>
    %cst_19 = arith.constant 0.000000e+00 : f32
    %16 = vector.broadcast %cst_19 : f32 to vector<16x32xf32>
    %17 = arith.maximumf %15, %16 : vector<16x32xf32>
    %cst_20 = arith.constant dense<0.000000e+00> : vector<16x32xf32>
    %18 = tpu.matmul %17, %6, %cst_20 {dimension_numbers = #tpu.dot_dimension_numbers<[1], [0], [0], [1], [0, 0, 1, 1], [], []>} : vector<16x32xf32>, vector<32x32xf32>, vector<16x32xf32> -> vector<16x32xf32>
    %19 = vector.broadcast %8 : vector<1x32xf32> to vector<16x32xf32>
    %20 = arith.addf %18, %19 : vector<16x32xf32>
    %21 = arith.addf %0, %20 : vector<16x32xf32>
    %cst_21 = arith.constant dense<0.000000e+00> : vector<16xf32>
    %22 = vector.multi_reduction <add>, %21, %cst_21 [1] : vector<16x32xf32> to vector<16xf32>
    %23 = vector.shape_cast %22 : vector<16xf32> to vector<16x1xf32>
    %cst_22 = arith.constant 3.200000e+01 : f32
    %24 = vector.broadcast %cst_22 : f32 to vector<16x1xf32>
    %25 = arith.divf %23, %24 : vector<16x1xf32>
    %26 = vector.broadcast %25 : vector<16x1xf32> to vector<16x32xf32>
    %27 = arith.subf %21, %26 : vector<16x32xf32>
    %28 = arith.mulf %27, %27 : vector<16x32xf32>
    %cst_23 = arith.constant dense<0.000000e+00> : vector<16xf32>
    %29 = vector.multi_reduction <add>, %28, %cst_23 [1] : vector<16x32xf32> to vector<16xf32>
    %30 = vector.shape_cast %29 : vector<16xf32> to vector<16x1xf32>
    %cst_24 = arith.constant 3.200000e+01 : f32
    %31 = vector.broadcast %cst_24 : f32 to vector<16x1xf32>
    %32 = arith.divf %30, %31 : vector<16x1xf32>
    %33 = vector.broadcast %25 : vector<16x1xf32> to vector<16x32xf32>
    %34 = arith.subf %21, %33 : vector<16x32xf32>
    %cst_25 = arith.constant 9.99999974E-6 : f32
    %35 = vector.broadcast %cst_25 : f32 to vector<16x1xf32>
    %36 = arith.addf %32, %35 : vector<16x1xf32>
    %37 = math.rsqrt %36 : vector<16x1xf32>
    %38 = vector.broadcast %37 : vector<16x1xf32> to vector<16x32xf32>
    %39 = arith.mulf %34, %38 : vector<16x32xf32>
    %40 = vector.broadcast %10 : vector<1x32xf32> to vector<16x32xf32>
    %41 = arith.mulf %39, %40 : vector<16x32xf32>
    %42 = vector.broadcast %12 : vector<1x32xf32> to vector<16x32xf32>
    %43 = arith.addf %41, %42 : vector<16x32xf32>
    %c1 = arith.constant 1 : index
    %c0_26 = arith.constant 0 : index
    %c0_27 = arith.constant 0 : index
    %44 = vector.load %arg1[%c1, %c0_26, %c0_27] : memref<4x32x32xf32, #tpu.memory_space<vmem>>, vector<1x32x32xf32>
    %45 = vector.shape_cast %44 : vector<1x32x32xf32> to vector<32x32xf32>
    %c1_28 = arith.constant 1 : index
    %c0_29 = arith.constant 0 : index
    %c0_30 = arith.constant 0 : index
    %46 = vector.load %arg2[%c1_28, %c0_29, %c0_30] : memref<4x1x32xf32, #tpu.memory_space<vmem>>, vector<1x1x32xf32>
    %47 = vector.shape_cast %46 : vector<1x1x32xf32> to vector<1x32xf32>
    %c1_31 = arith.constant 1 : index
    %c0_32 = arith.constant 0 : index
    %c0_33 = arith.constant 0 : index
    %48 = vector.load %arg3[%c1_31, %c0_32, %c0_33] : memref<4x32x32xf32, #tpu.memory_space<vmem>>, vector<1x32x32xf32>
    %49 = vector.shape_cast %48 : vector<1x32x32xf32> to vector<32x32xf32>
    %c1_34 = arith.constant 1 : index
    %c0_35 = arith.constant 0 : index
    %c0_36 = arith.constant 0 : index
    %50 = vector.load %arg4[%c1_34, %c0_35, %c0_36] : memref<4x1x32xf32, #tpu.memory_space<vmem>>, vector<1x1x32xf32>
    %51 = vector.shape_cast %50 : vector<1x1x32xf32> to vector<1x32xf32>
    %c1_37 = arith.constant 1 : index
    %c0_38 = arith.constant 0 : index
    %c0_39 = arith.constant 0 : index
    %52 = vector.load %arg5[%c1_37, %c0_38, %c0_39] : memref<4x1x32xf32, #tpu.memory_space<vmem>>, vector<1x1x32xf32>
    %53 = vector.shape_cast %52 : vector<1x1x32xf32> to vector<1x32xf32>
    %c1_40 = arith.constant 1 : index
    %c0_41 = arith.constant 0 : index
    %c0_42 = arith.constant 0 : index
    %54 = vector.load %arg6[%c1_40, %c0_41, %c0_42] : memref<4x1x32xf32, #tpu.memory_space<vmem>>, vector<1x1x32xf32>
    %55 = vector.shape_cast %54 : vector<1x1x32xf32> to vector<1x32xf32>
    %cst_43 = arith.constant dense<0.000000e+00> : vector<16x32xf32>
    %56 = tpu.matmul %43, %45, %cst_43 {dimension_numbers = #tpu.dot_dimension_numbers<[1], [0], [0], [1], [0, 0, 1, 1], [], []>} : vector<16x32xf32>, vector<32x32xf32>, vector<16x32xf32> -> vector<16x32xf32>
    %57 = vector.broadcast %47 : vector<1x32xf32> to vector<16x32xf32>
    %58 = arith.addf %56, %57 : vector<16x32xf32>
    %cst_44 = arith.constant 0.000000e+00 : f32
    %59 = vector.broadcast %cst_44 : f32 to vector<16x32xf32>
    %60 = arith.maximumf %58, %59 : vector<16x32xf32>
    %cst_45 = arith.constant dense<0.000000e+00> : vector<16x32xf32>
    %61 = tpu.matmul %60, %49, %cst_45 {dimension_numbers = #tpu.dot_dimension_numbers<[1], [0], [0], [1], [0, 0, 1, 1], [], []>} : vector<16x32xf32>, vector<32x32xf32>, vector<16x32xf32> -> vector<16x32xf32>
    %62 = vector.broadcast %51 : vector<1x32xf32> to vector<16x32xf32>
    %63 = arith.addf %61, %62 : vector<16x32xf32>
    %64 = arith.addf %43, %63 : vector<16x32xf32>
    %cst_46 = arith.constant dense<0.000000e+00> : vector<16xf32>
    %65 = vector.multi_reduction <add>, %64, %cst_46 [1] : vector<16x32xf32> to vector<16xf32>
    %66 = vector.shape_cast %65 : vector<16xf32> to vector<16x1xf32>
    %cst_47 = arith.constant 3.200000e+01 : f32
    %67 = vector.broadcast %cst_47 : f32 to vector<16x1xf32>
    %68 = arith.divf %66, %67 : vector<16x1xf32>
    %69 = vector.broadcast %68 : vector<16x1xf32> to vector<16x32xf32>
    %70 = arith.subf %64, %69 : vector<16x32xf32>
    %71 = arith.mulf %70, %70 : vector<16x32xf32>
    %cst_48 = arith.constant dense<0.000000e+00> : vector<16xf32>
    %72 = vector.multi_reduction <add>, %71, %cst_48 [1] : vector<16x32xf32> to vector<16xf32>
    %73 = vector.shape_cast %72 : vector<16xf32> to vector<16x1xf32>
    %cst_49 = arith.constant 3.200000e+01 : f32
    %74 = vector.broadcast %cst_49 : f32 to vector<16x1xf32>
    %75 = arith.divf %73, %74 : vector<16x1xf32>
    %76 = vector.broadcast %68 : vector<16x1xf32> to vector<16x32xf32>
    %77 = arith.subf %64, %76 : vector<16x32xf32>
    %cst_50 = arith.constant 9.99999974E-6 : f32
    %78 = vector.broadcast %cst_50 : f32 to vector<16x1xf32>
    %79 = arith.addf %75, %78 : vector<16x1xf32>
    %80 = math.rsqrt %79 : vector<16x1xf32>
    %81 = vector.broadcast %80 : vector<16x1xf32> to vector<16x32xf32>
    %82 = arith.mulf %77, %81 : vector<16x32xf32>
    %83 = vector.broadcast %53 : vector<1x32xf32> to vector<16x32xf32>
    %84 = arith.mulf %82, %83 : vector<16x32xf32>
    %85 = vector.broadcast %55 : vector<1x32xf32> to vector<16x32xf32>
    %86 = arith.addf %84, %85 : vector<16x32xf32>
    %c2 = arith.constant 2 : index
    %c0_51 = arith.constant 0 : index
    %c0_52 = arith.constant 0 : index
    %87 = vector.load %arg1[%c2, %c0_51, %c0_52] : memref<4x32x32xf32, #tpu.memory_space<vmem>>, vector<1x32x32xf32>
    %88 = vector.shape_cast %87 : vector<1x32x32xf32> to vector<32x32xf32>
    %c2_53 = arith.constant 2 : index
    %c0_54 = arith.constant 0 : index
    %c0_55 = arith.constant 0 : index
    %89 = vector.load %arg2[%c2_53, %c0_54, %c0_55] : memref<4x1x32xf32, #tpu.memory_space<vmem>>, vector<1x1x32xf32>
    %90 = vector.shape_cast %89 : vector<1x1x32xf32> to vector<1x32xf32>
    %c2_56 = arith.constant 2 : index
    %c0_57 = arith.constant 0 : index
    %c0_58 = arith.constant 0 : index
    %91 = vector.load %arg3[%c2_56, %c0_57, %c0_58] : memref<4x32x32xf32, #tpu.memory_space<vmem>>, vector<1x32x32xf32>
    %92 = vector.shape_cast %91 : vector<1x32x32xf32> to vector<32x32xf32>
    %c2_59 = arith.constant 2 : index
    %c0_60 = arith.constant 0 : index
    %c0_61 = arith.constant 0 : index
    %93 = vector.load %arg4[%c2_59, %c0_60, %c0_61] : memref<4x1x32xf32, #tpu.memory_space<vmem>>, vector<1x1x32xf32>
    %94 = vector.shape_cast %93 : vector<1x1x32xf32> to vector<1x32xf32>
    %c2_62 = arith.constant 2 : index
    %c0_63 = arith.constant 0 : index
    %c0_64 = arith.constant 0 : index
    %95 = vector.load %arg5[%c2_62, %c0_63, %c0_64] : memref<4x1x32xf32, #tpu.memory_space<vmem>>, vector<1x1x32xf32>
    %96 = vector.shape_cast %95 : vector<1x1x32xf32> to vector<1x32xf32>
    %c2_65 = arith.constant 2 : index
    %c0_66 = arith.constant 0 : index
    %c0_67 = arith.constant 0 : index
    %97 = vector.load %arg6[%c2_65, %c0_66, %c0_67] : memref<4x1x32xf32, #tpu.memory_space<vmem>>, vector<1x1x32xf32>
    %98 = vector.shape_cast %97 : vector<1x1x32xf32> to vector<1x32xf32>
    %cst_68 = arith.constant dense<0.000000e+00> : vector<16x32xf32>
    %99 = tpu.matmul %86, %88, %cst_68 {dimension_numbers = #tpu.dot_dimension_numbers<[1], [0], [0], [1], [0, 0, 1, 1], [], []>} : vector<16x32xf32>, vector<32x32xf32>, vector<16x32xf32> -> vector<16x32xf32>
    %100 = vector.broadcast %90 : vector<1x32xf32> to vector<16x32xf32>
    %101 = arith.addf %99, %100 : vector<16x32xf32>
    %cst_69 = arith.constant 0.000000e+00 : f32
    %102 = vector.broadcast %cst_69 : f32 to vector<16x32xf32>
    %103 = arith.maximumf %101, %102 : vector<16x32xf32>
    %cst_70 = arith.constant dense<0.000000e+00> : vector<16x32xf32>
    %104 = tpu.matmul %103, %92, %cst_70 {dimension_numbers = #tpu.dot_dimension_numbers<[1], [0], [0], [1], [0, 0, 1, 1], [], []>} : vector<16x32xf32>, vector<32x32xf32>, vector<16x32xf32> -> vector<16x32xf32>
    %105 = vector.broadcast %94 : vector<1x32xf32> to vector<16x32xf32>
    %106 = arith.addf %104, %105 : vector<16x32xf32>
    %107 = arith.addf %86, %106 : vector<16x32xf32>
    %cst_71 = arith.constant dense<0.000000e+00> : vector<16xf32>
    %108 = vector.multi_reduction <add>, %107, %cst_71 [1] : vector<16x32xf32> to vector<16xf32>
    %109 = vector.shape_cast %108 : vector<16xf32> to vector<16x1xf32>
    %cst_72 = arith.constant 3.200000e+01 : f32
    %110 = vector.broadcast %cst_72 : f32 to vector<16x1xf32>
    %111 = arith.divf %109, %110 : vector<16x1xf32>
    %112 = vector.broadcast %111 : vector<16x1xf32> to vector<16x32xf32>
    %113 = arith.subf %107, %112 : vector<16x32xf32>
    %114 = arith.mulf %113, %113 : vector<16x32xf32>
    %cst_73 = arith.constant dense<0.000000e+00> : vector<16xf32>
    %115 = vector.multi_reduction <add>, %114, %cst_73 [1] : vector<16x32xf32> to vector<16xf32>
    %116 = vector.shape_cast %115 : vector<16xf32> to vector<16x1xf32>
    %cst_74 = arith.constant 3.200000e+01 : f32
    %117 = vector.broadcast %cst_74 : f32 to vector<16x1xf32>
    %118 = arith.divf %116, %117 : vector<16x1xf32>
    %119 = vector.broadcast %111 : vector<16x1xf32> to vector<16x32xf32>
    %120 = arith.subf %107, %119 : vector<16x32xf32>
    %cst_75 = arith.constant 9.99999974E-6 : f32
    %121 = vector.broadcast %cst_75 : f32 to vector<16x1xf32>
    %122 = arith.addf %118, %121 : vector<16x1xf32>
    %123 = math.rsqrt %122 : vector<16x1xf32>
    %124 = vector.broadcast %123 : vector<16x1xf32> to vector<16x32xf32>
    %125 = arith.mulf %120, %124 : vector<16x32xf32>
    %126 = vector.broadcast %96 : vector<1x32xf32> to vector<16x32xf32>
    %127 = arith.mulf %125, %126 : vector<16x32xf32>
    %128 = vector.broadcast %98 : vector<1x32xf32> to vector<16x32xf32>
    %129 = arith.addf %127, %128 : vector<16x32xf32>
    %c3 = arith.constant 3 : index
    %c0_76 = arith.constant 0 : index
    %c0_77 = arith.constant 0 : index
    %130 = vector.load %arg1[%c3, %c0_76, %c0_77] : memref<4x32x32xf32, #tpu.memory_space<vmem>>, vector<1x32x32xf32>
    %131 = vector.shape_cast %130 : vector<1x32x32xf32> to vector<32x32xf32>
    %c3_78 = arith.constant 3 : index
    %c0_79 = arith.constant 0 : index
    %c0_80 = arith.constant 0 : index
    %132 = vector.load %arg2[%c3_78, %c0_79, %c0_80] : memref<4x1x32xf32, #tpu.memory_space<vmem>>, vector<1x1x32xf32>
    %133 = vector.shape_cast %132 : vector<1x1x32xf32> to vector<1x32xf32>
    %c3_81 = arith.constant 3 : index
    %c0_82 = arith.constant 0 : index
    %c0_83 = arith.constant 0 : index
    %134 = vector.load %arg3[%c3_81, %c0_82, %c0_83] : memref<4x32x32xf32, #tpu.memory_space<vmem>>, vector<1x32x32xf32>
    %135 = vector.shape_cast %134 : vector<1x32x32xf32> to vector<32x32xf32>
    %c3_84 = arith.constant 3 : index
    %c0_85 = arith.constant 0 : index
    %c0_86 = arith.constant 0 : index
    %136 = vector.load %arg4[%c3_84, %c0_85, %c0_86] : memref<4x1x32xf32, #tpu.memory_space<vmem>>, vector<1x1x32xf32>
    %137 = vector.shape_cast %136 : vector<1x1x32xf32> to vector<1x32xf32>
    %c3_87 = arith.constant 3 : index
    %c0_88 = arith.constant 0 : index
    %c0_89 = arith.constant 0 : index
    %138 = vector.load %arg5[%c3_87, %c0_88, %c0_89] : memref<4x1x32xf32, #tpu.memory_space<vmem>>, vector<1x1x32xf32>
    %139 = vector.shape_cast %138 : vector<1x1x32xf32> to vector<1x32xf32>
    %c3_90 = arith.constant 3 : index
    %c0_91 = arith.constant 0 : index
    %c0_92 = arith.constant 0 : index
    %140 = vector.load %arg6[%c3_90, %c0_91, %c0_92] : memref<4x1x32xf32, #tpu.memory_space<vmem>>, vector<1x1x32xf32>
    %141 = vector.shape_cast %140 : vector<1x1x32xf32> to vector<1x32xf32>
    %cst_93 = arith.constant dense<0.000000e+00> : vector<16x32xf32>
    %142 = tpu.matmul %129, %131, %cst_93 {dimension_numbers = #tpu.dot_dimension_numbers<[1], [0], [0], [1], [0, 0, 1, 1], [], []>} : vector<16x32xf32>, vector<32x32xf32>, vector<16x32xf32> -> vector<16x32xf32>
    %143 = vector.broadcast %133 : vector<1x32xf32> to vector<16x32xf32>
    %144 = arith.addf %142, %143 : vector<16x32xf32>
    %cst_94 = arith.constant 0.000000e+00 : f32
    %145 = vector.broadcast %cst_94 : f32 to vector<16x32xf32>
    %146 = arith.maximumf %144, %145 : vector<16x32xf32>
    %cst_95 = arith.constant dense<0.000000e+00> : vector<16x32xf32>
    %147 = tpu.matmul %146, %135, %cst_95 {dimension_numbers = #tpu.dot_dimension_numbers<[1], [0], [0], [1], [0, 0, 1, 1], [], []>} : vector<16x32xf32>, vector<32x32xf32>, vector<16x32xf32> -> vector<16x32xf32>
    %148 = vector.broadcast %137 : vector<1x32xf32> to vector<16x32xf32>
    %149 = arith.addf %147, %148 : vector<16x32xf32>
    %150 = arith.addf %129, %149 : vector<16x32xf32>
    %cst_96 = arith.constant dense<0.000000e+00> : vector<16xf32>
    %151 = vector.multi_reduction <add>, %150, %cst_96 [1] : vector<16x32xf32> to vector<16xf32>
    %152 = vector.shape_cast %151 : vector<16xf32> to vector<16x1xf32>
    %cst_97 = arith.constant 3.200000e+01 : f32
    %153 = vector.broadcast %cst_97 : f32 to vector<16x1xf32>
    %154 = arith.divf %152, %153 : vector<16x1xf32>
    %155 = vector.broadcast %154 : vector<16x1xf32> to vector<16x32xf32>
    %156 = arith.subf %150, %155 : vector<16x32xf32>
    %157 = arith.mulf %156, %156 : vector<16x32xf32>
    %cst_98 = arith.constant dense<0.000000e+00> : vector<16xf32>
    %158 = vector.multi_reduction <add>, %157, %cst_98 [1] : vector<16x32xf32> to vector<16xf32>
    %159 = vector.shape_cast %158 : vector<16xf32> to vector<16x1xf32>
    %cst_99 = arith.constant 3.200000e+01 : f32
    %160 = vector.broadcast %cst_99 : f32 to vector<16x1xf32>
    %161 = arith.divf %159, %160 : vector<16x1xf32>
    %162 = vector.broadcast %154 : vector<16x1xf32> to vector<16x32xf32>
    %163 = arith.subf %150, %162 : vector<16x32xf32>
    %cst_100 = arith.constant 9.99999974E-6 : f32
    %164 = vector.broadcast %cst_100 : f32 to vector<16x1xf32>
    %165 = arith.addf %161, %164 : vector<16x1xf32>
    %166 = math.rsqrt %165 : vector<16x1xf32>
    %167 = vector.broadcast %166 : vector<16x1xf32> to vector<16x32xf32>
    %168 = arith.mulf %163, %167 : vector<16x32xf32>
    %169 = vector.broadcast %139 : vector<1x32xf32> to vector<16x32xf32>
    %170 = arith.mulf %168, %169 : vector<16x32xf32>
    %171 = vector.broadcast %141 : vector<1x32xf32> to vector<16x32xf32>
    %172 = arith.addf %170, %171 : vector<16x32xf32>
    %c0_101 = arith.constant 0 : index
    %c0_102 = arith.constant 0 : index
    %173 = vector.load %arg7[%c0_101, %c0_102] : memref<32x6xf32, #tpu.memory_space<vmem>>, vector<32x6xf32>
    %cst_103 = arith.constant dense<0.000000e+00> : vector<16x6xf32>
    %174 = tpu.matmul %172, %173, %cst_103 {dimension_numbers = #tpu.dot_dimension_numbers<[1], [0], [0], [1], [0, 0, 1, 1], [], []>} : vector<16x32xf32>, vector<32x6xf32>, vector<16x6xf32> -> vector<16x6xf32>
    %c0_104 = arith.constant 0 : index
    %c0_105 = arith.constant 0 : index
    %175 = vector.load %arg8[%c0_104, %c0_105] : memref<1x6xf32, #tpu.memory_space<vmem>>, vector<1x6xf32>
    %176 = vector.broadcast %175 : vector<1x6xf32> to vector<16x6xf32>
    %177 = arith.addf %174, %176 : vector<16x6xf32>
    %c0_106 = arith.constant 0 : index
    %c0_107 = arith.constant 0 : index
    %178 = vector.load %arg9[%c0_106, %c0_107] : memref<16x38xf32, #tpu.memory_space<vmem>>, vector<16x32xf32>
    tpu.vector_store %arg9[%c0_106, %c0_107], %129 {strides = array<i32>} : memref<16x38xf32, #tpu.memory_space<vmem>>, vector<16x32xf32>,
    %c0_108 = arith.constant 0 : index
    %c32 = arith.constant 32 : index
    %179 = vector.load %arg9[%c0_108, %c32] : memref<16x38xf32, #tpu.memory_space<vmem>>, vector<16x6xf32>
    tpu.vector_store %arg9[%c0_108, %c32], %177 {strides = array<i32>} : memref<16x38xf32, #tpu.memory_space<vmem>>, vector<16x6xf32>,
    return
  }
}

module attributes {stable_mosaic.version = 11 : i64} {
  func.func @_heads_kernel(%arg0: memref<16x32xf32, #tpu.memory_space<vmem>>, %arg1: memref<9x32x32xf32, #tpu.memory_space<vmem>>, %arg2: memref<9x1x32xf32, #tpu.memory_space<vmem>>, %arg3: memref<9x32x32xf32, #tpu.memory_space<vmem>>, %arg4: memref<9x1x32xf32, #tpu.memory_space<vmem>>, %arg5: memref<9x1x32xf32, #tpu.memory_space<vmem>>, %arg6: memref<9x1x32xf32, #tpu.memory_space<vmem>>, %arg7: memref<32x206xf32, #tpu.memory_space<vmem>>, %arg8: memref<1x206xf32, #tpu.memory_space<vmem>>, %arg9: memref<32x1xf32, #tpu.memory_space<vmem>>, %arg10: memref<1x1xf32, #tpu.memory_space<vmem>>, %arg11: memref<32x1xf32, #tpu.memory_space<vmem>>, %arg12: memref<1x1xf32, #tpu.memory_space<vmem>>, %arg13: memref<16x208xf32, #tpu.memory_space<vmem>>) attributes {dimension_semantics = [], scalar_prefetch = 0 : i64, scratch_operands = 0 : i64, tpu.core_type = #tpu.core_type<tc>} {
    %c0 = arith.constant 0 : index
    %c0_0 = arith.constant 0 : index
    %0 = vector.load %arg0[%c0, %c0_0] : memref<16x32xf32, #tpu.memory_space<vmem>>, vector<16x32xf32>
    %c0_1 = arith.constant 0 : index
    %c0_2 = arith.constant 0 : index
    %c0_3 = arith.constant 0 : index
    %1 = vector.load %arg1[%c0_1, %c0_2, %c0_3] : memref<9x32x32xf32, #tpu.memory_space<vmem>>, vector<1x32x32xf32>
    %2 = vector.shape_cast %1 : vector<1x32x32xf32> to vector<32x32xf32>
    %c0_4 = arith.constant 0 : index
    %c0_5 = arith.constant 0 : index
    %c0_6 = arith.constant 0 : index
    %3 = vector.load %arg2[%c0_4, %c0_5, %c0_6] : memref<9x1x32xf32, #tpu.memory_space<vmem>>, vector<1x1x32xf32>
    %4 = vector.shape_cast %3 : vector<1x1x32xf32> to vector<1x32xf32>
    %c0_7 = arith.constant 0 : index
    %c0_8 = arith.constant 0 : index
    %c0_9 = arith.constant 0 : index
    %5 = vector.load %arg3[%c0_7, %c0_8, %c0_9] : memref<9x32x32xf32, #tpu.memory_space<vmem>>, vector<1x32x32xf32>
    %6 = vector.shape_cast %5 : vector<1x32x32xf32> to vector<32x32xf32>
    %c0_10 = arith.constant 0 : index
    %c0_11 = arith.constant 0 : index
    %c0_12 = arith.constant 0 : index
    %7 = vector.load %arg4[%c0_10, %c0_11, %c0_12] : memref<9x1x32xf32, #tpu.memory_space<vmem>>, vector<1x1x32xf32>
    %8 = vector.shape_cast %7 : vector<1x1x32xf32> to vector<1x32xf32>
    %c0_13 = arith.constant 0 : index
    %c0_14 = arith.constant 0 : index
    %c0_15 = arith.constant 0 : index
    %9 = vector.load %arg5[%c0_13, %c0_14, %c0_15] : memref<9x1x32xf32, #tpu.memory_space<vmem>>, vector<1x1x32xf32>
    %10 = vector.shape_cast %9 : vector<1x1x32xf32> to vector<1x32xf32>
    %c0_16 = arith.constant 0 : index
    %c0_17 = arith.constant 0 : index
    %c0_18 = arith.constant 0 : index
    %11 = vector.load %arg6[%c0_16, %c0_17, %c0_18] : memref<9x1x32xf32, #tpu.memory_space<vmem>>, vector<1x1x32xf32>
    %12 = vector.shape_cast %11 : vector<1x1x32xf32> to vector<1x32xf32>
    %cst = arith.constant dense<0.000000e+00> : vector<16x32xf32>
    %13 = tpu.matmul %0, %2, %cst {dimension_numbers = #tpu.dot_dimension_numbers<[1], [0], [0], [1], [0, 0, 1, 1], [], []>} : vector<16x32xf32>, vector<32x32xf32>, vector<16x32xf32> -> vector<16x32xf32>
    %14 = vector.broadcast %4 : vector<1x32xf32> to vector<16x32xf32>
    %15 = arith.addf %13, %14 : vector<16x32xf32>
    %cst_19 = arith.constant 0.000000e+00 : f32
    %16 = vector.broadcast %cst_19 : f32 to vector<16x32xf32>
    %17 = arith.maximumf %15, %16 : vector<16x32xf32>
    %cst_20 = arith.constant dense<0.000000e+00> : vector<16x32xf32>
    %18 = tpu.matmul %17, %6, %cst_20 {dimension_numbers = #tpu.dot_dimension_numbers<[1], [0], [0], [1], [0, 0, 1, 1], [], []>} : vector<16x32xf32>, vector<32x32xf32>, vector<16x32xf32> -> vector<16x32xf32>
    %19 = vector.broadcast %8 : vector<1x32xf32> to vector<16x32xf32>
    %20 = arith.addf %18, %19 : vector<16x32xf32>
    %21 = arith.addf %0, %20 : vector<16x32xf32>
    %cst_21 = arith.constant dense<0.000000e+00> : vector<16xf32>
    %22 = vector.multi_reduction <add>, %21, %cst_21 [1] : vector<16x32xf32> to vector<16xf32>
    %23 = vector.shape_cast %22 : vector<16xf32> to vector<16x1xf32>
    %cst_22 = arith.constant 3.200000e+01 : f32
    %24 = vector.broadcast %cst_22 : f32 to vector<16x1xf32>
    %25 = arith.divf %23, %24 : vector<16x1xf32>
    %26 = vector.broadcast %25 : vector<16x1xf32> to vector<16x32xf32>
    %27 = arith.subf %21, %26 : vector<16x32xf32>
    %28 = arith.mulf %27, %27 : vector<16x32xf32>
    %cst_23 = arith.constant dense<0.000000e+00> : vector<16xf32>
    %29 = vector.multi_reduction <add>, %28, %cst_23 [1] : vector<16x32xf32> to vector<16xf32>
    %30 = vector.shape_cast %29 : vector<16xf32> to vector<16x1xf32>
    %cst_24 = arith.constant 3.200000e+01 : f32
    %31 = vector.broadcast %cst_24 : f32 to vector<16x1xf32>
    %32 = arith.divf %30, %31 : vector<16x1xf32>
    %33 = vector.broadcast %25 : vector<16x1xf32> to vector<16x32xf32>
    %34 = arith.subf %21, %33 : vector<16x32xf32>
    %cst_25 = arith.constant 9.99999974E-6 : f32
    %35 = vector.broadcast %cst_25 : f32 to vector<16x1xf32>
    %36 = arith.addf %32, %35 : vector<16x1xf32>
    %37 = math.rsqrt %36 : vector<16x1xf32>
    %38 = vector.broadcast %37 : vector<16x1xf32> to vector<16x32xf32>
    %39 = arith.mulf %34, %38 : vector<16x32xf32>
    %40 = vector.broadcast %10 : vector<1x32xf32> to vector<16x32xf32>
    %41 = arith.mulf %39, %40 : vector<16x32xf32>
    %42 = vector.broadcast %12 : vector<1x32xf32> to vector<16x32xf32>
    %43 = arith.addf %41, %42 : vector<16x32xf32>
    %c1 = arith.constant 1 : index
    %c0_26 = arith.constant 0 : index
    %c0_27 = arith.constant 0 : index
    %44 = vector.load %arg1[%c1, %c0_26, %c0_27] : memref<9x32x32xf32, #tpu.memory_space<vmem>>, vector<1x32x32xf32>
    %45 = vector.shape_cast %44 : vector<1x32x32xf32> to vector<32x32xf32>
    %c1_28 = arith.constant 1 : index
    %c0_29 = arith.constant 0 : index
    %c0_30 = arith.constant 0 : index
    %46 = vector.load %arg2[%c1_28, %c0_29, %c0_30] : memref<9x1x32xf32, #tpu.memory_space<vmem>>, vector<1x1x32xf32>
    %47 = vector.shape_cast %46 : vector<1x1x32xf32> to vector<1x32xf32>
    %c1_31 = arith.constant 1 : index
    %c0_32 = arith.constant 0 : index
    %c0_33 = arith.constant 0 : index
    %48 = vector.load %arg3[%c1_31, %c0_32, %c0_33] : memref<9x32x32xf32, #tpu.memory_space<vmem>>, vector<1x32x32xf32>
    %49 = vector.shape_cast %48 : vector<1x32x32xf32> to vector<32x32xf32>
    %c1_34 = arith.constant 1 : index
    %c0_35 = arith.constant 0 : index
    %c0_36 = arith.constant 0 : index
    %50 = vector.load %arg4[%c1_34, %c0_35, %c0_36] : memref<9x1x32xf32, #tpu.memory_space<vmem>>, vector<1x1x32xf32>
    %51 = vector.shape_cast %50 : vector<1x1x32xf32> to vector<1x32xf32>
    %c1_37 = arith.constant 1 : index
    %c0_38 = arith.constant 0 : index
    %c0_39 = arith.constant 0 : index
    %52 = vector.load %arg5[%c1_37, %c0_38, %c0_39] : memref<9x1x32xf32, #tpu.memory_space<vmem>>, vector<1x1x32xf32>
    %53 = vector.shape_cast %52 : vector<1x1x32xf32> to vector<1x32xf32>
    %c1_40 = arith.constant 1 : index
    %c0_41 = arith.constant 0 : index
    %c0_42 = arith.constant 0 : index
    %54 = vector.load %arg6[%c1_40, %c0_41, %c0_42] : memref<9x1x32xf32, #tpu.memory_space<vmem>>, vector<1x1x32xf32>
    %55 = vector.shape_cast %54 : vector<1x1x32xf32> to vector<1x32xf32>
    %cst_43 = arith.constant dense<0.000000e+00> : vector<16x32xf32>
    %56 = tpu.matmul %43, %45, %cst_43 {dimension_numbers = #tpu.dot_dimension_numbers<[1], [0], [0], [1], [0, 0, 1, 1], [], []>} : vector<16x32xf32>, vector<32x32xf32>, vector<16x32xf32> -> vector<16x32xf32>
    %57 = vector.broadcast %47 : vector<1x32xf32> to vector<16x32xf32>
    %58 = arith.addf %56, %57 : vector<16x32xf32>
    %cst_44 = arith.constant 0.000000e+00 : f32
    %59 = vector.broadcast %cst_44 : f32 to vector<16x32xf32>
    %60 = arith.maximumf %58, %59 : vector<16x32xf32>
    %cst_45 = arith.constant dense<0.000000e+00> : vector<16x32xf32>
    %61 = tpu.matmul %60, %49, %cst_45 {dimension_numbers = #tpu.dot_dimension_numbers<[1], [0], [0], [1], [0, 0, 1, 1], [], []>} : vector<16x32xf32>, vector<32x32xf32>, vector<16x32xf32> -> vector<16x32xf32>
    %62 = vector.broadcast %51 : vector<1x32xf32> to vector<16x32xf32>
    %63 = arith.addf %61, %62 : vector<16x32xf32>
    %64 = arith.addf %43, %63 : vector<16x32xf32>
    %cst_46 = arith.constant dense<0.000000e+00> : vector<16xf32>
    %65 = vector.multi_reduction <add>, %64, %cst_46 [1] : vector<16x32xf32> to vector<16xf32>
    %66 = vector.shape_cast %65 : vector<16xf32> to vector<16x1xf32>
    %cst_47 = arith.constant 3.200000e+01 : f32
    %67 = vector.broadcast %cst_47 : f32 to vector<16x1xf32>
    %68 = arith.divf %66, %67 : vector<16x1xf32>
    %69 = vector.broadcast %68 : vector<16x1xf32> to vector<16x32xf32>
    %70 = arith.subf %64, %69 : vector<16x32xf32>
    %71 = arith.mulf %70, %70 : vector<16x32xf32>
    %cst_48 = arith.constant dense<0.000000e+00> : vector<16xf32>
    %72 = vector.multi_reduction <add>, %71, %cst_48 [1] : vector<16x32xf32> to vector<16xf32>
    %73 = vector.shape_cast %72 : vector<16xf32> to vector<16x1xf32>
    %cst_49 = arith.constant 3.200000e+01 : f32
    %74 = vector.broadcast %cst_49 : f32 to vector<16x1xf32>
    %75 = arith.divf %73, %74 : vector<16x1xf32>
    %76 = vector.broadcast %68 : vector<16x1xf32> to vector<16x32xf32>
    %77 = arith.subf %64, %76 : vector<16x32xf32>
    %cst_50 = arith.constant 9.99999974E-6 : f32
    %78 = vector.broadcast %cst_50 : f32 to vector<16x1xf32>
    %79 = arith.addf %75, %78 : vector<16x1xf32>
    %80 = math.rsqrt %79 : vector<16x1xf32>
    %81 = vector.broadcast %80 : vector<16x1xf32> to vector<16x32xf32>
    %82 = arith.mulf %77, %81 : vector<16x32xf32>
    %83 = vector.broadcast %53 : vector<1x32xf32> to vector<16x32xf32>
    %84 = arith.mulf %82, %83 : vector<16x32xf32>
    %85 = vector.broadcast %55 : vector<1x32xf32> to vector<16x32xf32>
    %86 = arith.addf %84, %85 : vector<16x32xf32>
    %c2 = arith.constant 2 : index
    %c0_51 = arith.constant 0 : index
    %c0_52 = arith.constant 0 : index
    %87 = vector.load %arg1[%c2, %c0_51, %c0_52] : memref<9x32x32xf32, #tpu.memory_space<vmem>>, vector<1x32x32xf32>
    %88 = vector.shape_cast %87 : vector<1x32x32xf32> to vector<32x32xf32>
    %c2_53 = arith.constant 2 : index
    %c0_54 = arith.constant 0 : index
    %c0_55 = arith.constant 0 : index
    %89 = vector.load %arg2[%c2_53, %c0_54, %c0_55] : memref<9x1x32xf32, #tpu.memory_space<vmem>>, vector<1x1x32xf32>
    %90 = vector.shape_cast %89 : vector<1x1x32xf32> to vector<1x32xf32>
    %c2_56 = arith.constant 2 : index
    %c0_57 = arith.constant 0 : index
    %c0_58 = arith.constant 0 : index
    %91 = vector.load %arg3[%c2_56, %c0_57, %c0_58] : memref<9x32x32xf32, #tpu.memory_space<vmem>>, vector<1x32x32xf32>
    %92 = vector.shape_cast %91 : vector<1x32x32xf32> to vector<32x32xf32>
    %c2_59 = arith.constant 2 : index
    %c0_60 = arith.constant 0 : index
    %c0_61 = arith.constant 0 : index
    %93 = vector.load %arg4[%c2_59, %c0_60, %c0_61] : memref<9x1x32xf32, #tpu.memory_space<vmem>>, vector<1x1x32xf32>
    %94 = vector.shape_cast %93 : vector<1x1x32xf32> to vector<1x32xf32>
    %c2_62 = arith.constant 2 : index
    %c0_63 = arith.constant 0 : index
    %c0_64 = arith.constant 0 : index
    %95 = vector.load %arg5[%c2_62, %c0_63, %c0_64] : memref<9x1x32xf32, #tpu.memory_space<vmem>>, vector<1x1x32xf32>
    %96 = vector.shape_cast %95 : vector<1x1x32xf32> to vector<1x32xf32>
    %c2_65 = arith.constant 2 : index
    %c0_66 = arith.constant 0 : index
    %c0_67 = arith.constant 0 : index
    %97 = vector.load %arg6[%c2_65, %c0_66, %c0_67] : memref<9x1x32xf32, #tpu.memory_space<vmem>>, vector<1x1x32xf32>
    %98 = vector.shape_cast %97 : vector<1x1x32xf32> to vector<1x32xf32>
    %cst_68 = arith.constant dense<0.000000e+00> : vector<16x32xf32>
    %99 = tpu.matmul %86, %88, %cst_68 {dimension_numbers = #tpu.dot_dimension_numbers<[1], [0], [0], [1], [0, 0, 1, 1], [], []>} : vector<16x32xf32>, vector<32x32xf32>, vector<16x32xf32> -> vector<16x32xf32>
    %100 = vector.broadcast %90 : vector<1x32xf32> to vector<16x32xf32>
    %101 = arith.addf %99, %100 : vector<16x32xf32>
    %cst_69 = arith.constant 0.000000e+00 : f32
    %102 = vector.broadcast %cst_69 : f32 to vector<16x32xf32>
    %103 = arith.maximumf %101, %102 : vector<16x32xf32>
    %cst_70 = arith.constant dense<0.000000e+00> : vector<16x32xf32>
    %104 = tpu.matmul %103, %92, %cst_70 {dimension_numbers = #tpu.dot_dimension_numbers<[1], [0], [0], [1], [0, 0, 1, 1], [], []>} : vector<16x32xf32>, vector<32x32xf32>, vector<16x32xf32> -> vector<16x32xf32>
    %105 = vector.broadcast %94 : vector<1x32xf32> to vector<16x32xf32>
    %106 = arith.addf %104, %105 : vector<16x32xf32>
    %107 = arith.addf %86, %106 : vector<16x32xf32>
    %cst_71 = arith.constant dense<0.000000e+00> : vector<16xf32>
    %108 = vector.multi_reduction <add>, %107, %cst_71 [1] : vector<16x32xf32> to vector<16xf32>
    %109 = vector.shape_cast %108 : vector<16xf32> to vector<16x1xf32>
    %cst_72 = arith.constant 3.200000e+01 : f32
    %110 = vector.broadcast %cst_72 : f32 to vector<16x1xf32>
    %111 = arith.divf %109, %110 : vector<16x1xf32>
    %112 = vector.broadcast %111 : vector<16x1xf32> to vector<16x32xf32>
    %113 = arith.subf %107, %112 : vector<16x32xf32>
    %114 = arith.mulf %113, %113 : vector<16x32xf32>
    %cst_73 = arith.constant dense<0.000000e+00> : vector<16xf32>
    %115 = vector.multi_reduction <add>, %114, %cst_73 [1] : vector<16x32xf32> to vector<16xf32>
    %116 = vector.shape_cast %115 : vector<16xf32> to vector<16x1xf32>
    %cst_74 = arith.constant 3.200000e+01 : f32
    %117 = vector.broadcast %cst_74 : f32 to vector<16x1xf32>
    %118 = arith.divf %116, %117 : vector<16x1xf32>
    %119 = vector.broadcast %111 : vector<16x1xf32> to vector<16x32xf32>
    %120 = arith.subf %107, %119 : vector<16x32xf32>
    %cst_75 = arith.constant 9.99999974E-6 : f32
    %121 = vector.broadcast %cst_75 : f32 to vector<16x1xf32>
    %122 = arith.addf %118, %121 : vector<16x1xf32>
    %123 = math.rsqrt %122 : vector<16x1xf32>
    %124 = vector.broadcast %123 : vector<16x1xf32> to vector<16x32xf32>
    %125 = arith.mulf %120, %124 : vector<16x32xf32>
    %126 = vector.broadcast %96 : vector<1x32xf32> to vector<16x32xf32>
    %127 = arith.mulf %125, %126 : vector<16x32xf32>
    %128 = vector.broadcast %98 : vector<1x32xf32> to vector<16x32xf32>
    %129 = arith.addf %127, %128 : vector<16x32xf32>
    %c3 = arith.constant 3 : index
    %c0_76 = arith.constant 0 : index
    %c0_77 = arith.constant 0 : index
    %130 = vector.load %arg1[%c3, %c0_76, %c0_77] : memref<9x32x32xf32, #tpu.memory_space<vmem>>, vector<1x32x32xf32>
    %131 = vector.shape_cast %130 : vector<1x32x32xf32> to vector<32x32xf32>
    %c3_78 = arith.constant 3 : index
    %c0_79 = arith.constant 0 : index
    %c0_80 = arith.constant 0 : index
    %132 = vector.load %arg2[%c3_78, %c0_79, %c0_80] : memref<9x1x32xf32, #tpu.memory_space<vmem>>, vector<1x1x32xf32>
    %133 = vector.shape_cast %132 : vector<1x1x32xf32> to vector<1x32xf32>
    %c3_81 = arith.constant 3 : index
    %c0_82 = arith.constant 0 : index
    %c0_83 = arith.constant 0 : index
    %134 = vector.load %arg3[%c3_81, %c0_82, %c0_83] : memref<9x32x32xf32, #tpu.memory_space<vmem>>, vector<1x32x32xf32>
    %135 = vector.shape_cast %134 : vector<1x32x32xf32> to vector<32x32xf32>
    %c3_84 = arith.constant 3 : index
    %c0_85 = arith.constant 0 : index
    %c0_86 = arith.constant 0 : index
    %136 = vector.load %arg4[%c3_84, %c0_85, %c0_86] : memref<9x1x32xf32, #tpu.memory_space<vmem>>, vector<1x1x32xf32>
    %137 = vector.shape_cast %136 : vector<1x1x32xf32> to vector<1x32xf32>
    %c3_87 = arith.constant 3 : index
    %c0_88 = arith.constant 0 : index
    %c0_89 = arith.constant 0 : index
    %138 = vector.load %arg5[%c3_87, %c0_88, %c0_89] : memref<9x1x32xf32, #tpu.memory_space<vmem>>, vector<1x1x32xf32>
    %139 = vector.shape_cast %138 : vector<1x1x32xf32> to vector<1x32xf32>
    %c3_90 = arith.constant 3 : index
    %c0_91 = arith.constant 0 : index
    %c0_92 = arith.constant 0 : index
    %140 = vector.load %arg6[%c3_90, %c0_91, %c0_92] : memref<9x1x32xf32, #tpu.memory_space<vmem>>, vector<1x1x32xf32>
    %141 = vector.shape_cast %140 : vector<1x1x32xf32> to vector<1x32xf32>
    %cst_93 = arith.constant dense<0.000000e+00> : vector<16x32xf32>
    %142 = tpu.matmul %0, %131, %cst_93 {dimension_numbers = #tpu.dot_dimension_numbers<[1], [0], [0], [1], [0, 0, 1, 1], [], []>} : vector<16x32xf32>, vector<32x32xf32>, vector<16x32xf32> -> vector<16x32xf32>
    %143 = vector.broadcast %133 : vector<1x32xf32> to vector<16x32xf32>
    %144 = arith.addf %142, %143 : vector<16x32xf32>
    %cst_94 = arith.constant 0.000000e+00 : f32
    %145 = vector.broadcast %cst_94 : f32 to vector<16x32xf32>
    %146 = arith.maximumf %144, %145 : vector<16x32xf32>
    %cst_95 = arith.constant dense<0.000000e+00> : vector<16x32xf32>
    %147 = tpu.matmul %146, %135, %cst_95 {dimension_numbers = #tpu.dot_dimension_numbers<[1], [0], [0], [1], [0, 0, 1, 1], [], []>} : vector<16x32xf32>, vector<32x32xf32>, vector<16x32xf32> -> vector<16x32xf32>
    %148 = vector.broadcast %137 : vector<1x32xf32> to vector<16x32xf32>
    %149 = arith.addf %147, %148 : vector<16x32xf32>
    %150 = arith.addf %0, %149 : vector<16x32xf32>
    %cst_96 = arith.constant dense<0.000000e+00> : vector<16xf32>
    %151 = vector.multi_reduction <add>, %150, %cst_96 [1] : vector<16x32xf32> to vector<16xf32>
    %152 = vector.shape_cast %151 : vector<16xf32> to vector<16x1xf32>
    %cst_97 = arith.constant 3.200000e+01 : f32
    %153 = vector.broadcast %cst_97 : f32 to vector<16x1xf32>
    %154 = arith.divf %152, %153 : vector<16x1xf32>
    %155 = vector.broadcast %154 : vector<16x1xf32> to vector<16x32xf32>
    %156 = arith.subf %150, %155 : vector<16x32xf32>
    %157 = arith.mulf %156, %156 : vector<16x32xf32>
    %cst_98 = arith.constant dense<0.000000e+00> : vector<16xf32>
    %158 = vector.multi_reduction <add>, %157, %cst_98 [1] : vector<16x32xf32> to vector<16xf32>
    %159 = vector.shape_cast %158 : vector<16xf32> to vector<16x1xf32>
    %cst_99 = arith.constant 3.200000e+01 : f32
    %160 = vector.broadcast %cst_99 : f32 to vector<16x1xf32>
    %161 = arith.divf %159, %160 : vector<16x1xf32>
    %162 = vector.broadcast %154 : vector<16x1xf32> to vector<16x32xf32>
    %163 = arith.subf %150, %162 : vector<16x32xf32>
    %cst_100 = arith.constant 9.99999974E-6 : f32
    %164 = vector.broadcast %cst_100 : f32 to vector<16x1xf32>
    %165 = arith.addf %161, %164 : vector<16x1xf32>
    %166 = math.rsqrt %165 : vector<16x1xf32>
    %167 = vector.broadcast %166 : vector<16x1xf32> to vector<16x32xf32>
    %168 = arith.mulf %163, %167 : vector<16x32xf32>
    %169 = vector.broadcast %139 : vector<1x32xf32> to vector<16x32xf32>
    %170 = arith.mulf %168, %169 : vector<16x32xf32>
    %171 = vector.broadcast %141 : vector<1x32xf32> to vector<16x32xf32>
    %172 = arith.addf %170, %171 : vector<16x32xf32>
    %c4 = arith.constant 4 : index
    %c0_101 = arith.constant 0 : index
    %c0_102 = arith.constant 0 : index
    %173 = vector.load %arg1[%c4, %c0_101, %c0_102] : memref<9x32x32xf32, #tpu.memory_space<vmem>>, vector<1x32x32xf32>
    %174 = vector.shape_cast %173 : vector<1x32x32xf32> to vector<32x32xf32>
    %c4_103 = arith.constant 4 : index
    %c0_104 = arith.constant 0 : index
    %c0_105 = arith.constant 0 : index
    %175 = vector.load %arg2[%c4_103, %c0_104, %c0_105] : memref<9x1x32xf32, #tpu.memory_space<vmem>>, vector<1x1x32xf32>
    %176 = vector.shape_cast %175 : vector<1x1x32xf32> to vector<1x32xf32>
    %c4_106 = arith.constant 4 : index
    %c0_107 = arith.constant 0 : index
    %c0_108 = arith.constant 0 : index
    %177 = vector.load %arg3[%c4_106, %c0_107, %c0_108] : memref<9x32x32xf32, #tpu.memory_space<vmem>>, vector<1x32x32xf32>
    %178 = vector.shape_cast %177 : vector<1x32x32xf32> to vector<32x32xf32>
    %c4_109 = arith.constant 4 : index
    %c0_110 = arith.constant 0 : index
    %c0_111 = arith.constant 0 : index
    %179 = vector.load %arg4[%c4_109, %c0_110, %c0_111] : memref<9x1x32xf32, #tpu.memory_space<vmem>>, vector<1x1x32xf32>
    %180 = vector.shape_cast %179 : vector<1x1x32xf32> to vector<1x32xf32>
    %c4_112 = arith.constant 4 : index
    %c0_113 = arith.constant 0 : index
    %c0_114 = arith.constant 0 : index
    %181 = vector.load %arg5[%c4_112, %c0_113, %c0_114] : memref<9x1x32xf32, #tpu.memory_space<vmem>>, vector<1x1x32xf32>
    %182 = vector.shape_cast %181 : vector<1x1x32xf32> to vector<1x32xf32>
    %c4_115 = arith.constant 4 : index
    %c0_116 = arith.constant 0 : index
    %c0_117 = arith.constant 0 : index
    %183 = vector.load %arg6[%c4_115, %c0_116, %c0_117] : memref<9x1x32xf32, #tpu.memory_space<vmem>>, vector<1x1x32xf32>
    %184 = vector.shape_cast %183 : vector<1x1x32xf32> to vector<1x32xf32>
    %cst_118 = arith.constant dense<0.000000e+00> : vector<16x32xf32>
    %185 = tpu.matmul %172, %174, %cst_118 {dimension_numbers = #tpu.dot_dimension_numbers<[1], [0], [0], [1], [0, 0, 1, 1], [], []>} : vector<16x32xf32>, vector<32x32xf32>, vector<16x32xf32> -> vector<16x32xf32>
    %186 = vector.broadcast %176 : vector<1x32xf32> to vector<16x32xf32>
    %187 = arith.addf %185, %186 : vector<16x32xf32>
    %cst_119 = arith.constant 0.000000e+00 : f32
    %188 = vector.broadcast %cst_119 : f32 to vector<16x32xf32>
    %189 = arith.maximumf %187, %188 : vector<16x32xf32>
    %cst_120 = arith.constant dense<0.000000e+00> : vector<16x32xf32>
    %190 = tpu.matmul %189, %178, %cst_120 {dimension_numbers = #tpu.dot_dimension_numbers<[1], [0], [0], [1], [0, 0, 1, 1], [], []>} : vector<16x32xf32>, vector<32x32xf32>, vector<16x32xf32> -> vector<16x32xf32>
    %191 = vector.broadcast %180 : vector<1x32xf32> to vector<16x32xf32>
    %192 = arith.addf %190, %191 : vector<16x32xf32>
    %193 = arith.addf %172, %192 : vector<16x32xf32>
    %cst_121 = arith.constant dense<0.000000e+00> : vector<16xf32>
    %194 = vector.multi_reduction <add>, %193, %cst_121 [1] : vector<16x32xf32> to vector<16xf32>
    %195 = vector.shape_cast %194 : vector<16xf32> to vector<16x1xf32>
    %cst_122 = arith.constant 3.200000e+01 : f32
    %196 = vector.broadcast %cst_122 : f32 to vector<16x1xf32>
    %197 = arith.divf %195, %196 : vector<16x1xf32>
    %198 = vector.broadcast %197 : vector<16x1xf32> to vector<16x32xf32>
    %199 = arith.subf %193, %198 : vector<16x32xf32>
    %200 = arith.mulf %199, %199 : vector<16x32xf32>
    %cst_123 = arith.constant dense<0.000000e+00> : vector<16xf32>
    %201 = vector.multi_reduction <add>, %200, %cst_123 [1] : vector<16x32xf32> to vector<16xf32>
    %202 = vector.shape_cast %201 : vector<16xf32> to vector<16x1xf32>
    %cst_124 = arith.constant 3.200000e+01 : f32
    %203 = vector.broadcast %cst_124 : f32 to vector<16x1xf32>
    %204 = arith.divf %202, %203 : vector<16x1xf32>
    %205 = vector.broadcast %197 : vector<16x1xf32> to vector<16x32xf32>
    %206 = arith.subf %193, %205 : vector<16x32xf32>
    %cst_125 = arith.constant 9.99999974E-6 : f32
    %207 = vector.broadcast %cst_125 : f32 to vector<16x1xf32>
    %208 = arith.addf %204, %207 : vector<16x1xf32>
    %209 = math.rsqrt %208 : vector<16x1xf32>
    %210 = vector.broadcast %209 : vector<16x1xf32> to vector<16x32xf32>
    %211 = arith.mulf %206, %210 : vector<16x32xf32>
    %212 = vector.broadcast %182 : vector<1x32xf32> to vector<16x32xf32>
    %213 = arith.mulf %211, %212 : vector<16x32xf32>
    %214 = vector.broadcast %184 : vector<1x32xf32> to vector<16x32xf32>
    %215 = arith.addf %213, %214 : vector<16x32xf32>
    %c5 = arith.constant 5 : index
    %c0_126 = arith.constant 0 : index
    %c0_127 = arith.constant 0 : index
    %216 = vector.load %arg1[%c5, %c0_126, %c0_127] : memref<9x32x32xf32, #tpu.memory_space<vmem>>, vector<1x32x32xf32>
    %217 = vector.shape_cast %216 : vector<1x32x32xf32> to vector<32x32xf32>
    %c5_128 = arith.constant 5 : index
    %c0_129 = arith.constant 0 : index
    %c0_130 = arith.constant 0 : index
    %218 = vector.load %arg2[%c5_128, %c0_129, %c0_130] : memref<9x1x32xf32, #tpu.memory_space<vmem>>, vector<1x1x32xf32>
    %219 = vector.shape_cast %218 : vector<1x1x32xf32> to vector<1x32xf32>
    %c5_131 = arith.constant 5 : index
    %c0_132 = arith.constant 0 : index
    %c0_133 = arith.constant 0 : index
    %220 = vector.load %arg3[%c5_131, %c0_132, %c0_133] : memref<9x32x32xf32, #tpu.memory_space<vmem>>, vector<1x32x32xf32>
    %221 = vector.shape_cast %220 : vector<1x32x32xf32> to vector<32x32xf32>
    %c5_134 = arith.constant 5 : index
    %c0_135 = arith.constant 0 : index
    %c0_136 = arith.constant 0 : index
    %222 = vector.load %arg4[%c5_134, %c0_135, %c0_136] : memref<9x1x32xf32, #tpu.memory_space<vmem>>, vector<1x1x32xf32>
    %223 = vector.shape_cast %222 : vector<1x1x32xf32> to vector<1x32xf32>
    %c5_137 = arith.constant 5 : index
    %c0_138 = arith.constant 0 : index
    %c0_139 = arith.constant 0 : index
    %224 = vector.load %arg5[%c5_137, %c0_138, %c0_139] : memref<9x1x32xf32, #tpu.memory_space<vmem>>, vector<1x1x32xf32>
    %225 = vector.shape_cast %224 : vector<1x1x32xf32> to vector<1x32xf32>
    %c5_140 = arith.constant 5 : index
    %c0_141 = arith.constant 0 : index
    %c0_142 = arith.constant 0 : index
    %226 = vector.load %arg6[%c5_140, %c0_141, %c0_142] : memref<9x1x32xf32, #tpu.memory_space<vmem>>, vector<1x1x32xf32>
    %227 = vector.shape_cast %226 : vector<1x1x32xf32> to vector<1x32xf32>
    %cst_143 = arith.constant dense<0.000000e+00> : vector<16x32xf32>
    %228 = tpu.matmul %215, %217, %cst_143 {dimension_numbers = #tpu.dot_dimension_numbers<[1], [0], [0], [1], [0, 0, 1, 1], [], []>} : vector<16x32xf32>, vector<32x32xf32>, vector<16x32xf32> -> vector<16x32xf32>
    %229 = vector.broadcast %219 : vector<1x32xf32> to vector<16x32xf32>
    %230 = arith.addf %228, %229 : vector<16x32xf32>
    %cst_144 = arith.constant 0.000000e+00 : f32
    %231 = vector.broadcast %cst_144 : f32 to vector<16x32xf32>
    %232 = arith.maximumf %230, %231 : vector<16x32xf32>
    %cst_145 = arith.constant dense<0.000000e+00> : vector<16x32xf32>
    %233 = tpu.matmul %232, %221, %cst_145 {dimension_numbers = #tpu.dot_dimension_numbers<[1], [0], [0], [1], [0, 0, 1, 1], [], []>} : vector<16x32xf32>, vector<32x32xf32>, vector<16x32xf32> -> vector<16x32xf32>
    %234 = vector.broadcast %223 : vector<1x32xf32> to vector<16x32xf32>
    %235 = arith.addf %233, %234 : vector<16x32xf32>
    %236 = arith.addf %215, %235 : vector<16x32xf32>
    %cst_146 = arith.constant dense<0.000000e+00> : vector<16xf32>
    %237 = vector.multi_reduction <add>, %236, %cst_146 [1] : vector<16x32xf32> to vector<16xf32>
    %238 = vector.shape_cast %237 : vector<16xf32> to vector<16x1xf32>
    %cst_147 = arith.constant 3.200000e+01 : f32
    %239 = vector.broadcast %cst_147 : f32 to vector<16x1xf32>
    %240 = arith.divf %238, %239 : vector<16x1xf32>
    %241 = vector.broadcast %240 : vector<16x1xf32> to vector<16x32xf32>
    %242 = arith.subf %236, %241 : vector<16x32xf32>
    %243 = arith.mulf %242, %242 : vector<16x32xf32>
    %cst_148 = arith.constant dense<0.000000e+00> : vector<16xf32>
    %244 = vector.multi_reduction <add>, %243, %cst_148 [1] : vector<16x32xf32> to vector<16xf32>
    %245 = vector.shape_cast %244 : vector<16xf32> to vector<16x1xf32>
    %cst_149 = arith.constant 3.200000e+01 : f32
    %246 = vector.broadcast %cst_149 : f32 to vector<16x1xf32>
    %247 = arith.divf %245, %246 : vector<16x1xf32>
    %248 = vector.broadcast %240 : vector<16x1xf32> to vector<16x32xf32>
    %249 = arith.subf %236, %248 : vector<16x32xf32>
    %cst_150 = arith.constant 9.99999974E-6 : f32
    %250 = vector.broadcast %cst_150 : f32 to vector<16x1xf32>
    %251 = arith.addf %247, %250 : vector<16x1xf32>
    %252 = math.rsqrt %251 : vector<16x1xf32>
    %253 = vector.broadcast %252 : vector<16x1xf32> to vector<16x32xf32>
    %254 = arith.mulf %249, %253 : vector<16x32xf32>
    %255 = vector.broadcast %225 : vector<1x32xf32> to vector<16x32xf32>
    %256 = arith.mulf %254, %255 : vector<16x32xf32>
    %257 = vector.broadcast %227 : vector<1x32xf32> to vector<16x32xf32>
    %258 = arith.addf %256, %257 : vector<16x32xf32>
    %c6 = arith.constant 6 : index
    %c0_151 = arith.constant 0 : index
    %c0_152 = arith.constant 0 : index
    %259 = vector.load %arg1[%c6, %c0_151, %c0_152] : memref<9x32x32xf32, #tpu.memory_space<vmem>>, vector<1x32x32xf32>
    %260 = vector.shape_cast %259 : vector<1x32x32xf32> to vector<32x32xf32>
    %c6_153 = arith.constant 6 : index
    %c0_154 = arith.constant 0 : index
    %c0_155 = arith.constant 0 : index
    %261 = vector.load %arg2[%c6_153, %c0_154, %c0_155] : memref<9x1x32xf32, #tpu.memory_space<vmem>>, vector<1x1x32xf32>
    %262 = vector.shape_cast %261 : vector<1x1x32xf32> to vector<1x32xf32>
    %c6_156 = arith.constant 6 : index
    %c0_157 = arith.constant 0 : index
    %c0_158 = arith.constant 0 : index
    %263 = vector.load %arg3[%c6_156, %c0_157, %c0_158] : memref<9x32x32xf32, #tpu.memory_space<vmem>>, vector<1x32x32xf32>
    %264 = vector.shape_cast %263 : vector<1x32x32xf32> to vector<32x32xf32>
    %c6_159 = arith.constant 6 : index
    %c0_160 = arith.constant 0 : index
    %c0_161 = arith.constant 0 : index
    %265 = vector.load %arg4[%c6_159, %c0_160, %c0_161] : memref<9x1x32xf32, #tpu.memory_space<vmem>>, vector<1x1x32xf32>
    %266 = vector.shape_cast %265 : vector<1x1x32xf32> to vector<1x32xf32>
    %c6_162 = arith.constant 6 : index
    %c0_163 = arith.constant 0 : index
    %c0_164 = arith.constant 0 : index
    %267 = vector.load %arg5[%c6_162, %c0_163, %c0_164] : memref<9x1x32xf32, #tpu.memory_space<vmem>>, vector<1x1x32xf32>
    %268 = vector.shape_cast %267 : vector<1x1x32xf32> to vector<1x32xf32>
    %c6_165 = arith.constant 6 : index
    %c0_166 = arith.constant 0 : index
    %c0_167 = arith.constant 0 : index
    %269 = vector.load %arg6[%c6_165, %c0_166, %c0_167] : memref<9x1x32xf32, #tpu.memory_space<vmem>>, vector<1x1x32xf32>
    %270 = vector.shape_cast %269 : vector<1x1x32xf32> to vector<1x32xf32>
    %cst_168 = arith.constant dense<0.000000e+00> : vector<16x32xf32>
    %271 = tpu.matmul %0, %260, %cst_168 {dimension_numbers = #tpu.dot_dimension_numbers<[1], [0], [0], [1], [0, 0, 1, 1], [], []>} : vector<16x32xf32>, vector<32x32xf32>, vector<16x32xf32> -> vector<16x32xf32>
    %272 = vector.broadcast %262 : vector<1x32xf32> to vector<16x32xf32>
    %273 = arith.addf %271, %272 : vector<16x32xf32>
    %cst_169 = arith.constant 0.000000e+00 : f32
    %274 = vector.broadcast %cst_169 : f32 to vector<16x32xf32>
    %275 = arith.maximumf %273, %274 : vector<16x32xf32>
    %cst_170 = arith.constant dense<0.000000e+00> : vector<16x32xf32>
    %276 = tpu.matmul %275, %264, %cst_170 {dimension_numbers = #tpu.dot_dimension_numbers<[1], [0], [0], [1], [0, 0, 1, 1], [], []>} : vector<16x32xf32>, vector<32x32xf32>, vector<16x32xf32> -> vector<16x32xf32>
    %277 = vector.broadcast %266 : vector<1x32xf32> to vector<16x32xf32>
    %278 = arith.addf %276, %277 : vector<16x32xf32>
    %279 = arith.addf %0, %278 : vector<16x32xf32>
    %cst_171 = arith.constant dense<0.000000e+00> : vector<16xf32>
    %280 = vector.multi_reduction <add>, %279, %cst_171 [1] : vector<16x32xf32> to vector<16xf32>
    %281 = vector.shape_cast %280 : vector<16xf32> to vector<16x1xf32>
    %cst_172 = arith.constant 3.200000e+01 : f32
    %282 = vector.broadcast %cst_172 : f32 to vector<16x1xf32>
    %283 = arith.divf %281, %282 : vector<16x1xf32>
    %284 = vector.broadcast %283 : vector<16x1xf32> to vector<16x32xf32>
    %285 = arith.subf %279, %284 : vector<16x32xf32>
    %286 = arith.mulf %285, %285 : vector<16x32xf32>
    %cst_173 = arith.constant dense<0.000000e+00> : vector<16xf32>
    %287 = vector.multi_reduction <add>, %286, %cst_173 [1] : vector<16x32xf32> to vector<16xf32>
    %288 = vector.shape_cast %287 : vector<16xf32> to vector<16x1xf32>
    %cst_174 = arith.constant 3.200000e+01 : f32
    %289 = vector.broadcast %cst_174 : f32 to vector<16x1xf32>
    %290 = arith.divf %288, %289 : vector<16x1xf32>
    %291 = vector.broadcast %283 : vector<16x1xf32> to vector<16x32xf32>
    %292 = arith.subf %279, %291 : vector<16x32xf32>
    %cst_175 = arith.constant 9.99999974E-6 : f32
    %293 = vector.broadcast %cst_175 : f32 to vector<16x1xf32>
    %294 = arith.addf %290, %293 : vector<16x1xf32>
    %295 = math.rsqrt %294 : vector<16x1xf32>
    %296 = vector.broadcast %295 : vector<16x1xf32> to vector<16x32xf32>
    %297 = arith.mulf %292, %296 : vector<16x32xf32>
    %298 = vector.broadcast %268 : vector<1x32xf32> to vector<16x32xf32>
    %299 = arith.mulf %297, %298 : vector<16x32xf32>
    %300 = vector.broadcast %270 : vector<1x32xf32> to vector<16x32xf32>
    %301 = arith.addf %299, %300 : vector<16x32xf32>
    %c7 = arith.constant 7 : index
    %c0_176 = arith.constant 0 : index
    %c0_177 = arith.constant 0 : index
    %302 = vector.load %arg1[%c7, %c0_176, %c0_177] : memref<9x32x32xf32, #tpu.memory_space<vmem>>, vector<1x32x32xf32>
    %303 = vector.shape_cast %302 : vector<1x32x32xf32> to vector<32x32xf32>
    %c7_178 = arith.constant 7 : index
    %c0_179 = arith.constant 0 : index
    %c0_180 = arith.constant 0 : index
    %304 = vector.load %arg2[%c7_178, %c0_179, %c0_180] : memref<9x1x32xf32, #tpu.memory_space<vmem>>, vector<1x1x32xf32>
    %305 = vector.shape_cast %304 : vector<1x1x32xf32> to vector<1x32xf32>
    %c7_181 = arith.constant 7 : index
    %c0_182 = arith.constant 0 : index
    %c0_183 = arith.constant 0 : index
    %306 = vector.load %arg3[%c7_181, %c0_182, %c0_183] : memref<9x32x32xf32, #tpu.memory_space<vmem>>, vector<1x32x32xf32>
    %307 = vector.shape_cast %306 : vector<1x32x32xf32> to vector<32x32xf32>
    %c7_184 = arith.constant 7 : index
    %c0_185 = arith.constant 0 : index
    %c0_186 = arith.constant 0 : index
    %308 = vector.load %arg4[%c7_184, %c0_185, %c0_186] : memref<9x1x32xf32, #tpu.memory_space<vmem>>, vector<1x1x32xf32>
    %309 = vector.shape_cast %308 : vector<1x1x32xf32> to vector<1x32xf32>
    %c7_187 = arith.constant 7 : index
    %c0_188 = arith.constant 0 : index
    %c0_189 = arith.constant 0 : index
    %310 = vector.load %arg5[%c7_187, %c0_188, %c0_189] : memref<9x1x32xf32, #tpu.memory_space<vmem>>, vector<1x1x32xf32>
    %311 = vector.shape_cast %310 : vector<1x1x32xf32> to vector<1x32xf32>
    %c7_190 = arith.constant 7 : index
    %c0_191 = arith.constant 0 : index
    %c0_192 = arith.constant 0 : index
    %312 = vector.load %arg6[%c7_190, %c0_191, %c0_192] : memref<9x1x32xf32, #tpu.memory_space<vmem>>, vector<1x1x32xf32>
    %313 = vector.shape_cast %312 : vector<1x1x32xf32> to vector<1x32xf32>
    %cst_193 = arith.constant dense<0.000000e+00> : vector<16x32xf32>
    %314 = tpu.matmul %301, %303, %cst_193 {dimension_numbers = #tpu.dot_dimension_numbers<[1], [0], [0], [1], [0, 0, 1, 1], [], []>} : vector<16x32xf32>, vector<32x32xf32>, vector<16x32xf32> -> vector<16x32xf32>
    %315 = vector.broadcast %305 : vector<1x32xf32> to vector<16x32xf32>
    %316 = arith.addf %314, %315 : vector<16x32xf32>
    %cst_194 = arith.constant 0.000000e+00 : f32
    %317 = vector.broadcast %cst_194 : f32 to vector<16x32xf32>
    %318 = arith.maximumf %316, %317 : vector<16x32xf32>
    %cst_195 = arith.constant dense<0.000000e+00> : vector<16x32xf32>
    %319 = tpu.matmul %318, %307, %cst_195 {dimension_numbers = #tpu.dot_dimension_numbers<[1], [0], [0], [1], [0, 0, 1, 1], [], []>} : vector<16x32xf32>, vector<32x32xf32>, vector<16x32xf32> -> vector<16x32xf32>
    %320 = vector.broadcast %309 : vector<1x32xf32> to vector<16x32xf32>
    %321 = arith.addf %319, %320 : vector<16x32xf32>
    %322 = arith.addf %301, %321 : vector<16x32xf32>
    %cst_196 = arith.constant dense<0.000000e+00> : vector<16xf32>
    %323 = vector.multi_reduction <add>, %322, %cst_196 [1] : vector<16x32xf32> to vector<16xf32>
    %324 = vector.shape_cast %323 : vector<16xf32> to vector<16x1xf32>
    %cst_197 = arith.constant 3.200000e+01 : f32
    %325 = vector.broadcast %cst_197 : f32 to vector<16x1xf32>
    %326 = arith.divf %324, %325 : vector<16x1xf32>
    %327 = vector.broadcast %326 : vector<16x1xf32> to vector<16x32xf32>
    %328 = arith.subf %322, %327 : vector<16x32xf32>
    %329 = arith.mulf %328, %328 : vector<16x32xf32>
    %cst_198 = arith.constant dense<0.000000e+00> : vector<16xf32>
    %330 = vector.multi_reduction <add>, %329, %cst_198 [1] : vector<16x32xf32> to vector<16xf32>
    %331 = vector.shape_cast %330 : vector<16xf32> to vector<16x1xf32>
    %cst_199 = arith.constant 3.200000e+01 : f32
    %332 = vector.broadcast %cst_199 : f32 to vector<16x1xf32>
    %333 = arith.divf %331, %332 : vector<16x1xf32>
    %334 = vector.broadcast %326 : vector<16x1xf32> to vector<16x32xf32>
    %335 = arith.subf %322, %334 : vector<16x32xf32>
    %cst_200 = arith.constant 9.99999974E-6 : f32
    %336 = vector.broadcast %cst_200 : f32 to vector<16x1xf32>
    %337 = arith.addf %333, %336 : vector<16x1xf32>
    %338 = math.rsqrt %337 : vector<16x1xf32>
    %339 = vector.broadcast %338 : vector<16x1xf32> to vector<16x32xf32>
    %340 = arith.mulf %335, %339 : vector<16x32xf32>
    %341 = vector.broadcast %311 : vector<1x32xf32> to vector<16x32xf32>
    %342 = arith.mulf %340, %341 : vector<16x32xf32>
    %343 = vector.broadcast %313 : vector<1x32xf32> to vector<16x32xf32>
    %344 = arith.addf %342, %343 : vector<16x32xf32>
    %c8 = arith.constant 8 : index
    %c0_201 = arith.constant 0 : index
    %c0_202 = arith.constant 0 : index
    %345 = vector.load %arg1[%c8, %c0_201, %c0_202] : memref<9x32x32xf32, #tpu.memory_space<vmem>>, vector<1x32x32xf32>
    %346 = vector.shape_cast %345 : vector<1x32x32xf32> to vector<32x32xf32>
    %c8_203 = arith.constant 8 : index
    %c0_204 = arith.constant 0 : index
    %c0_205 = arith.constant 0 : index
    %347 = vector.load %arg2[%c8_203, %c0_204, %c0_205] : memref<9x1x32xf32, #tpu.memory_space<vmem>>, vector<1x1x32xf32>
    %348 = vector.shape_cast %347 : vector<1x1x32xf32> to vector<1x32xf32>
    %c8_206 = arith.constant 8 : index
    %c0_207 = arith.constant 0 : index
    %c0_208 = arith.constant 0 : index
    %349 = vector.load %arg3[%c8_206, %c0_207, %c0_208] : memref<9x32x32xf32, #tpu.memory_space<vmem>>, vector<1x32x32xf32>
    %350 = vector.shape_cast %349 : vector<1x32x32xf32> to vector<32x32xf32>
    %c8_209 = arith.constant 8 : index
    %c0_210 = arith.constant 0 : index
    %c0_211 = arith.constant 0 : index
    %351 = vector.load %arg4[%c8_209, %c0_210, %c0_211] : memref<9x1x32xf32, #tpu.memory_space<vmem>>, vector<1x1x32xf32>
    %352 = vector.shape_cast %351 : vector<1x1x32xf32> to vector<1x32xf32>
    %c8_212 = arith.constant 8 : index
    %c0_213 = arith.constant 0 : index
    %c0_214 = arith.constant 0 : index
    %353 = vector.load %arg5[%c8_212, %c0_213, %c0_214] : memref<9x1x32xf32, #tpu.memory_space<vmem>>, vector<1x1x32xf32>
    %354 = vector.shape_cast %353 : vector<1x1x32xf32> to vector<1x32xf32>
    %c8_215 = arith.constant 8 : index
    %c0_216 = arith.constant 0 : index
    %c0_217 = arith.constant 0 : index
    %355 = vector.load %arg6[%c8_215, %c0_216, %c0_217] : memref<9x1x32xf32, #tpu.memory_space<vmem>>, vector<1x1x32xf32>
    %356 = vector.shape_cast %355 : vector<1x1x32xf32> to vector<1x32xf32>
    %cst_218 = arith.constant dense<0.000000e+00> : vector<16x32xf32>
    %357 = tpu.matmul %344, %346, %cst_218 {dimension_numbers = #tpu.dot_dimension_numbers<[1], [0], [0], [1], [0, 0, 1, 1], [], []>} : vector<16x32xf32>, vector<32x32xf32>, vector<16x32xf32> -> vector<16x32xf32>
    %358 = vector.broadcast %348 : vector<1x32xf32> to vector<16x32xf32>
    %359 = arith.addf %357, %358 : vector<16x32xf32>
    %cst_219 = arith.constant 0.000000e+00 : f32
    %360 = vector.broadcast %cst_219 : f32 to vector<16x32xf32>
    %361 = arith.maximumf %359, %360 : vector<16x32xf32>
    %cst_220 = arith.constant dense<0.000000e+00> : vector<16x32xf32>
    %362 = tpu.matmul %361, %350, %cst_220 {dimension_numbers = #tpu.dot_dimension_numbers<[1], [0], [0], [1], [0, 0, 1, 1], [], []>} : vector<16x32xf32>, vector<32x32xf32>, vector<16x32xf32> -> vector<16x32xf32>
    %363 = vector.broadcast %352 : vector<1x32xf32> to vector<16x32xf32>
    %364 = arith.addf %362, %363 : vector<16x32xf32>
    %365 = arith.addf %344, %364 : vector<16x32xf32>
    %cst_221 = arith.constant dense<0.000000e+00> : vector<16xf32>
    %366 = vector.multi_reduction <add>, %365, %cst_221 [1] : vector<16x32xf32> to vector<16xf32>
    %367 = vector.shape_cast %366 : vector<16xf32> to vector<16x1xf32>
    %cst_222 = arith.constant 3.200000e+01 : f32
    %368 = vector.broadcast %cst_222 : f32 to vector<16x1xf32>
    %369 = arith.divf %367, %368 : vector<16x1xf32>
    %370 = vector.broadcast %369 : vector<16x1xf32> to vector<16x32xf32>
    %371 = arith.subf %365, %370 : vector<16x32xf32>
    %372 = arith.mulf %371, %371 : vector<16x32xf32>
    %cst_223 = arith.constant dense<0.000000e+00> : vector<16xf32>
    %373 = vector.multi_reduction <add>, %372, %cst_223 [1] : vector<16x32xf32> to vector<16xf32>
    %374 = vector.shape_cast %373 : vector<16xf32> to vector<16x1xf32>
    %cst_224 = arith.constant 3.200000e+01 : f32
    %375 = vector.broadcast %cst_224 : f32 to vector<16x1xf32>
    %376 = arith.divf %374, %375 : vector<16x1xf32>
    %377 = vector.broadcast %369 : vector<16x1xf32> to vector<16x32xf32>
    %378 = arith.subf %365, %377 : vector<16x32xf32>
    %cst_225 = arith.constant 9.99999974E-6 : f32
    %379 = vector.broadcast %cst_225 : f32 to vector<16x1xf32>
    %380 = arith.addf %376, %379 : vector<16x1xf32>
    %381 = math.rsqrt %380 : vector<16x1xf32>
    %382 = vector.broadcast %381 : vector<16x1xf32> to vector<16x32xf32>
    %383 = arith.mulf %378, %382 : vector<16x32xf32>
    %384 = vector.broadcast %354 : vector<1x32xf32> to vector<16x32xf32>
    %385 = arith.mulf %383, %384 : vector<16x32xf32>
    %386 = vector.broadcast %356 : vector<1x32xf32> to vector<16x32xf32>
    %387 = arith.addf %385, %386 : vector<16x32xf32>
    %c0_226 = arith.constant 0 : index
    %c0_227 = arith.constant 0 : index
    %388 = vector.load %arg7[%c0_226, %c0_227] : memref<32x206xf32, #tpu.memory_space<vmem>>, vector<32x206xf32>
    %cst_228 = arith.constant dense<0.000000e+00> : vector<16x206xf32>
    %389 = tpu.matmul %129, %388, %cst_228 {dimension_numbers = #tpu.dot_dimension_numbers<[1], [0], [0], [1], [0, 0, 1, 1], [], []>} : vector<16x32xf32>, vector<32x206xf32>, vector<16x206xf32> -> vector<16x206xf32>
    %c0_229 = arith.constant 0 : index
    %c0_230 = arith.constant 0 : index
    %390 = vector.load %arg8[%c0_229, %c0_230] : memref<1x206xf32, #tpu.memory_space<vmem>>, vector<1x206xf32>
    %391 = vector.broadcast %390 : vector<1x206xf32> to vector<16x206xf32>
    %392 = arith.addf %389, %391 : vector<16x206xf32>
    %c0_231 = arith.constant 0 : index
    %c0_232 = arith.constant 0 : index
    %393 = vector.load %arg13[%c0_231, %c0_232] : memref<16x208xf32, #tpu.memory_space<vmem>>, vector<16x206xf32>
    tpu.vector_store %arg13[%c0_231, %c0_232], %392 {strides = array<i32>} : memref<16x208xf32, #tpu.memory_space<vmem>>, vector<16x206xf32>,
    %c0_233 = arith.constant 0 : index
    %c0_234 = arith.constant 0 : index
    %394 = vector.load %arg9[%c0_233, %c0_234] : memref<32x1xf32, #tpu.memory_space<vmem>>, vector<32x1xf32>
    %cst_235 = arith.constant dense<0.000000e+00> : vector<16x1xf32>
    %395 = tpu.matmul %258, %394, %cst_235 {dimension_numbers = #tpu.dot_dimension_numbers<[1], [0], [0], [1], [0, 0, 1, 1], [], []>} : vector<16x32xf32>, vector<32x1xf32>, vector<16x1xf32> -> vector<16x1xf32>
    %c0_236 = arith.constant 0 : index
    %c0_237 = arith.constant 0 : index
    %396 = vector.load %arg10[%c0_236, %c0_237] : memref<1x1xf32, #tpu.memory_space<vmem>>, vector<1x1xf32>
    %397 = vector.broadcast %396 : vector<1x1xf32> to vector<16x1xf32>
    %398 = arith.addf %395, %397 : vector<16x1xf32>
    %c0_238 = arith.constant 0 : index
    %c206 = arith.constant 206 : index
    %399 = vector.load %arg13[%c0_238, %c206] : memref<16x208xf32, #tpu.memory_space<vmem>>, vector<16x1xf32>
    tpu.vector_store %arg13[%c0_238, %c206], %398 {strides = array<i32>} : memref<16x208xf32, #tpu.memory_space<vmem>>, vector<16x1xf32>,
    %c0_239 = arith.constant 0 : index
    %c0_240 = arith.constant 0 : index
    %400 = vector.load %arg11[%c0_239, %c0_240] : memref<32x1xf32, #tpu.memory_space<vmem>>, vector<32x1xf32>
    %cst_241 = arith.constant dense<0.000000e+00> : vector<16x1xf32>
    %401 = tpu.matmul %387, %400, %cst_241 {dimension_numbers = #tpu.dot_dimension_numbers<[1], [0], [0], [1], [0, 0, 1, 1], [], []>} : vector<16x32xf32>, vector<32x1xf32>, vector<16x1xf32> -> vector<16x1xf32>
    %c0_242 = arith.constant 0 : index
    %c0_243 = arith.constant 0 : index
    %402 = vector.load %arg12[%c0_242, %c0_243] : memref<1x1xf32, #tpu.memory_space<vmem>>, vector<1x1xf32>
    %403 = vector.broadcast %402 : vector<1x1xf32> to vector<16x1xf32>
    %404 = arith.addf %401, %403 : vector<16x1xf32>
    %c0_244 = arith.constant 0 : index
    %c207 = arith.constant 207 : index
    %405 = vector.load %arg13[%c0_244, %c207] : memref<16x208xf32, #tpu.memory_space<vmem>>, vector<16x1xf32>
    tpu.vector_store %arg13[%c0_244, %c207], %404 {strides = array<i32>} : memref<16x208xf32, #tpu.memory_space<vmem>>, vector<16x1xf32>,
    return
  }
}

</mosaic_0001>

<bundles_post_ra>
// kernel: forward.10
= control target key start
LH: loop header
LB: loop body
LE: loop exit
PB: predicated region body
PF: predicated region fallthrough
CT: control target
= control target key end

     0   :  { %vm62_vm0 = vcmask 261120   ;;  %s2297_s0 = inlined_call_operand.vmem [shape: f32[16,32], index: 0, kind: input, shape index: {}]   ;;  %s2298_s1 = inlined_call_operand.vmem [shape: f32[16,32], index: 1, kind: input, shape index: {}]   ;;  %s2299_s2 = inlined_call_operand.vmem [shape: f32[1,16], index: 2, kind: input, shape index: {}]   ;;  %s2300_s3 = inlined_call_operand.vmem [shape: f32[32,32], index: 3, kind: input, shape index: {}]   ;;  %s2301_s4 = inlined_call_operand.vmem [shape: f32[1,32], index: 4, kind: input, shape index: {}]   ;;  %s2302_s5 = inlined_call_operand.vmem [shape: f32[32,64], index: 5, kind: input, shape index: {}]   ;;  %s2303_s6 = inlined_call_operand.vmem [shape: f32[1,64], index: 6, kind: input, shape index: {}]   ;;  %s2304_s7 = inlined_call_operand.vmem [shape: f32[32,32], index: 7, kind: input, shape index: {}]   ;;  %s2305_s8 = inlined_call_operand.vmem [shape: f32[1,32], index: 8, kind: input, shape index: {}]   ;;  %s2306_s9 = inlined_call_operand.vmem [shape: f32[1,32], index: 9, kind: input, shape index: {}]   ;;  %s2307_s10 = inlined_call_operand.vmem [shape: f32[1,32], index: 10, kind: input, shape index: {}]   ;;  %s2308_s11 = inlined_call_operand.vmem [shape: f32[32,20], index: 11, kind: input, shape index: {}]   ;;  %s2309_s12 = inlined_call_operand.vmem [shape: f32[1,20], index: 12, kind: input, shape index: {}]   ;;  %s2310_s13 = inlined_call_operand.vmem [shape: f32[16,52], index: 13, kind: output, shape index: {0}]   ;;  %s2311_s14 = inlined_call_operand.hbm [shape: f32[4,16,16], index: 14, kind: output, shape index: {1}]  }
   0x1   :  { %v144_v0 = vld [vmem:[%s2302_s5] sm:$0xff]  ;;  %v145_v1 = vld [vmem:[%s2302_s5 + $0x8] sm:$0xff]  ;;  %v146_v2 = vld [vmem:[%s2302_s5 + $0x10] sm:$0xff] }
   0x2   :  { %v1805_v3 = vpack.c.bf16 %v145_v1, %v144_v0  ;;  %v147_v4 = vld [vmem:[%s2302_s5 + $0x18] sm:$0xff]  ;;  %v49_v5 = vld [vmem:[%s2298_s1] sm:$0xff]  ;;  %v52_v8 = vld [vmem:[%s2300_s3 + $0x8] sm:$0xff] }
   0x3   :  { %v51_v6 = vld [vmem:[%s2300_s3] sm:$0xff]  ;;  %v1809_v7 = vpack.c.bf16 %v147_v4, %v146_v2  ;;  %1707 = vmatprep.mubr.msk.f32.mxu1 %vm62_vm0, %v49_v5  ;;  %v53_v9 = vld [vmem:[%s2300_s3 + $0x10] sm:$0xff]  ;;  %v54_v11 = vld [vmem:[%s2300_s3 + $0x18] sm:$0xff] }
   0x4   :  { %1806 = vmatprep.subr.bf16.mxu1 %v1805_v3  ;;  %v1797_v10 = vpack.c.bf16 %v52_v8, %v51_v6  ;;  %v2090_v12 = vld [vmem:[%s2297_s0] sm:$0xff]  ;;  %v1801_v13 = vpack.c.bf16 %v54_v11, %v53_v9 }
   0x5   :  { %1808 = vmatpush3.bf16.msra.mxu1 %v1805_v3  ;;  %1696 = vmatprep.mubr.msk.f32.mxu0 %vm62_vm0, %v2090_v12 }
   0x6   :  { %20 = vsyncpa [#allocation3], 0  ;;  %1810 = vmatprep.subr.bf16.mxu1 %v1809_v7  ;;  %1798 = vmatprep.subr.bf16.mxu0 %v1797_v10  ;;  %v50_v14 = vld [vmem:[%s2298_s1 + $0x8] sm:$0xff]  ;;  %v1584_v16 = vld [vmem:[%s2303_s6] ss:$0 sm:$0xff]  ;;  %vm241_vm1 = vcmask 64512  }
   0x7   :  { %1800 = vmatpush3.bf16.msra.mxu0 %v1797_v10  ;;  %v2100_v15 = vld [vmem:[%s2297_s0 + $0x8] sm:$0xff]  ;;  %v1581_v20 = vld [vmem:[%s2301_s4] ss:$0 sm:$0xff]  ;;  %vm2113_vm2 = vmpackc.low %vm241_vm1, %vm241_vm1  ;;  %s1973_s0 = smov 120   ;;  %vm339_vm3 = vcmask 130048   ;;  %s1974_s22 = smov 96  }
   0x8   :  { %1802 = vmatprep.subr.bf16.mxu0 %v1801_v13  ;;  %v2138_v31 = vld [vmem:[%s2299_s2] ss:$0 sm:$0xff]  ;;  %s1975_s23 = smov 112   ;;  %s1976_s2 = smov 88  }
   0x9   :  { %1812 = vmatpush3.bf16.msra.mxu1 %v1809_v7  ;;  %s1977_s24 = smov 104   ;;  %s1978_s25 = smov 80  }
   0xa   :  { %s1979_s26 = smov 72  }
   0xb   :  { %1804 = vmatpush3.bf16.msra.mxu0 %v1801_v13 }
   0xc   :  { %1708 = vmatmul.mubr.msk.f32.vlgmr.msra.gmra.mrb[0].mxu1 %vm62_vm0, %v50_v14 }
   0xe   :  { %1697 = vmatmul.mubr.msk.f32.vlgmr.msra.gmra.mrb[0].mxu0 %vm62_vm0, %v2100_v15 }
  0xdf   :  { %v1709_v17 = vpop.f32.mrb[0].mxu1 }
  0xe0   :  { %v233_v18 = vadd.f32 %v1709_v17, %v1584_v16  ;;  %v227_v19 = vpop.f32.mrb[1].mxu1 }
  0xe1   :  { %v228_v21 = vadd.f32 %v1584_v16, %v227_v19  ;;  %v1698_v22 = vpop.f32.mrb[0].mxu0 }
  0xe2   :  { %v135_v24 = vpop.f32.mrb[1].mxu0  ;;  %v2131_v28 = vadd.f32 %v1698_v22, %v1581_v20 }
  0xe3   :  { %v2117_v25 = vpack.i.bf16 %v233_v18, %v228_v21  ;;  %v1813_v26 = vpack.c.bf16 %v233_v18, %v228_v21  ;;  %v2119_v27 = vadd.f32 %v1581_v20, %v135_v24 }
  0xe5   :  { %1884 = vrot.lane.b32.xlu1 %v2117_v25, %s1973_s0  ;;  %1815 = vmatprep.subr.msk.bf16.mxu0 %vm2113_vm2, %v1813_v26 }
  0xe6   :  { %1818 = vmatpush3.bf16.xpose.msk.msra.mxu0 %vm2113_vm2, %v1813_v26  ;;  %1714 = vmatprep.mubr.msk.f32.mxu0 %vm241_vm1, %v2119_v27 }
  0xe9   :  { %451 = vrot.lane.b32.xlu1 %v2119_v27, %s1973_s0 }
  0xed   :  { %1715 = vmatmul.mubr.msk.f32.vlgmr.msra.gmra.mrb[2].mxu0 %vm241_vm1, %v2131_v28 }
 0x157   :  { %v1885_v41 = vpop.permute.xlu1 %1884 }
 0x158   :  { %v1887_v45 = vunpack.i.h.bf16 %v1885_v41  ;;  %v1886_v47 = vunpack.i.l.bf16 %v1885_v41 }
 0x15a   :  { %v1823_v51 = vpack.c.bf16 %v1887_v45, %v1886_v47 }
 0x15b   :  { %v452_v56 = vpop.permute.xlu1 %451 }
 0x1c0   :  { %v1716_v29 = vpop.f32.mrb[2].mxu0 }
 0x1c1   :  { %v320_v30 = vpop.f32.mrb[3].mxu0  ;;  %v330_v32 = vmul.f32 0.35355338, %v1716_v29 }
 0x1c2   :  { %v329_v33 = vmul.f32 0.35355338, %v320_v30 }
 0x1c3   :  { %v338_v36 = vadd.f32 %v2138_v31, %v330_v32 }
 0x1c4   :  { %v337_v34 = vadd.f32 %v2138_v31, %v329_v33 }
 0x1c5   :  { %v343_v37 = vsel %vm339_vm3, %v338_v36, -inf }
 0x1c6   :  { %v340_v35 = vsel %vm339_vm3, %v337_v34, -inf }
 0x1c7   :  { %341 = vmax.xlane.f32.xlu0 %v340_v35 }
 0x1cb   :  { %344 = vmax.xlane.f32.xlu0 %v343_v37 }
 0x1e1   :  { %1879 = vrot.lane.b32.xlu0 %v2117_v25, %s1974_s22 }
 0x1e5   :  { %1889 = vrot.lane.b32.xlu0 %v2117_v25, %s1975_s23 }
 0x1e9   :  { %822 = vrot.lane.b32.xlu0 %v2131_v28, %s1975_s23 }
 0x254   :  { %v342_v38 = vpop.xlane.xlu0 %341 }
 0x255   :  { %v346_v39 = vsub.f32 %v337_v34, %v342_v38 }
 0x257   :  { %v348_v43 = vmul.f32 1.442695, %v346_v39 }
 0x258   :  { %v345_v40 = vpop.xlane.xlu0 %344 }
 0x259   :  { %v347_v42 = vsub.f32 %v338_v36, %v345_v40 }
 0x25b   :  { %v350_v44 = vmul.f32 1.442695, %v347_v42 }
 0x25c   :  { %v1880_v46 = vpop.permute.xlu0 %1879 }
 0x25d   :  { %1913 = vpow2.f32 %v350_v44  ;;  %v1882_v48 = vunpack.i.h.bf16 %v1880_v46  ;;  %v1881_v49 = vunpack.i.l.bf16 %v1880_v46 }
 0x25e   :  { %1915 = vpow2.f32 %v348_v43 }
 0x25f   :  { %v1819_v50 = vpack.c.bf16 %v1882_v48, %v1881_v49 }
 0x260   :  { %v1890_v60 = vpop.permute.xlu0 %1889 }
 0x261   :  { %1820 = vmatprep.subr.bf16.mxu1 %v1819_v50  ;;  %v1892_v63 = vunpack.i.h.bf16 %v1890_v60  ;;  %v1891_v0 = vunpack.i.l.bf16 %v1890_v60 }
 0x262   :  { %1822 = vmatpush3.bf16.msra.mxu1 %v1819_v50 }
 0x263   :  { %1825 = vmatprep.subr.msk.bf16.mxu1 %vm2113_vm2, %v1823_v51  ;;  %v1833_v2 = vpack.c.bf16 %v1892_v63, %v1891_v0 }
 0x264   :  { %v823_v5 = vpop.permute.xlu0 %822 }
 0x267   :  { %v1914_v52 = vpop.eup %1913 }
 0x268   :  { %v355_v53 = vsel %vm339_vm3, %v1914_v52, 0.0  ;;  %v1916_v54 = vpop.eup %1915 }
 0x269   :  { %356 = vadd.xlane.f32.xlu1 %v355_v53  ;;  %v352_v55 = vsel %vm339_vm3, %v1916_v54, 0.0 }
 0x26d   :  { %353 = vadd.xlane.f32.xlu1 %v352_v55 }
 0x27e   :  { %453 = vrot.lane.b32.xlu1 %v2131_v28, %s1973_s0 }
 0x282   :  { %820 = vrot.lane.b32.xlu1 %v2119_v27, %s1975_s23 }
 0x2f6   :  { %v357_v57 = vpop.xlane.xlu1 %356 }
 0x2f7   :  { %1917 = vrcp.f32 %v357_v57 }
 0x2fa   :  { %v354_v58 = vpop.xlane.xlu1 %353 }
 0x2fb   :  { %1919 = vrcp.f32 %v354_v58 }
 0x2fe   :  { %v454_v3 = vpop.permute.xlu1 %453 }
 0x301   :  { %v1918_v59 = vpop.eup %1917 }
 0x302   :  { %v361_v61 = vmul.f32 %v1918_v59, %v1914_v52  ;;  %v821_v4 = vpop.permute.xlu1 %820 }
 0x304   :  { %363 = vst.msk [vmem:[#allocation2 + $0x8] sm:$0xff] %vm339_vm3, %v361_v61 }
 0x305   :  { %v1920_v62 = vpop.eup %1919 }
 0x306   :  { %v360_v1 = vmul.f32 %v1920_v62, %v1916_v54 }
 0x308   :  { %362 = vst.msk [vmem:[#allocation2] sm:$0xff] %vm339_vm3, %v360_v1  ;;  %1721 = vmatprep.mubr.msk.f32.mxu1 %vm339_vm3, %v360_v1 }
 0x309   :  { %1722 = vmatmul.mubr.msk.f32.vlgmr.msra.gmra.mrb[2].mxu1 %vm339_vm3, %v361_v61 }
 0x30a   :  { %1828 = vmatpush3.bf16.xpose.msk.msra.mxu1 %vm2113_vm2, %v1823_v51  ;;  %1728 = vmatprep.mubr.msk.f32.mxu1 %vm241_vm1, %v452_v56 }
 0x30b   :  { %1835 = vmatprep.subr.msk.bf16.mxu1 %vm2113_vm2, %v1833_v2 }
 0x311   :  { %1729 = vmatmul.mubr.msk.f32.vlgmr.msra.gmra.mrb[4].mxu1 %vm241_vm1, %v454_v3  ;;  %v237_v3 = vld [vmem:[%s2304_s7] sm:$0xff] }
 0x312   :  { %1838 = vmatpush3.bf16.xpose.msk.msra.mxu1 %vm2113_vm2, %v1833_v2  ;;  %1752 = vmatprep.mubr.msk.f32.mxu1 %vm241_vm1, %v821_v4  ;;  %v238_v2 = vld [vmem:[%s2304_s7 + $0x8] sm:$0xff] }
 0x319   :  { %1753 = vmatmul.mubr.msk.f32.vlgmr.msra.gmra.mrb[6].mxu1 %vm241_vm1, %v823_v5 }
 0x3dc   :  { %v2168_v6 = vpop.f32.mrb[2].mxu1 }
 0x3dd   :  { %v2170_v7 = vpop.f32.mrb[3].mxu1 }
 0x3e4   :  { %v1730_v8 = vpop.f32.mrb[4].mxu1 }
 0x3e5   :  { %v543_v9 = vmul.f32 0.35355338, %v1730_v8  ;;  %v533_v10 = vpop.f32.mrb[5].mxu1 }
 0x3e6   :  { %v542_v11 = vmul.f32 0.35355338, %v533_v10 }
 0x3e7   :  { %v545_v13 = vadd.f32 %v2138_v31, %v543_v9 }
 0x3e8   :  { %v544_v14 = vadd.f32 %v2138_v31, %v542_v11 }
 0x3e9   :  { %v549_v16 = vsel %vm339_vm3, %v545_v13, -inf }
 0x3ea   :  { %550 = vmax.xlane.f32.xlu0 %v549_v16  ;;  %v546_v17 = vsel %vm339_vm3, %v544_v14, -inf }
 0x3eb   :  { %547 = vmax.xlane.f32.xlu1 %v546_v17 }
 0x3ec   :  { %v1754_v18 = vpop.f32.mrb[6].mxu1 }
 0x3ed   :  { %v902_v19 = vpop.f32.mrb[7].mxu1  ;;  %v912_v45 = vmul.f32 0.35355338, %v1754_v18 }
 0x3ee   :  { %v911_v20 = vmul.f32 0.35355338, %v902_v19 }
 0x3ef   :  { %v914_v46 = vadd.f32 %v2138_v31, %v912_v45 }
 0x3f0   :  { %v913_v21 = vadd.f32 %v2138_v31, %v911_v20 }
 0x3f1   :  { %v918_v47 = vsel %vm339_vm3, %v914_v46, -inf }
 0x3f2   :  { %v915_v22 = vsel %vm339_vm3, %v913_v21, -inf }
 0x3fc   :  { %1894 = vrot.lane.b32.xlu1 %v2117_v25, %s1976_s2 }
 0x400   :  { %1110 = vrot.lane.b32.xlu1 %v2119_v27, %s1977_s24 }
 0x404   :  { %1112 = vrot.lane.b32.xlu1 %v2131_v28, %s1977_s24 }
 0x428   :  { %916 = vmax.xlane.f32.xlu1 %v915_v22 }
 0x439   :  { %1904 = vrot.lane.b32.xlu1 %v2117_v25, %s1978_s25 }
 0x43d   :  { %1909 = vrot.lane.b32.xlu1 %v2117_v25, %s1979_s26 }
 0x477   :  { %v551_v24 = vpop.xlane.xlu0 %550 }
 0x478   :  { %v553_v26 = vsub.f32 %v545_v13, %v551_v24  ;;  %v548_v29 = vpop.xlane.xlu1 %547 }
 0x479   :  { %v552_v30 = vsub.f32 %v544_v14, %v548_v29  ;;  %v239_v29 = vld [vmem:[%s2304_s7 + $0x10] sm:$0xff] }
 0x47a   :  { %v556_v27 = vmul.f32 1.442695, %v553_v26 }
 0x47b   :  { %v554_v32 = vmul.f32 1.442695, %v552_v30 }
 0x47c   :  { %v1895_v33 = vpop.permute.xlu1 %1894 }
 0x47d   :  { %1921 = vpow2.f32 %v554_v32  ;;  %v1897_v28 = vunpack.i.h.bf16 %v1895_v33  ;;  %v1896_v34 = vunpack.i.l.bf16 %v1895_v33 }
 0x47e   :  { %1923 = vpow2.f32 %v556_v27 }
 0x47f   :  { %v1829_v35 = vpack.c.bf16 %v1897_v28, %v1896_v34 }
 0x480   :  { %v1111_v36 = vpop.permute.xlu1 %1110 }
 0x481   :  { %1830 = vmatprep.subr.bf16.mxu0 %v1829_v35  ;;  %1771 = vmatprep.mubr.msk.f32.mxu1 %vm241_vm1, %v1111_v36 }
 0x482   :  { %1832 = vmatpush3.bf16.msra.mxu0 %v1829_v35 }
 0x483   :  { %1738 = vmatprep.subr.mxu0 %v238_v2 }
 0x484   :  { %v1113_v41 = vpop.permute.xlu1 %1112 }
 0x487   :  { %v1922_v37 = vpop.eup %1921 }
 0x488   :  { %v558_v38 = vsel %vm339_vm3, %v1922_v37, 0.0  ;;  %v1924_v39 = vpop.eup %1923 }
 0x489   :  { %559 = vadd.xlane.f32.xlu0 %v558_v38  ;;  %v561_v40 = vsel %vm339_vm3, %v1924_v39, 0.0 }
 0x48d   :  { %562 = vadd.xlane.f32.xlu0 %v561_v40 }
 0x4a3   :  { %1899 = vrot.lane.b32.xlu0 %v2117_v25, %s1977_s24 }
 0x4b5   :  { %v917_v42 = vpop.xlane.xlu1 %916 }
 0x4b6   :  { %v921_v43 = vsub.f32 %v913_v21, %v917_v42  ;;  %v240_v42 = vld [vmem:[%s2304_s7 + $0x18] sm:$0xff] }
 0x4b8   :  { %v923_v44 = vmul.f32 1.442695, %v921_v43 }
 0x4b9   :  { %v1905_v5 = vpop.permute.xlu1 %1904 }
 0x4ba   :  { %1925 = vpow2.f32 %v923_v44  ;;  %v1907_v10 = vunpack.i.h.bf16 %v1905_v5  ;;  %v1906_v11 = vunpack.i.l.bf16 %v1905_v5  ;;  %v1458_v5 = vld [vmem:[%s2308_s11 + $0x10] sm:$0xff] }
 0x4bc   :  { %v1839_v16 = vpack.c.bf16 %v1907_v10, %v1906_v11 }
 0x4bd   :  { %v1910_v22 = vpop.permute.xlu1 %1909 }
 0x4be   :  { %v1912_v30 = vunpack.i.h.bf16 %v1910_v22  ;;  %v1911_v27 = vunpack.i.l.bf16 %v1910_v22 }
 0x4c0   :  { %v1849_v32 = vpack.c.bf16 %v1912_v30, %v1911_v27 }
 0x4c2   :  { %919 = vmax.xlane.f32.xlu0 %v918_v47 }
 0x4c4   :  { %v1926_v48 = vpop.eup %1925 }
 0x4c5   :  { %v927_v49 = vsel %vm339_vm3, %v1926_v48, 0.0 }
 0x4c6   :  { %928 = vadd.xlane.f32.xlu0 %v927_v49 }
 0x516   :  { %v560_v50 = vpop.xlane.xlu0 %559 }
 0x517   :  { %1927 = vrcp.f32 %v560_v50 }
 0x51a   :  { %v563_v51 = vpop.xlane.xlu0 %562 }
 0x51b   :  { %1929 = vrcp.f32 %v563_v51  ;;  %v1620_v51 = vld [vmem:[%s2305_s8] ss:$0 sm:$0xff] }
 0x51e   :  { %v1900_v25 = vpop.permute.xlu0 %1899 }
 0x51f   :  { %v1902_v52 = vunpack.i.h.bf16 %v1900_v25  ;;  %v1901_v53 = vunpack.i.l.bf16 %v1900_v25 }
 0x521   :  { %v1928_v54 = vpop.eup %1927  ;;  %v1843_v55 = vpack.c.bf16 %v1902_v52, %v1901_v53 }
 0x522   :  { %v566_v56 = vmul.f32 %v1928_v54, %v1922_v37 }
 0x523   :  { %1845 = vmatprep.subr.msk.bf16.mxu1 %vm2113_vm2, %v1843_v55 }
 0x524   :  { %569 = vst.msk [vmem:[#allocation2 + $0x10] sm:$0xff] %vm339_vm3, %v566_v56  ;;  %1735 = vmatprep.mubr.msk.f32.mxu0 %vm339_vm3, %v566_v56  ;;  %1848 = vmatpush3.bf16.xpose.msk.msra.mxu1 %vm2113_vm2, %v1843_v55 }
 0x525   :  { %v1930_v57 = vpop.eup %1929 }
 0x526   :  { %v567_v58 = vmul.f32 %v1930_v57, %v1924_v39 }
 0x528   :  { %570 = vst.msk [vmem:[#allocation2 + $0x18] sm:$0xff] %vm339_vm3, %v567_v58  ;;  %1736 = vmatmul.mubr.msk.f32.vlgmr.msra.gmra.mrb[4].mxu0 %vm339_vm3, %v567_v58 }
 0x529   :  { %1739 = vmatpush3.msra.mxu0 %v238_v2 }
 0x52a   :  { %1743 = vmatprep.subr.mxu0 %v237_v3 }
 0x52b   :  { %1772 = vmatmul.mubr.msk.f32.vlgmr.msra.gmra.mrb[8].mxu1 %vm241_vm1, %v1113_v41 }
 0x54f   :  { %v920_v59 = vpop.xlane.xlu0 %919 }
 0x550   :  { %v922_v60 = vsub.f32 %v914_v46, %v920_v59 }
 0x552   :  { %v925_v61 = vmul.f32 1.442695, %v922_v60 }
 0x553   :  { %v929_v62 = vpop.xlane.xlu0 %928 }
 0x554   :  { %1931 = vpow2.f32 %v925_v61 }
 0x555   :  { %1933 = vrcp.f32 %v929_v62 }
 0x55e   :  { %v1932_v63 = vpop.eup %1931 }
 0x55f   :  { %v1934_v0 = vpop.eup %1933  ;;  %v930_v1 = vsel %vm339_vm3, %v1932_v63, 0.0 }
 0x560   :  { %931 = vadd.xlane.f32.xlu0 %v930_v1  ;;  %v935_v23 = vmul.f32 %v1934_v0, %v1926_v48 }
 0x562   :  { %938 = vst.msk [vmem:[#allocation2 + $0x20] sm:$0xff] %vm339_vm3, %v935_v23 }
 0x5ed   :  { %v932_v4 = vpop.xlane.xlu0 %931 }
 0x5ee   :  { %1935 = vrcp.f32 %v932_v4 }
 0x5f8   :  { %v1936_v8 = vpop.eup %1935 }
 0x5f9   :  { %v936_v9 = vmul.f32 %v1936_v8, %v1932_v63  ;;  %v1459_v8 = vld [vmem:[%s2308_s11 + $0x18] sm:$0xff] }
 0x5fb   :  { %939 = vst.msk [vmem:[#allocation2 + $0x28] sm:$0xff] %vm339_vm3, %v936_v9  ;;  %v1737_v13 = vpop.f32.mrb[4].mxu0 }
 0x5fc   :  { %v649_v14 = vpop.f32.mrb[5].mxu0 }
 0x5fd   :  { %1740 = vmatprep.mubr.msk.f32.mxu0 %vm241_vm1, %v649_v14 }
 0x5fe   :  { %1741 = vmatmul.mubr.msk.f32.vlgmr.msra.gmra.mrb[6].mxu0 %vm241_vm1, %v1737_v13  ;;  %v1773_v17 = vpop.f32.mrb[8].mxu1 }
 0x5ff   :  { %1744 = vmatpush3.msra.mxu0 %v237_v3  ;;  %1745 = vmatprep.mubr.msk.f32.mxu0 %vm241_vm1, %v2170_v7  ;;  %v1192_v18 = vpop.f32.mrb[9].mxu1  ;;  %v1202_v19 = vmul.f32 0.35355338, %v1773_v17  ;;  %v1457_v3 = vld [vmem:[%s2308_s11 + $0x8] sm:$0xff] }
 0x600   :  { %1840 = vmatprep.subr.bf16.mxu0 %v1839_v16  ;;  %v1201_v20 = vmul.f32 0.35355338, %v1192_v18 }
 0x601   :  { %v1204_v26 = vadd.f32 %v2138_v31, %v1202_v19  ;;  %v1621_v19 = vld [vmem:[%s2306_s9] ss:$0 sm:$0xff] }
 0x602   :  { %v1203_v21 = vadd.f32 %v2138_v31, %v1201_v20 }
 0x603   :  { %v1208_v7 = vsel %vm339_vm3, %v1204_v26, -inf }
 0x604   :  { %v1205_v24 = vsel %vm339_vm3, %v1203_v21, -inf }
 0x605   :  { %1206 = vmax.xlane.f32.xlu0 %v1205_v24 }
 0x606   :  { %1746 = vmatmul.mubr.msk.f32.vlgmr.msra.gmra.mrb[6].mxu0 %vm241_vm1, %v2168_v6 }
 0x607   :  { %1842 = vmatpush3.bf16.msra.mxu0 %v1839_v16  ;;  %1759 = vmatprep.mubr.msk.f32.mxu0 %vm339_vm3, %v935_v23 }
 0x608   :  { %1762 = vmatprep.subr.mxu0 %v239_v29 }
 0x609   :  { %1209 = vmax.xlane.f32.xlu0 %v1208_v7 }
 0x60a   :  { %1760 = vmatmul.mubr.msk.f32.vlgmr.msra.gmra.mrb[8].mxu0 %vm339_vm3, %v936_v9  ;;  %v1857_v9 = vpack.c.bf16 %v1459_v8, %v1458_v5 }
 0x60b   :  { %1763 = vmatpush3.msra.mxu0 %v239_v29 }
 0x60c   :  { %1850 = vmatprep.subr.bf16.mxu0 %v1849_v32 }
 0x692   :  { %v1207_v31 = vpop.xlane.xlu0 %1206 }
 0x693   :  { %v1211_v33 = vsub.f32 %v1203_v21, %v1207_v31  ;;  %v1622_v21 = vld [vmem:[%s2307_s10] ss:$0 sm:$0xff]  ;;  %s1980_s10 = smov [#allocation2]  }
 0x694   :  { %s1568_s26 = sshll.u32 %s1980_s10, 4  ;;  %s1569_s26 = int_to_ptr.vmem [resolvable:$true] %s1568_s26 }
 0x695   :  { %v1213_v28 = vmul.f32 1.442695, %v1211_v33  ;;  %s1949_s27 = scalar_lea.vmem %s1569_s26, 1024  ;;  %p1954_p1 = scmp.lt.s32.totalorder %s1569_s26, %s1569_s26 }
 0x696   :  { %v1210_v34 = vpop.xlane.xlu0 %1209  ;;  %p1950_p0 = scmp.ne.s32.totalorder %s1569_s26, %s1949_s27  ;;  %p1955_p2 = scmp.lt.s32.totalorder %s1949_s27, %s1949_s27 }
 0x697   :  { %1937 = vpow2.f32 %v1213_v28  ;;  %v1212_v35 = vsub.f32 %v1204_v26, %v1210_v34 }
 0x698   :  { %p1956_p3 = por %p1955_p2, %p1954_p1 }
 0x699   :  { %v1215_v36 = vmul.f32 1.442695, %v1212_v35 }
 0x69a   :  { %p1957_p4 = pnand %p1956_p3, %p1950_p0 }
 0x69b   :  { %1939 = vpow2.f32 %v1215_v36 }
 0x6a1   :  { %v1938_v6 = vpop.eup %1937 }
 0x6a2   :  { %v1217_v37 = vsel %vm339_vm3, %v1938_v6, 0.0 }
 0x6a3   :  { %1218 = vadd.xlane.f32.xlu0 %v1217_v37 }
 0x6a5   :  { %v1940_v38 = vpop.eup %1939 }
 0x6a6   :  { %v1220_v39 = vsel %vm339_vm3, %v1940_v38, 0.0 }
 0x6a7   :  { %1221 = vadd.xlane.f32.xlu0 %v1220_v39 }
 0x6dd   :  { %v1761_v40 = vpop.f32.mrb[8].mxu0 }
 0x6de   :  { %v1018_v41 = vpop.f32.mrb[9].mxu0 }
 0x6df   :  { %1764 = vmatprep.mubr.msk.f32.mxu0 %vm241_vm1, %v1018_v41 }
 0x6e0   :  { %1765 = vmatmul.mubr.msk.f32.vlgmr.msra.gmra.mrb[6].mxu0 %vm241_vm1, %v1761_v40 }
 0x6e1   :  { %1852 = vmatpush3.bf16.msra.mxu0 %v1849_v32 }
 0x6e2   :  { %1781 = vmatprep.subr.mxu0 %v240_v42 }
 0x730   :  { %v1219_v43 = vpop.xlane.xlu0 %1218 }
 0x731   :  { %1941 = vrcp.f32 %v1219_v43 }
 0x734   :  { %v1222_v44 = vpop.xlane.xlu0 %1221 }
 0x735   :  { %1943 = vrcp.f32 %v1222_v44 }
 0x73b   :  { %v1942_v45 = vpop.eup %1941 }
 0x73c   :  { %v1225_v46 = vmul.f32 %v1942_v45, %v1938_v6 }
 0x73e   :  { %1228 = vst.msk [vmem:[#allocation2 + $0x30] sm:$0xff] %vm339_vm3, %v1225_v46  ;;  %1778 = vmatprep.mubr.msk.f32.mxu0 %vm339_vm3, %v1225_v46 }
 0x73f   :  { %v1944_v47 = vpop.eup %1943 }
 0x740   :  { %v1226_v48 = vmul.f32 %v1944_v47, %v1940_v38 }
 0x742   :  { %1229 = vst.msk [vmem:[#allocation2 + $0x38] sm:$0xff] %vm339_vm3, %v1226_v48  ;;  %1779 = vmatmul.mubr.msk.f32.vlgmr.msra.gmra.mrb[10].mxu0 %vm339_vm3, %v1226_v48 }
 0x743   :  { %1782 = vmatpush3.msra.mxu0 %v240_v42 }
 0x815   :  { %v1780_v49 = vpop.f32.mrb[10].mxu0 }
 0x816   :  { %v1308_v50 = vpop.f32.mrb[11].mxu0 }
 0x817   :  { %1783 = vmatprep.mubr.msk.f32.mxu0 %vm241_vm1, %v1308_v50 }
 0x818   :  { %1784 = vmatmul.mubr.msk.f32.vlgmr.msra.gmra.mrb[6].mxu0 %vm241_vm1, %v1780_v49 }
 0x8eb   :  { %v1785_v25 = vpop.f32.mrb[6].mxu0 }
 0x8ec   :  { %v1408_v52 = vadd.f32 %v1785_v25, %v1620_v51  ;;  %v1389_v53 = vpop.f32.mrb[7].mxu0 }
 0x8ed   :  { %v1407_v54 = vadd.f32 %v1620_v51, %v1389_v53 }
 0x8ee   :  { %v1410_v55 = vadd.f32 %v1408_v52, %v2100_v15 }
 0x8ef   :  { %v1409_v56 = vadd.f32 %v1407_v54, %v2090_v12  ;;  %v1456_v12 = vld [vmem:[%s2308_s11] sm:$0xff] }
 0x8f0   :  { %v1416_v57 = vsel %vm62_vm0, %v1410_v55, 0.0  ;;  %v1853_v4 = vpack.c.bf16 %v1457_v3, %v1456_v12 }
 0x8f1   :  { %1417 = vadd.xlane.f32.xlu1 %v1416_v57  ;;  %v1413_v58 = vsel %vm62_vm0, %v1409_v56, 0.0 }
 0x8f2   :  { %1414 = vadd.xlane.f32.xlu0 %v1413_v58  ;;  %1854 = vmatprep.subr.bf16.mxu1 %v1853_v4 }
 0x8f3   :  { %1856 = vmatpush3.bf16.msra.mxu1 %v1853_v4 }
 0x8f4   :  { %1858 = vmatprep.subr.bf16.mxu1 %v1857_v9 }
 0x8f7   :  { %1860 = vmatpush3.bf16.msra.mxu1 %v1857_v9 }
 0x97e   :  { %v1418_v59 = vpop.xlane.xlu1 %1417 }
 0x97f   :  { %v1421_v60 = vmul.f32 0.03125, %v1418_v59  ;;  %v1415_v61 = vpop.xlane.xlu0 %1414 }
 0x980   :  { %v1420_v62 = vmul.f32 0.03125, %v1415_v61 }
 0x981   :  { %v1423_v63 = vsub.f32 %v1410_v55, %v1421_v60 }
 0x982   :  { %v1422_v0 = vsub.f32 %v1409_v56, %v1420_v62 }
 0x983   :  { %v1425_v2 = vmul.f32 %v1423_v63, %v1423_v63 }
 0x984   :  { %v1424_v1 = vmul.f32 %v1422_v0, %v1422_v0 }
 0x985   :  { %v1429_v15 = vsel %vm62_vm0, %v1425_v2, 0.0 }
 0x986   :  { %v1426_v23 = vsel %vm62_vm0, %v1424_v1, 0.0 }
 0x987   :  { %1427 = vadd.xlane.f32.xlu0 %v1426_v23 }
 0x98b   :  { %1430 = vadd.xlane.f32.xlu0 %v1429_v15 }
 0xa14   :  { %v1428_v10 = vpop.xlane.xlu0 %1427 }
 0xa15   :  { %v1432_v11 = vmul.f32 0.03125, %v1428_v10 }
 0xa17   :  { %v1434_v13 = vadd.f32 1e-05, %v1432_v11 }
 0xa18   :  { %v1431_v14 = vpop.xlane.xlu0 %1430 }
 0xa19   :  { %1945 = vrsqrt.f32 %v1434_v13  ;;  %v1433_v16 = vmul.f32 0.03125, %v1431_v14 }
 0xa1b   :  { %v1435_v17 = vadd.f32 1e-05, %v1433_v16 }
 0xa1d   :  { %1947 = vrsqrt.f32 %v1435_v17 }
 0xa23   :  { %v1946_v18 = vpop.eup %1945 }
 0xa24   :  { %v1438_v20 = vmul.f32 %v1946_v18, %v1422_v0 }
 0xa26   :  { %v1446_v22 = vmul.f32 %v1621_v19, %v1438_v20 }
 0xa27   :  { %v1948_v24 = vpop.eup %1947 }
 0xa28   :  { %v1439_v26 = vmul.f32 %v1948_v24, %v1423_v63  ;;  %v1454_v29 = vadd.f32 %v1622_v21, %v1446_v22 }
 0xa2a   :  { %v1447_v30 = vmul.f32 %v1621_v19, %v1439_v26  ;;  %1794 = vmatprep.mubr.msk.f32.mxu1 %vm62_vm0, %v1454_v29  ;;  %1548 = vst.msk [vmem:[%s2310_s13] sm:$0xff] %vm62_vm0, %v1454_v29 }
 0xa2c   :  { %v1455_v27 = vadd.f32 %v1622_v21, %v1447_v30 }
 0xa2e   :  { %1549 = vst.msk [vmem:[%s2310_s13 + $0x8] sm:$0xff] %vm62_vm0, %v1455_v27  ;;  %1795 = vmatmul.mubr.msk.f32.vlgmr.msra.gmra.mrb[10].mxu1 %vm62_vm0, %v1455_v27 }
 0xa2f   :  { %1960 = shalt.err (!%p1957_p4)
}
 0xa30   :  { %s1961_s29 = scalar_lea.hbm %s2311_s14, 1024 }
 0xa31   :  { %p1962_p5 = scmp.ne.s32.totalorder %s2311_s14, %s1961_s29  ;;  %p1965_p6 = scmp.lt.u32.totalorder %s1961_s29, %s2311_s14 }
 0xa33   :  { %p1967_p7 = pnand %p1965_p6, %p1962_p5 }
 0xa35   :  { %1970 = shalt.err (!%p1967_p7)
}
 0xa36   :  { %s1981_s7 = smov 128   ;;  %s1982_s3 = smov 8   ;;  %v1623_v7 = vld [vmem:[%s2309_s12] ss:$0 sm:$0xff]  ;;  %vm1558_vm4 = vcmask 425216  }
 0xa37   :  { %1574 = dma.vmem_to_hbm [thread:$0]  %s1569_s26, 1024, %s2311_s14, [#allocation3], %s1981_s7, %s1981_s7, %s1982_s3  }
 0xa38   :  { %s1983_s1 = smov 32  }
 0xb01   :  { %v1796_v32 = vpop.f32.mrb[10].mxu1 }
 0xb02   :  { %v1539_v31 = vpop.f32.mrb[11].mxu1  ;;  %v1545_v28 = vadd.f32 %v1796_v32, %v1623_v7 }
 0xb03   :  { %v1540_v33 = vadd.f32 %v1623_v7, %v1539_v31 }
 0xb05   :  { %1552 = vrot.lane.b32.xlu0 %v1540_v33, %s1983_s1 }
 0xb09   :  { %1554 = vrot.lane.b32.xlu0 %v1545_v28, %s1983_s1 }
 0xb77   :  { %v1553_v34 = vpop.permute.xlu0 %1552 }
 0xb78   :  { %1559 = vst.msk [vmem:[%s2310_s13] sm:$0xff] %vm1558_vm4, %v1553_v34 }
 0xb7b   :  { %v1555_v35 = vpop.permute.xlu0 %1554 }
 0xb7c   :  { %1560 = vst.msk [vmem:[%s2310_s13 + $0x8] sm:$0xff] %vm1558_vm4, %v1555_v35 }
 0xb7d   :  { %1971 = dma.done.wait [#allocation3], 1024  }
 0xb7e   :  { %1972 = vsyncadd [#allocation3], 4294966272 }
 0xb7f   :  { %1580 = vsyncpa [#allocation3], 1 }

// kernel: forward.9
= control target key start
LH: loop header
LB: loop body
LE: loop exit
PB: predicated region body
PF: predicated region fallthrough
CT: control target
= control target key end

     0   :  { %v3818_v3 = vmov 0.0   ;;  %v3819_v4 = vmov 5   ;;  %v3820_v13 = vmov 4   ;;  %vm77_vm0 = vcmask 261120   ;;  %s3828_s19 = smov 96   ;;  %s3834_s21 = smov 28   ;;  %s4401_s5 = inlined_call_operand.vmem [shape: f32[32,144], index: 5, kind: input, shape index: {}]   ;;  %s4402_s1 = inlined_call_operand.vmem [shape: f32[16,9], index: 1, kind: input, shape index: {}]   ;;  %s4403_s0 = inlined_call_operand.vmem [shape: f32[16,32], index: 0, kind: input, shape index: {}]   ;;  %s4404_s2 = inlined_call_operand.vmem [shape: f32[16,3], index: 2, kind: input, shape index: {}]   ;;  %s4405_s3 = inlined_call_operand.vmem [shape: f32[1,16], index: 3, kind: input, shape index: {}]   ;;  %s4406_s6 = inlined_call_operand.vmem [shape: f32[1,144], index: 6, kind: input, shape index: {}]   ;;  %s4407_s4 = inlined_call_operand.vmem [shape: f32[16,16], index: 4, kind: input, shape index: {}]   ;;  %s4408_s7 = inlined_call_operand.vmem [shape: f32[32,32], index: 7, kind: input, shape index: {}]   ;;  %s4409_s8 = inlined_call_operand.vmem [shape: f32[1,32], index: 8, kind: input, shape index: {}]   ;;  %s4410_s11 = inlined_call_operand.vmem [shape: f32[32,20], index: 11, kind: input, shape index: {}]   ;;  %s4411_s9 = inlined_call_operand.vmem [shape: f32[1,32], index: 9, kind: input, shape index: {}]   ;;  %s4412_s10 = inlined_call_operand.vmem [shape: f32[1,32], index: 10, kind: input, shape index: {}]   ;;  %s4413_s13 = inlined_call_operand.vmem [shape: f32[16,68], index: 13, kind: output, shape index: {}]   ;;  %s4414_s12 = inlined_call_operand.vmem [shape: f32[1,20], index: 12, kind: input, shape index: {}]  }
   0x1   :  { %v54_v0 = vld [vmem:[%s4401_s5 + $0x8] sm:$0xff]  ;;  %v56_v1 = vld [vmem:[%s4401_s5 + $0x18] sm:$0xff]  ;;  %v53_v2 = vld [vmem:[%s4401_s5] sm:$0xff]  ;;  %148 = vmatprep.mubr.f32.mxu0 %v3818_v3  ;;  %3721 = vset.pattern.permute.xlu1 %v3819_v4  ;;  %v3821_v19 = vmov 1   ;;  %v3822_v20 = vmov 2   ;;  %v3823_v21 = vmov 7   ;;  %v67_v31 = vlaneseq }
   0x2   :  { %v3525_v5 = vpack.c.bf16 %v56_v1, %v54_v0  ;;  %v55_v6 = vld [vmem:[%s4401_s5 + $0x10] sm:$0xff]  ;;  %v58_v7 = vld [vmem:[%s4401_s5 + $0x28] sm:$0xff]  ;;  %v60_v8 = vld [vmem:[%s4401_s5 + $0x38] sm:$0xff]  ;;  %3720 = vset.pattern.permute.xlu0 %v3820_v13  ;;  %v3824_v22 = vmov 8   ;;  %v3825_v23 = vmov 3   ;;  %v3826_v25 = vmov 6  }
   0x3   :  { %v3527_v9 = vpack.c.bf16 %v55_v6, %v53_v2  ;;  %v3529_v10 = vpack.c.bf16 %v60_v8, %v58_v7  ;;  %v57_v11 = vld [vmem:[%s4401_s5 + $0x20] sm:$0xff]  ;;  %v59_v12 = vld [vmem:[%s4401_s5 + $0x30] sm:$0xff]  ;;  %v47_v16 = vld [vmem:[%s4402_s1 + $0x8] sm:$0xff]  ;;  %v3827_v26 = vmov 0   ;;  %v68_v33 = vshrl.u32 %v67_v31, 7  ;;  %s3835_s22 = smov 64  }
   0x4   :  { %3526 = vmatprep.subr.bf16.mxu0 %v3525_v5  ;;  %v46_v14 = vld [vmem:[%s4402_s1] sm:$0xff]  ;;  %v3531_v15 = vpack.c.bf16 %v59_v12, %v57_v11  ;;  %v45_v18 = vld [vmem:[%s4403_s0 + $0x8] sm:$0xff]  ;;  %vm3832_vm1 = vmmov 0   ;;  %vm365_vm2 = vcmask 31744   ;;  %vm734_vm4 = vcmask 64512   ;;  %s3837_s27 = smov 120  }
   0x5   :  { %3528 = vmatpush1.bf16.msra.mxu0 %v3527_v9  ;;  %256 = vperm.xlu1 %3721, %v46_v14   ;;  %v44_v17 = vld [vmem:[%s4403_s0] sm:$0xff]  ;;  %v49_v27 = vld [vmem:[%s4404_s2 + $0x8] sm:$0xff]  ;;  %v3967_v35 = vsub.s32 0, %v68_v33  ;;  %v73_v40 = vsub.s32 1, %v68_v33  ;;  %vm4057_vm3 = vmpackc.low %vm365_vm2, %vm365_vm2  ;;  %vm826_vm6 = vcmask 130048   ;;  %s3838_s28 = smov 56  }
   0x6   :  { %3530 = vmatprep.subr.bf16.mxu0 %v3529_v10  ;;  %236 = vperm.xlu0 %3720, %v46_v14   ;;  %v48_v24 = vld [vmem:[%s4404_s2] sm:$0xff]  ;;  %vm4085_vm5 = vmpackc.low %vm734_vm4, %vm734_vm4  ;;  %s3839_s29 = smov 24   ;;  %s3840_s5 = smov 80   ;;  %vm3095_vm7 = vcmask 425216   ;;  %vm3108_vm8 = vcmask 556448  }
   0x7   :  { %v3117_v28 = vld [vmem:[%s4405_s3] ss:$0 sm:$0xff]  ;;  %s3829_s3 = smov 112   ;;  %s3841_s16 = smov 48  }
   0x8   :  { %v61_v37 = vld [vmem:[%s4406_s6] sm:$0x3]  ;;  %s3830_s6 = smov 32   ;;  %s3842_s17 = smov 20  }
   0x9   :  { %3532 = vmatpush1.bf16.msra.mxu0 %v3531_v15  ;;  %260 = vperm.xlu1 %3721, %v47_v16   ;;  %v70_v38 = vrot.slane %v61_v37, %v3967_v35  ;;  %v74_v45 = vrot.slane %v61_v37, %v73_v40  ;;  %s3843_s18 = smov 72   ;;  %s3846_s23 = smov 52  }
   0xa   :  { %240 = vperm.xlu0 %3720, %v47_v16  }
   0xc   :  { %3115 = vmatmul.mubr.msk.f32.vlgmr.msra.gmra.mrb[0].mxu0 %vm77_vm0, %v44_v17 }
   0xd   :  { %154 = vmatprep.mubr.f32.mxu0 %v3818_v3  ;;  %3723 = vset.pattern.permute.xlu1 %v3821_v19 }
   0xe   :  { %178 = vperm.xlu1 %3723, %v47_v16   ;;  %3722 = vset.pattern.permute.xlu0 %v3821_v19 }
   0xf   :  { %174 = vperm.xlu0 %3722, %v46_v14  }
  0x10   :  { %3116 = vmatmul.mubr.msk.f32.gmra.mrb[2].mxu0 %vm77_vm0, %v45_v18 }
  0x11   :  { %3351 = vmatprep.mubr.msk.f32.mxu0 %vm3832_vm1, %v3818_v3 }
  0x12   :  { %3724 = vset.pattern.permute.xlu1 %v3822_v20 }
  0x13   :  { %194 = vperm.xlu1 %3724, %v46_v14   ;;  %3725 = vset.pattern.permute.xlu0 %v3822_v20 }
  0x14   :  { %198 = vperm.xlu0 %3725, %v47_v16  }
  0x17   :  { %3726 = vset.pattern.permute.xlu1 %v3823_v21 }
  0x18   :  { %296 = vperm.xlu1 %3726, %v46_v14   ;;  %3727 = vset.pattern.permute.xlu0 %v3824_v22 }
  0x19   :  { %316 = vperm.xlu0 %3727, %v46_v14  }
  0x1c   :  { %300 = vperm.xlu1 %3726, %v47_v16  }
  0x1d   :  { %3730 = vset.pattern.permute.xlu0 %v3825_v23 }
  0x1e   :  { %230 = vperm.xlu0 %3730, %v47_v16  }
  0x20   :  { %3728 = vset.pattern.permute.xlu1 %v3824_v22 }
  0x21   :  { %320 = vperm.xlu1 %3728, %v47_v16  }
  0x22   :  { %3732 = vset.pattern.permute.xlu0 %v3821_v19 }
  0x23   :  { %276 = vperm.xlu0 %3732, %v48_v24  }
  0x25   :  { %3729 = vset.pattern.permute.xlu1 %v3825_v23 }
  0x26   :  { %226 = vperm.xlu1 %3729, %v46_v14  }
  0x27   :  { %3735 = vset.pattern.permute.xlu0 %v3826_v25 }
  0x28   :  { %290 = vperm.xlu0 %3735, %v47_v16  }
  0x2a   :  { %3731 = vset.pattern.permute.xlu1 %v3827_v26 }
  0x2b   :  { %163 = vperm.xlu1 %3731, %v46_v14  }
  0x2c   :  { %3736 = vset.pattern.permute.xlu0 %v3827_v26 }
  0x2d   :  { %215 = vperm.xlu0 %3736, %v48_v24  }
  0x2f   :  { %168 = vperm.xlu1 %3731, %v47_v16  }
  0x31   :  { %3739 = vset.pattern.permute.xlu0 %v3822_v20 }
  0x32   :  { %340 = vperm.xlu0 %3739, %v49_v27  }
  0x33   :  { %3733 = vset.pattern.permute.xlu1 %v3821_v19 }
  0x34   :  { %280 = vperm.xlu1 %3733, %v49_v27  }
  0x36   :  { %350 = vrot.lane.b32.xlu0 %v3117_v28, %s3828_s19 }
  0x38   :  { %3734 = vset.pattern.permute.xlu1 %v3826_v25 }
  0x39   :  { %286 = vperm.xlu1 %3734, %v46_v14  }
  0x3d   :  { %3737 = vset.pattern.permute.xlu1 %v3827_v26 }
  0x3e   :  { %220 = vperm.xlu1 %3737, %v49_v27  }
  0x42   :  { %3738 = vset.pattern.permute.xlu1 %v3822_v20 }
  0x43   :  { %336 = vperm.xlu1 %3738, %v48_v24  }
  0x84   :  { %v257_v29 = vpop.permute.xlu1 %256 }
  0x85   :  { %v237_v34 = vpop.permute.xlu0 %236 }
  0x88   :  { %v261_v30 = vpop.permute.xlu1 %260 }
  0x89   :  { %v241_v39 = vpop.permute.xlu0 %240 }
  0x8d   :  { %v179_v32 = vpop.permute.xlu1 %178 }
  0x8e   :  { %v175_v51 = vpop.permute.xlu0 %174 }
  0x92   :  { %v195_v36 = vpop.permute.xlu1 %194 }
  0x93   :  { %v199_v58 = vpop.permute.xlu0 %198 }
  0x97   :  { %v297_v41 = vpop.permute.xlu1 %296 }
  0x98   :  { %v317_v2 = vpop.permute.xlu0 %316 }
  0x9b   :  { %v301_v50 = vpop.permute.xlu1 %300 }
  0x9d   :  { %v231_v7 = vpop.permute.xlu0 %230 }
  0xa0   :  { %v321_v61 = vpop.permute.xlu1 %320 }
  0xa2   :  { %v277_v9 = vpop.permute.xlu0 %276 }
  0xa5   :  { %v227_v5 = vpop.permute.xlu1 %226 }
  0xa7   :  { %v291_v11 = vpop.permute.xlu0 %290 }
  0xaa   :  { %v164_v6 = vpop.permute.xlu1 %163 }
  0xac   :  { %v216_v13 = vpop.permute.xlu0 %215 }
  0xae   :  { %v169_v8 = vpop.permute.xlu1 %168 }
  0xb1   :  { %v341_v15 = vpop.permute.xlu0 %340 }
  0xb3   :  { %v281_v10 = vpop.permute.xlu1 %280 }
  0xb5   :  { %v351_v17 = vpop.permute.xlu0 %350 }
  0xb8   :  { %v287_v12 = vpop.permute.xlu1 %286 }
  0xbd   :  { %v221_v14 = vpop.permute.xlu1 %220 }
  0xc2   :  { %v337_v16 = vpop.permute.xlu1 %336 }
  0xdf   :  { %v150_v42 = vpop.f32.mrb[0].mxu0 }
  0xe0   :  { %v3973_v43 = vadd.f32 %v150_v42, %v70_v38  ;;  %v152_v44 = vpop.f32.mrb[1].mxu0 }
  0xe1   :  { %v153_v52 = vadd.f32 %v152_v44, %v74_v45 }
  0xe2   :  { %v243_v46 = vmul.f32 %v237_v34, %v3973_v43  ;;  %v181_v55 = vmul.f32 %v175_v51, %v3973_v43  ;;  %v303_v0 = vmul.f32 %v297_v41, %v3973_v43  ;;  %v233_v21 = vmul.f32 %v227_v5, %v3973_v43 }
  0xe3   :  { %v156_v47 = vpop.f32.mrb[2].mxu0  ;;  %v263_v57 = vmul.f32 %v257_v29, %v153_v52  ;;  %v201_v60 = vmul.f32 %v195_v36, %v153_v52  ;;  %v323_v4 = vmul.f32 %v317_v2, %v153_v52  ;;  %v171_v25 = vmul.f32 %v164_v6, %v3973_v43 }
  0xe4   :  { %v3976_v48 = vadd.f32 %v156_v47, %v70_v38  ;;  %v158_v49 = vpop.f32.mrb[3].mxu0  ;;  %247 = vrot.lane.b32.xlu1 %v243_v46, %s3829_s3  ;;  %v293_v51 = vmul.f32 %v287_v12, %v3973_v43 }
  0xe5   :  { %v159_v53 = vadd.f32 %v158_v49, %v74_v45 }
  0xe6   :  { %v304_v54 = vmul.f32 %v301_v50, %v3976_v48  ;;  %v244_v63 = vmul.f32 %v241_v39, %v3976_v48  ;;  %v182_v1 = vmul.f32 %v179_v32, %v3976_v48  ;;  %v234_v33 = vmul.f32 %v231_v7, %v3976_v48 }
  0xe7   :  { %v264_v56 = vmul.f32 %v261_v30, %v159_v53  ;;  %v202_v59 = vmul.f32 %v199_v58, %v159_v53  ;;  %v324_v62 = vmul.f32 %v321_v61, %v159_v53  ;;  %v294_v39 = vmul.f32 %v291_v11, %v3976_v48 }
  0xe8   :  { %309 = vrot.lane.b32.xlu0 %v304_v54, %s3829_s3  ;;  %185 = vrot.lane.b32.xlu1 %v181_v55, %s3829_s3  ;;  %v172_v49 = vmul.f32 %v169_v8, %v3976_v48  ;;  %v4050_v11 = vpack.i.bf16 %v3976_v48, %v3973_v43 }
  0xec   :  { %269 = vrot.lane.b32.xlu0 %v264_v56, %s3828_s19  ;;  %267 = vrot.lane.b32.xlu1 %v263_v57, %s3828_s19  ;;  %v3831_v56 = vmov 0.0|0.0  }
  0xed   :  { %3551 = vmatprep.subr.bf16.mxu0 %v3831_v56 }
  0xf0   :  { %207 = vrot.lane.b32.xlu0 %v202_v59, %s3828_s19  ;;  %205 = vrot.lane.b32.xlu1 %v201_v60, %s3828_s19 }
  0xf4   :  { %329 = vrot.lane.b32.xlu0 %v324_v62, %s3828_s19  ;;  %249 = vrot.lane.b32.xlu1 %v244_v63, %s3829_s3 }
  0xf8   :  { %307 = vrot.lane.b32.xlu1 %v303_v0, %s3829_s3 }
  0xfc   :  { %187 = vrot.lane.b32.xlu1 %v182_v1, %s3829_s3 }
 0x100   :  { %327 = vrot.lane.b32.xlu1 %v323_v4, %s3828_s19 }
 0x156   :  { %v248_v18 = vpop.permute.xlu1 %247 }
 0x157   :  { %v253_v22 = vadd.f32 %v248_v18, %v233_v21 }
 0x15a   :  { %v310_v19 = vpop.permute.xlu0 %309  ;;  %v186_v20 = vpop.permute.xlu1 %185 }
 0x15b   :  { %v191_v27 = vadd.f32 %v186_v20, %v171_v25  ;;  %v314_v44 = vadd.f32 %v310_v19, %v294_v39 }
 0x15e   :  { %v270_v23 = vpop.permute.xlu0 %269  ;;  %v268_v24 = vpop.permute.xlu1 %267 }
 0x15f   :  { %v273_v26 = vadd.f32 %v268_v24, %v253_v22 }
 0x161   :  { %v283_v28 = vadd.f32 %v277_v9, %v273_v26 }
 0x162   :  { %v206_v29 = vpop.permute.xlu1 %205  ;;  %v208_v32 = vpop.permute.xlu0 %207 }
 0x163   :  { %v3997_v30 = vmul.f32 %v351_v17, %v283_v28  ;;  %v211_v31 = vadd.f32 %v206_v29, %v191_v27 }
 0x165   :  { %v223_v34 = vadd.f32 %v216_v13, %v211_v31  ;;  %361 = vrot.lane.b32.xlu1 %v3997_v30, %s3830_s6  ;;  %v619_v0 = vmul.f32 %v3997_v30, %v3997_v30  ;;  %v3833_v31 = vmov 1.0  }
 0x166   :  { %v250_v36 = vpop.permute.xlu1 %249  ;;  %v330_v41 = vpop.permute.xlu0 %329 }
 0x167   :  { %v4002_v37 = vmul.f32 %v351_v17, %v223_v34  ;;  %v254_v38 = vadd.f32 %v250_v36, %v234_v33  ;;  %v334_v46 = vadd.f32 %v330_v41, %v314_v44 }
 0x169   :  { %v274_v40 = vadd.f32 %v270_v23, %v254_v38  ;;  %447 = vrot.lane.b32.xlu1 %v4002_v37, %s3830_s6  ;;  %v344_v53 = vadd.f32 %v341_v15, %v334_v46  ;;  %v617_v60 = vmul.f32 %v4002_v37, %v4002_v37 }
 0x16a   :  { %v308_v42 = vpop.permute.xlu1 %307 }
 0x16b   :  { %v284_v45 = vadd.f32 %v281_v10, %v274_v40  ;;  %v313_v54 = vadd.f32 %v308_v42, %v293_v51  ;;  %v4016_v61 = vmul.f32 %v351_v17, %v344_v53  ;;  %v621_v5 = vadd.f32 %v619_v0, %v617_v60 }
 0x16d   :  { %v4007_v47 = vmul.f32 %v351_v17, %v284_v45  ;;  %v624_v7 = vmul.f32 %v4016_v61, %v4016_v61 }
 0x16e   :  { %v188_v50 = vpop.permute.xlu1 %187 }
 0x16f   :  { %v192_v52 = vadd.f32 %v188_v50, %v172_v49  ;;  %363 = vrot.lane.b32.xlu0 %v4007_v47, %s3830_s6  ;;  %v620_v4 = vmul.f32 %v4007_v47, %v4007_v47 }
 0x171   :  { %v212_v55 = vadd.f32 %v208_v32, %v192_v52 }
 0x172   :  { %v328_v57 = vpop.permute.xlu1 %327 }
 0x173   :  { %v224_v58 = vadd.f32 %v221_v14, %v212_v55  ;;  %v333_v59 = vadd.f32 %v328_v57, %v313_v54 }
 0x175   :  { %v4018_v62 = vmul.f32 %v351_v17, %v224_v58  ;;  %v343_v63 = vadd.f32 %v337_v16, %v333_v59  ;;  %v4113_v58 = vld [vmem:[%s4407_s4 + $0x8] sm:$0xff] }
 0x177   :  { %v4022_v1 = vmul.f32 %v351_v17, %v343_v63  ;;  %449 = vrot.lane.b32.xlu0 %v4018_v62, %s3830_s6  ;;  %v618_v2 = vmul.f32 %v4018_v62, %v4018_v62  ;;  %v4118_v63 = vld [vmem:[%s4407_s4] sm:$0xff]  ;;  %s3836_s4 = smov 88  }
 0x179   :  { %v622_v6 = vadd.f32 %v620_v4, %v618_v2  ;;  %v623_v8 = vmul.f32 %v4022_v1, %v4022_v1 }
 0x17b   :  { %v4036_v9 = vadd.f32 %v624_v7, %v622_v6  ;;  %v4038_v10 = vadd.f32 %v623_v8, %v621_v5 }
 0x17d   :  { %631 = vrot.lane.b32.xlu0 %v4036_v9, %s3830_s6  ;;  %629 = vrot.lane.b32.xlu1 %v4038_v10, %s3830_s6 }
 0x181   :  { %534 = vrot.lane.b32.xlu0 %v4016_v61, %s3830_s6  ;;  %532 = vrot.lane.b32.xlu1 %v4022_v1, %s3830_s6 }
 0x185   :  { %3741 = vrot.lane.b32.xlu1 %v4050_v11, %s3828_s19  ;;  %s3844_s19 = smov 104  }
 0x1d7   :  { %v362_v12 = vpop.permute.xlu1 %361 }
 0x1d8   :  { %3330 = vmatprep.mubr.msk.f32.mxu1 %vm365_vm2, %v362_v12 }
 0x1db   :  { %v448_v16 = vpop.permute.xlu1 %447 }
 0x1e1   :  { %v364_v13 = vpop.permute.xlu0 %363 }
 0x1e2   :  { %v3533_v15 = vpack.c.bf16 %v364_v13, %v362_v12 }
 0x1e4   :  { %3535 = vmatprep.subr.msk.bf16.mxu1 %vm4057_vm3, %v3533_v15 }
 0x1e5   :  { %3538 = vmatpush3.bf16.xpose.msk.msra.mxu1 %vm4057_vm3, %v3533_v15 }
 0x1e9   :  { %v450_v17 = vpop.permute.xlu0 %449 }
 0x1ea   :  { %v3539_v18 = vpack.c.bf16 %v450_v17, %v448_v16 }
 0x1ec   :  { %3331 = vmatmul.mubr.msk.f32.vlgmr.msra.gmra.mrb[0].mxu1 %vm365_vm2, %v364_v13  ;;  %3541 = vmatprep.subr.msk.bf16.mxu1 %vm4057_vm3, %v3539_v18 }
 0x1ed   :  { %3544 = vmatpush3.bf16.xpose.msk.msra.mxu1 %vm4057_vm3, %v3539_v18  ;;  %3337 = vmatprep.mubr.msk.f32.mxu1 %vm365_vm2, %v448_v16 }
 0x1ef   :  { %v632_v19 = vpop.permute.xlu0 %631  ;;  %v630_v20 = vpop.permute.xlu1 %629 }
 0x1f0   :  { %v3552_v21 = vpack.c.bf16 %v632_v19, %v630_v20  ;;  %v638_v22 = vsel %vm365_vm2, %v632_v19, 0.0  ;;  %v635_v23 = vsel %vm365_vm2, %v630_v20, 0.0 }
 0x1f1   :  { %639 = vadd.xlane.f32.xlu1 %v638_v22  ;;  %636 = vadd.xlane.f32.xlu0 %v635_v23 }
 0x1f2   :  { %3554 = vmatpush3.bf16.xpose.msk.msra.mxu0 %vm4057_vm3, %v3552_v21 }
 0x1f3   :  { %v535_v24 = vpop.permute.xlu0 %534  ;;  %v533_v25 = vpop.permute.xlu1 %532 }
 0x1f4   :  { %v3545_v26 = vpack.c.bf16 %v535_v24, %v533_v25  ;;  %3338 = vmatmul.mubr.msk.f32.vlgmr.msra.gmra.mrb[0].mxu1 %vm365_vm2, %v450_v17 }
 0x1f5   :  { %3344 = vmatprep.mubr.msk.f32.mxu1 %vm365_vm2, %v533_v25 }
 0x1f6   :  { %3547 = vmatprep.subr.msk.bf16.mxu1 %vm4057_vm3, %v3545_v26 }
 0x1f7   :  { %3550 = vmatpush3.bf16.xpose.msk.msra.mxu1 %vm4057_vm3, %v3545_v26  ;;  %v3742_v27 = vpop.permute.xlu1 %3741 }
 0x1f8   :  { %v3744_v28 = vunpack.i.h.bf16 %v3742_v27  ;;  %v3743_v29 = vunpack.i.l.bf16 %v3742_v27 }
 0x1f9   :  { %3352 = vmatmul.mubr.msk.f32.vlgmr.msra.gmra.mrb[4].mxu0 %vm365_vm2, %v3833_v31 }
 0x1fa   :  { %v3555_v33 = vpack.c.bf16 %v3744_v28, %v3743_v29  ;;  %3358 = vmatprep.mubr.msk.f32.mxu0 %vm734_vm4, %v3973_v43 }
 0x1fc   :  { %3557 = vmatprep.subr.msk.bf16.mxu0 %vm4085_vm5, %v3555_v33 }
 0x1fd   :  { %3560 = vmatpush3.bf16.xpose.msk.msra.mxu0 %vm4085_vm5, %v3555_v33 }
 0x1fe   :  { %3345 = vmatmul.mubr.msk.f32.vlgmr.msra.gmra.mrb[0].mxu1 %vm365_vm2, %v535_v24 }
 0x202   :  { %938 = vrot.lane.b32.xlu1 %v3997_v30, %s3834_s21 }
 0x204   :  { %3359 = vmatmul.mubr.msk.f32.vlgmr.msra.gmra.mrb[6].mxu0 %vm734_vm4, %v3976_v48 }
 0x206   :  { %3746 = vrot.lane.b32.xlu1 %v4050_v11, %s3835_s22 }
 0x20a   :  { %1021 = vrot.lane.b32.xlu1 %v4002_v37, %s3834_s21 }
 0x20e   :  { %1189 = vrot.lane.b32.xlu1 %v4038_v10, %s3834_s21 }
 0x212   :  { %1104 = vrot.lane.b32.xlu1 %v4022_v1, %s3834_s21 }
 0x27e   :  { %v640_v34 = vpop.xlane.xlu1 %639  ;;  %v637_v49 = vpop.xlane.xlu0 %636 }
 0x282   :  { %v939_v36 = vpop.permute.xlu1 %938 }
 0x283   :  { %3372 = vmatprep.mubr.msk.f32.mxu1 %vm365_vm2, %v939_v36 }
 0x286   :  { %v3747_v38 = vpop.permute.xlu1 %3746 }
 0x287   :  { %v3749_v39 = vunpack.i.h.bf16 %v3747_v38  ;;  %v3748_v40 = vunpack.i.l.bf16 %v3747_v38 }
 0x289   :  { %v3561_v41 = vpack.c.bf16 %v3749_v39, %v3748_v40 }
 0x28a   :  { %v1022_v24 = vpop.permute.xlu1 %1021 }
 0x28b   :  { %3562 = vmatprep.subr.bf16.mxu0 %v3561_v41 }
 0x28c   :  { %3564 = vmatpush3.bf16.msra.mxu0 %v3561_v41 }
 0x28d   :  { %3583 = vmatprep.subr.bf16.mxu0 %v3831_v56 }
 0x2cc   :  { %v714_v42 = vpop.f32.mrb[4].mxu0 }
 0x2cd   :  { %v3353_v44 = vpop.f32.mrb[5].mxu0  ;;  %v721_v45 = vrot.slane %v714_v42, %v3967_v35 }
 0x2cf   :  { %v723_v50 = vadd.f32 %v721_v45, %v640_v34  ;;  %v722_v53 = vadd.f32 %v721_v45, %v637_v49  ;;  %v1190_v34 = vpop.permute.xlu1 %1189 }
 0x2d0   :  { %v1195_v40 = vsel %vm365_vm2, %v1190_v34, 0.0 }
 0x2d1   :  { %v3346_v46 = vpop.f32.mrb[0].mxu1 }
 0x2d2   :  { %v725_v51 = vmul.f32 2.0, %v3346_v46  ;;  %v606_v52 = vpop.f32.mrb[1].mxu1 }
 0x2d3   :  { %v724_v54 = vmul.f32 2.0, %v606_v52 }
 0x2d4   :  { %v727_v55 = vsub.f32 %v723_v50, %v725_v51 }
 0x2d5   :  { %v726_v57 = vsub.f32 %v722_v53, %v724_v54 }
 0x2d6   :  { %v823_v4 = vmul.f32 0.5, %v727_v55 }
 0x2d7   :  { %v3360_v59 = vpop.f32.mrb[6].mxu0  ;;  %v822_v6 = vmul.f32 0.5, %v726_v57 }
 0x2d8   :  { %v819_v60 = vmul.f32 0.35355338, %v3360_v59  ;;  %v809_v0 = vpop.f32.mrb[7].mxu0 }
 0x2d9   :  { %v818_v2 = vmul.f32 0.35355338, %v809_v0 }
 0x2da   :  { %v821_v5 = vadd.f32 %v819_v60, %v4113_v58 }
 0x2db   :  { %v820_v7 = vadd.f32 %v818_v2, %v4118_v63 }
 0x2dc   :  { %v825_v8 = vsub.f32 %v821_v5, %v823_v4 }
 0x2dd   :  { %v824_v12 = vsub.f32 %v820_v7, %v822_v6 }
 0x2de   :  { %v830_v15 = vsel %vm826_vm6, %v825_v8, -inf }
 0x2df   :  { %v827_v13 = vsel %vm826_vm6, %v824_v12, -inf }
 0x2e0   :  { %828 = vmax.xlane.f32.xlu0 %v827_v13 }
 0x2e4   :  { %831 = vmax.xlane.f32.xlu0 %v830_v15 }
 0x2fa   :  { %940 = vrot.lane.b32.xlu0 %v4007_v47, %s3834_s21 }
 0x2fe   :  { %1023 = vrot.lane.b32.xlu0 %v4018_v62, %s3834_s21 }
 0x302   :  { %1191 = vrot.lane.b32.xlu0 %v4036_v9, %s3834_s21 }
 0x36d   :  { %v829_v16 = vpop.xlane.xlu0 %828 }
 0x36e   :  { %v833_v17 = vsub.f32 %v824_v12, %v829_v16 }
 0x370   :  { %v835_v18 = vmul.f32 1.442695, %v833_v17 }
 0x371   :  { %v832_v19 = vpop.xlane.xlu0 %831 }
 0x372   :  { %3780 = vpow2.f32 %v835_v18  ;;  %v834_v20 = vsub.f32 %v825_v8, %v832_v19 }
 0x374   :  { %v837_v21 = vmul.f32 1.442695, %v834_v20 }
 0x375   :  { %v941_v22 = vpop.permute.xlu0 %940 }
 0x376   :  { %3782 = vpow2.f32 %v837_v21  ;;  %v3565_v23 = vpack.c.bf16 %v941_v22, %v939_v36  ;;  %v1105_v36 = vpop.permute.xlu1 %1104 }
 0x378   :  { %3567 = vmatprep.subr.msk.bf16.mxu1 %vm4057_vm3, %v3565_v23 }
 0x379   :  { %3570 = vmatpush3.bf16.xpose.msk.msra.mxu1 %vm4057_vm3, %v3565_v23  ;;  %v1024_v25 = vpop.permute.xlu0 %1023 }
 0x37a   :  { %v3571_v26 = vpack.c.bf16 %v1024_v25, %v1022_v24 }
 0x37c   :  { %v3781_v27 = vpop.eup %3780  ;;  %3573 = vmatprep.subr.msk.bf16.mxu1 %vm4057_vm3, %v3571_v26 }
 0x37d   :  { %v839_v28 = vsel %vm826_vm6, %v3781_v27, 0.0  ;;  %v1192_v38 = vpop.permute.xlu0 %1191 }
 0x37e   :  { %840 = vadd.xlane.f32.xlu1 %v839_v28  ;;  %v1198_v39 = vsel %vm365_vm2, %v1192_v38, 0.0  ;;  %v3584_v55 = vpack.c.bf16 %v1192_v38, %v1190_v34 }
 0x380   :  { %v3783_v29 = vpop.eup %3782  ;;  %3373 = vmatmul.mubr.msk.f32.vlgmr.msra.gmra.mrb[2].mxu1 %vm365_vm2, %v941_v22 }
 0x381   :  { %3576 = vmatpush3.bf16.xpose.msk.msra.mxu1 %vm4057_vm3, %v3571_v26  ;;  %3379 = vmatprep.mubr.msk.f32.mxu1 %vm365_vm2, %v1022_v24  ;;  %v842_v33 = vsel %vm826_vm6, %v3783_v29, 0.0 }
 0x382   :  { %843 = vadd.xlane.f32.xlu0 %v842_v33 }
 0x388   :  { %3380 = vmatmul.mubr.msk.f32.vlgmr.msra.gmra.mrb[2].mxu1 %vm365_vm2, %v1024_v25 }
 0x389   :  { %3386 = vmatprep.mubr.msk.f32.mxu1 %vm365_vm2, %v1105_v36 }
 0x38f   :  { %3751 = vrot.lane.b32.xlu1 %v4050_v11, %s3836_s4 }
 0x393   :  { %1287 = vrot.lane.b32.xlu1 %v3976_v48, %s3837_s27 }
 0x398   :  { %1106 = vrot.lane.b32.xlu0 %v4016_v61, %s3834_s21 }
 0x39c   :  { %1285 = vrot.lane.b32.xlu0 %v3973_v43, %s3837_s27 }
 0x3b7   :  { %1199 = vadd.xlane.f32.xlu1 %v1198_v39 }
 0x3bb   :  { %1196 = vadd.xlane.f32.xlu0 %v1195_v40 }
 0x40b   :  { %v841_v41 = vpop.xlane.xlu1 %840 }
 0x40c   :  { %3784 = vrcp.f32 %v841_v41 }
 0x40f   :  { %v844_v42 = vpop.xlane.xlu0 %843  ;;  %v3752_v49 = vpop.permute.xlu1 %3751 }
 0x410   :  { %3786 = vrcp.f32 %v844_v42  ;;  %v3754_v51 = vunpack.i.h.bf16 %v3752_v49  ;;  %v3753_v52 = vunpack.i.l.bf16 %v3752_v49 }
 0x412   :  { %v3587_v57 = vpack.c.bf16 %v3754_v51, %v3753_v52 }
 0x413   :  { %v1107_v44 = vpop.permute.xlu0 %1106  ;;  %v1288_v60 = vpop.permute.xlu1 %1287 }
 0x414   :  { %v3577_v45 = vpack.c.bf16 %v1107_v44, %v1105_v36 }
 0x416   :  { %v3785_v46 = vpop.eup %3784  ;;  %3579 = vmatprep.subr.msk.bf16.mxu1 %vm4057_vm3, %v3577_v45 }
 0x417   :  { %3582 = vmatpush3.bf16.xpose.msk.msra.mxu1 %vm4057_vm3, %v3577_v45  ;;  %v4155_v50 = vmul.f32 %v3785_v46, %v3781_v27  ;;  %v1286_v59 = vpop.permute.xlu0 %1285 }
 0x419   :  { %3365 = vmatprep.mubr.msk.f32.mxu0 %vm826_vm6, %v4155_v50 }
 0x41a   :  { %v3787_v53 = vpop.eup %3786 }
 0x41b   :  { %v4159_v54 = vmul.f32 %v3787_v53, %v3783_v29 }
 0x41d   :  { %3366 = vmatmul.mubr.msk.f32.vlgmr.msra.gmra.mrb[8].mxu0 %vm826_vm6, %v4159_v54 }
 0x41e   :  { %3586 = vmatpush3.bf16.xpose.msk.msra.mxu0 %vm4057_vm3, %v3584_v55  ;;  %3387 = vmatmul.mubr.msk.f32.vlgmr.msra.gmra.mrb[2].mxu1 %vm365_vm2, %v1107_v44 }
 0x41f   :  { %3589 = vmatprep.subr.msk.bf16.mxu0 %vm4085_vm5, %v3587_v57  ;;  %3393 = vmatprep.mubr.msk.f32.mxu0 %vm3832_vm1, %v3818_v3 }
 0x425   :  { %3394 = vmatmul.mubr.msk.f32.vlgmr.msra.gmra.mrb[10].mxu0 %vm365_vm2, %v3833_v31 }
 0x426   :  { %3592 = vmatpush3.bf16.xpose.msk.msra.mxu0 %vm4085_vm5, %v3587_v57  ;;  %3400 = vmatprep.mubr.msk.f32.mxu0 %vm734_vm4, %v1286_v59 }
 0x42d   :  { %3401 = vmatmul.mubr.msk.f32.vlgmr.msra.gmra.mrb[12].mxu0 %vm734_vm4, %v1288_v60 }
 0x444   :  { %v1200_v12 = vpop.xlane.xlu1 %1199 }
 0x448   :  { %v1197_v13 = vpop.xlane.xlu0 %1196 }
 0x4f0   :  { %v4176_v0 = vpop.f32.mrb[8].mxu0 }
 0x4f1   :  { %v4178_v2 = vpop.f32.mrb[9].mxu0  ;;  %v3388_v4 = vpop.f32.mrb[2].mxu1 }
 0x4f2   :  { %v1178_v5 = vpop.f32.mrb[3].mxu1  ;;  %v1282_v15 = vmul.f32 2.0, %v3388_v4 }
 0x4f3   :  { %v1281_v16 = vmul.f32 2.0, %v1178_v5 }
 0x4f8   :  { %v1271_v6 = vpop.f32.mrb[10].mxu0 }
 0x4f9   :  { %v1278_v7 = vrot.slane %v1271_v6, %v3967_v35  ;;  %v3395_v8 = vpop.f32.mrb[11].mxu0 }
 0x4fb   :  { %v1279_v17 = vadd.f32 %v1278_v7, %v1197_v13  ;;  %v1280_v18 = vadd.f32 %v1278_v7, %v1200_v12 }
 0x4fd   :  { %v1283_v19 = vsub.f32 %v1279_v17, %v1281_v16  ;;  %v1284_v20 = vsub.f32 %v1280_v18, %v1282_v15 }
 0x4ff   :  { %v1381_v26 = vmul.f32 0.5, %v1284_v20  ;;  %v1380_v28 = vmul.f32 0.5, %v1283_v19 }
 0x500   :  { %v3402_v21 = vpop.f32.mrb[12].mxu0 }
 0x501   :  { %v1377_v22 = vmul.f32 0.35355338, %v3402_v21  ;;  %v1367_v23 = vpop.f32.mrb[13].mxu0 }
 0x502   :  { %v1376_v24 = vmul.f32 0.35355338, %v1367_v23 }
 0x503   :  { %v1379_v25 = vadd.f32 %v1377_v22, %v4113_v58 }
 0x504   :  { %v1378_v27 = vadd.f32 %v1376_v24, %v4118_v63 }
 0x505   :  { %v1383_v29 = vsub.f32 %v1379_v25, %v1381_v26  ;;  %v63_v26 = vld [vmem:[%s4408_s7 + $0x8] sm:$0xff] }
 0x506   :  { %v1382_v33 = vsub.f32 %v1378_v27, %v1380_v28  ;;  %v62_v27 = vld [vmem:[%s4408_s7] sm:$0xff] }
 0x507   :  { %v1387_v36 = vsel %vm826_vm6, %v1383_v29, -inf }
 0x508   :  { %v1384_v34 = vsel %vm826_vm6, %v1382_v33, -inf }
 0x509   :  { %1385 = vmax.xlane.f32.xlu0 %v1384_v34 }
 0x50d   :  { %1388 = vmax.xlane.f32.xlu0 %v1387_v36 }
 0x596   :  { %v1386_v38 = vpop.xlane.xlu0 %1385 }
 0x597   :  { %v1390_v39 = vsub.f32 %v1382_v33, %v1386_v38 }
 0x599   :  { %v1392_v40 = vmul.f32 1.442695, %v1390_v39 }
 0x59a   :  { %v1389_v41 = vpop.xlane.xlu0 %1388 }
 0x59b   :  { %3788 = vpow2.f32 %v1392_v40  ;;  %v1391_v42 = vsub.f32 %v1383_v29, %v1389_v41 }
 0x59d   :  { %v1394_v44 = vmul.f32 1.442695, %v1391_v42 }
 0x59f   :  { %3790 = vpow2.f32 %v1394_v44 }
 0x5a5   :  { %v3789_v45 = vpop.eup %3788 }
 0x5a6   :  { %v1396_v46 = vsel %vm826_vm6, %v3789_v45, 0.0 }
 0x5a7   :  { %1397 = vadd.xlane.f32.xlu1 %v1396_v46 }
 0x5a9   :  { %v3791_v49 = vpop.eup %3790 }
 0x5aa   :  { %v1399_v51 = vsel %vm826_vm6, %v3791_v49, 0.0 }
 0x5ab   :  { %1400 = vadd.xlane.f32.xlu0 %v1399_v51 }
 0x5b8   :  { %3756 = vrot.lane.b32.xlu1 %v4050_v11, %s3838_s28 }
 0x5bc   :  { %1659 = vrot.lane.b32.xlu1 %v4007_v47, %s3839_s29 }
 0x5c0   :  { %1740 = vrot.lane.b32.xlu1 %v4002_v37, %s3839_s29 }
 0x5c1   :  { %1657 = vrot.lane.b32.xlu0 %v3997_v30, %s3839_s29 }
 0x5c4   :  { %1908 = vrot.lane.b32.xlu1 %v4038_v10, %s3839_s29 }
 0x5c5   :  { %1742 = vrot.lane.b32.xlu0 %v4018_v62, %s3839_s29 }
 0x5c8   :  { %1823 = vrot.lane.b32.xlu1 %v4022_v1, %s3839_s29 }
 0x5c9   :  { %1910 = vrot.lane.b32.xlu0 %v4036_v9, %s3839_s29 }
 0x5cc   :  { %3761 = vrot.lane.b32.xlu1 %v4050_v11, %s3840_s5 }
 0x5cd   :  { %1825 = vrot.lane.b32.xlu0 %v4016_v61, %s3839_s29 }
 0x5d0   :  { %2006 = vrot.lane.b32.xlu1 %v3976_v48, %s3829_s3 }
 0x5d1   :  { %2004 = vrot.lane.b32.xlu0 %v3973_v43, %s3829_s3  ;;  %s3845_s3 = smov 40  }
 0x634   :  { %v1398_v52 = vpop.xlane.xlu1 %1397 }
 0x635   :  { %3792 = vrcp.f32 %v1398_v52 }
 0x638   :  { %v3757_v53 = vpop.permute.xlu1 %3756  ;;  %v1401_v55 = vpop.xlane.xlu0 %1400 }
 0x639   :  { %v3759_v57 = vunpack.i.h.bf16 %v3757_v53  ;;  %v3758_v59 = vunpack.i.l.bf16 %v3757_v53  ;;  %3794 = vrcp.f32 %v1401_v55 }
 0x63b   :  { %v3593_v60 = vpack.c.bf16 %v3759_v57, %v3758_v59 }
 0x63c   :  { %v1660_v4 = vpop.permute.xlu1 %1659  ;;  %v1658_v5 = vpop.permute.xlu0 %1657 }
 0x63d   :  { %v3597_v6 = vpack.c.bf16 %v1660_v4, %v1658_v5  ;;  %3594 = vmatprep.subr.bf16.mxu0 %v3593_v60  ;;  %3424 = vmatprep.mubr.msk.f32.mxu1 %vm365_vm2, %v1658_v5 }
 0x63e   :  { %3596 = vmatpush3.bf16.msra.mxu0 %v3593_v60 }
 0x63f   :  { %v3793_v7 = vpop.eup %3792  ;;  %3599 = vmatprep.subr.msk.bf16.mxu1 %vm4057_vm3, %v3597_v6  ;;  %3410 = vmatprep.subr.mxu0 %v63_v26 }
 0x640   :  { %v1741_v8 = vpop.permute.xlu1 %1740  ;;  %3602 = vmatpush3.bf16.xpose.msk.msra.mxu1 %vm4057_vm3, %v3597_v6  ;;  %v1743_v12 = vpop.permute.xlu0 %1742  ;;  %v4206_v13 = vmul.f32 %v3793_v7, %v3789_v45 }
 0x641   :  { %v3603_v15 = vpack.c.bf16 %v1743_v12, %v1741_v8 }
 0x642   :  { %3407 = vmatprep.mubr.msk.f32.mxu0 %vm826_vm6, %v4206_v13 }
 0x643   :  { %v3795_v16 = vpop.eup %3794  ;;  %3605 = vmatprep.subr.msk.bf16.mxu1 %vm4057_vm3, %v3603_v15 }
 0x644   :  { %v4212_v17 = vmul.f32 %v3795_v16, %v3791_v49  ;;  %v1909_v18 = vpop.permute.xlu1 %1908  ;;  %v1911_v19 = vpop.permute.xlu0 %1910 }
 0x645   :  { %v3616_v20 = vpack.c.bf16 %v1911_v19, %v1909_v18  ;;  %v1914_v21 = vsel %vm365_vm2, %v1909_v18, 0.0  ;;  %v1917_v22 = vsel %vm365_vm2, %v1911_v19, 0.0 }
 0x646   :  { %1915 = vadd.xlane.f32.xlu0 %v1914_v21  ;;  %3408 = vmatmul.mubr.msk.f32.vlgmr.msra.gmra.mrb[14].mxu0 %vm826_vm6, %v4212_v17 }
 0x647   :  { %1918 = vadd.xlane.f32.xlu1 %v1917_v22  ;;  %3425 = vmatmul.mubr.msk.f32.vlgmr.msra.gmra.mrb[4].mxu1 %vm365_vm2, %v1660_v4 }
 0x648   :  { %v1824_v23 = vpop.permute.xlu1 %1823  ;;  %3608 = vmatpush3.bf16.xpose.msk.msra.mxu1 %vm4057_vm3, %v3603_v15  ;;  %3431 = vmatprep.mubr.msk.f32.mxu1 %vm365_vm2, %v1741_v8  ;;  %v1826_v24 = vpop.permute.xlu0 %1825 }
 0x649   :  { %v3609_v25 = vpack.c.bf16 %v1826_v24, %v1824_v23  ;;  %3411 = vmatpush3.msra.mxu0 %v63_v26 }
 0x64a   :  { %3415 = vmatprep.subr.mxu0 %v62_v27 }
 0x64b   :  { %3611 = vmatprep.subr.msk.bf16.mxu1 %vm4057_vm3, %v3609_v25 }
 0x64c   :  { %v3762_v33 = vpop.permute.xlu1 %3761 }
 0x64d   :  { %v3764_v34 = vunpack.i.h.bf16 %v3762_v33  ;;  %v3763_v36 = vunpack.i.l.bf16 %v3762_v33 }
 0x64f   :  { %3432 = vmatmul.mubr.msk.f32.vlgmr.msra.gmra.mrb[4].mxu1 %vm365_vm2, %v1743_v12  ;;  %v3619_v38 = vpack.c.bf16 %v3764_v34, %v3763_v36 }
 0x650   :  { %3614 = vmatpush3.bf16.xpose.msk.msra.mxu1 %vm4057_vm3, %v3609_v25  ;;  %3438 = vmatprep.mubr.msk.f32.mxu1 %vm365_vm2, %v1824_v23 }
 0x657   :  { %3439 = vmatmul.mubr.msk.f32.vlgmr.msra.gmra.mrb[4].mxu1 %vm365_vm2, %v1826_v24 }
 0x719   :  { %v3409_v28 = vpop.f32.mrb[14].mxu0 }
 0x71a   :  { %v1486_v29 = vpop.f32.mrb[15].mxu0 }
 0x71b   :  { %3412 = vmatprep.mubr.msk.f32.mxu0 %vm734_vm4, %v1486_v29 }
 0x71c   :  { %3413 = vmatmul.mubr.msk.f32.vlgmr.msra.gmra.mrb[16].mxu0 %vm734_vm4, %v3409_v28 }
 0x71d   :  { %3416 = vmatpush3.msra.mxu0 %v62_v27  ;;  %3417 = vmatprep.mubr.msk.f32.mxu0 %vm734_vm4, %v4178_v2  ;;  %v2005_v2 = vpop.permute.xlu0 %2004 }
 0x71e   :  { %3615 = vmatprep.subr.bf16.mxu0 %v3831_v56 }
 0x721   :  { %v1916_v46 = vpop.xlane.xlu0 %1915 }
 0x724   :  { %3418 = vmatmul.mubr.msk.f32.vlgmr.msra.gmra.mrb[16].mxu0 %vm734_vm4, %v4176_v0  ;;  %v2007_v0 = vpop.permute.xlu1 %2006 }
 0x725   :  { %3618 = vmatpush3.bf16.xpose.msk.msra.mxu0 %vm4057_vm3, %v3616_v20  ;;  %3445 = vmatprep.mubr.msk.f32.mxu0 %vm3832_vm1, %v3818_v3 }
 0x726   :  { %3621 = vmatprep.subr.msk.bf16.mxu0 %vm4085_vm5, %v3619_v38 }
 0x728   :  { %v1919_v45 = vpop.xlane.xlu1 %1918 }
 0x72a   :  { %v3440_v39 = vpop.f32.mrb[4].mxu1 }
 0x72b   :  { %v1897_v40 = vpop.f32.mrb[5].mxu1  ;;  %v2001_v49 = vmul.f32 2.0, %v3440_v39 }
 0x72c   :  { %3446 = vmatmul.mubr.msk.f32.vlgmr.msra.gmra.mrb[18].mxu0 %vm365_vm2, %v3833_v31  ;;  %v2000_v51 = vmul.f32 2.0, %v1897_v40 }
 0x72d   :  { %3624 = vmatpush3.bf16.xpose.msk.msra.mxu0 %vm4085_vm5, %v3619_v38  ;;  %3452 = vmatprep.mubr.msk.f32.mxu0 %vm734_vm4, %v2005_v2 }
 0x734   :  { %3453 = vmatmul.mubr.msk.f32.vlgmr.msra.gmra.mrb[20].mxu0 %vm734_vm4, %v2007_v0 }
 0x7ff   :  { %v1990_v41 = vpop.f32.mrb[18].mxu0 }
 0x800   :  { %v1997_v42 = vrot.slane %v1990_v41, %v3967_v35  ;;  %v3447_v44 = vpop.f32.mrb[19].mxu0 }
 0x802   :  { %v1998_v52 = vadd.f32 %v1997_v42, %v1916_v46  ;;  %v1999_v53 = vadd.f32 %v1997_v42, %v1919_v45 }
 0x804   :  { %v2002_v55 = vsub.f32 %v1998_v52, %v2000_v51  ;;  %v2003_v57 = vsub.f32 %v1999_v53, %v2001_v49  ;;  %v64_v51 = vld [vmem:[%s4408_s7 + $0x10] sm:$0xff] }
 0x806   :  { %v2100_v7 = vmul.f32 0.5, %v2003_v57  ;;  %v2099_v12 = vmul.f32 0.5, %v2002_v55 }
 0x807   :  { %v3454_v59 = vpop.f32.mrb[20].mxu0 }
 0x808   :  { %v2096_v60 = vmul.f32 0.35355338, %v3454_v59  ;;  %v2086_v4 = vpop.f32.mrb[21].mxu0 }
 0x809   :  { %v2095_v5 = vmul.f32 0.35355338, %v2086_v4 }
 0x80a   :  { %v2098_v6 = vadd.f32 %v2096_v60, %v4113_v58 }
 0x80b   :  { %v2097_v8 = vadd.f32 %v2095_v5, %v4118_v63 }
 0x80c   :  { %v2102_v15 = vsub.f32 %v2098_v6, %v2100_v7 }
 0x80d   :  { %v2101_v16 = vsub.f32 %v2097_v8, %v2099_v12 }
 0x80e   :  { %v2106_v19 = vsel %vm826_vm6, %v2102_v15, -inf }
 0x80f   :  { %v2103_v18 = vsel %vm826_vm6, %v2101_v16, -inf }
 0x810   :  { %2104 = vmax.xlane.f32.xlu0 %v2103_v18 }
 0x814   :  { %2107 = vmax.xlane.f32.xlu0 %v2106_v19 }
 0x89d   :  { %v2105_v20 = vpop.xlane.xlu0 %2104 }
 0x89e   :  { %v2109_v21 = vsub.f32 %v2101_v16, %v2105_v20 }
 0x8a0   :  { %v2111_v22 = vmul.f32 1.442695, %v2109_v21 }
 0x8a1   :  { %v2108_v23 = vpop.xlane.xlu0 %2107 }
 0x8a2   :  { %3796 = vpow2.f32 %v2111_v22  ;;  %v2110_v24 = vsub.f32 %v2102_v15, %v2108_v23 }
 0x8a4   :  { %v2113_v25 = vmul.f32 1.442695, %v2110_v24 }
 0x8a6   :  { %3798 = vpow2.f32 %v2113_v25 }
 0x8ac   :  { %v3797_v26 = vpop.eup %3796 }
 0x8ad   :  { %v2115_v27 = vsel %vm826_vm6, %v3797_v26, 0.0 }
 0x8ae   :  { %2116 = vadd.xlane.f32.xlu1 %v2115_v27 }
 0x8b0   :  { %v3799_v28 = vpop.eup %3798 }
 0x8b1   :  { %v2118_v29 = vsel %vm826_vm6, %v3799_v28, 0.0 }
 0x8b2   :  { %2119 = vadd.xlane.f32.xlu0 %v2118_v29 }
 0x8bf   :  { %3766 = vrot.lane.b32.xlu1 %v4050_v11, %s3841_s16 }
 0x8c3   :  { %2299 = vrot.lane.b32.xlu1 %v4007_v47, %s3842_s17 }
 0x8c7   :  { %2380 = vrot.lane.b32.xlu1 %v4002_v37, %s3842_s17 }
 0x8c8   :  { %2297 = vrot.lane.b32.xlu0 %v3997_v30, %s3842_s17 }
 0x8cb   :  { %2548 = vrot.lane.b32.xlu1 %v4038_v10, %s3842_s17 }
 0x8cc   :  { %2382 = vrot.lane.b32.xlu0 %v4018_v62, %s3842_s17 }
 0x8cf   :  { %2463 = vrot.lane.b32.xlu1 %v4022_v1, %s3842_s17 }
 0x8d0   :  { %2550 = vrot.lane.b32.xlu0 %v4036_v9, %s3842_s17 }
 0x8d3   :  { %3771 = vrot.lane.b32.xlu1 %v4050_v11, %s3843_s18 }
 0x8d4   :  { %2465 = vrot.lane.b32.xlu0 %v4016_v61, %s3842_s17 }
 0x8d7   :  { %2646 = vrot.lane.b32.xlu1 %v3976_v48, %s3844_s19 }
 0x8d8   :  { %2644 = vrot.lane.b32.xlu0 %v3973_v43, %s3844_s19  ;;  %v1406_v43 = vadd.f32 %v4206_v13, %v4155_v50  ;;  %v1407_v50 = vadd.f32 %v4212_v17, %v4159_v54 }
 0x93b   :  { %v2117_v37 = vpop.xlane.xlu1 %2116 }
 0x93c   :  { %3800 = vrcp.f32 %v2117_v37 }
 0x93f   :  { %v3767_v30 = vpop.permute.xlu1 %3766  ;;  %v2120_v47 = vpop.xlane.xlu0 %2119 }
 0x940   :  { %v3769_v10 = vunpack.i.h.bf16 %v3767_v30  ;;  %v3768_v62 = vunpack.i.l.bf16 %v3767_v30  ;;  %3802 = vrcp.f32 %v2120_v47 }
 0x942   :  { %v3625_v1 = vpack.c.bf16 %v3769_v10, %v3768_v62 }
 0x943   :  { %v2300_v33 = vpop.permute.xlu1 %2299  ;;  %v2298_v9 = vpop.permute.xlu0 %2297 }
 0x944   :  { %v3629_v34 = vpack.c.bf16 %v2300_v33, %v2298_v9  ;;  %3626 = vmatprep.subr.bf16.mxu0 %v3625_v1  ;;  %3471 = vmatprep.mubr.msk.f32.mxu1 %vm365_vm2, %v2298_v9 }
 0x945   :  { %3628 = vmatpush3.bf16.msra.mxu0 %v3625_v1 }
 0x946   :  { %v3801_v61 = vpop.eup %3800  ;;  %3631 = vmatprep.subr.msk.bf16.mxu1 %vm4057_vm3, %v3629_v34  ;;  %3462 = vmatprep.subr.mxu0 %v64_v51 }
 0x947   :  { %v2381_v48 = vpop.permute.xlu1 %2380  ;;  %3634 = vmatpush3.bf16.xpose.msk.msra.mxu1 %vm4057_vm3, %v3629_v34  ;;  %v2383_v36 = vpop.permute.xlu0 %2382  ;;  %v2123_v38 = vmul.f32 %v3801_v61, %v3797_v26 }
 0x948   :  { %v3635_v39 = vpack.c.bf16 %v2383_v36, %v2381_v48 }
 0x949   :  { %v4280_v40 = vadd.f32 %v2123_v38, %v1406_v43  ;;  %3459 = vmatprep.mubr.msk.f32.mxu0 %vm826_vm6, %v2123_v38 }
 0x94a   :  { %v3803_v2 = vpop.eup %3802  ;;  %3637 = vmatprep.subr.msk.bf16.mxu1 %vm4057_vm3, %v3635_v39 }
 0x94b   :  { %v2124_v0 = vmul.f32 %v3803_v2, %v3799_v28  ;;  %v2549_v41 = vpop.permute.xlu1 %2548  ;;  %v2551_v42 = vpop.permute.xlu0 %2550  ;;  %v65_v2 = vld [vmem:[%s4408_s7 + $0x18] sm:$0xff] }
 0x94c   :  { %v3648_v13 = vpack.c.bf16 %v2551_v42, %v2549_v41  ;;  %v2554_v44 = vsel %vm365_vm2, %v2549_v41, 0.0  ;;  %v2557_v45 = vsel %vm365_vm2, %v2551_v42, 0.0 }
 0x94d   :  { %2555 = vadd.xlane.f32.xlu0 %v2554_v44  ;;  %3460 = vmatmul.mubr.msk.f32.vlgmr.msra.gmra.mrb[22].mxu0 %vm826_vm6, %v2124_v0  ;;  %v4290_v46 = vadd.f32 %v2124_v0, %v1407_v50 }
 0x94e   :  { %2558 = vadd.xlane.f32.xlu1 %v2557_v45  ;;  %3472 = vmatmul.mubr.msk.f32.vlgmr.msra.gmra.mrb[6].mxu1 %vm365_vm2, %v2300_v33 }
 0x94f   :  { %v2464_v49 = vpop.permute.xlu1 %2463  ;;  %3640 = vmatpush3.bf16.xpose.msk.msra.mxu1 %vm4057_vm3, %v3635_v39  ;;  %3478 = vmatprep.mubr.msk.f32.mxu1 %vm365_vm2, %v2381_v48  ;;  %v2466_v54 = vpop.permute.xlu0 %2465 }
 0x950   :  { %v3641_v17 = vpack.c.bf16 %v2466_v54, %v2464_v49  ;;  %3463 = vmatpush3.msra.mxu0 %v64_v51 }
 0x951   :  { %3647 = vmatprep.subr.bf16.mxu0 %v3831_v56 }
 0x952   :  { %3643 = vmatprep.subr.msk.bf16.mxu1 %vm4057_vm3, %v3641_v17 }
 0x953   :  { %v3772_v52 = vpop.permute.xlu1 %3771  ;;  %v2645_v56 = vpop.permute.xlu0 %2644 }
 0x954   :  { %v3774_v53 = vunpack.i.h.bf16 %v3772_v52  ;;  %v3773_v55 = vunpack.i.l.bf16 %v3772_v52 }
 0x956   :  { %3479 = vmatmul.mubr.msk.f32.vlgmr.msra.gmra.mrb[6].mxu1 %vm365_vm2, %v2383_v36  ;;  %v3651_v60 = vpack.c.bf16 %v3774_v53, %v3773_v55  ;;  %v3817_v55 = vld [vmem:[%s4403_s0 + $0x8] sm:$0xff] }
 0x957   :  { %3646 = vmatpush3.bf16.xpose.msk.msra.mxu1 %vm4057_vm3, %v3641_v17  ;;  %3485 = vmatprep.mubr.msk.f32.mxu1 %vm365_vm2, %v2464_v49  ;;  %v2647_v5 = vpop.permute.xlu1 %2646 }
 0x95e   :  { %3486 = vmatmul.mubr.msk.f32.vlgmr.msra.gmra.mrb[6].mxu1 %vm365_vm2, %v2466_v54 }
 0x9da   :  { %v2556_v12 = vpop.xlane.xlu0 %2555 }
 0x9db   :  { %v2559_v8 = vpop.xlane.xlu1 %2558 }
 0xa20   :  { %v3461_v57 = vpop.f32.mrb[22].mxu0 }
 0xa21   :  { %v2205_v59 = vpop.f32.mrb[23].mxu0 }
 0xa22   :  { %3464 = vmatprep.mubr.msk.f32.mxu0 %vm734_vm4, %v2205_v59 }
 0xa23   :  { %3465 = vmatmul.mubr.msk.f32.vlgmr.msra.gmra.mrb[16].mxu0 %vm734_vm4, %v3461_v57 }
 0xa24   :  { %3650 = vmatpush3.bf16.xpose.msk.msra.mxu0 %vm4057_vm3, %v3648_v13  ;;  %3492 = vmatprep.mubr.msk.f32.mxu0 %vm3832_vm1, %v3818_v3 }
 0xa25   :  { %3653 = vmatprep.subr.msk.bf16.mxu0 %vm4085_vm5, %v3651_v60 }
 0xa2b   :  { %3493 = vmatmul.mubr.msk.f32.vlgmr.msra.gmra.mrb[24].mxu0 %vm365_vm2, %v3833_v31 }
 0xa2c   :  { %3656 = vmatpush3.bf16.xpose.msk.msra.mxu0 %vm4085_vm5, %v3651_v60  ;;  %3499 = vmatprep.mubr.msk.f32.mxu0 %vm734_vm4, %v2645_v56 }
 0xa31   :  { %v3487_v4 = vpop.f32.mrb[6].mxu1 }
 0xa32   :  { %v2537_v6 = vpop.f32.mrb[7].mxu1  ;;  %v2641_v15 = vmul.f32 2.0, %v3487_v4 }
 0xa33   :  { %3500 = vmatmul.mubr.msk.f32.vlgmr.msra.gmra.mrb[26].mxu0 %vm734_vm4, %v2647_v5  ;;  %v2640_v16 = vmul.f32 2.0, %v2537_v6 }
 0xafe   :  { %v2630_v14 = vpop.f32.mrb[24].mxu0 }
 0xaff   :  { %v2637_v3 = vrot.slane %v2630_v14, %v3967_v35  ;;  %v3494_v7 = vpop.f32.mrb[25].mxu0 }
 0xb01   :  { %v2638_v18 = vadd.f32 %v2637_v3, %v2556_v12  ;;  %v2639_v31 = vadd.f32 %v2637_v3, %v2559_v8 }
 0xb03   :  { %v2642_v19 = vsub.f32 %v2638_v18, %v2640_v16  ;;  %v2643_v32 = vsub.f32 %v2639_v31, %v2641_v15  ;;  %v2993_v16 = vld [vmem:[%s4410_s11] sm:$0xff]  ;;  %v2994_v18 = vld [vmem:[%s4410_s11 + $0x8] sm:$0xff] }
 0xb04   :  { %v3661_v31 = vpack.c.bf16 %v2994_v18, %v2993_v16 }
 0xb05   :  { %v2740_v25 = vmul.f32 0.5, %v2643_v32  ;;  %v2739_v27 = vmul.f32 0.5, %v2642_v19  ;;  %v2995_v19 = vld [vmem:[%s4410_s11 + $0x10] sm:$0xff]  ;;  %v2996_v32 = vld [vmem:[%s4410_s11 + $0x18] sm:$0xff] }
 0xb06   :  { %v3501_v20 = vpop.f32.mrb[26].mxu0  ;;  %3662 = vmatprep.subr.bf16.mxu1 %v3661_v31 }
 0xb07   :  { %v2736_v21 = vmul.f32 0.35355338, %v3501_v20  ;;  %v2726_v22 = vpop.f32.mrb[27].mxu0  ;;  %3664 = vmatpush3.bf16.msra.mxu1 %v3661_v31  ;;  %v3665_v20 = vpack.c.bf16 %v2996_v32, %v2995_v19 }
 0xb08   :  { %v2735_v23 = vmul.f32 0.35355338, %v2726_v22 }
 0xb09   :  { %v2738_v24 = vadd.f32 %v2736_v21, %v4113_v58  ;;  %3666 = vmatprep.subr.bf16.mxu1 %v3665_v20 }
 0xb0a   :  { %v2737_v26 = vadd.f32 %v2735_v23, %v4118_v63 }
 0xb0b   :  { %v2742_v35 = vsub.f32 %v2738_v24, %v2740_v25  ;;  %3668 = vmatpush3.bf16.msra.mxu1 %v3665_v20 }
 0xb0c   :  { %v2741_v28 = vsub.f32 %v2737_v26, %v2739_v27 }
 0xb0d   :  { %v2746_v37 = vsel %vm826_vm6, %v2742_v35, -inf }
 0xb0e   :  { %v2743_v29 = vsel %vm826_vm6, %v2741_v28, -inf }
 0xb0f   :  { %2744 = vmax.xlane.f32.xlu0 %v2743_v29  ;;  %v3212_v29 = vld [vmem:[%s4412_s10] ss:$0 sm:$0xff] }
 0xb13   :  { %2747 = vmax.xlane.f32.xlu0 %v2746_v37 }
 0xb9c   :  { %v2745_v30 = vpop.xlane.xlu0 %2744 }
 0xb9d   :  { %v2749_v47 = vsub.f32 %v2741_v28, %v2745_v30 }
 0xb9f   :  { %v2751_v10 = vmul.f32 1.442695, %v2749_v47 }
 0xba0   :  { %v2748_v62 = vpop.xlane.xlu0 %2747 }
 0xba1   :  { %3804 = vpow2.f32 %v2751_v10  ;;  %v2750_v1 = vsub.f32 %v2742_v35, %v2748_v62  ;;  %v3211_v35 = vld [vmem:[%s4411_s9] ss:$0 sm:$0xff] }
 0xba3   :  { %v2753_v33 = vmul.f32 1.442695, %v2750_v1 }
 0xba5   :  { %3806 = vpow2.f32 %v2753_v33  ;;  %v3213_v33 = vld [vmem:[%s4414_s12] ss:$0 sm:$0xff] }
 0xbab   :  { %v3805_v58 = vpop.eup %3804 }
 0xbac   :  { %v2755_v63 = vsel %vm826_vm6, %v3805_v58, 0.0 }
 0xbad   :  { %2756 = vadd.xlane.f32.xlu1 %v2755_v63 }
 0xbaf   :  { %v3807_v9 = vpop.eup %3806 }
 0xbb0   :  { %v2758_v34 = vsel %vm826_vm6, %v3807_v9, 0.0 }
 0xbb1   :  { %2759 = vadd.xlane.f32.xlu0 %v2758_v34 }
 0xbbe   :  { %3776 = vrot.lane.b32.xlu1 %v4050_v11, %s3845_s3 }
 0xc3a   :  { %v2757_v61 = vpop.xlane.xlu1 %2756 }
 0xc3b   :  { %3808 = vrcp.f32 %v2757_v61 }
 0xc3e   :  { %v3777_v43 = vpop.permute.xlu1 %3776  ;;  %v2760_v48 = vpop.xlane.xlu0 %2759 }
 0xc3f   :  { %v3779_v36 = vunpack.i.h.bf16 %v3777_v43  ;;  %v3778_v38 = vunpack.i.l.bf16 %v3777_v43  ;;  %3810 = vrcp.f32 %v2760_v48 }
 0xc41   :  { %v3657_v39 = vpack.c.bf16 %v3779_v36, %v3778_v38 }
 0xc43   :  { %3658 = vmatprep.subr.bf16.mxu0 %v3657_v39 }
 0xc44   :  { %3660 = vmatpush3.bf16.msra.mxu0 %v3657_v39 }
 0xc45   :  { %v3809_v0 = vpop.eup %3808  ;;  %3509 = vmatprep.subr.mxu0 %v65_v2 }
 0xc46   :  { %v2763_v41 = vmul.f32 %v3809_v0, %v3805_v58 }
 0xc48   :  { %3506 = vmatprep.mubr.msk.f32.mxu0 %vm826_vm6, %v2763_v41  ;;  %v2765_v11 = vadd.f32 %v2763_v41, %v4280_v40  ;;  %v3210_v40 = vld [vmem:[%s4409_s8] ss:$0 sm:$0xff] }
 0xc49   :  { %v3811_v42 = vpop.eup %3810 }
 0xc4a   :  { %v2764_v50 = vmul.f32 %v3811_v42, %v3807_v9  ;;  %v3098_v13 = vmul.f32 0.25, %v2765_v11 }
 0xc4c   :  { %3102 = vrot.lane.b32.xlu1 %v3098_v13, %s3846_s23  ;;  %3507 = vmatmul.mubr.msk.f32.vlgmr.msra.gmra.mrb[28].mxu0 %vm826_vm6, %v2764_v50  ;;  %v4337_v44 = vadd.f32 %v2764_v50, %v4290_v46  ;;  %v3816_v46 = vld [vmem:[%s4403_s0] sm:$0xff] }
 0xc4d   :  { %3510 = vmatpush3.msra.mxu0 %v65_v2 }
 0xc4e   :  { %v3099_v61 = vmul.f32 0.25, %v4337_v44 }
 0xcbe   :  { %v3103_v43 = vpop.permute.xlu1 %3102 }
 0xd1f   :  { %v3508_v45 = vpop.f32.mrb[28].mxu0 }
 0xd20   :  { %v2845_v49 = vpop.f32.mrb[29].mxu0 }
 0xd21   :  { %3511 = vmatprep.mubr.msk.f32.mxu0 %vm734_vm4, %v2845_v49 }
 0xd22   :  { %3512 = vmatmul.mubr.msk.f32.vlgmr.msra.gmra.mrb[16].mxu0 %vm734_vm4, %v3508_v45 }
 0xdf5   :  { %v3513_v54 = vpop.f32.mrb[16].mxu0 }
 0xdf6   :  { %v2926_v17 = vpop.f32.mrb[17].mxu0  ;;  %v2945_v51 = vadd.f32 %v3513_v54, %v3210_v40 }
 0xdf7   :  { %v2944_v52 = vadd.f32 %v3210_v40, %v2926_v17 }
 0xdf8   :  { %v2947_v57 = vadd.f32 %v3817_v55, %v2945_v51 }
 0xdf9   :  { %v2946_v53 = vadd.f32 %v3816_v46, %v2944_v52 }
 0xdfa   :  { %v2953_v60 = vsel %vm77_vm0, %v2947_v57, 0.0 }
 0xdfb   :  { %v2950_v59 = vsel %vm77_vm0, %v2946_v53, 0.0 }
 0xdfc   :  { %2951 = vadd.xlane.f32.xlu0 %v2950_v59 }
 0xe00   :  { %2954 = vadd.xlane.f32.xlu0 %v2953_v60 }
 0xe89   :  { %v2952_v56 = vpop.xlane.xlu0 %2951 }
 0xe8a   :  { %v2957_v4 = vmul.f32 0.03125, %v2952_v56 }
 0xe8c   :  { %v2959_v5 = vsub.f32 %v2946_v53, %v2957_v4 }
 0xe8d   :  { %v2955_v6 = vpop.xlane.xlu0 %2954 }
 0xe8e   :  { %v2958_v14 = vmul.f32 0.03125, %v2955_v6  ;;  %v2961_v3 = vmul.f32 %v2959_v5, %v2959_v5 }
 0xe90   :  { %v2960_v7 = vsub.f32 %v2947_v57, %v2958_v14  ;;  %v2963_v8 = vsel %vm77_vm0, %v2961_v3, 0.0 }
 0xe91   :  { %2964 = vadd.xlane.f32.xlu0 %v2963_v8 }
 0xe92   :  { %v2962_v12 = vmul.f32 %v2960_v7, %v2960_v7 }
 0xe94   :  { %v2966_v15 = vsel %vm77_vm0, %v2962_v12, 0.0 }
 0xe95   :  { %2967 = vadd.xlane.f32.xlu0 %v2966_v15 }
 0xf1e   :  { %v2965_v21 = vpop.xlane.xlu0 %2964 }
 0xf1f   :  { %v2969_v22 = vmul.f32 0.03125, %v2965_v21 }
 0xf21   :  { %v2971_v23 = vadd.f32 1e-05, %v2969_v22 }
 0xf22   :  { %v2968_v24 = vpop.xlane.xlu0 %2967 }
 0xf23   :  { %3812 = vrsqrt.f32 %v2971_v23  ;;  %v2970_v25 = vmul.f32 0.03125, %v2968_v24 }
 0xf25   :  { %v2972_v26 = vadd.f32 1e-05, %v2970_v25 }
 0xf27   :  { %3814 = vrsqrt.f32 %v2972_v26 }
 0xf2d   :  { %v3813_v27 = vpop.eup %3812 }
 0xf2e   :  { %v2975_v28 = vmul.f32 %v3813_v27, %v2959_v5 }
 0xf30   :  { %v2983_v37 = vmul.f32 %v3211_v35, %v2975_v28 }
 0xf31   :  { %v3815_v30 = vpop.eup %3814 }
 0xf32   :  { %v2976_v47 = vmul.f32 %v3815_v30, %v2960_v7  ;;  %v2991_v10 = vadd.f32 %v3212_v29, %v2983_v37 }
 0xf34   :  { %v2984_v62 = vmul.f32 %v3211_v35, %v2976_v47  ;;  %3522 = vmatprep.mubr.msk.f32.mxu1 %vm77_vm0, %v2991_v10  ;;  %3085 = vst.msk [vmem:[%s4413_s13] sm:$0xff] %vm77_vm0, %v2991_v10 }
 0xf36   :  { %v2992_v1 = vadd.f32 %v3212_v29, %v2984_v62 }
 0xf38   :  { %3523 = vmatmul.mubr.msk.f32.vlgmr.msra.gmra.mrb[8].mxu1 %vm77_vm0, %v2992_v1  ;;  %3086 = vst.msk [vmem:[%s4413_s13 + $0x8] sm:$0xff] %vm77_vm0, %v2992_v1 }
0x100b   :  { %v3524_v58 = vpop.f32.mrb[8].mxu1 }
0x100c   :  { %v3082_v63 = vadd.f32 %v3524_v58, %v3213_v33  ;;  %v3076_v9 = vpop.f32.mrb[9].mxu1 }
0x100d   :  { %v3077_v34 = vadd.f32 %v3213_v33, %v3076_v9 }
0x100e   :  { %3091 = vrot.lane.b32.xlu0 %v3082_v63, %s3830_s6 }
0x100f   :  { %3089 = vrot.lane.b32.xlu1 %v3077_v34, %s3830_s6 }
0x1013   :  { %3104 = vrot.lane.b32.xlu1 %v3099_v61, %s3846_s23 }
0x1080   :  { %v3092_v48 = vpop.permute.xlu0 %3091 }
0x1081   :  { %3097 = vst.msk [vmem:[%s4413_s13 + $0x8] sm:$0xff] %vm3095_vm7, %v3092_v48  ;;  %v3090_v36 = vpop.permute.xlu1 %3089 }
0x1082   :  { %3096 = vst.msk [vmem:[%s4413_s13] sm:$0xff] %vm3095_vm7, %v3090_v36 }
0x1083   :  { %3109 = vst.msk [vmem:[%s4413_s13] sm:$0xff] %vm3108_vm8, %v3103_v43 }
0x1085   :  { %v3105_v38 = vpop.permute.xlu1 %3104 }
0x1086   :  { %3110 = vst.msk [vmem:[%s4413_s13 + $0x8] sm:$0xff] %vm3108_vm8, %v3105_v38 }

// kernel: forward.12
= control target key start
LH: loop header
LB: loop body
LE: loop exit
PB: predicated region body
PF: predicated region fallthrough
CT: control target
= control target key end

     0   :  { %vm52_vm0 = vcmask 261120   ;;  %vm1084_vm1 = vcmask 310528   ;;  %s1668_s1 = inlined_call_operand.vmem [shape: f32[4,32,32], index: 1, kind: input, shape index: {}]   ;;  %s1669_s0 = inlined_call_operand.vmem [shape: f32[16,32], index: 0, kind: input, shape index: {}]   ;;  %s1670_s3 = inlined_call_operand.vmem [shape: f32[4,32,32], index: 3, kind: input, shape index: {}]   ;;  %s1671_s2 = inlined_call_operand.vmem [shape: f32[4,1,32], index: 2, kind: input, shape index: {}]   ;;  %s1672_s4 = inlined_call_operand.vmem [shape: f32[4,1,32], index: 4, kind: input, shape index: {}]   ;;  %s1673_s5 = inlined_call_operand.vmem [shape: f32[4,1,32], index: 5, kind: input, shape index: {}]   ;;  %s1674_s6 = inlined_call_operand.vmem [shape: f32[4,1,32], index: 6, kind: input, shape index: {}]   ;;  %s1675_s9 = inlined_call_operand.vmem [shape: f32[16,38], index: 9, kind: output, shape index: {}]   ;;  %s1676_s7 = inlined_call_operand.vmem [shape: f32[32,6], index: 7, kind: input, shape index: {}]   ;;  %s1677_s8 = inlined_call_operand.vmem [shape: f32[1,6], index: 8, kind: input, shape index: {}]  }
   0x1   :  { %v34_v0 = vld [vmem:[%s1668_s1] sm:$0xff]  ;;  %v35_v1 = vld [vmem:[%s1668_s1 + $0x8] sm:$0xff]  ;;  %v36_v2 = vld [vmem:[%s1668_s1 + $0x10] sm:$0xff] }
   0x2   :  { %v1315_v3 = vpack.c.bf16 %v35_v1, %v34_v0  ;;  %v37_v4 = vld [vmem:[%s1668_s1 + $0x18] sm:$0xff]  ;;  %v32_v5 = vld [vmem:[%s1669_s0] sm:$0xff]  ;;  %v40_v8 = vld [vmem:[%s1670_s3 + $0x8] sm:$0xff] }
   0x3   :  { %v1319_v6 = vpack.c.bf16 %v37_v4, %v36_v2  ;;  %1224 = vmatprep.mubr.msk.f32.mxu0 %vm52_vm0, %v32_v5  ;;  %v39_v7 = vld [vmem:[%s1670_s3] sm:$0xff]  ;;  %v33_v10 = vld [vmem:[%s1669_s0 + $0x8] sm:$0xff]  ;;  %v41_v11 = vld [vmem:[%s1670_s3 + $0x10] sm:$0xff] }
   0x4   :  { %1316 = vmatprep.subr.bf16.mxu0 %v1315_v3  ;;  %v1323_v9 = vpack.c.bf16 %v40_v8, %v39_v7  ;;  %v42_v12 = vld [vmem:[%s1670_s3 + $0x18] sm:$0xff]  ;;  %v1091_v14 = vld [vmem:[%s1671_s2] ss:$0 sm:$0xff]  ;;  %v1100_v41 = vld [vmem:[%s1668_s1 + $0x28] sm:$0xff] }
   0x5   :  { %1318 = vmatpush3.bf16.msra.mxu0 %v1315_v3  ;;  %v1327_v13 = vpack.c.bf16 %v42_v12, %v41_v11  ;;  %v1094_v21 = vld [vmem:[%s1672_s4] ss:$0 sm:$0xff]  ;;  %v1101_v43 = vld [vmem:[%s1668_s1 + $0x30] sm:$0xff]  ;;  %v1102_v44 = vld [vmem:[%s1668_s1 + $0x38] sm:$0xff] }
   0x6   :  { %1320 = vmatprep.subr.bf16.mxu0 %v1319_v6  ;;  %1324 = vmatprep.subr.bf16.mxu1 %v1323_v9  ;;  %v1099_v40 = vld [vmem:[%s1668_s1 + $0x20] sm:$0xff]  ;;  %v1335_v45 = vpack.c.bf16 %v1102_v44, %v1101_v43  ;;  %v1105_v47 = vld [vmem:[%s1670_s3 + $0x28] sm:$0xff]  ;;  %v1106_v1 = vld [vmem:[%s1670_s3 + $0x30] sm:$0xff] }
   0x7   :  { %1326 = vmatpush3.bf16.msra.mxu1 %v1323_v9  ;;  %v1331_v42 = vpack.c.bf16 %v1100_v41, %v1099_v40  ;;  %v1104_v46 = vld [vmem:[%s1670_s3 + $0x20] sm:$0xff]  ;;  %v1107_v2 = vld [vmem:[%s1670_s3 + $0x38] sm:$0xff] }
   0x8   :  { %1328 = vmatprep.subr.bf16.mxu1 %v1327_v13  ;;  %v1339_v48 = vpack.c.bf16 %v1105_v47, %v1104_v46  ;;  %v1097_v56 = vld [vmem:[%s1673_s5] ss:$0 sm:$0xff]  ;;  %v1343_v3 = vpack.c.bf16 %v1107_v2, %v1106_v1  ;;  %v1111_v4 = vld [vmem:[%s1671_s2 + $0x1] ss:$0 sm:$0xff]  ;;  %v1134_v1 = vld [vmem:[%s1672_s4 + $0x2] ss:$0 sm:$0xff] }
   0x9   :  { %1322 = vmatpush3.bf16.msra.mxu0 %v1319_v6  ;;  %v1098_v58 = vld [vmem:[%s1674_s6] ss:$0 sm:$0xff]  ;;  %v1114_v11 = vld [vmem:[%s1672_s4 + $0x1] ss:$0 sm:$0xff] }
   0xa   :  { %1332 = vmatprep.subr.bf16.mxu0 %v1331_v42  ;;  %v1117_v46 = vld [vmem:[%s1673_s5 + $0x1] ss:$0 sm:$0xff] }
   0xb   :  { %1330 = vmatpush3.bf16.msra.mxu1 %v1327_v13 }
   0xc   :  { %1225 = vmatmul.mubr.msk.f32.vlgmr.msra.gmra.mrb[0].mxu0 %vm52_vm0, %v33_v10  ;;  %1340 = vmatprep.subr.bf16.mxu1 %v1339_v48 }
   0xd   :  { %1334 = vmatpush3.bf16.msra.mxu0 %v1331_v42 }
   0xe   :  { %1336 = vmatprep.subr.bf16.mxu0 %v1335_v45 }
  0x11   :  { %1338 = vmatpush3.bf16.msra.mxu0 %v1335_v45 }
  0xdf   :  { %v1226_v15 = vpop.f32.mrb[0].mxu0 }
  0xe0   :  { %v131_v16 = vadd.f32 %v1226_v15, %v1091_v14  ;;  %v125_v17 = vpop.f32.mrb[1].mxu0 }
  0xe1   :  { %v126_v18 = vadd.f32 %v1091_v14, %v125_v17 }
  0xe2   :  { %v135_v20 = vmax.f32 %v131_v16, 0.0 }
  0xe3   :  { %v134_v19 = vmax.f32 %v126_v18, 0.0 }
  0xe5   :  { %1235 = vmatprep.mubr.msk.f32.mxu1 %vm52_vm0, %v134_v19 }
  0xe6   :  { %1236 = vmatmul.mubr.msk.f32.vlgmr.msra.gmra.mrb[0].mxu1 %vm52_vm0, %v135_v20 }
  0xe7   :  { %1342 = vmatpush3.bf16.msra.mxu1 %v1339_v48 }
  0xe8   :  { %1344 = vmatprep.subr.bf16.mxu1 %v1343_v3 }
  0xeb   :  { %1346 = vmatpush3.bf16.msra.mxu1 %v1343_v3 }
 0x1b9   :  { %v1237_v22 = vpop.f32.mrb[0].mxu1 }
 0x1ba   :  { %v214_v23 = vpop.f32.mrb[1].mxu1  ;;  %v220_v24 = vadd.f32 %v1237_v22, %v1094_v21 }
 0x1bb   :  { %v215_v25 = vadd.f32 %v1094_v21, %v214_v23 }
 0x1bc   :  { %v224_v28 = vadd.f32 %v220_v24, %v33_v10 }
 0x1bd   :  { %v223_v26 = vadd.f32 %v215_v25, %v32_v5 }
 0x1be   :  { %v228_v29 = vsel %vm52_vm0, %v224_v28, 0.0 }
 0x1bf   :  { %v225_v27 = vsel %vm52_vm0, %v223_v26, 0.0 }
 0x1c0   :  { %226 = vadd.xlane.f32.xlu0 %v225_v27 }
 0x1c4   :  { %229 = vadd.xlane.f32.xlu0 %v228_v29 }
 0x24d   :  { %v227_v30 = vpop.xlane.xlu0 %226 }
 0x24e   :  { %v232_v31 = vmul.f32 0.03125, %v227_v30  ;;  %v1119_v30 = vld [vmem:[%s1668_s1 + $0x40] sm:$0xff] }
 0x250   :  { %v234_v32 = vsub.f32 %v223_v26, %v232_v31  ;;  %v1120_v31 = vld [vmem:[%s1668_s1 + $0x48] sm:$0xff] }
 0x251   :  { %v230_v33 = vpop.xlane.xlu0 %229 }
 0x252   :  { %v233_v34 = vmul.f32 0.03125, %v230_v33  ;;  %v236_v35 = vmul.f32 %v234_v32, %v234_v32  ;;  %v1121_v33 = vld [vmem:[%s1668_s1 + $0x50] sm:$0xff] }
 0x254   :  { %v235_v36 = vsub.f32 %v224_v28, %v233_v34  ;;  %v238_v37 = vsel %vm52_vm0, %v236_v35, 0.0  ;;  %v1122_v34 = vld [vmem:[%s1668_s1 + $0x58] sm:$0xff] }
 0x255   :  { %239 = vadd.xlane.f32.xlu1 %v238_v37  ;;  %v1351_v35 = vpack.c.bf16 %v1122_v34, %v1121_v33  ;;  %v1125_v37 = vld [vmem:[%s1670_s3 + $0x48] sm:$0xff] }
 0x256   :  { %v237_v38 = vmul.f32 %v235_v36, %v235_v36 }
 0x258   :  { %v241_v39 = vsel %vm52_vm0, %v237_v38, 0.0 }
 0x259   :  { %242 = vadd.xlane.f32.xlu1 %v241_v39 }
 0x2e2   :  { %v240_v49 = vpop.xlane.xlu1 %239 }
 0x2e3   :  { %v244_v50 = vmul.f32 0.03125, %v240_v49 }
 0x2e5   :  { %v246_v51 = vadd.f32 1e-05, %v244_v50  ;;  %v1118_v50 = vld [vmem:[%s1674_s6 + $0x1] ss:$0 sm:$0xff] }
 0x2e6   :  { %v243_v52 = vpop.xlane.xlu1 %242 }
 0x2e7   :  { %1388 = vrsqrt.f32 %v246_v51  ;;  %v245_v53 = vmul.f32 0.03125, %v243_v52 }
 0x2e9   :  { %v247_v54 = vadd.f32 1e-05, %v245_v53 }
 0x2eb   :  { %1390 = vrsqrt.f32 %v247_v54 }
 0x2f1   :  { %v1389_v55 = vpop.eup %1388 }
 0x2f2   :  { %v250_v57 = vmul.f32 %v1389_v55, %v234_v32  ;;  %v1347_v32 = vpack.c.bf16 %v1120_v31, %v1119_v30  ;;  %v1126_v55 = vld [vmem:[%s1670_s3 + $0x50] sm:$0xff] }
 0x2f4   :  { %v258_v59 = vmul.f32 %v1097_v56, %v250_v57  ;;  %1348 = vmatprep.subr.bf16.mxu0 %v1347_v32 }
 0x2f5   :  { %v1391_v60 = vpop.eup %1390 }
 0x2f6   :  { %v251_v61 = vmul.f32 %v1391_v60, %v235_v36  ;;  %v266_v62 = vadd.f32 %v1098_v58, %v258_v59  ;;  %v1124_v36 = vld [vmem:[%s1670_s3 + $0x40] sm:$0xff] }
 0x2f7   :  { %v1355_v38 = vpack.c.bf16 %v1125_v37, %v1124_v36  ;;  %v1137_v36 = vld [vmem:[%s1673_s5 + $0x2] ss:$0 sm:$0xff] }
 0x2f8   :  { %v259_v63 = vmul.f32 %v1097_v56, %v251_v61  ;;  %1246 = vmatprep.mubr.msk.f32.mxu0 %vm52_vm0, %v266_v62  ;;  %v1127_v56 = vld [vmem:[%s1670_s3 + $0x58] sm:$0xff] }
 0x2f9   :  { %1356 = vmatprep.subr.bf16.mxu1 %v1355_v38  ;;  %v1359_v57 = vpack.c.bf16 %v1127_v56, %v1126_v55  ;;  %v1154_v55 = vld [vmem:[%s1672_s4 + $0x3] ss:$0 sm:$0xff] }
 0x2fa   :  { %v267_v0 = vadd.f32 %v1098_v58, %v259_v63  ;;  %v1131_v58 = vld [vmem:[%s1671_s2 + $0x2] ss:$0 sm:$0xff] }
 0x2fc   :  { %1247 = vmatmul.mubr.msk.f32.vlgmr.msra.gmra.mrb[2].mxu0 %vm52_vm0, %v267_v0 }
 0x2fd   :  { %1350 = vmatpush3.bf16.msra.mxu0 %v1347_v32 }
 0x2fe   :  { %1352 = vmatprep.subr.bf16.mxu0 %v1351_v35 }
 0x301   :  { %1354 = vmatpush3.bf16.msra.mxu0 %v1351_v35 }
 0x3cf   :  { %v1248_v5 = vpop.f32.mrb[2].mxu0 }
 0x3d0   :  { %v370_v6 = vadd.f32 %v1248_v5, %v1111_v4  ;;  %v364_v7 = vpop.f32.mrb[3].mxu0 }
 0x3d1   :  { %v365_v8 = vadd.f32 %v1111_v4, %v364_v7 }
 0x3d2   :  { %v374_v10 = vmax.f32 %v370_v6, 0.0 }
 0x3d3   :  { %v373_v9 = vmax.f32 %v365_v8, 0.0 }
 0x3d5   :  { %1257 = vmatprep.mubr.msk.f32.mxu1 %vm52_vm0, %v373_v9 }
 0x3d6   :  { %1258 = vmatmul.mubr.msk.f32.vlgmr.msra.gmra.mrb[2].mxu1 %vm52_vm0, %v374_v10 }
 0x3d7   :  { %1358 = vmatpush3.bf16.msra.mxu1 %v1355_v38 }
 0x3d8   :  { %1360 = vmatprep.subr.bf16.mxu1 %v1359_v57 }
 0x3db   :  { %1362 = vmatpush3.bf16.msra.mxu1 %v1359_v57 }
 0x4a9   :  { %v1259_v12 = vpop.f32.mrb[2].mxu1 }
 0x4aa   :  { %v459_v13 = vadd.f32 %v1259_v12, %v1114_v11  ;;  %v453_v14 = vpop.f32.mrb[3].mxu1 }
 0x4ab   :  { %v454_v15 = vadd.f32 %v1114_v11, %v453_v14 }
 0x4ac   :  { %v463_v16 = vadd.f32 %v459_v13, %v267_v0 }
 0x4ad   :  { %v462_v17 = vadd.f32 %v454_v15, %v266_v62 }
 0x4ae   :  { %v467_v18 = vsel %vm52_vm0, %v463_v16, 0.0 }
 0x4af   :  { %468 = vadd.xlane.f32.xlu1 %v467_v18  ;;  %v464_v19 = vsel %vm52_vm0, %v462_v17, 0.0 }
 0x4b0   :  { %465 = vadd.xlane.f32.xlu0 %v464_v19 }
 0x53c   :  { %v469_v20 = vpop.xlane.xlu1 %468 }
 0x53d   :  { %v471_v21 = vmul.f32 0.03125, %v469_v20  ;;  %v466_v22 = vpop.xlane.xlu0 %465  ;;  %v1139_v20 = vld [vmem:[%s1668_s1 + $0x60] sm:$0xff] }
 0x53e   :  { %v470_v23 = vmul.f32 0.03125, %v466_v22 }
 0x53f   :  { %v473_v24 = vsub.f32 %v463_v16, %v471_v21  ;;  %v1140_v21 = vld [vmem:[%s1668_s1 + $0x68] sm:$0xff] }
 0x540   :  { %v472_v25 = vsub.f32 %v462_v17, %v470_v23  ;;  %v1363_v22 = vpack.c.bf16 %v1140_v21, %v1139_v20  ;;  %v1141_v23 = vld [vmem:[%s1668_s1 + $0x70] sm:$0xff] }
 0x541   :  { %v475_v26 = vmul.f32 %v473_v24, %v473_v24 }
 0x542   :  { %v474_v27 = vmul.f32 %v472_v25, %v472_v25  ;;  %1364 = vmatprep.subr.bf16.mxu0 %v1363_v22 }
 0x543   :  { %v479_v28 = vsel %vm52_vm0, %v475_v26, 0.0  ;;  %v1144_v26 = vld [vmem:[%s1670_s3 + $0x60] sm:$0xff] }
 0x544   :  { %480 = vadd.xlane.f32.xlu1 %v479_v28  ;;  %v476_v29 = vsel %vm52_vm0, %v474_v27, 0.0  ;;  %v1145_v27 = vld [vmem:[%s1670_s3 + $0x68] sm:$0xff] }
 0x545   :  { %477 = vadd.xlane.f32.xlu0 %v476_v29  ;;  %v1371_v28 = vpack.c.bf16 %v1145_v27, %v1144_v26  ;;  %v1158_v27 = vld [vmem:[%s1674_s6 + $0x3] ss:$0 sm:$0xff] }
 0x547   :  { %1372 = vmatprep.subr.bf16.mxu1 %v1371_v28 }
 0x5d1   :  { %v481_v39 = vpop.xlane.xlu1 %480 }
 0x5d2   :  { %v483_v40 = vmul.f32 0.03125, %v481_v39  ;;  %v478_v41 = vpop.xlane.xlu0 %477  ;;  %v1138_v39 = vld [vmem:[%s1674_s6 + $0x2] ss:$0 sm:$0xff] }
 0x5d3   :  { %v482_v42 = vmul.f32 0.03125, %v478_v41 }
 0x5d4   :  { %v485_v43 = vadd.f32 1e-05, %v483_v40 }
 0x5d5   :  { %v484_v44 = vadd.f32 1e-05, %v482_v42 }
 0x5d6   :  { %1392 = vrsqrt.f32 %v485_v43 }
 0x5d7   :  { %1394 = vrsqrt.f32 %v484_v44 }
 0x5e0   :  { %v1393_v45 = vpop.eup %1392 }
 0x5e1   :  { %v1395_v47 = vpop.eup %1394  ;;  %v489_v48 = vmul.f32 %v1393_v45, %v473_v24  ;;  %v1142_v24 = vld [vmem:[%s1668_s1 + $0x78] sm:$0xff]  ;;  %v1146_v45 = vld [vmem:[%s1670_s3 + $0x70] sm:$0xff] }
 0x5e2   :  { %v488_v49 = vmul.f32 %v1395_v47, %v472_v25  ;;  %v1367_v25 = vpack.c.bf16 %v1142_v24, %v1141_v23  ;;  %v1157_v23 = vld [vmem:[%s1673_s5 + $0x3] ss:$0 sm:$0xff]  ;;  %s1404_s5 = smov 32  }
 0x5e3   :  { %v497_v51 = vmul.f32 %v1117_v46, %v489_v48  ;;  %v1151_v48 = vld [vmem:[%s1671_s2 + $0x3] ss:$0 sm:$0xff] }
 0x5e4   :  { %v496_v52 = vmul.f32 %v1117_v46, %v488_v49  ;;  %v1147_v46 = vld [vmem:[%s1670_s3 + $0x78] sm:$0xff] }
 0x5e5   :  { %v505_v54 = vadd.f32 %v1118_v50, %v497_v51  ;;  %v1375_v47 = vpack.c.bf16 %v1147_v46, %v1146_v45 }
 0x5e6   :  { %v504_v53 = vadd.f32 %v1118_v50, %v496_v52 }
 0x5e8   :  { %1268 = vmatprep.mubr.msk.f32.mxu0 %vm52_vm0, %v504_v53 }
 0x5e9   :  { %1269 = vmatmul.mubr.msk.f32.vlgmr.msra.gmra.mrb[4].mxu0 %vm52_vm0, %v505_v54 }
 0x5ea   :  { %1366 = vmatpush3.bf16.msra.mxu0 %v1363_v22 }
 0x5eb   :  { %1368 = vmatprep.subr.bf16.mxu0 %v1367_v25 }
 0x5ee   :  { %1370 = vmatpush3.bf16.msra.mxu0 %v1367_v25 }
 0x6bc   :  { %v1270_v59 = vpop.f32.mrb[4].mxu0 }
 0x6bd   :  { %v608_v60 = vadd.f32 %v1270_v59, %v1131_v58  ;;  %v602_v61 = vpop.f32.mrb[5].mxu0 }
 0x6be   :  { %v603_v62 = vadd.f32 %v1131_v58, %v602_v61 }
 0x6bf   :  { %v612_v0 = vmax.f32 %v608_v60, 0.0 }
 0x6c0   :  { %v611_v63 = vmax.f32 %v603_v62, 0.0 }
 0x6c2   :  { %1279 = vmatprep.mubr.msk.f32.mxu1 %vm52_vm0, %v611_v63 }
 0x6c3   :  { %1280 = vmatmul.mubr.msk.f32.vlgmr.msra.gmra.mrb[4].mxu1 %vm52_vm0, %v612_v0 }
 0x6c4   :  { %1374 = vmatpush3.bf16.msra.mxu1 %v1371_v28 }
 0x6c5   :  { %1376 = vmatprep.subr.bf16.mxu1 %v1375_v47 }
 0x6c8   :  { %1378 = vmatpush3.bf16.msra.mxu1 %v1375_v47 }
 0x796   :  { %v1281_v2 = vpop.f32.mrb[4].mxu1 }
 0x797   :  { %v697_v3 = vadd.f32 %v1281_v2, %v1134_v1  ;;  %v691_v4 = vpop.f32.mrb[5].mxu1 }
 0x798   :  { %v692_v5 = vadd.f32 %v1134_v1, %v691_v4 }
 0x799   :  { %v701_v6 = vadd.f32 %v697_v3, %v505_v54 }
 0x79a   :  { %v700_v7 = vadd.f32 %v692_v5, %v504_v53 }
 0x79b   :  { %v705_v8 = vsel %vm52_vm0, %v701_v6, 0.0 }
 0x79c   :  { %706 = vadd.xlane.f32.xlu1 %v705_v8  ;;  %v702_v9 = vsel %vm52_vm0, %v700_v7, 0.0 }
 0x79d   :  { %703 = vadd.xlane.f32.xlu0 %v702_v9 }
 0x829   :  { %v707_v10 = vpop.xlane.xlu1 %706 }
 0x82a   :  { %v709_v11 = vmul.f32 0.03125, %v707_v10  ;;  %v704_v12 = vpop.xlane.xlu0 %703  ;;  %v982_v10 = vld [vmem:[%s1676_s7] sm:$0xff] }
 0x82b   :  { %v708_v13 = vmul.f32 0.03125, %v704_v12 }
 0x82c   :  { %v711_v14 = vsub.f32 %v701_v6, %v709_v11  ;;  %v983_v11 = vld [vmem:[%s1676_s7 + $0x8] sm:$0xff] }
 0x82d   :  { %v710_v15 = vsub.f32 %v700_v7, %v708_v13  ;;  %v1379_v12 = vpack.c.bf16 %v983_v11, %v982_v10  ;;  %v984_v13 = vld [vmem:[%s1676_s7 + $0x10] sm:$0xff] }
 0x82e   :  { %v713_v16 = vmul.f32 %v711_v14, %v711_v14 }
 0x82f   :  { %v712_v17 = vmul.f32 %v710_v15, %v710_v15  ;;  %1380 = vmatprep.subr.bf16.mxu0 %v1379_v12 }
 0x830   :  { %v717_v18 = vsel %vm52_vm0, %v713_v16, 0.0 }
 0x831   :  { %718 = vadd.xlane.f32.xlu1 %v717_v18  ;;  %v714_v19 = vsel %vm52_vm0, %v712_v17, 0.0 }
 0x832   :  { %715 = vadd.xlane.f32.xlu0 %v714_v19 }
 0x8be   :  { %v719_v29 = vpop.xlane.xlu1 %718 }
 0x8bf   :  { %v721_v30 = vmul.f32 0.03125, %v719_v29  ;;  %v716_v31 = vpop.xlane.xlu0 %715 }
 0x8c0   :  { %v720_v32 = vmul.f32 0.03125, %v716_v31 }
 0x8c1   :  { %v723_v33 = vadd.f32 1e-05, %v721_v30 }
 0x8c2   :  { %v722_v34 = vadd.f32 1e-05, %v720_v32  ;;  %v1159_v32 = vld [vmem:[%s1677_s8] ss:$0 sm:$0xff] }
 0x8c3   :  { %1396 = vrsqrt.f32 %v723_v33 }
 0x8c4   :  { %1398 = vrsqrt.f32 %v722_v34 }
 0x8cd   :  { %v1397_v35 = vpop.eup %1396 }
 0x8ce   :  { %v1399_v37 = vpop.eup %1398  ;;  %v727_v38 = vmul.f32 %v1397_v35, %v711_v14  ;;  %v985_v14 = vld [vmem:[%s1676_s7 + $0x18] sm:$0xff] }
 0x8cf   :  { %v726_v40 = vmul.f32 %v1399_v37, %v710_v15  ;;  %v1383_v15 = vpack.c.bf16 %v985_v14, %v984_v13 }
 0x8d0   :  { %v735_v41 = vmul.f32 %v1137_v36, %v727_v38 }
 0x8d1   :  { %v734_v42 = vmul.f32 %v1137_v36, %v726_v40 }
 0x8d2   :  { %v743_v43 = vadd.f32 %v1138_v39, %v735_v41 }
 0x8d3   :  { %v742_v44 = vadd.f32 %v1138_v39, %v734_v42 }
 0x8d4   :  { %1075 = vst.msk [vmem:[%s1675_s9 + $0x8] sm:$0xff] %vm52_vm0, %v743_v43 }
 0x8d5   :  { %1290 = vmatprep.mubr.msk.f32.mxu0 %vm52_vm0, %v742_v44  ;;  %1074 = vst.msk [vmem:[%s1675_s9] sm:$0xff] %vm52_vm0, %v742_v44 }
 0x8d6   :  { %1291 = vmatmul.mubr.msk.f32.vlgmr.msra.gmra.mrb[6].mxu0 %vm52_vm0, %v743_v43 }
 0x8d7   :  { %1382 = vmatpush3.bf16.msra.mxu0 %v1379_v12 }
 0x8d8   :  { %1384 = vmatprep.subr.bf16.mxu0 %v1383_v15 }
 0x8db   :  { %1386 = vmatpush3.bf16.msra.mxu0 %v1383_v15 }
 0x9a9   :  { %v1292_v49 = vpop.f32.mrb[6].mxu0 }
 0x9aa   :  { %v846_v50 = vadd.f32 %v1292_v49, %v1151_v48  ;;  %v840_v51 = vpop.f32.mrb[7].mxu0 }
 0x9ab   :  { %v841_v52 = vadd.f32 %v1151_v48, %v840_v51 }
 0x9ac   :  { %v850_v54 = vmax.f32 %v846_v50, 0.0 }
 0x9ad   :  { %v849_v53 = vmax.f32 %v841_v52, 0.0 }
 0x9af   :  { %1301 = vmatprep.mubr.msk.f32.mxu1 %vm52_vm0, %v849_v53 }
 0x9b0   :  { %1302 = vmatmul.mubr.msk.f32.vlgmr.msra.gmra.mrb[6].mxu1 %vm52_vm0, %v850_v54 }
 0xa83   :  { %v1303_v56 = vpop.f32.mrb[6].mxu1 }
 0xa84   :  { %v935_v57 = vadd.f32 %v1303_v56, %v1154_v55  ;;  %v929_v58 = vpop.f32.mrb[7].mxu1 }
 0xa85   :  { %v930_v59 = vadd.f32 %v1154_v55, %v929_v58 }
 0xa86   :  { %v939_v60 = vadd.f32 %v935_v57, %v743_v43 }
 0xa87   :  { %v938_v61 = vadd.f32 %v930_v59, %v742_v44 }
 0xa88   :  { %v943_v62 = vsel %vm52_vm0, %v939_v60, 0.0 }
 0xa89   :  { %944 = vadd.xlane.f32.xlu1 %v943_v62  ;;  %v940_v63 = vsel %vm52_vm0, %v938_v61, 0.0 }
 0xa8a   :  { %941 = vadd.xlane.f32.xlu0 %v940_v63 }
 0xb16   :  { %v945_v0 = vpop.xlane.xlu1 %944 }
 0xb17   :  { %v947_v1 = vmul.f32 0.03125, %v945_v0  ;;  %v942_v2 = vpop.xlane.xlu0 %941 }
 0xb18   :  { %v946_v3 = vmul.f32 0.03125, %v942_v2 }
 0xb19   :  { %v949_v4 = vsub.f32 %v939_v60, %v947_v1 }
 0xb1a   :  { %v948_v5 = vsub.f32 %v938_v61, %v946_v3 }
 0xb1b   :  { %v951_v6 = vmul.f32 %v949_v4, %v949_v4 }
 0xb1c   :  { %v950_v7 = vmul.f32 %v948_v5, %v948_v5 }
 0xb1d   :  { %v955_v8 = vsel %vm52_vm0, %v951_v6, 0.0 }
 0xb1e   :  { %956 = vadd.xlane.f32.xlu1 %v955_v8  ;;  %v952_v9 = vsel %vm52_vm0, %v950_v7, 0.0 }
 0xb1f   :  { %953 = vadd.xlane.f32.xlu0 %v952_v9 }
 0xbab   :  { %v957_v16 = vpop.xlane.xlu1 %956 }
 0xbac   :  { %v959_v17 = vmul.f32 0.03125, %v957_v16  ;;  %v954_v18 = vpop.xlane.xlu0 %953 }
 0xbad   :  { %v958_v19 = vmul.f32 0.03125, %v954_v18 }
 0xbae   :  { %v961_v20 = vadd.f32 1e-05, %v959_v17 }
 0xbaf   :  { %v960_v21 = vadd.f32 1e-05, %v958_v19 }
 0xbb0   :  { %1400 = vrsqrt.f32 %v961_v20 }
 0xbb1   :  { %1402 = vrsqrt.f32 %v960_v21 }
 0xbba   :  { %v1401_v22 = vpop.eup %1400 }
 0xbbb   :  { %v1403_v24 = vpop.eup %1402  ;;  %v965_v25 = vmul.f32 %v1401_v22, %v949_v4 }
 0xbbc   :  { %v964_v26 = vmul.f32 %v1403_v24, %v948_v5 }
 0xbbd   :  { %v973_v28 = vmul.f32 %v1157_v23, %v965_v25 }
 0xbbe   :  { %v972_v29 = vmul.f32 %v1157_v23, %v964_v26 }
 0xbbf   :  { %v981_v31 = vadd.f32 %v1158_v27, %v973_v28 }
 0xbc0   :  { %v980_v30 = vadd.f32 %v1158_v27, %v972_v29 }
 0xbc2   :  { %1312 = vmatprep.mubr.msk.f32.mxu0 %vm52_vm0, %v980_v30 }
 0xbc3   :  { %1313 = vmatmul.mubr.msk.f32.vlgmr.msra.gmra.mrb[8].mxu0 %vm52_vm0, %v981_v31 }
 0xc96   :  { %v1314_v33 = vpop.f32.mrb[8].mxu0 }
 0xc97   :  { %v1071_v34 = vadd.f32 %v1314_v33, %v1159_v32  ;;  %v1065_v35 = vpop.f32.mrb[9].mxu0 }
 0xc98   :  { %v1066_v36 = vadd.f32 %v1159_v32, %v1065_v35 }
 0xc99   :  { %1080 = vrot.lane.b32.xlu1 %v1071_v34, %s1404_s5 }
 0xc9a   :  { %1078 = vrot.lane.b32.xlu0 %v1066_v36, %s1404_s5 }
 0xd0b   :  { %v1081_v37 = vpop.permute.xlu1 %1080 }
 0xd0c   :  { %1086 = vst.msk [vmem:[%s1675_s9 + $0x8] sm:$0xff] %vm1084_vm1, %v1081_v37  ;;  %v1079_v38 = vpop.permute.xlu0 %1078 }
 0xd0d   :  { %1085 = vst.msk [vmem:[%s1675_s9] sm:$0xff] %vm1084_vm1, %v1079_v38 }

// kernel: forward.11
= control target key start
LH: loop header
LB: loop body
LE: loop exit
PB: predicated region body
PF: predicated region fallthrough
CT: control target
= control target key end

     0   :  { %v3935_v3 = vmov 0.0   ;;  %v3936_v4 = vmov 5   ;;  %v3937_v13 = vmov 4   ;;  %vm71_vm0 = vcmask 261120   ;;  %s3945_s26 = smov 16   ;;  %s3947_s28 = smov 96   ;;  %s4558_s5 = inlined_call_operand.vmem [shape: f32[32,192], index: 5, kind: input, shape index: {}]   ;;  %s4559_s1 = inlined_call_operand.vmem [shape: f32[16,9], index: 1, kind: input, shape index: {}]   ;;  %s4560_s0 = inlined_call_operand.vmem [shape: f32[16,32], index: 0, kind: input, shape index: {}]   ;;  %s4561_s2 = inlined_call_operand.vmem [shape: f32[16,3], index: 2, kind: input, shape index: {}]   ;;  %s4562_s3 = inlined_call_operand.vmem [shape: f32[1,16], index: 3, kind: input, shape index: {}]   ;;  %s4563_s6 = inlined_call_operand.vmem [shape: f32[1,192], index: 6, kind: input, shape index: {}]   ;;  %s4564_s4 = inlined_call_operand.vmem [shape: f32[16,16], index: 4, kind: input, shape index: {}]   ;;  %s4565_s7 = inlined_call_operand.vmem [shape: f32[32,32], index: 7, kind: input, shape index: {}]   ;;  %s4566_s8 = inlined_call_operand.vmem [shape: f32[1,32], index: 8, kind: input, shape index: {}]   ;;  %s4567_s9 = inlined_call_operand.vmem [shape: f32[1,32], index: 9, kind: input, shape index: {}]   ;;  %s4568_s10 = inlined_call_operand.vmem [shape: f32[1,32], index: 10, kind: input, shape index: {}]   ;;  %s4569_s11 = inlined_call_operand.vmem [shape: f32[16,32], index: 11, kind: output, shape index: {}]  }
   0x1   :  { %v48_v0 = vld [vmem:[%s4558_s5 + $0x8] sm:$0xff]  ;;  %v50_v1 = vld [vmem:[%s4558_s5 + $0x18] sm:$0xff]  ;;  %v47_v2 = vld [vmem:[%s4558_s5] sm:$0xff]  ;;  %142 = vmatprep.mubr.f32.mxu0 %v3935_v3  ;;  %3758 = vset.pattern.permute.xlu1 %v3936_v4  ;;  %v3938_v19 = vmov 1   ;;  %v3939_v20 = vmov 2   ;;  %v3940_v21 = vmov 7   ;;  %v61_v32 = vlaneseq }
   0x2   :  { %v3568_v5 = vpack.c.bf16 %v50_v1, %v48_v0  ;;  %v49_v6 = vld [vmem:[%s4558_s5 + $0x10] sm:$0xff]  ;;  %v52_v7 = vld [vmem:[%s4558_s5 + $0x28] sm:$0xff]  ;;  %v54_v8 = vld [vmem:[%s4558_s5 + $0x38] sm:$0xff]  ;;  %3757 = vset.pattern.permute.xlu0 %v3937_v13  ;;  %v3941_v22 = vmov 8   ;;  %v3942_v23 = vmov 3   ;;  %v3943_v25 = vmov 6  }
   0x3   :  { %v3570_v9 = vpack.c.bf16 %v49_v6, %v47_v2  ;;  %v3572_v10 = vpack.c.bf16 %v54_v8, %v52_v7  ;;  %v51_v11 = vld [vmem:[%s4558_s5 + $0x20] sm:$0xff]  ;;  %v53_v12 = vld [vmem:[%s4558_s5 + $0x30] sm:$0xff]  ;;  %v41_v16 = vld [vmem:[%s4559_s1 + $0x8] sm:$0xff]  ;;  %v3944_v26 = vmov 0   ;;  %v62_v35 = vshrl.u32 %v61_v32, 7  ;;  %s3952_s14 = smov 108  }
   0x4   :  { %3569 = vmatprep.subr.bf16.mxu0 %v3568_v5  ;;  %v40_v14 = vld [vmem:[%s4559_s1] sm:$0xff]  ;;  %v3574_v15 = vpack.c.bf16 %v53_v12, %v51_v11  ;;  %v39_v18 = vld [vmem:[%s4560_s0 + $0x8] sm:$0xff]  ;;  %vm3950_vm1 = vmmov 0   ;;  %vm428_vm2 = vcmask 31744   ;;  %vm837_vm4 = vcmask 64512   ;;  %s3954_s15 = smov 28  }
   0x5   :  { %3571 = vmatpush1.bf16.msra.mxu0 %v3570_v9  ;;  %250 = vperm.xlu1 %3758, %v40_v14   ;;  %v38_v17 = vld [vmem:[%s4560_s0] sm:$0xff]  ;;  %v43_v27 = vld [vmem:[%s4561_s2 + $0x8] sm:$0xff]  ;;  %v67_v37 = vsub.s32 1, %v62_v35  ;;  %v4091_v54 = vsub.s32 0, %v62_v35  ;;  %vm4257_vm3 = vmpackc.low %vm428_vm2, %vm428_vm2  ;;  %vm929_vm6 = vcmask 130048   ;;  %s3955_s16 = smov 120  }
   0x6   :  { %3573 = vmatprep.subr.bf16.mxu0 %v3572_v10  ;;  %230 = vperm.xlu0 %3757, %v40_v14   ;;  %v42_v24 = vld [vmem:[%s4561_s2] sm:$0xff]  ;;  %vm4281_vm5 = vmpackc.low %vm837_vm4, %vm837_vm4  ;;  %s3956_s17 = smov 88   ;;  %s3957_s18 = smov 104  }
   0x7   :  { %v4075_v28 = vld [vmem:[%s4562_s3] ss:$0 sm:$0xff]  ;;  %s3946_s3 = smov 112   ;;  %s3958_s19 = smov 56  }
   0x8   :  { %v55_v39 = vld [vmem:[%s4563_s6] sm:$0x3]  ;;  %s3948_s6 = smov 32   ;;  %s3959_s5 = smov 24  }
   0x9   :  { %3575 = vmatpush1.bf16.msra.mxu0 %v3574_v15  ;;  %254 = vperm.xlu1 %3758, %v41_v16   ;;  %v68_v40 = vrot.slane %v55_v39, %v67_v37  ;;  %v64_v58 = vrot.slane %v55_v39, %v4091_v54  ;;  %s3960_s20 = smov 80   ;;  %s3961_s24 = smov 100  }
   0xa   :  { %234 = vperm.xlu0 %3757, %v41_v16   ;;  %s3962_s25 = smov 48   ;;  %s3964_s2 = smov 72  }
   0xc   :  { %3178 = vmatmul.mubr.msk.f32.vlgmr.msra.gmra.mrb[0].mxu0 %vm71_vm0, %v38_v17 }
   0xd   :  { %148 = vmatprep.mubr.f32.mxu0 %v3935_v3  ;;  %3760 = vset.pattern.permute.xlu1 %v3938_v19 }
   0xe   :  { %172 = vperm.xlu1 %3760, %v41_v16   ;;  %3759 = vset.pattern.permute.xlu0 %v3938_v19 }
   0xf   :  { %168 = vperm.xlu0 %3759, %v40_v14  }
  0x10   :  { %3179 = vmatmul.mubr.msk.f32.gmra.mrb[2].mxu0 %vm71_vm0, %v39_v18 }
  0x11   :  { %3405 = vmatprep.mubr.msk.f32.mxu0 %vm3950_vm1, %v3935_v3 }
  0x12   :  { %3761 = vset.pattern.permute.xlu1 %v3939_v20 }
  0x13   :  { %188 = vperm.xlu1 %3761, %v40_v14   ;;  %3762 = vset.pattern.permute.xlu0 %v3939_v20 }
  0x14   :  { %192 = vperm.xlu0 %3762, %v41_v16  }
  0x17   :  { %3763 = vset.pattern.permute.xlu1 %v3940_v21 }
  0x18   :  { %290 = vperm.xlu1 %3763, %v40_v14   ;;  %3764 = vset.pattern.permute.xlu0 %v3941_v22 }
  0x19   :  { %310 = vperm.xlu0 %3764, %v40_v14  }
  0x1c   :  { %294 = vperm.xlu1 %3763, %v41_v16  }
  0x1d   :  { %3767 = vset.pattern.permute.xlu0 %v3942_v23 }
  0x1e   :  { %224 = vperm.xlu0 %3767, %v41_v16  }
  0x20   :  { %3765 = vset.pattern.permute.xlu1 %v3941_v22 }
  0x21   :  { %314 = vperm.xlu1 %3765, %v41_v16  }
  0x22   :  { %3769 = vset.pattern.permute.xlu0 %v3938_v19 }
  0x23   :  { %270 = vperm.xlu0 %3769, %v42_v24  }
  0x25   :  { %3766 = vset.pattern.permute.xlu1 %v3942_v23 }
  0x26   :  { %220 = vperm.xlu1 %3766, %v40_v14  }
  0x27   :  { %3772 = vset.pattern.permute.xlu0 %v3943_v25 }
  0x28   :  { %284 = vperm.xlu0 %3772, %v41_v16  }
  0x2a   :  { %3768 = vset.pattern.permute.xlu1 %v3944_v26 }
  0x2b   :  { %157 = vperm.xlu1 %3768, %v40_v14  }
  0x2c   :  { %3773 = vset.pattern.permute.xlu0 %v3944_v26 }
  0x2d   :  { %209 = vperm.xlu0 %3773, %v42_v24  }
  0x2f   :  { %162 = vperm.xlu1 %3768, %v41_v16  }
  0x31   :  { %3776 = vset.pattern.permute.xlu0 %v3939_v20 }
  0x32   :  { %334 = vperm.xlu0 %3776, %v43_v27  }
  0x33   :  { %3770 = vset.pattern.permute.xlu1 %v3938_v19 }
  0x34   :  { %274 = vperm.xlu1 %3770, %v43_v27  }
  0x36   :  { %407 = vrot.lane.b32.xlu0 %v4075_v28, %s3945_s26  ;;  %s3963_s26 = smov 20  }
  0x38   :  { %3771 = vset.pattern.permute.xlu1 %v3943_v25 }
  0x39   :  { %280 = vperm.xlu1 %3771, %v40_v14  }
  0x3d   :  { %3774 = vset.pattern.permute.xlu1 %v3944_v26 }
  0x3e   :  { %214 = vperm.xlu1 %3774, %v43_v27  }
  0x42   :  { %3775 = vset.pattern.permute.xlu1 %v3939_v20 }
  0x43   :  { %330 = vperm.xlu1 %3775, %v42_v24  }
  0x84   :  { %v251_v30 = vpop.permute.xlu1 %250 }
  0x85   :  { %v231_v29 = vpop.permute.xlu0 %230 }
  0x88   :  { %v255_v33 = vpop.permute.xlu1 %254 }
  0x89   :  { %v235_v31 = vpop.permute.xlu0 %234 }
  0x8d   :  { %v173_v36 = vpop.permute.xlu1 %172 }
  0x8e   :  { %v169_v34 = vpop.permute.xlu0 %168 }
  0x92   :  { %v189_v41 = vpop.permute.xlu1 %188 }
  0x93   :  { %v193_v38 = vpop.permute.xlu0 %192 }
  0x97   :  { %v291_v51 = vpop.permute.xlu1 %290 }
  0x98   :  { %v311_v44 = vpop.permute.xlu0 %310 }
  0x9b   :  { %v295_v57 = vpop.permute.xlu1 %294 }
  0x9d   :  { %v225_v13 = vpop.permute.xlu0 %224 }
  0xa0   :  { %v315_v7 = vpop.permute.xlu1 %314 }
  0xa2   :  { %v4132_v15 = vpop.permute.xlu0 %270 }
  0xa5   :  { %v221_v11 = vpop.permute.xlu1 %220 }
  0xa7   :  { %v4136_v17 = vpop.permute.xlu0 %284 }
  0xaa   :  { %v158_v12 = vpop.permute.xlu1 %157 }
  0xac   :  { %v4138_v18 = vpop.permute.xlu0 %209 }
  0xae   :  { %v4130_v14 = vpop.permute.xlu1 %162 }
  0xb1   :  { %v4142_v21 = vpop.permute.xlu0 %334 }
  0xb3   :  { %v4134_v16 = vpop.permute.xlu1 %274 }
  0xb5   :  { %v408_v23 = vpop.permute.xlu0 %407 }
  0xb8   :  { %v281_v19 = vpop.permute.xlu1 %280 }
  0xbd   :  { %v4140_v20 = vpop.permute.xlu1 %214 }
  0xc2   :  { %v4144_v22 = vpop.permute.xlu1 %330 }
  0xdf   :  { %v144_v42 = vpop.f32.mrb[0].mxu0 }
  0xe0   :  { %v146_v43 = vpop.f32.mrb[1].mxu0  ;;  %v4106_v62 = vadd.f32 %v144_v42, %v64_v58 }
  0xe1   :  { %v4081_v45 = vadd.f32 %v146_v43, %v68_v40 }
  0xe2   :  { %v175_v2 = vmul.f32 %v169_v34, %v4106_v62  ;;  %v237_v4 = vmul.f32 %v231_v29, %v4106_v62  ;;  %v297_v5 = vmul.f32 %v291_v51, %v4106_v62 }
  0xe3   :  { %v317_v46 = vmul.f32 %v311_v44, %v4081_v45  ;;  %v150_v47 = vpop.f32.mrb[2].mxu0  ;;  %v373_v48 = vmul.f32 %v231_v29, %v4081_v45  ;;  %v257_v53 = vmul.f32 %v251_v30, %v4081_v45  ;;  %v355_v56 = vmul.f32 %v169_v34, %v4081_v45 }
  0xe4   :  { %v152_v49 = vpop.f32.mrb[3].mxu0  ;;  %v4101_v60 = vadd.f32 %v150_v47, %v64_v58  ;;  %v195_v61 = vmul.f32 %v189_v41, %v4081_v45  ;;  %v391_v0 = vmul.f32 %v291_v51, %v4081_v45  ;;  %v353_v34 = vmul.f32 %v158_v12, %v4081_v45 }
  0xe5   :  { %v4085_v50 = vadd.f32 %v152_v49, %v68_v40  ;;  %377 = vrot.lane.b32.xlu1 %v373_v48, %s3946_s3  ;;  %321 = vrot.lane.b32.xlu0 %v317_v46, %s3947_s28  ;;  %v389_v35 = vmul.f32 %v281_v19, %v4081_v45 }
  0xe6   :  { %v238_v63 = vmul.f32 %v235_v31, %v4101_v60  ;;  %v176_v9 = vmul.f32 %v173_v36, %v4101_v60  ;;  %v298_v10 = vmul.f32 %v295_v57, %v4101_v60  ;;  %v228_v58 = vmul.f32 %v225_v13, %v4101_v60 }
  0xe7   :  { %v258_v52 = vmul.f32 %v255_v33, %v4085_v50  ;;  %v196_v55 = vmul.f32 %v193_v38, %v4085_v50  ;;  %v392_v59 = vmul.f32 %v295_v57, %v4085_v50  ;;  %v374_v1 = vmul.f32 %v235_v31, %v4085_v50 }
  0xe8   :  { %v356_v6 = vmul.f32 %v173_v36, %v4085_v50  ;;  %v318_v8 = vmul.f32 %v315_v7, %v4085_v50  ;;  %v371_v31 = vmul.f32 %v221_v11, %v4081_v45  ;;  %v372_v36 = vmul.f32 %v225_v13, %v4085_v50 }
  0xe9   :  { %263 = vrot.lane.b32.xlu0 %v258_v52, %s3947_s28  ;;  %261 = vrot.lane.b32.xlu1 %v257_v53, %s3947_s28  ;;  %v227_v52 = vmul.f32 %v221_v11, %v4106_v62  ;;  %v354_v57 = vmul.f32 %v4130_v14, %v4085_v50  ;;  %v165_v11 = vmul.f32 %v158_v12, %v4106_v62 }
  0xea   :  { %v166_v12 = vmul.f32 %v4130_v14, %v4101_v60 }
  0xed   :  { %201 = vrot.lane.b32.xlu0 %v196_v55, %s3947_s28  ;;  %359 = vrot.lane.b32.xlu1 %v355_v56, %s3946_s3 }
  0xf1   :  { %397 = vrot.lane.b32.xlu0 %v392_v59, %s3946_s3  ;;  %199 = vrot.lane.b32.xlu1 %v195_v61, %s3947_s28 }
  0xf5   :  { %243 = vrot.lane.b32.xlu0 %v238_v63, %s3946_s3  ;;  %395 = vrot.lane.b32.xlu1 %v391_v0, %s3946_s3  ;;  %v390_v63 = vmul.f32 %v4136_v17, %v4085_v50 }
  0xf9   :  { %379 = vrot.lane.b32.xlu1 %v374_v1, %s3946_s3  ;;  %179 = vrot.lane.b32.xlu0 %v175_v2, %s3946_s3 }
  0xfd   :  { %241 = vrot.lane.b32.xlu1 %v237_v4, %s3946_s3  ;;  %301 = vrot.lane.b32.xlu0 %v297_v5, %s3946_s3 }
 0x101   :  { %361 = vrot.lane.b32.xlu1 %v356_v6, %s3946_s3 }
 0x105   :  { %323 = vrot.lane.b32.xlu1 %v318_v8, %s3947_s28 }
 0x109   :  { %344 = vrot.lane.b32.xlu1 %v4075_v28, %s3947_s28 }
 0x10d   :  { %181 = vrot.lane.b32.xlu1 %v176_v9, %s3946_s3 }
 0x111   :  { %303 = vrot.lane.b32.xlu1 %v298_v10, %s3946_s3 }
 0x157   :  { %v378_v24 = vpop.permute.xlu1 %377  ;;  %v4146_v25 = vpop.permute.xlu0 %321 }
 0x158   :  { %v383_v33 = vadd.f32 %v378_v24, %v371_v31 }
 0x15b   :  { %v262_v26 = vpop.permute.xlu1 %261  ;;  %v264_v27 = vpop.permute.xlu0 %263 }
 0x15c   :  { %v385_v37 = vadd.f32 %v383_v33, %v262_v26 }
 0x15e   :  { %v387_v44 = vadd.f32 %v385_v37, %v4132_v15 }
 0x15f   :  { %v360_v28 = vpop.permute.xlu1 %359  ;;  %v4150_v30 = vpop.permute.xlu0 %201 }
 0x160   :  { %v365_v38 = vadd.f32 %v360_v28, %v353_v34  ;;  %v412_v53 = vmul.f32 %v408_v23, %v387_v44 }
 0x162   :  { %v730_v31 = vmul.f32 %v412_v53, %v412_v53 }
 0x163   :  { %v4148_v29 = vpop.permute.xlu1 %199  ;;  %v398_v39 = vpop.permute.xlu0 %397 }
 0x164   :  { %v367_v42 = vadd.f32 %v365_v38, %v4148_v29  ;;  %v402_v5 = vadd.f32 %v398_v39, %v390_v63 }
 0x166   :  { %v369_v49 = vadd.f32 %v367_v42, %v4138_v18 }
 0x167   :  { %v396_v32 = vpop.permute.xlu1 %395  ;;  %v244_v51 = vpop.permute.xlu0 %243 }
 0x168   :  { %v401_v40 = vadd.f32 %v396_v32, %v389_v35  ;;  %v410_v0 = vmul.f32 %v408_v23, %v369_v49  ;;  %v248_v4 = vadd.f32 %v244_v51, %v228_v58  ;;  %v287_v35 = vmul.f32 %v281_v19, %v4106_v62 }
 0x169   :  { %v3949_v49 = vmov 0.0|0.0  }
 0x16a   :  { %v403_v47 = vadd.f32 %v401_v40, %v4146_v25  ;;  %v728_v24 = vmul.f32 %v410_v0, %v410_v0  ;;  %v268_v28 = vadd.f32 %v264_v27, %v248_v4  ;;  %3594 = vmatprep.subr.bf16.mxu0 %v3949_v49 }
 0x16b   :  { %v380_v41 = vpop.permute.xlu1 %379  ;;  %v180_v6 = vpop.permute.xlu0 %179 }
 0x16c   :  { %v384_v43 = vadd.f32 %v380_v41, %v372_v36  ;;  %v405_v59 = vadd.f32 %v403_v47, %v4144_v22  ;;  %v185_v32 = vadd.f32 %v180_v6, %v165_v11  ;;  %v732_v41 = vadd.f32 %v730_v31, %v728_v24 }
 0x16e   :  { %v386_v46 = vadd.f32 %v384_v43, %v264_v27  ;;  %v414_v9 = vmul.f32 %v408_v23, %v405_v59  ;;  %v205_v44 = vadd.f32 %v4148_v29, %v185_v32 }
 0x16f   :  { %v242_v48 = vpop.permute.xlu1 %241  ;;  %v302_v38 = vpop.permute.xlu0 %301 }
 0x170   :  { %v388_v45 = vadd.f32 %v386_v46, %v4134_v16  ;;  %v247_v56 = vadd.f32 %v242_v48, %v227_v52  ;;  %v734_v37 = vmul.f32 %v414_v9, %v414_v9  ;;  %v307_v46 = vadd.f32 %v302_v38, %v287_v35 }
 0x172   :  { %v413_v55 = vmul.f32 %v408_v23, %v388_v45  ;;  %v267_v7 = vadd.f32 %v262_v26, %v247_v56  ;;  %v736_v48 = vadd.f32 %v734_v37, %v732_v41  ;;  %v217_v45 = vadd.f32 %v4138_v18, %v205_v44 }
 0x173   :  { %v362_v61 = vpop.permute.xlu1 %361  ;;  %v327_v58 = vadd.f32 %v4146_v25, %v307_v46 }
 0x174   :  { %v366_v1 = vadd.f32 %v362_v61, %v354_v57  ;;  %v4168_v2 = vpack.i.bf16 %v413_v55, %v412_v53  ;;  %v277_v33 = vadd.f32 %v4132_v15, %v267_v7  ;;  %v731_v43 = vmul.f32 %v413_v55, %v413_v55 }
 0x175   :  { %v278_v15 = vadd.f32 %v4134_v16, %v268_v28  ;;  %v288_v53 = vmul.f32 %v4136_v17, %v4101_v60  ;;  %v337_v61 = vadd.f32 %v4144_v22, %v327_v58 }
 0x176   :  { %v368_v8 = vadd.f32 %v366_v1, %v4150_v30  ;;  %3778 = vrot.lane.b32.xlu0 %v4168_v2, %s3946_s3 }
 0x177   :  { %v324_v10 = vpop.permute.xlu1 %323 }
 0x178   :  { %v370_v13 = vadd.f32 %v368_v8, %v4140_v20  ;;  %v404_v50 = vadd.f32 %v402_v5, %v324_v10 }
 0x17a   :  { %v411_v34 = vmul.f32 %v408_v23, %v370_v13  ;;  %v406_v26 = vadd.f32 %v404_v50, %v4142_v21 }
 0x17b   :  { %v345_v36 = vpop.permute.xlu1 %344 }
 0x17c   :  { %v415_v39 = vmul.f32 %v408_v23, %v406_v26  ;;  %v4178_v40 = vmul.f32 %v345_v36, %v277_v33  ;;  %v4182_v27 = vpack.i.bf16 %v411_v34, %v410_v0  ;;  %v729_v42 = vmul.f32 %v411_v34, %v411_v34 }
 0x17d   :  { %v4193_v16 = vmul.f32 %v345_v36, %v278_v15  ;;  %v4206_v59 = vmul.f32 %v345_v36, %v217_v45  ;;  %v4223_v0 = vmul.f32 %v345_v36, %v337_v61 }
 0x17e   :  { %418 = vrot.lane.b32.xlu0 %v4178_v40, %s3948_s6  ;;  %v735_v19 = vmul.f32 %v415_v39, %v415_v39  ;;  %v4188_v23 = vpack.i.bf16 %v415_v39, %v414_v9  ;;  %3783 = vrot.lane.b32.xlu1 %v4182_v27, %s3946_s3  ;;  %v733_v47 = vadd.f32 %v731_v43, %v729_v42 }
 0x17f   :  { %v182_v14 = vpop.permute.xlu1 %181  ;;  %v704_v25 = vmul.f32 %v4206_v59, %v4206_v59  ;;  %v710_v5 = vmul.f32 %v4223_v0, %v4223_v0  ;;  %v707_v6 = vmul.f32 %v4193_v16, %v4193_v16 }
 0x180   :  { %v186_v29 = vadd.f32 %v182_v14, %v166_v12  ;;  %v737_v51 = vadd.f32 %v735_v19, %v733_v47 }
 0x182   :  { %v206_v52 = vadd.f32 %v4150_v30, %v186_v29  ;;  %420 = vrot.lane.b32.xlu1 %v4193_v16, %s3948_s6  ;;  %v4201_v56 = vpack.i.bf16 %v737_v51, %v736_v48  ;;  %v3951_v51 = vmov 1.0  }
 0x183   :  { %v304_v55 = vpop.permute.xlu1 %303 }
 0x184   :  { %v308_v57 = vadd.f32 %v304_v55, %v288_v53  ;;  %v218_v18 = vadd.f32 %v4140_v20, %v206_v52  ;;  %3793 = vrot.lane.b32.xlu0 %v4201_v56, %s3946_s3  ;;  %v706_v20 = vmul.f32 %v4178_v40, %v4178_v40 }
 0x186   :  { %v328_v17 = vadd.f32 %v324_v10, %v308_v57  ;;  %3788 = vrot.lane.b32.xlu1 %v4188_v23, %s3946_s3  ;;  %v4215_v63 = vmul.f32 %v345_v36, %v218_v18  ;;  %v708_v22 = vadd.f32 %v706_v20, %v704_v25 }
 0x188   :  { %v338_v30 = vadd.f32 %v4142_v21, %v328_v17  ;;  %514 = vrot.lane.b32.xlu0 %v4206_v59, %s3948_s6  ;;  %v4231_v21 = vpack.i.bf16 %v4101_v60, %v4106_v62  ;;  %v705_v4 = vmul.f32 %v4215_v63, %v4215_v63  ;;  %v4247_v8 = vadd.f32 %v710_v5, %v708_v22 }
 0x18a   :  { %v4225_v1 = vmul.f32 %v345_v36, %v338_v30  ;;  %516 = vrot.lane.b32.xlu1 %v4215_v63, %s3948_s6  ;;  %v709_v9 = vadd.f32 %v707_v6, %v705_v4 }
 0x18c   :  { %3798 = vrot.lane.b32.xlu0 %v4231_v21, %s3947_s28  ;;  %v711_v7 = vmul.f32 %v4225_v1, %v4225_v1  ;;  %s3965_s28 = smov 40  }
 0x18e   :  { %609 = vrot.lane.b32.xlu1 %v4223_v0, %s3948_s6  ;;  %v4251_v10 = vadd.f32 %v711_v7, %v709_v9 }
 0x190   :  { %611 = vrot.lane.b32.xlu0 %v4225_v1, %s3948_s6 }
 0x192   :  { %716 = vrot.lane.b32.xlu1 %v4247_v8, %s3948_s6 }
 0x194   :  { %718 = vrot.lane.b32.xlu0 %v4251_v10, %s3948_s6 }
 0x1e8   :  { %v3779_v11 = vpop.permute.xlu0 %3778 }
 0x1e9   :  { %v3781_v13 = vunpack.i.h.bf16 %v3779_v11  ;;  %v3780_v50 = vunpack.i.l.bf16 %v3779_v11  ;;  %v4306_v11 = vld [vmem:[%s4564_s4 + $0x8] sm:$0xff] }
 0x1eb   :  { %v3576_v28 = vpack.c.bf16 %v3781_v13, %v3780_v50 }
 0x1ed   :  { %3578 = vmatprep.subr.msk.bf16.mxu1 %vm4257_vm3, %v3576_v28 }
 0x1ee   :  { %3581 = vmatpush3.bf16.xpose.msk.msra.mxu1 %vm4257_vm3, %v3576_v28  ;;  %v4311_v28 = vld [vmem:[%s4564_s4] sm:$0xff]  ;;  %s3953_s4 = smov 64  }
 0x1f0   :  { %v419_v31 = vpop.permute.xlu0 %418  ;;  %v3784_v32 = vpop.permute.xlu1 %3783 }
 0x1f1   :  { %3384 = vmatprep.mubr.msk.f32.mxu1 %vm428_vm2, %v419_v31  ;;  %v3786_v33 = vunpack.i.h.bf16 %v3784_v32  ;;  %v3785_v34 = vunpack.i.l.bf16 %v3784_v32 }
 0x1f3   :  { %v3582_v26 = vpack.c.bf16 %v3786_v33, %v3785_v34 }
 0x1f4   :  { %v421_v35 = vpop.permute.xlu1 %420 }
 0x1f5   :  { %3385 = vmatmul.mubr.msk.f32.vlgmr.msra.gmra.mrb[0].mxu1 %vm428_vm2, %v421_v35  ;;  %3584 = vmatprep.subr.msk.bf16.mxu1 %vm4257_vm3, %v3582_v26 }
 0x1f6   :  { %v3794_v36 = vpop.permute.xlu0 %3793  ;;  %3587 = vmatpush3.bf16.xpose.msk.msra.mxu1 %vm4257_vm3, %v3582_v26 }
 0x1f7   :  { %v3796_v37 = vunpack.i.h.bf16 %v3794_v36  ;;  %v3795_v38 = vunpack.i.l.bf16 %v3794_v36 }
 0x1f8   :  { %v3789_v39 = vpop.permute.xlu1 %3788 }
 0x1f9   :  { %v3595_v12 = vpack.c.bf16 %v3796_v37, %v3795_v38  ;;  %v3791_v41 = vunpack.i.h.bf16 %v3789_v39  ;;  %v3790_v42 = vunpack.i.l.bf16 %v3789_v39 }
 0x1fa   :  { %v515_v43 = vpop.permute.xlu0 %514 }
 0x1fb   :  { %v3588_v15 = vpack.c.bf16 %v3791_v41, %v3790_v42  ;;  %3391 = vmatprep.mubr.msk.f32.mxu1 %vm428_vm2, %v515_v43  ;;  %3597 = vmatpush3.bf16.xpose.msk.msra.mxu0 %vm4257_vm3, %v3595_v12 }
 0x1fc   :  { %v517_v44 = vpop.permute.xlu1 %516 }
 0x1fd   :  { %3392 = vmatmul.mubr.msk.f32.vlgmr.msra.gmra.mrb[0].mxu1 %vm428_vm2, %v517_v44  ;;  %3590 = vmatprep.subr.msk.bf16.mxu1 %vm4257_vm3, %v3588_v15 }
 0x1fe   :  { %3593 = vmatpush3.bf16.xpose.msk.msra.mxu1 %vm4257_vm3, %v3588_v15  ;;  %v3799_v19 = vpop.permute.xlu0 %3798 }
 0x1ff   :  { %v3801_v46 = vunpack.i.h.bf16 %v3799_v19  ;;  %v3800_v14 = vunpack.i.l.bf16 %v3799_v19 }
 0x200   :  { %v610_v47 = vpop.permute.xlu1 %609 }
 0x201   :  { %v3598_v29 = vpack.c.bf16 %v3801_v46, %v3800_v14  ;;  %3398 = vmatprep.mubr.msk.f32.mxu1 %vm428_vm2, %v610_v47 }
 0x202   :  { %3406 = vmatmul.mubr.msk.f32.vlgmr.msra.gmra.mrb[4].mxu0 %vm428_vm2, %v3951_v51  ;;  %v612_v45 = vpop.permute.xlu0 %611 }
 0x203   :  { %3600 = vmatprep.subr.msk.bf16.mxu0 %vm4281_vm5, %v3598_v29  ;;  %3412 = vmatprep.mubr.msk.f32.mxu0 %vm837_vm4, %v4106_v62 }
 0x204   :  { %3603 = vmatpush3.bf16.xpose.msk.msra.mxu0 %vm4281_vm5, %v3598_v29  ;;  %v717_v52 = vpop.permute.xlu1 %716 }
 0x205   :  { %3399 = vmatmul.mubr.msk.f32.vlgmr.msra.gmra.mrb[0].mxu1 %vm428_vm2, %v612_v45  ;;  %v722_v53 = vsel %vm428_vm2, %v717_v52, 0.0  ;;  %3626 = vmatprep.subr.bf16.mxu0 %v3949_v49 }
 0x206   :  { %v719_v55 = vpop.permute.xlu0 %718  ;;  %723 = vadd.xlane.f32.xlu1 %v722_v53 }
 0x207   :  { %v725_v57 = vsel %vm428_vm2, %v719_v55, 0.0 }
 0x208   :  { %726 = vadd.xlane.f32.xlu0 %v725_v57 }
 0x20b   :  { %3413 = vmatmul.mubr.msk.f32.vlgmr.msra.gmra.mrb[6].mxu0 %vm837_vm4, %v4101_v60 }
 0x20c   :  { %3447 = vmatprep.mubr.msk.f32.mxu0 %vm3950_vm1, %v3935_v3 }
 0x293   :  { %v724_v20 = vpop.xlane.xlu1 %723 }
 0x295   :  { %v727_v30 = vpop.xlane.xlu0 %726 }
 0x2d5   :  { %v817_v58 = vpop.f32.mrb[4].mxu0 }
 0x2d6   :  { %v824_v18 = vrot.slane %v817_v58, %v4091_v54  ;;  %v3407_v17 = vpop.f32.mrb[5].mxu0 }
 0x2d8   :  { %v826_v61 = vadd.f32 %v824_v18, %v727_v30  ;;  %v3400_v25 = vpop.f32.mrb[0].mxu1  ;;  %v825_v5 = vadd.f32 %v824_v18, %v724_v20 }
 0x2d9   :  { %v828_v22 = vmul.f32 2.0, %v3400_v25  ;;  %v693_v4 = vpop.f32.mrb[1].mxu1 }
 0x2da   :  { %v827_v6 = vmul.f32 2.0, %v693_v4 }
 0x2db   :  { %v830_v7 = vsub.f32 %v826_v61, %v828_v22 }
 0x2dc   :  { %v829_v9 = vsub.f32 %v825_v5, %v827_v6 }
 0x2dd   :  { %v926_v33 = vmul.f32 0.5, %v830_v7 }
 0x2de   :  { %v3414_v13 = vpop.f32.mrb[6].mxu0  ;;  %v925_v26 = vmul.f32 0.5, %v829_v9 }
 0x2df   :  { %v922_v50 = vmul.f32 0.35355338, %v3414_v13  ;;  %v912_v31 = vpop.f32.mrb[7].mxu0 }
 0x2e0   :  { %v921_v32 = vmul.f32 0.35355338, %v912_v31 }
 0x2e1   :  { %v924_v34 = vadd.f32 %v922_v50, %v4306_v11 }
 0x2e2   :  { %v923_v35 = vadd.f32 %v921_v32, %v4311_v28 }
 0x2e3   :  { %v928_v36 = vsub.f32 %v924_v34, %v926_v33 }
 0x2e4   :  { %v927_v37 = vsub.f32 %v923_v35, %v925_v26 }
 0x2e5   :  { %v933_v38 = vsel %vm929_vm6, %v928_v36, -inf }
 0x2e6   :  { %934 = vmax.xlane.f32.xlu1 %v933_v38  ;;  %v930_v39 = vsel %vm929_vm6, %v927_v37, -inf }
 0x2e7   :  { %931 = vmax.xlane.f32.xlu0 %v930_v39 }
 0x2f7   :  { %3808 = vrot.lane.b32.xlu1 %v4168_v2, %s3952_s14 }
 0x2fb   :  { %3813 = vrot.lane.b32.xlu1 %v4182_v27, %s3952_s14 }
 0x2fd   :  { %3803 = vrot.lane.b32.xlu0 %v4231_v21, %s3953_s4 }
 0x373   :  { %v935_v12 = vpop.xlane.xlu1 %934 }
 0x374   :  { %v937_v41 = vsub.f32 %v928_v36, %v935_v12  ;;  %v932_v42 = vpop.xlane.xlu0 %931 }
 0x375   :  { %v936_v43 = vsub.f32 %v927_v37, %v932_v42 }
 0x376   :  { %v940_v15 = vmul.f32 1.442695, %v937_v41 }
 0x377   :  { %v938_v44 = vmul.f32 1.442695, %v936_v43  ;;  %v3809_v19 = vpop.permute.xlu1 %3808 }
 0x378   :  { %3897 = vpow2.f32 %v940_v15  ;;  %v3811_v46 = vunpack.i.h.bf16 %v3809_v19  ;;  %v3804_v14 = vpop.permute.xlu0 %3803  ;;  %v3810_v47 = vunpack.i.l.bf16 %v3809_v19 }
 0x379   :  { %3899 = vpow2.f32 %v938_v44  ;;  %v3806_v29 = vunpack.i.h.bf16 %v3804_v14  ;;  %v3805_v45 = vunpack.i.l.bf16 %v3804_v14 }
 0x37a   :  { %v3608_v53 = vpack.c.bf16 %v3811_v46, %v3810_v47 }
 0x37b   :  { %v3604_v52 = vpack.c.bf16 %v3806_v29, %v3805_v45  ;;  %v3814_v17 = vpop.permute.xlu1 %3813 }
 0x37c   :  { %v3816_v13 = vunpack.i.h.bf16 %v3814_v17  ;;  %v3815_v50 = vunpack.i.l.bf16 %v3814_v17 }
 0x37d   :  { %3605 = vmatprep.subr.bf16.mxu1 %v3604_v52 }
 0x37e   :  { %3607 = vmatpush3.bf16.msra.mxu1 %v3604_v52  ;;  %v3614_v35 = vpack.c.bf16 %v3816_v13, %v3815_v50 }
 0x37f   :  { %3610 = vmatprep.subr.msk.bf16.mxu1 %vm4257_vm3, %v3608_v53 }
 0x382   :  { %v3898_v55 = vpop.eup %3897 }
 0x383   :  { %v3900_v57 = vpop.eup %3899  ;;  %v945_v58 = vsel %vm929_vm6, %v3898_v55, 0.0 }
 0x384   :  { %946 = vadd.xlane.f32.xlu1 %v945_v58  ;;  %v942_v18 = vsel %vm929_vm6, %v3900_v57, 0.0 }
 0x385   :  { %943 = vadd.xlane.f32.xlu0 %v942_v18 }
 0x395   :  { %1041 = vrot.lane.b32.xlu1 %v4193_v16, %s3954_s15 }
 0x399   :  { %3823 = vrot.lane.b32.xlu1 %v4188_v23, %s3952_s14 }
 0x39b   :  { %1039 = vrot.lane.b32.xlu0 %v4178_v40, %s3954_s15 }
 0x39d   :  { %1132 = vrot.lane.b32.xlu1 %v4215_v63, %s3954_s15 }
 0x39f   :  { %3818 = vrot.lane.b32.xlu0 %v4201_v56, %s3952_s14 }
 0x3a1   :  { %1221 = vrot.lane.b32.xlu1 %v4223_v0, %s3954_s15 }
 0x3a3   :  { %1130 = vrot.lane.b32.xlu0 %v4206_v59, %s3954_s15 }
 0x3a5   :  { %1414 = vrot.lane.b32.xlu1 %v4106_v62, %s3955_s16 }
 0x3a7   :  { %3828 = vrot.lane.b32.xlu0 %v4231_v21, %s3956_s17 }
 0x3a9   :  { %1314 = vrot.lane.b32.xlu1 %v4247_v8, %s3954_s15 }
 0x3ab   :  { %1223 = vrot.lane.b32.xlu0 %v4225_v1, %s3954_s15 }
 0x3af   :  { %1416 = vrot.lane.b32.xlu0 %v4101_v60, %s3955_s16 }
 0x3b3   :  { %1316 = vrot.lane.b32.xlu0 %v4251_v10, %s3954_s15 }
 0x411   :  { %v947_v30 = vpop.xlane.xlu1 %946 }
 0x412   :  { %3901 = vrcp.f32 %v947_v30  ;;  %v944_v61 = vpop.xlane.xlu0 %943 }
 0x413   :  { %3903 = vrcp.f32 %v944_v61 }
 0x415   :  { %v1042_v25 = vpop.permute.xlu1 %1041 }
 0x416   :  { %v1040_v20 = vpop.permute.xlu0 %1039 }
 0x419   :  { %v3824_v22 = vpop.permute.xlu1 %3823 }
 0x41a   :  { %v3819_v4 = vpop.permute.xlu0 %3818  ;;  %v3826_v12 = vunpack.i.h.bf16 %v3824_v22  ;;  %v3825_v41 = vunpack.i.l.bf16 %v3824_v22 }
 0x41b   :  { %v3821_v5 = vunpack.i.h.bf16 %v3819_v4  ;;  %v3820_v6 = vunpack.i.l.bf16 %v3819_v4 }
 0x41c   :  { %v3902_v7 = vpop.eup %3901  ;;  %v3620_v44 = vpack.c.bf16 %v3826_v12, %v3825_v41 }
 0x41d   :  { %v3904_v9 = vpop.eup %3903  ;;  %v3627_v31 = vpack.c.bf16 %v3821_v5, %v3820_v6  ;;  %v1133_v32 = vpop.permute.xlu1 %1132  ;;  %v951_v26 = vmul.f32 %v3902_v7, %v3898_v55 }
 0x41e   :  { %v1131_v33 = vpop.permute.xlu0 %1130  ;;  %v950_v34 = vmul.f32 %v3904_v9, %v3900_v57 }
 0x41f   :  { %3629 = vmatpush3.bf16.xpose.msk.msra.mxu0 %vm4257_vm3, %v3627_v31 }
 0x420   :  { %3419 = vmatprep.mubr.msk.f32.mxu1 %vm929_vm6, %v950_v34 }
 0x421   :  { %3420 = vmatmul.mubr.msk.f32.vlgmr.msra.gmra.mrb[2].mxu1 %vm929_vm6, %v951_v26  ;;  %v1222_v36 = vpop.permute.xlu1 %1221 }
 0x422   :  { %3613 = vmatpush3.bf16.xpose.msk.msra.mxu1 %vm4257_vm3, %v3608_v53  ;;  %v3829_v37 = vpop.permute.xlu0 %3828  ;;  %3426 = vmatprep.mubr.msk.f32.mxu1 %vm428_vm2, %v1040_v20 }
 0x423   :  { %v3831_v38 = vunpack.i.h.bf16 %v3829_v37  ;;  %v3830_v39 = vunpack.i.l.bf16 %v3829_v37  ;;  %3616 = vmatprep.subr.msk.bf16.mxu1 %vm4257_vm3, %v3614_v35 }
 0x425   :  { %v3630_v42 = vpack.c.bf16 %v3831_v38, %v3830_v39  ;;  %v1415_v43 = vpop.permute.xlu1 %1414 }
 0x426   :  { %v1224_v15 = vpop.permute.xlu0 %1223  ;;  %3448 = vmatmul.mubr.msk.f32.vlgmr.msra.gmra.mrb[8].mxu0 %vm428_vm2, %v3951_v51 }
 0x427   :  { %3632 = vmatprep.subr.msk.bf16.mxu0 %vm4281_vm5, %v3630_v42  ;;  %3454 = vmatprep.mubr.msk.f32.mxu0 %vm837_vm4, %v1415_v43 }
 0x428   :  { %3635 = vmatpush3.bf16.xpose.msk.msra.mxu0 %vm4281_vm5, %v3630_v42 }
 0x429   :  { %3427 = vmatmul.mubr.msk.f32.vlgmr.msra.gmra.mrb[4].mxu1 %vm428_vm2, %v1042_v25  ;;  %v1315_v19 = vpop.permute.xlu1 %1314 }
 0x42a   :  { %3619 = vmatpush3.bf16.xpose.msk.msra.mxu1 %vm4257_vm3, %v3614_v35  ;;  %3433 = vmatprep.mubr.msk.f32.mxu1 %vm428_vm2, %v1131_v33  ;;  %v1417_v46 = vpop.permute.xlu0 %1416  ;;  %v1320_v14 = vsel %vm428_vm2, %v1315_v19, 0.0 }
 0x42b   :  { %3622 = vmatprep.subr.msk.bf16.mxu1 %vm4257_vm3, %v3620_v44  ;;  %1321 = vadd.xlane.f32.xlu1 %v1320_v14 }
 0x42e   :  { %v1317_v47 = vpop.permute.xlu0 %1316 }
 0x42f   :  { %3455 = vmatmul.mubr.msk.f32.vlgmr.msra.gmra.mrb[10].mxu0 %vm837_vm4, %v1417_v46  ;;  %v1323_v29 = vsel %vm428_vm2, %v1317_v47, 0.0 }
 0x430   :  { %1324 = vadd.xlane.f32.xlu0 %v1323_v29 }
 0x431   :  { %3434 = vmatmul.mubr.msk.f32.vlgmr.msra.gmra.mrb[4].mxu1 %vm428_vm2, %v1133_v32 }
 0x432   :  { %3625 = vmatpush3.bf16.xpose.msk.msra.mxu1 %vm4257_vm3, %v3620_v44  ;;  %3440 = vmatprep.mubr.msk.f32.mxu1 %vm428_vm2, %v1222_v36 }
 0x439   :  { %3441 = vmatmul.mubr.msk.f32.vlgmr.msra.gmra.mrb[4].mxu1 %vm428_vm2, %v1224_v15 }
 0x4b8   :  { %v1322_v61 = vpop.xlane.xlu1 %1321 }
 0x4bd   :  { %v1325_v17 = vpop.xlane.xlu0 %1324 }
 0x4f4   :  { %v4371_v45 = vpop.f32.mrb[2].mxu1 }
 0x4f5   :  { %v4373_v52 = vpop.f32.mrb[3].mxu1 }
 0x4f9   :  { %v1400_v53 = vpop.f32.mrb[8].mxu0 }
 0x4fa   :  { %v3449_v55 = vpop.f32.mrb[9].mxu0  ;;  %v1407_v18 = vrot.slane %v1400_v53, %v4091_v54 }
 0x4fc   :  { %v1409_v25 = vadd.f32 %v1407_v18, %v1325_v17  ;;  %v1408_v5 = vadd.f32 %v1407_v18, %v1322_v61 }
 0x502   :  { %v3456_v57 = vpop.f32.mrb[10].mxu0 }
 0x503   :  { %v1496_v58 = vpop.f32.mrb[11].mxu0  ;;  %v1506_v20 = vmul.f32 0.35355338, %v3456_v57 }
 0x504   :  { %v1505_v6 = vmul.f32 0.35355338, %v1496_v58 }
 0x505   :  { %v1508_v50 = vadd.f32 %v1506_v20, %v4306_v11 }
 0x506   :  { %v1507_v32 = vadd.f32 %v1505_v6, %v4311_v28 }
 0x50c   :  { %v3442_v30 = vpop.f32.mrb[4].mxu1 }
 0x50d   :  { %v1411_v22 = vmul.f32 2.0, %v3442_v30  ;;  %v1303_v4 = vpop.f32.mrb[5].mxu1 }
 0x50e   :  { %v1410_v7 = vmul.f32 2.0, %v1303_v4 }
 0x50f   :  { %v1413_v9 = vsub.f32 %v1409_v25, %v1411_v22 }
 0x510   :  { %v1412_v13 = vsub.f32 %v1408_v5, %v1410_v7 }
 0x511   :  { %v1510_v31 = vmul.f32 0.5, %v1413_v9 }
 0x512   :  { %v1509_v33 = vmul.f32 0.5, %v1412_v13 }
 0x513   :  { %v1512_v34 = vsub.f32 %v1508_v50, %v1510_v31 }
 0x514   :  { %v1511_v26 = vsub.f32 %v1507_v32, %v1509_v33 }
 0x515   :  { %v1516_v35 = vsel %vm929_vm6, %v1512_v34, -inf }
 0x516   :  { %1517 = vmax.xlane.f32.xlu1 %v1516_v35  ;;  %v1513_v36 = vsel %vm929_vm6, %v1511_v26, -inf }
 0x517   :  { %1514 = vmax.xlane.f32.xlu0 %v1513_v36 }
 0x5a3   :  { %v1518_v37 = vpop.xlane.xlu1 %1517 }
 0x5a4   :  { %v1520_v38 = vsub.f32 %v1512_v34, %v1518_v37  ;;  %v1515_v39 = vpop.xlane.xlu0 %1514 }
 0x5a5   :  { %v1519_v12 = vsub.f32 %v1511_v26, %v1515_v39 }
 0x5a6   :  { %v1523_v41 = vmul.f32 1.442695, %v1520_v38 }
 0x5a7   :  { %v1521_v42 = vmul.f32 1.442695, %v1519_v12 }
 0x5a8   :  { %3905 = vpow2.f32 %v1523_v41 }
 0x5a9   :  { %3907 = vpow2.f32 %v1521_v42 }
 0x5b2   :  { %v3906_v43 = vpop.eup %3905 }
 0x5b3   :  { %v3908_v15 = vpop.eup %3907  ;;  %v1528_v44 = vsel %vm929_vm6, %v3906_v43, 0.0 }
 0x5b4   :  { %1529 = vadd.xlane.f32.xlu1 %v1528_v44  ;;  %v1525_v19 = vsel %vm929_vm6, %v3908_v15, 0.0  ;;  %v56_v44 = vld [vmem:[%s4565_s7] sm:$0xff] }
 0x5b5   :  { %1526 = vadd.xlane.f32.xlu0 %v1525_v19 }
 0x5c5   :  { %3838 = vrot.lane.b32.xlu1 %v4168_v2, %s3957_s18 }
 0x5c9   :  { %3843 = vrot.lane.b32.xlu1 %v4182_v27, %s3957_s18 }
 0x5cb   :  { %3833 = vrot.lane.b32.xlu0 %v4231_v21, %s3958_s19 }
 0x5cd   :  { %1786 = vrot.lane.b32.xlu1 %v4193_v16, %s3959_s5 }
 0x5cf   :  { %1784 = vrot.lane.b32.xlu0 %v4178_v40, %s3959_s5 }
 0x5d1   :  { %3853 = vrot.lane.b32.xlu1 %v4188_v23, %s3957_s18 }
 0x5d3   :  { %3848 = vrot.lane.b32.xlu0 %v4201_v56, %s3957_s18 }
 0x5d5   :  { %1877 = vrot.lane.b32.xlu1 %v4215_v63, %s3959_s5 }
 0x5d7   :  { %1875 = vrot.lane.b32.xlu0 %v4206_v59, %s3959_s5 }
 0x5d9   :  { %1966 = vrot.lane.b32.xlu1 %v4223_v0, %s3959_s5 }
 0x5db   :  { %3858 = vrot.lane.b32.xlu0 %v4231_v21, %s3960_s20 }
 0x5dd   :  { %2159 = vrot.lane.b32.xlu1 %v4106_v62, %s3946_s3 }
 0x5df   :  { %1968 = vrot.lane.b32.xlu0 %v4225_v1, %s3959_s5 }
 0x5e1   :  { %2059 = vrot.lane.b32.xlu1 %v4247_v8, %s3959_s5 }
 0x5e3   :  { %2161 = vrot.lane.b32.xlu0 %v4101_v60, %s3946_s3 }
 0x5e7   :  { %2061 = vrot.lane.b32.xlu0 %v4251_v10, %s3959_s5 }
 0x641   :  { %v1530_v46 = vpop.xlane.xlu1 %1529 }
 0x642   :  { %3909 = vrcp.f32 %v1530_v46  ;;  %v1527_v14 = vpop.xlane.xlu0 %1526 }
 0x643   :  { %3911 = vrcp.f32 %v1527_v14 }
 0x645   :  { %v3839_v47 = vpop.permute.xlu1 %3838 }
 0x646   :  { %v3841_v29 = vunpack.i.h.bf16 %v3839_v47  ;;  %v3840_v53 = vunpack.i.l.bf16 %v3839_v47  ;;  %v3834_v55 = vpop.permute.xlu0 %3833 }
 0x647   :  { %v3836_v57 = vunpack.i.h.bf16 %v3834_v55  ;;  %v3835_v58 = vunpack.i.l.bf16 %v3834_v55 }
 0x648   :  { %v3640_v18 = vpack.c.bf16 %v3841_v29, %v3840_v53 }
 0x649   :  { %v3636_v17 = vpack.c.bf16 %v3836_v57, %v3835_v58  ;;  %v3844_v30 = vpop.permute.xlu1 %3843 }
 0x64a   :  { %v3846_v61 = vunpack.i.h.bf16 %v3844_v30  ;;  %v3845_v25 = vunpack.i.l.bf16 %v3844_v30  ;;  %3642 = vmatprep.subr.msk.bf16.mxu1 %vm4257_vm3, %v3640_v18  ;;  %v1785_v20 = vpop.permute.xlu0 %1784 }
 0x64b   :  { %3637 = vmatprep.subr.bf16.mxu0 %v3636_v17  ;;  %3645 = vmatpush3.bf16.xpose.msk.msra.mxu1 %vm4257_vm3, %v3640_v18 }
 0x64c   :  { %v3910_v22 = vpop.eup %3909  ;;  %v3646_v4 = vpack.c.bf16 %v3846_v61, %v3845_v25  ;;  %3478 = vmatprep.mubr.msk.f32.mxu1 %vm428_vm2, %v1785_v20  ;;  %3639 = vmatpush3.bf16.msra.mxu0 %v3636_v17 }
 0x64d   :  { %v3912_v5 = vpop.eup %3911  ;;  %v1787_v6 = vpop.permute.xlu1 %1786  ;;  %v1534_v13 = vmul.f32 %v3910_v22, %v3906_v43 }
 0x64e   :  { %3648 = vmatprep.subr.msk.bf16.mxu1 %vm4257_vm3, %v3646_v4  ;;  %v3849_v7 = vpop.permute.xlu0 %3848  ;;  %v1533_v9 = vmul.f32 %v3912_v5, %v3908_v15  ;;  %v57_v15 = vld [vmem:[%s4565_s7 + $0x8] sm:$0xff] }
 0x64f   :  { %3464 = vmatprep.subr.mxu0 %v57_v15  ;;  %v3851_v14 = vunpack.i.h.bf16 %v3849_v7  ;;  %v3850_v47 = vunpack.i.l.bf16 %v3849_v7 }
 0x650   :  { %3461 = vmatprep.mubr.msk.f32.mxu0 %vm929_vm6, %v1533_v9 }
 0x651   :  { %v3854_v50 = vpop.permute.xlu1 %3853  ;;  %3462 = vmatmul.mubr.msk.f32.vlgmr.msra.gmra.mrb[12].mxu0 %vm929_vm6, %v1534_v13  ;;  %v3659_v55 = vpack.c.bf16 %v3851_v14, %v3850_v47 }
 0x652   :  { %v3856_v31 = vunpack.i.h.bf16 %v3854_v50  ;;  %v3855_v32 = vunpack.i.l.bf16 %v3854_v50  ;;  %3479 = vmatmul.mubr.msk.f32.vlgmr.msra.gmra.mrb[6].mxu1 %vm428_vm2, %v1787_v6  ;;  %v1876_v33 = vpop.permute.xlu0 %1875  ;;  %3465 = vmatpush3.msra.mxu0 %v57_v15 }
 0x653   :  { %3651 = vmatpush3.bf16.xpose.msk.msra.mxu1 %vm4257_vm3, %v3646_v4  ;;  %3485 = vmatprep.mubr.msk.f32.mxu1 %vm428_vm2, %v1876_v33 }
 0x654   :  { %v3652_v34 = vpack.c.bf16 %v3856_v31, %v3855_v32  ;;  %3469 = vmatprep.subr.mxu0 %v56_v44 }
 0x655   :  { %v1878_v26 = vpop.permute.xlu1 %1877 }
 0x656   :  { %3654 = vmatprep.subr.msk.bf16.mxu1 %vm4257_vm3, %v3652_v34  ;;  %v3859_v35 = vpop.permute.xlu0 %3858 }
 0x657   :  { %v3861_v29 = vunpack.i.h.bf16 %v3859_v35  ;;  %v3860_v53 = vunpack.i.l.bf16 %v3859_v35 }
 0x659   :  { %v1967_v36 = vpop.permute.xlu1 %1966  ;;  %v3662_v57 = vpack.c.bf16 %v3861_v29, %v3860_v53 }
 0x65a   :  { %3486 = vmatmul.mubr.msk.f32.vlgmr.msra.gmra.mrb[6].mxu1 %vm428_vm2, %v1878_v26  ;;  %v1969_v37 = vpop.permute.xlu0 %1968 }
 0x65b   :  { %3657 = vmatpush3.bf16.xpose.msk.msra.mxu1 %vm4257_vm3, %v3652_v34  ;;  %3492 = vmatprep.mubr.msk.f32.mxu1 %vm428_vm2, %v1967_v36 }
 0x65d   :  { %v2160_v38 = vpop.permute.xlu1 %2159 }
 0x65e   :  { %v2162_v39 = vpop.permute.xlu0 %2161 }
 0x661   :  { %v2060_v12 = vpop.permute.xlu1 %2059 }
 0x662   :  { %v2065_v41 = vsel %vm428_vm2, %v2060_v12, 0.0  ;;  %3493 = vmatmul.mubr.msk.f32.vlgmr.msra.gmra.mrb[6].mxu1 %vm428_vm2, %v1969_v37  ;;  %v2062_v42 = vpop.permute.xlu0 %2061 }
 0x663   :  { %2066 = vadd.xlane.f32.xlu1 %v2065_v41  ;;  %v2068_v43 = vsel %vm428_vm2, %v2062_v42, 0.0 }
 0x664   :  { %2069 = vadd.xlane.f32.xlu0 %v2068_v43 }
 0x6f0   :  { %v2067_v30 = vpop.xlane.xlu1 %2066 }
 0x6f1   :  { %v2070_v61 = vpop.xlane.xlu0 %2069 }
 0x724   :  { %v3463_v19 = vpop.f32.mrb[12].mxu0 }
 0x725   :  { %v1613_v46 = vpop.f32.mrb[13].mxu0 }
 0x726   :  { %3466 = vmatprep.mubr.msk.f32.mxu0 %vm837_vm4, %v1613_v46 }
 0x727   :  { %3467 = vmatmul.mubr.msk.f32.vlgmr.msra.gmra.mrb[14].mxu0 %vm837_vm4, %v3463_v19 }
 0x728   :  { %3470 = vmatpush3.msra.mxu0 %v56_v44  ;;  %3471 = vmatprep.mubr.msk.f32.mxu0 %vm837_vm4, %v4373_v52 }
 0x729   :  { %3658 = vmatprep.subr.bf16.mxu0 %v3949_v49 }
 0x72f   :  { %3472 = vmatmul.mubr.msk.f32.vlgmr.msra.gmra.mrb[14].mxu0 %vm837_vm4, %v4371_v45 }
 0x730   :  { %3661 = vmatpush3.bf16.xpose.msk.msra.mxu0 %vm4257_vm3, %v3659_v55  ;;  %3499 = vmatprep.mubr.msk.f32.mxu0 %vm3950_vm1, %v3935_v3 }
 0x731   :  { %3664 = vmatprep.subr.msk.bf16.mxu0 %vm4281_vm5, %v3662_v57 }
 0x735   :  { %v3494_v52 = vpop.f32.mrb[6].mxu1 }
 0x736   :  { %v2048_v58 = vpop.f32.mrb[7].mxu1  ;;  %v2156_v25 = vmul.f32 2.0, %v3494_v52 }
 0x737   :  { %3500 = vmatmul.mubr.msk.f32.vlgmr.msra.gmra.mrb[16].mxu0 %vm428_vm2, %v3951_v51  ;;  %v2155_v20 = vmul.f32 2.0, %v2048_v58 }
 0x738   :  { %3667 = vmatpush3.bf16.xpose.msk.msra.mxu0 %vm4281_vm5, %v3662_v57  ;;  %3506 = vmatprep.mubr.msk.f32.mxu0 %vm837_vm4, %v2160_v38 }
 0x73f   :  { %3507 = vmatmul.mubr.msk.f32.vlgmr.msra.gmra.mrb[18].mxu0 %vm837_vm4, %v2162_v39 }
 0x80a   :  { %v2145_v45 = vpop.f32.mrb[16].mxu0 }
 0x80b   :  { %v2152_v18 = vrot.slane %v2145_v45, %v4091_v54  ;;  %v3501_v17 = vpop.f32.mrb[17].mxu0 }
 0x80d   :  { %v2153_v22 = vadd.f32 %v2152_v18, %v2067_v30  ;;  %v2154_v4 = vadd.f32 %v2152_v18, %v2070_v61 }
 0x80f   :  { %v2157_v5 = vsub.f32 %v2153_v22, %v2155_v20  ;;  %v2158_v6 = vsub.f32 %v2154_v4, %v2156_v25 }
 0x811   :  { %v2255_v31 = vmul.f32 0.5, %v2158_v6  ;;  %v2254_v34 = vmul.f32 0.5, %v2157_v5 }
 0x812   :  { %v3508_v7 = vpop.f32.mrb[18].mxu0 }
 0x813   :  { %v2251_v9 = vmul.f32 0.35355338, %v3508_v7  ;;  %v2241_v13 = vpop.f32.mrb[19].mxu0 }
 0x814   :  { %v2250_v50 = vmul.f32 0.35355338, %v2241_v13 }
 0x815   :  { %v2253_v32 = vadd.f32 %v2251_v9, %v4306_v11 }
 0x816   :  { %v2252_v33 = vadd.f32 %v2250_v50, %v4311_v28  ;;  %v58_v50 = vld [vmem:[%s4565_s7 + $0x10] sm:$0xff] }
 0x817   :  { %v2257_v26 = vsub.f32 %v2253_v32, %v2255_v31 }
 0x818   :  { %v2256_v35 = vsub.f32 %v2252_v33, %v2254_v34 }
 0x819   :  { %v2261_v36 = vsel %vm929_vm6, %v2257_v26, -inf }
 0x81a   :  { %2262 = vmax.xlane.f32.xlu1 %v2261_v36  ;;  %v2258_v37 = vsel %vm929_vm6, %v2256_v35, -inf }
 0x81b   :  { %2259 = vmax.xlane.f32.xlu0 %v2258_v37 }
 0x8a7   :  { %v2263_v38 = vpop.xlane.xlu1 %2262 }
 0x8a8   :  { %v2265_v39 = vsub.f32 %v2257_v26, %v2263_v38  ;;  %v2260_v12 = vpop.xlane.xlu0 %2259 }
 0x8a9   :  { %v2264_v41 = vsub.f32 %v2256_v35, %v2260_v12 }
 0x8aa   :  { %v2268_v42 = vmul.f32 1.442695, %v2265_v39 }
 0x8ab   :  { %v2266_v43 = vmul.f32 1.442695, %v2264_v41 }
 0x8ac   :  { %3913 = vpow2.f32 %v2268_v42 }
 0x8ad   :  { %3915 = vpow2.f32 %v2266_v43 }
 0x8b6   :  { %v3914_v15 = vpop.eup %3913 }
 0x8b7   :  { %v3916_v44 = vpop.eup %3915  ;;  %v2273_v19 = vsel %vm929_vm6, %v3914_v15, 0.0 }
 0x8b8   :  { %2274 = vadd.xlane.f32.xlu1 %v2273_v19  ;;  %v2270_v46 = vsel %vm929_vm6, %v3916_v44, 0.0 }
 0x8b9   :  { %2271 = vadd.xlane.f32.xlu0 %v2270_v46 }
 0x8c9   :  { %3868 = vrot.lane.b32.xlu1 %v4168_v2, %s3961_s24 }
 0x8cd   :  { %3873 = vrot.lane.b32.xlu1 %v4182_v27, %s3961_s24 }
 0x8cf   :  { %3863 = vrot.lane.b32.xlu0 %v4231_v21, %s3962_s25 }
 0x8d1   :  { %2452 = vrot.lane.b32.xlu1 %v4193_v16, %s3963_s26 }
 0x8d3   :  { %2450 = vrot.lane.b32.xlu0 %v4178_v40, %s3963_s26 }
 0x8d5   :  { %3883 = vrot.lane.b32.xlu1 %v4188_v23, %s3961_s24 }
 0x8d7   :  { %3878 = vrot.lane.b32.xlu0 %v4201_v56, %s3961_s24 }
 0x8d9   :  { %2543 = vrot.lane.b32.xlu1 %v4215_v63, %s3963_s26 }
 0x8db   :  { %2541 = vrot.lane.b32.xlu0 %v4206_v59, %s3963_s26 }
 0x8dd   :  { %2632 = vrot.lane.b32.xlu1 %v4223_v0, %s3963_s26 }
 0x8df   :  { %3888 = vrot.lane.b32.xlu0 %v4231_v21, %s3964_s2 }
 0x8e1   :  { %2825 = vrot.lane.b32.xlu1 %v4106_v62, %s3957_s18 }
 0x8e3   :  { %2634 = vrot.lane.b32.xlu0 %v4225_v1, %s3963_s26 }
 0x8e5   :  { %2725 = vrot.lane.b32.xlu1 %v4247_v8, %s3963_s26 }
 0x8e7   :  { %2827 = vrot.lane.b32.xlu0 %v4101_v60, %s3957_s18 }
 0x8eb   :  { %2727 = vrot.lane.b32.xlu0 %v4251_v10, %s3963_s26 }
 0x945   :  { %v2275_v2 = vpop.xlane.xlu1 %2274 }
 0x946   :  { %3917 = vrcp.f32 %v2275_v2  ;;  %v2272_v40 = vpop.xlane.xlu0 %2271 }
 0x947   :  { %3919 = vrcp.f32 %v2272_v40 }
 0x949   :  { %v3869_v27 = vpop.permute.xlu1 %3868 }
 0x94a   :  { %v3871_v23 = vunpack.i.h.bf16 %v3869_v27  ;;  %v3870_v16 = vunpack.i.l.bf16 %v3869_v27  ;;  %v3864_v56 = vpop.permute.xlu0 %3863 }
 0x94b   :  { %v3866_v59 = vunpack.i.h.bf16 %v3864_v56  ;;  %v3865_v63 = vunpack.i.l.bf16 %v3864_v56 }
 0x94c   :  { %v3672_v62 = vpack.c.bf16 %v3871_v23, %v3870_v16 }
 0x94d   :  { %v3668_v0 = vpack.c.bf16 %v3866_v59, %v3865_v63  ;;  %v3874_v1 = vpop.permute.xlu1 %3873 }
 0x94e   :  { %v3876_v14 = vunpack.i.h.bf16 %v3874_v1  ;;  %v3875_v8 = vunpack.i.l.bf16 %v3874_v1  ;;  %3674 = vmatprep.subr.msk.bf16.mxu1 %vm4257_vm3, %v3672_v62  ;;  %v2451_v60 = vpop.permute.xlu0 %2450 }
 0x94f   :  { %3669 = vmatprep.subr.bf16.mxu0 %v3668_v0  ;;  %3677 = vmatpush3.bf16.xpose.msk.msra.mxu1 %vm4257_vm3, %v3672_v62 }
 0x950   :  { %v3918_v10 = vpop.eup %3917  ;;  %v3678_v47 = vpack.c.bf16 %v3876_v14, %v3875_v8  ;;  %3525 = vmatprep.mubr.msk.f32.mxu1 %vm428_vm2, %v2451_v60  ;;  %3671 = vmatpush3.bf16.msra.mxu0 %v3668_v0 }
 0x951   :  { %v3920_v29 = vpop.eup %3919  ;;  %v2453_v53 = vpop.permute.xlu1 %2452  ;;  %v2279_v52 = vmul.f32 %v3918_v10, %v3914_v15  ;;  %3516 = vmatprep.subr.mxu0 %v58_v50 }
 0x952   :  { %3680 = vmatprep.subr.msk.bf16.mxu1 %vm4257_vm3, %v3678_v47  ;;  %v3879_v55 = vpop.permute.xlu0 %3878  ;;  %v2278_v57 = vmul.f32 %v3920_v29, %v3916_v44 }
 0x953   :  { %v3881_v31 = vunpack.i.h.bf16 %v3879_v55  ;;  %v3880_v32 = vunpack.i.l.bf16 %v3879_v55 }
 0x954   :  { %3513 = vmatprep.mubr.msk.f32.mxu0 %vm929_vm6, %v2278_v57 }
 0x955   :  { %v3884_v58 = vpop.permute.xlu1 %3883  ;;  %3514 = vmatmul.mubr.msk.f32.vlgmr.msra.gmra.mrb[20].mxu0 %vm929_vm6, %v2279_v52  ;;  %v3691_v36 = vpack.c.bf16 %v3881_v31, %v3880_v32 }
 0x956   :  { %v3886_v45 = vunpack.i.h.bf16 %v3884_v58  ;;  %v3885_v18 = vunpack.i.l.bf16 %v3884_v58  ;;  %3526 = vmatmul.mubr.msk.f32.vlgmr.msra.gmra.mrb[8].mxu1 %vm428_vm2, %v2453_v53  ;;  %v2542_v17 = vpop.permute.xlu0 %2541  ;;  %3517 = vmatpush3.msra.mxu0 %v58_v50  ;;  %v3934_v50 = vld [vmem:[%s4560_s0 + $0x8] sm:$0xff] }
 0x957   :  { %3683 = vmatpush3.bf16.xpose.msk.msra.mxu1 %vm4257_vm3, %v3678_v47  ;;  %3532 = vmatprep.mubr.msk.f32.mxu1 %vm428_vm2, %v2542_v17 }
 0x958   :  { %v3684_v30 = vpack.c.bf16 %v3886_v45, %v3885_v18  ;;  %3690 = vmatprep.subr.bf16.mxu0 %v3949_v49  ;;  %v59_v18 = vld [vmem:[%s4565_s7 + $0x18] sm:$0xff] }
 0x959   :  { %v2544_v61 = vpop.permute.xlu1 %2543 }
 0x95a   :  { %3686 = vmatprep.subr.msk.bf16.mxu1 %vm4257_vm3, %v3684_v30  ;;  %v3889_v25 = vpop.permute.xlu0 %3888 }
 0x95b   :  { %v3891_v33 = vunpack.i.h.bf16 %v3889_v25  ;;  %v3890_v34 = vunpack.i.l.bf16 %v3889_v25 }
 0x95d   :  { %v2633_v20 = vpop.permute.xlu1 %2632  ;;  %v3694_v37 = vpack.c.bf16 %v3891_v33, %v3890_v34 }
 0x95e   :  { %3533 = vmatmul.mubr.msk.f32.vlgmr.msra.gmra.mrb[8].mxu1 %vm428_vm2, %v2544_v61  ;;  %v2635_v22 = vpop.permute.xlu0 %2634 }
 0x95f   :  { %3689 = vmatpush3.bf16.xpose.msk.msra.mxu1 %vm4257_vm3, %v3684_v30  ;;  %3539 = vmatprep.mubr.msk.f32.mxu1 %vm428_vm2, %v2633_v20 }
 0x961   :  { %v2826_v4 = vpop.permute.xlu1 %2825 }
 0x962   :  { %v2828_v5 = vpop.permute.xlu0 %2827 }
 0x965   :  { %v2726_v6 = vpop.permute.xlu1 %2725 }
 0x966   :  { %v2731_v7 = vsel %vm428_vm2, %v2726_v6, 0.0  ;;  %3540 = vmatmul.mubr.msk.f32.vlgmr.msra.gmra.mrb[8].mxu1 %vm428_vm2, %v2635_v22  ;;  %v2728_v9 = vpop.permute.xlu0 %2727  ;;  %v3273_v22 = vld [vmem:[%s4566_s8] ss:$0 sm:$0xff] }
 0x967   :  { %v2734_v13 = vsel %vm428_vm2, %v2728_v9, 0.0  ;;  %2732 = vadd.xlane.f32.xlu1 %v2731_v7  ;;  %v3933_v9 = vld [vmem:[%s4560_s0] sm:$0xff] }
 0x968   :  { %2735 = vadd.xlane.f32.xlu0 %v2734_v13 }
 0x9f5   :  { %v2736_v41 = vpop.xlane.xlu0 %2735 }
 0xa28   :  { %v3515_v26 = vpop.f32.mrb[20].mxu0 }
 0xa29   :  { %v2358_v35 = vpop.f32.mrb[21].mxu0 }
 0xa2a   :  { %3518 = vmatprep.mubr.msk.f32.mxu0 %vm837_vm4, %v2358_v35 }
 0xa2b   :  { %3519 = vmatmul.mubr.msk.f32.vlgmr.msra.gmra.mrb[14].mxu0 %vm837_vm4, %v3515_v26 }
 0xa2c   :  { %3693 = vmatpush3.bf16.xpose.msk.msra.mxu0 %vm4257_vm3, %v3691_v36  ;;  %3546 = vmatprep.mubr.msk.f32.mxu0 %vm3950_vm1, %v3935_v3  ;;  %v2733_v3 = vpop.xlane.xlu1 %2732 }
 0xa2d   :  { %3696 = vmatprep.subr.msk.bf16.mxu0 %vm4281_vm5, %v3694_v37 }
 0xa33   :  { %3547 = vmatmul.mubr.msk.f32.vlgmr.msra.gmra.mrb[22].mxu0 %vm428_vm2, %v3951_v51 }
 0xa34   :  { %3699 = vmatpush3.bf16.xpose.msk.msra.mxu0 %vm4281_vm5, %v3694_v37  ;;  %3553 = vmatprep.mubr.msk.f32.mxu0 %vm837_vm4, %v2826_v4 }
 0xa39   :  { %v3541_v49 = vpop.f32.mrb[8].mxu1 }
 0xa3a   :  { %v2714_v38 = vpop.f32.mrb[9].mxu1  ;;  %v2822_v42 = vmul.f32 2.0, %v3541_v49 }
 0xa3b   :  { %3554 = vmatmul.mubr.msk.f32.vlgmr.msra.gmra.mrb[24].mxu0 %vm837_vm4, %v2828_v5  ;;  %v2821_v43 = vmul.f32 2.0, %v2714_v38 }
 0xb06   :  { %v2811_v24 = vpop.f32.mrb[22].mxu0 }
 0xb07   :  { %v2818_v39 = vrot.slane %v2811_v24, %v4091_v54  ;;  %v3548_v12 = vpop.f32.mrb[23].mxu0 }
 0xb09   :  { %v2819_v15 = vadd.f32 %v2818_v39, %v2733_v3  ;;  %v2820_v44 = vadd.f32 %v2818_v39, %v2736_v41 }
 0xb0b   :  { %v2823_v51 = vsub.f32 %v2819_v15, %v2821_v43  ;;  %v2824_v19 = vsub.f32 %v2820_v44, %v2822_v42 }
 0xb0d   :  { %v2921_v27 = vmul.f32 0.5, %v2824_v19  ;;  %v2920_v16 = vmul.f32 0.5, %v2823_v51  ;;  %v3274_v19 = vld [vmem:[%s4567_s9] ss:$0 sm:$0xff] }
 0xb0e   :  { %v3555_v48 = vpop.f32.mrb[24].mxu0 }
 0xb0f   :  { %v2917_v46 = vmul.f32 0.35355338, %v3555_v48  ;;  %v2907_v2 = vpop.f32.mrb[25].mxu0 }
 0xb10   :  { %v2916_v40 = vmul.f32 0.35355338, %v2907_v2 }
 0xb11   :  { %v2919_v23 = vadd.f32 %v2917_v46, %v4306_v11  ;;  %v3275_v46 = vld [vmem:[%s4568_s10] ss:$0 sm:$0xff] }
 0xb12   :  { %v2918_v56 = vadd.f32 %v2916_v40, %v4311_v28 }
 0xb13   :  { %v2923_v54 = vsub.f32 %v2919_v23, %v2921_v27 }
 0xb14   :  { %v2922_v59 = vsub.f32 %v2918_v56, %v2920_v16 }
 0xb15   :  { %v2927_v63 = vsel %vm929_vm6, %v2923_v54, -inf }
 0xb16   :  { %2928 = vmax.xlane.f32.xlu1 %v2927_v63  ;;  %v2924_v62 = vsel %vm929_vm6, %v2922_v59, -inf }
 0xb17   :  { %2925 = vmax.xlane.f32.xlu0 %v2924_v62 }
 0xba3   :  { %v2929_v0 = vpop.xlane.xlu1 %2928 }
 0xba4   :  { %v2931_v1 = vsub.f32 %v2923_v54, %v2929_v0  ;;  %v2926_v14 = vpop.xlane.xlu0 %2925 }
 0xba5   :  { %v2930_v8 = vsub.f32 %v2922_v59, %v2926_v14 }
 0xba6   :  { %v2934_v60 = vmul.f32 1.442695, %v2931_v1 }
 0xba7   :  { %v2932_v10 = vmul.f32 1.442695, %v2930_v8 }
 0xba8   :  { %3921 = vpow2.f32 %v2934_v60 }
 0xba9   :  { %3923 = vpow2.f32 %v2932_v10 }
 0xbb2   :  { %v3922_v11 = vpop.eup %3921 }
 0xbb3   :  { %v3924_v47 = vpop.eup %3923  ;;  %v2939_v28 = vsel %vm929_vm6, %v3922_v11, 0.0 }
 0xbb4   :  { %2940 = vadd.xlane.f32.xlu1 %v2939_v28  ;;  %v2936_v29 = vsel %vm929_vm6, %v3924_v47, 0.0 }
 0xbb5   :  { %2937 = vadd.xlane.f32.xlu0 %v2936_v29 }
 0xbcb   :  { %3893 = vrot.lane.b32.xlu0 %v4231_v21, %s3965_s28 }
 0xc41   :  { %v2941_v53 = vpop.xlane.xlu1 %2940 }
 0xc42   :  { %3925 = vrcp.f32 %v2941_v53  ;;  %v2938_v55 = vpop.xlane.xlu0 %2937 }
 0xc43   :  { %3927 = vrcp.f32 %v2938_v55 }
 0xc46   :  { %v3894_v57 = vpop.permute.xlu0 %3893 }
 0xc47   :  { %v3896_v52 = vunpack.i.h.bf16 %v3894_v57  ;;  %v3895_v58 = vunpack.i.l.bf16 %v3894_v57 }
 0xc49   :  { %v3700_v45 = vpack.c.bf16 %v3896_v52, %v3895_v58 }
 0xc4b   :  { %3701 = vmatprep.subr.bf16.mxu0 %v3700_v45 }
 0xc4c   :  { %v3926_v17 = vpop.eup %3925  ;;  %3703 = vmatpush3.bf16.msra.mxu0 %v3700_v45 }
 0xc4d   :  { %v3928_v30 = vpop.eup %3927  ;;  %3563 = vmatprep.subr.mxu0 %v59_v18  ;;  %v2945_v25 = vmul.f32 %v3926_v17, %v3922_v11 }
 0xc4e   :  { %v2944_v61 = vmul.f32 %v3928_v30, %v3924_v47 }
 0xc50   :  { %3560 = vmatprep.mubr.msk.f32.mxu0 %vm929_vm6, %v2944_v61 }
 0xc51   :  { %3561 = vmatmul.mubr.msk.f32.vlgmr.msra.gmra.mrb[26].mxu0 %vm929_vm6, %v2945_v25 }
 0xc52   :  { %3564 = vmatpush3.msra.mxu0 %v59_v18 }
 0xd24   :  { %v3562_v21 = vpop.f32.mrb[26].mxu0 }
 0xd25   :  { %v3024_v20 = vpop.f32.mrb[27].mxu0 }
 0xd26   :  { %3565 = vmatprep.mubr.msk.f32.mxu0 %vm837_vm4, %v3024_v20 }
 0xd27   :  { %3566 = vmatmul.mubr.msk.f32.vlgmr.msra.gmra.mrb[14].mxu0 %vm837_vm4, %v3562_v21 }
 0xdfa   :  { %v3567_v4 = vpop.f32.mrb[14].mxu0 }
 0xdfb   :  { %v3105_v5 = vpop.f32.mrb[15].mxu0  ;;  %v3124_v6 = vadd.f32 %v3567_v4, %v3273_v22 }
 0xdfc   :  { %v3123_v7 = vadd.f32 %v3273_v22, %v3105_v5 }
 0xdfd   :  { %v3126_v31 = vadd.f32 %v3934_v50, %v3124_v6 }
 0xdfe   :  { %v3125_v13 = vadd.f32 %v3933_v9, %v3123_v7 }
 0xdff   :  { %v3132_v33 = vsel %vm71_vm0, %v3126_v31, 0.0 }
 0xe00   :  { %v3129_v32 = vsel %vm71_vm0, %v3125_v13, 0.0 }
 0xe01   :  { %3130 = vadd.xlane.f32.xlu1 %v3129_v32 }
 0xe05   :  { %3133 = vadd.xlane.f32.xlu1 %v3132_v33 }
 0xe8e   :  { %v3131_v34 = vpop.xlane.xlu1 %3130 }
 0xe8f   :  { %v3136_v26 = vmul.f32 0.03125, %v3131_v34 }
 0xe91   :  { %v3138_v35 = vsub.f32 %v3125_v13, %v3136_v26 }
 0xe92   :  { %v3134_v36 = vpop.xlane.xlu1 %3133 }
 0xe93   :  { %v3137_v37 = vmul.f32 0.03125, %v3134_v36  ;;  %v3140_v49 = vmul.f32 %v3138_v35, %v3138_v35 }
 0xe95   :  { %v3139_v38 = vsub.f32 %v3126_v31, %v3137_v37  ;;  %v3142_v24 = vsel %vm71_vm0, %v3140_v49, 0.0 }
 0xe96   :  { %3143 = vadd.xlane.f32.xlu1 %v3142_v24 }
 0xe97   :  { %v3141_v39 = vmul.f32 %v3139_v38, %v3139_v38 }
 0xe99   :  { %v3145_v12 = vsel %vm71_vm0, %v3141_v39, 0.0 }
 0xe9a   :  { %3146 = vadd.xlane.f32.xlu1 %v3145_v12 }
 0xf23   :  { %v3144_v3 = vpop.xlane.xlu1 %3143 }
 0xf24   :  { %v3148_v41 = vmul.f32 0.03125, %v3144_v3 }
 0xf26   :  { %v3150_v42 = vadd.f32 1e-05, %v3148_v41 }
 0xf27   :  { %v3147_v43 = vpop.xlane.xlu1 %3146 }
 0xf28   :  { %3929 = vrsqrt.f32 %v3150_v42  ;;  %v3149_v15 = vmul.f32 0.03125, %v3147_v43 }
 0xf2a   :  { %v3151_v44 = vadd.f32 1e-05, %v3149_v15 }
 0xf2c   :  { %3931 = vrsqrt.f32 %v3151_v44 }
 0xf32   :  { %v3930_v51 = vpop.eup %3929 }
 0xf33   :  { %v3154_v48 = vmul.f32 %v3930_v51, %v3138_v35 }
 0xf35   :  { %v3162_v2 = vmul.f32 %v3274_v19, %v3154_v48 }
 0xf36   :  { %v3932_v40 = vpop.eup %3931 }
 0xf37   :  { %v3170_v27 = vadd.f32 %v3275_v46, %v3162_v2  ;;  %v3155_v23 = vmul.f32 %v3932_v40, %v3139_v38 }
 0xf39   :  { %3172 = vst.msk [vmem:[%s4569_s11] sm:$0xff] %vm71_vm0, %v3170_v27  ;;  %v3163_v16 = vmul.f32 %v3274_v19, %v3155_v23 }
 0xf3b   :  { %v3171_v56 = vadd.f32 %v3275_v46, %v3163_v16 }
 0xf3d   :  { %3173 = vst.msk [vmem:[%s4569_s11 + $0x8] sm:$0xff] %vm71_vm0, %v3171_v56 }

// kernel: forward.17
= control target key start
LH: loop header
LB: loop body
LE: loop exit
PB: predicated region body
PF: predicated region fallthrough
CT: control target
= control target key end

     0   :  { %vm68_vm0 = vcmask 261120   ;;  %vm2280_vm1 = vcmask 637952   ;;  %s3218_s18 = smov 78   ;;  %vm2384_vm2 = vcmask 646768   ;;  %s3219_s23 = smov 79   ;;  %vm2487_vm3 = vcmask 654968   ;;  %s3869_s1 = inlined_call_operand.vmem [shape: f32[9,32,32], index: 1, kind: input, shape index: {}]   ;;  %s3870_s0 = inlined_call_operand.vmem [shape: f32[16,32], index: 0, kind: input, shape index: {}]   ;;  %s3871_s3 = inlined_call_operand.vmem [shape: f32[9,32,32], index: 3, kind: input, shape index: {}]   ;;  %s3872_s2 = inlined_call_operand.vmem [shape: f32[9,1,32], index: 2, kind: input, shape index: {}]   ;;  %s3873_s4 = inlined_call_operand.vmem [shape: f32[9,1,32], index: 4, kind: input, shape index: {}]   ;;  %s3874_s5 = inlined_call_operand.vmem [shape: f32[9,1,32], index: 5, kind: input, shape index: {}]   ;;  %s3875_s6 = inlined_call_operand.vmem [shape: f32[9,1,32], index: 6, kind: input, shape index: {}]   ;;  %s3876_s7 = inlined_call_operand.vmem [shape: f32[32,206], index: 7, kind: input, shape index: {}]   ;;  %s3877_s9 = inlined_call_operand.vmem [shape: f32[32,1], index: 9, kind: input, shape index: {}]   ;;  %s3878_s11 = inlined_call_operand.vmem [shape: f32[32,1], index: 11, kind: input, shape index: {}]   ;;  %s3879_s10 = inlined_call_operand.<no memory space> [shape: f32[1,1], index: 10, kind: input, shape index: {}]   ;;  %s3880_s8 = inlined_call_operand.vmem [shape: f32[1,206], index: 8, kind: input, shape index: {}]   ;;  %s3881_s12 = inlined_call_operand.<no memory space> [shape: f32[1,1], index: 12, kind: input, shape index: {}]   ;;  %s3882_s13 = inlined_call_operand.vmem [shape: f32[16,208], index: 13, kind: output, shape index: {}]  }
   0x1   :  { %v50_v0 = vld [vmem:[%s3869_s1] sm:$0xff]  ;;  %v51_v1 = vld [vmem:[%s3869_s1 + $0x8] sm:$0xff]  ;;  %v52_v2 = vld [vmem:[%s3869_s1 + $0x10] sm:$0xff] }
   0x2   :  { %v3010_v3 = vpack.c.bf16 %v51_v1, %v50_v0  ;;  %v53_v4 = vld [vmem:[%s3869_s1 + $0x18] sm:$0xff]  ;;  %v3305_v5 = vld [vmem:[%s3870_s0] sm:$0xff]  ;;  %v56_v8 = vld [vmem:[%s3871_s3 + $0x8] sm:$0xff] }
   0x3   :  { %v3014_v6 = vpack.c.bf16 %v53_v4, %v52_v2  ;;  %2798 = vmatprep.mubr.msk.f32.mxu0 %vm68_vm0, %v3305_v5  ;;  %v55_v7 = vld [vmem:[%s3871_s3] sm:$0xff]  ;;  %v3318_v10 = vld [vmem:[%s3870_s0 + $0x8] sm:$0xff]  ;;  %v57_v11 = vld [vmem:[%s3871_s3 + $0x10] sm:$0xff] }
   0x4   :  { %3011 = vmatprep.subr.bf16.mxu0 %v3010_v3  ;;  %v3018_v9 = vpack.c.bf16 %v56_v8, %v55_v7  ;;  %v58_v12 = vld [vmem:[%s3871_s3 + $0x18] sm:$0xff]  ;;  %v2494_v14 = vld [vmem:[%s3872_s2] ss:$0 sm:$0xff]  ;;  %v2503_v41 = vld [vmem:[%s3869_s1 + $0x28] sm:$0xff] }
   0x5   :  { %3013 = vmatpush3.bf16.msra.mxu0 %v3010_v3  ;;  %v3022_v13 = vpack.c.bf16 %v58_v12, %v57_v11  ;;  %v2497_v21 = vld [vmem:[%s3873_s4] ss:$0 sm:$0xff]  ;;  %v2504_v43 = vld [vmem:[%s3869_s1 + $0x30] sm:$0xff]  ;;  %v2505_v44 = vld [vmem:[%s3869_s1 + $0x38] sm:$0xff] }
   0x6   :  { %3015 = vmatprep.subr.bf16.mxu0 %v3014_v6  ;;  %3019 = vmatprep.subr.bf16.mxu1 %v3018_v9  ;;  %v2502_v40 = vld [vmem:[%s3869_s1 + $0x20] sm:$0xff]  ;;  %v3030_v45 = vpack.c.bf16 %v2505_v44, %v2504_v43  ;;  %v2508_v47 = vld [vmem:[%s3871_s3 + $0x28] sm:$0xff]  ;;  %v2509_v1 = vld [vmem:[%s3871_s3 + $0x30] sm:$0xff] }
   0x7   :  { %3021 = vmatpush3.bf16.msra.mxu1 %v3018_v9  ;;  %v3026_v42 = vpack.c.bf16 %v2503_v41, %v2502_v40  ;;  %v2507_v46 = vld [vmem:[%s3871_s3 + $0x20] sm:$0xff]  ;;  %v2510_v2 = vld [vmem:[%s3871_s3 + $0x38] sm:$0xff] }
   0x8   :  { %3023 = vmatprep.subr.bf16.mxu1 %v3022_v13  ;;  %v3034_v48 = vpack.c.bf16 %v2508_v47, %v2507_v46  ;;  %v2500_v56 = vld [vmem:[%s3874_s5] ss:$0 sm:$0xff]  ;;  %v3038_v3 = vpack.c.bf16 %v2510_v2, %v2509_v1  ;;  %v2514_v4 = vld [vmem:[%s3872_s2 + $0x1] ss:$0 sm:$0xff] }
   0x9   :  { %3017 = vmatpush3.bf16.msra.mxu0 %v3014_v6  ;;  %v2501_v58 = vld [vmem:[%s3875_s6] ss:$0 sm:$0xff] }
   0xa   :  { %3027 = vmatprep.subr.bf16.mxu0 %v3026_v42  ;;  %v2527_v41 = vld [vmem:[%s3871_s3 + $0x40] sm:$0xff] }
   0xb   :  { %3025 = vmatpush3.bf16.msra.mxu1 %v3022_v13  ;;  %v2517_v13 = vld [vmem:[%s3873_s4 + $0x1] ss:$0 sm:$0xff] }
   0xc   :  { %2799 = vmatmul.mubr.msk.f32.vlgmr.msra.gmra.mrb[0].mxu0 %vm68_vm0, %v3318_v10  ;;  %3035 = vmatprep.subr.bf16.mxu1 %v3034_v48  ;;  %v2547_v2 = vld [vmem:[%s3871_s3 + $0x60] sm:$0xff] }
   0xd   :  { %3029 = vmatpush3.bf16.msra.mxu0 %v3026_v42  ;;  %v2528_v42 = vld [vmem:[%s3871_s3 + $0x48] sm:$0xff] }
   0xe   :  { %3031 = vmatprep.subr.bf16.mxu0 %v3030_v45  ;;  %v3050_v43 = vpack.c.bf16 %v2528_v42, %v2527_v41 }
  0x11   :  { %3033 = vmatpush3.bf16.msra.mxu0 %v3030_v45 }
  0xdf   :  { %v2800_v15 = vpop.f32.mrb[0].mxu0 }
  0xe0   :  { %v147_v16 = vadd.f32 %v2800_v15, %v2494_v14  ;;  %v141_v17 = vpop.f32.mrb[1].mxu0 }
  0xe1   :  { %v142_v18 = vadd.f32 %v2494_v14, %v141_v17 }
  0xe2   :  { %v151_v20 = vmax.f32 %v147_v16, 0.0 }
  0xe3   :  { %v150_v19 = vmax.f32 %v142_v18, 0.0 }
  0xe5   :  { %2809 = vmatprep.mubr.msk.f32.mxu1 %vm68_vm0, %v150_v19 }
  0xe6   :  { %2810 = vmatmul.mubr.msk.f32.vlgmr.msra.gmra.mrb[0].mxu1 %vm68_vm0, %v151_v20 }
  0xe7   :  { %3037 = vmatpush3.bf16.msra.mxu1 %v3034_v48 }
  0xe8   :  { %3039 = vmatprep.subr.bf16.mxu1 %v3038_v3 }
  0xeb   :  { %3041 = vmatpush3.bf16.msra.mxu1 %v3038_v3  ;;  %v2548_v3 = vld [vmem:[%s3871_s3 + $0x68] sm:$0xff] }
  0xec   :  { %3051 = vmatprep.subr.bf16.mxu1 %v3050_v43 }
 0x1b9   :  { %v2811_v22 = vpop.f32.mrb[0].mxu1 }
 0x1ba   :  { %v230_v23 = vpop.f32.mrb[1].mxu1  ;;  %v236_v24 = vadd.f32 %v2811_v22, %v2497_v21 }
 0x1bb   :  { %v231_v25 = vadd.f32 %v2497_v21, %v230_v23 }
 0x1bc   :  { %v240_v28 = vadd.f32 %v236_v24, %v3318_v10 }
 0x1bd   :  { %v239_v26 = vadd.f32 %v231_v25, %v3305_v5 }
 0x1be   :  { %v244_v29 = vsel %vm68_vm0, %v240_v28, 0.0 }
 0x1bf   :  { %v241_v27 = vsel %vm68_vm0, %v239_v26, 0.0 }
 0x1c0   :  { %242 = vadd.xlane.f32.xlu0 %v241_v27 }
 0x1c4   :  { %245 = vadd.xlane.f32.xlu0 %v244_v29 }
 0x24d   :  { %v243_v30 = vpop.xlane.xlu0 %242 }
 0x24e   :  { %v248_v31 = vmul.f32 0.03125, %v243_v30 }
 0x250   :  { %v250_v32 = vsub.f32 %v239_v26, %v248_v31 }
 0x251   :  { %v246_v33 = vpop.xlane.xlu0 %245 }
 0x252   :  { %v249_v34 = vmul.f32 0.03125, %v246_v33  ;;  %v252_v35 = vmul.f32 %v250_v32, %v250_v32  ;;  %v2523_v33 = vld [vmem:[%s3869_s1 + $0x48] sm:$0xff] }
 0x254   :  { %v251_v36 = vsub.f32 %v240_v28, %v249_v34  ;;  %v254_v37 = vsel %vm68_vm0, %v252_v35, 0.0  ;;  %v2524_v35 = vld [vmem:[%s3869_s1 + $0x50] sm:$0xff] }
 0x255   :  { %255 = vadd.xlane.f32.xlu1 %v254_v37 }
 0x256   :  { %v253_v38 = vmul.f32 %v251_v36, %v251_v36 }
 0x258   :  { %v257_v39 = vsel %vm68_vm0, %v253_v38, 0.0  ;;  %v2542_v38 = vld [vmem:[%s3869_s1 + $0x60] sm:$0xff] }
 0x259   :  { %258 = vadd.xlane.f32.xlu1 %v257_v39  ;;  %v2543_v39 = vld [vmem:[%s3869_s1 + $0x68] sm:$0xff] }
 0x25a   :  { %v3058_v40 = vpack.c.bf16 %v2543_v39, %v2542_v38 }
 0x2e2   :  { %v256_v49 = vpop.xlane.xlu1 %255 }
 0x2e3   :  { %v260_v50 = vmul.f32 0.03125, %v256_v49 }
 0x2e5   :  { %v262_v51 = vadd.f32 1e-05, %v260_v50 }
 0x2e6   :  { %v259_v52 = vpop.xlane.xlu1 %258 }
 0x2e7   :  { %3181 = vrsqrt.f32 %v262_v51  ;;  %v261_v53 = vmul.f32 0.03125, %v259_v52  ;;  %v2520_v51 = vld [vmem:[%s3874_s5 + $0x1] ss:$0 sm:$0xff] }
 0x2e9   :  { %v263_v54 = vadd.f32 1e-05, %v261_v53 }
 0x2eb   :  { %3183 = vrsqrt.f32 %v263_v54 }
 0x2f1   :  { %v3182_v55 = vpop.eup %3181 }
 0x2f2   :  { %v266_v57 = vmul.f32 %v3182_v55, %v250_v32  ;;  %v2522_v32 = vld [vmem:[%s3869_s1 + $0x40] sm:$0xff] }
 0x2f3   :  { %v3042_v34 = vpack.c.bf16 %v2523_v33, %v2522_v32  ;;  %v2521_v55 = vld [vmem:[%s3875_s6 + $0x1] ss:$0 sm:$0xff] }
 0x2f4   :  { %v274_v59 = vmul.f32 %v2500_v56, %v266_v57 }
 0x2f5   :  { %v3184_v60 = vpop.eup %3183  ;;  %3043 = vmatprep.subr.bf16.mxu0 %v3042_v34 }
 0x2f6   :  { %v267_v61 = vmul.f32 %v3184_v60, %v251_v36  ;;  %v282_v62 = vadd.f32 %v2501_v58, %v274_v59  ;;  %v2525_v36 = vld [vmem:[%s3869_s1 + $0x58] sm:$0xff] }
 0x2f7   :  { %v3046_v37 = vpack.c.bf16 %v2525_v36, %v2524_v35  ;;  %v2545_v59 = vld [vmem:[%s3869_s1 + $0x78] sm:$0xff] }
 0x2f8   :  { %v275_v63 = vmul.f32 %v2500_v56, %v267_v61  ;;  %2820 = vmatprep.mubr.msk.f32.mxu0 %vm68_vm0, %v282_v62 }
 0x2fa   :  { %v283_v0 = vadd.f32 %v2501_v58, %v275_v63  ;;  %v2544_v58 = vld [vmem:[%s3869_s1 + $0x70] sm:$0xff] }
 0x2fb   :  { %v2529_v63 = vld [vmem:[%s3871_s3 + $0x50] sm:$0xff] }
 0x2fc   :  { %2821 = vmatmul.mubr.msk.f32.vlgmr.msra.gmra.mrb[2].mxu0 %vm68_vm0, %v283_v0 }
 0x2fd   :  { %3045 = vmatpush3.bf16.msra.mxu0 %v3042_v34 }
 0x2fe   :  { %3047 = vmatprep.subr.bf16.mxu0 %v3046_v37 }
 0x301   :  { %3049 = vmatpush3.bf16.msra.mxu0 %v3046_v37 }
 0x302   :  { %3059 = vmatprep.subr.bf16.mxu0 %v3058_v40 }
 0x3cf   :  { %v2822_v6 = vpop.f32.mrb[2].mxu0 }
 0x3d0   :  { %v386_v7 = vadd.f32 %v2822_v6, %v2514_v4  ;;  %v380_v8 = vpop.f32.mrb[3].mxu0  ;;  %v2534_v6 = vld [vmem:[%s3872_s2 + $0x2] ss:$0 sm:$0xff] }
 0x3d1   :  { %v381_v9 = vadd.f32 %v2514_v4, %v380_v8  ;;  %v3066_v4 = vpack.c.bf16 %v2548_v3, %v2547_v2  ;;  %v2561_v3 = vld [vmem:[%s3875_s6 + $0x3] ss:$0 sm:$0xff] }
 0x3d2   :  { %v390_v12 = vmax.f32 %v386_v7, 0.0 }
 0x3d3   :  { %v389_v11 = vmax.f32 %v381_v9, 0.0 }
 0x3d5   :  { %2831 = vmatprep.mubr.msk.f32.mxu1 %vm68_vm0, %v389_v11 }
 0x3d6   :  { %2832 = vmatmul.mubr.msk.f32.vlgmr.msra.gmra.mrb[2].mxu1 %vm68_vm0, %v390_v12  ;;  %v2549_v12 = vld [vmem:[%s3871_s3 + $0x70] sm:$0xff] }
 0x3d7   :  { %3053 = vmatpush3.bf16.msra.mxu1 %v3050_v43 }
 0x4a9   :  { %v2833_v14 = vpop.f32.mrb[2].mxu1 }
 0x4aa   :  { %v475_v15 = vadd.f32 %v2833_v14, %v2517_v13  ;;  %v469_v16 = vpop.f32.mrb[3].mxu1 }
 0x4ab   :  { %v470_v17 = vadd.f32 %v2517_v13, %v469_v16  ;;  %v2550_v13 = vld [vmem:[%s3871_s3 + $0x78] sm:$0xff] }
 0x4ac   :  { %v479_v18 = vadd.f32 %v475_v15, %v283_v0  ;;  %v2530_v0 = vld [vmem:[%s3871_s3 + $0x58] sm:$0xff]  ;;  %v3070_v16 = vpack.c.bf16 %v2550_v13, %v2549_v12  ;;  %v2574_v13 = vld [vmem:[%s3872_s2 + $0x4] ss:$0 sm:$0xff] }
 0x4ad   :  { %v478_v19 = vadd.f32 %v470_v17, %v282_v62  ;;  %v3062_v62 = vpack.c.bf16 %v2545_v59, %v2544_v58  ;;  %v3054_v1 = vpack.c.bf16 %v2530_v0, %v2529_v63  ;;  %v2554_v17 = vld [vmem:[%s3872_s2 + $0x3] ss:$0 sm:$0xff] }
 0x4ae   :  { %v483_v20 = vsel %vm68_vm0, %v479_v18, 0.0  ;;  %v2560_v63 = vld [vmem:[%s3874_s5 + $0x3] ss:$0 sm:$0xff] }
 0x4af   :  { %484 = vadd.xlane.f32.xlu1 %v483_v20  ;;  %v480_v21 = vsel %vm68_vm0, %v478_v19, 0.0  ;;  %3055 = vmatprep.subr.bf16.mxu1 %v3054_v1 }
 0x4b0   :  { %481 = vadd.xlane.f32.xlu0 %v480_v21  ;;  %3057 = vmatpush3.bf16.msra.mxu1 %v3054_v1 }
 0x4b1   :  { %3067 = vmatprep.subr.bf16.mxu1 %v3066_v4 }
 0x53c   :  { %v485_v22 = vpop.xlane.xlu1 %484 }
 0x53d   :  { %v487_v23 = vmul.f32 0.03125, %v485_v22  ;;  %v482_v24 = vpop.xlane.xlu0 %481 }
 0x53e   :  { %v486_v25 = vmul.f32 0.03125, %v482_v24 }
 0x53f   :  { %v489_v26 = vsub.f32 %v479_v18, %v487_v23 }
 0x540   :  { %v488_v27 = vsub.f32 %v478_v19, %v486_v25 }
 0x541   :  { %v491_v28 = vmul.f32 %v489_v26, %v489_v26 }
 0x542   :  { %v490_v29 = vmul.f32 %v488_v27, %v488_v27 }
 0x543   :  { %v495_v30 = vsel %vm68_vm0, %v491_v28, 0.0 }
 0x544   :  { %496 = vadd.xlane.f32.xlu1 %v495_v30  ;;  %v492_v31 = vsel %vm68_vm0, %v490_v29, 0.0 }
 0x545   :  { %493 = vadd.xlane.f32.xlu0 %v492_v31 }
 0x5d1   :  { %v497_v44 = vpop.xlane.xlu1 %496 }
 0x5d2   :  { %v499_v45 = vmul.f32 0.03125, %v497_v44  ;;  %v494_v46 = vpop.xlane.xlu0 %493 }
 0x5d3   :  { %v498_v47 = vmul.f32 0.03125, %v494_v46  ;;  %v2563_v46 = vld [vmem:[%s3869_s1 + $0x88] sm:$0xff] }
 0x5d4   :  { %v501_v48 = vadd.f32 1e-05, %v499_v45  ;;  %v2562_v45 = vld [vmem:[%s3869_s1 + $0x80] sm:$0xff] }
 0x5d5   :  { %v500_v49 = vadd.f32 1e-05, %v498_v47  ;;  %v3074_v47 = vpack.c.bf16 %v2563_v46, %v2562_v45  ;;  %v2585_v45 = vld [vmem:[%s3869_s1 + $0xb8] sm:$0xff] }
 0x5d6   :  { %3185 = vrsqrt.f32 %v501_v48  ;;  %v2564_v48 = vld [vmem:[%s3869_s1 + $0x90] sm:$0xff] }
 0x5d7   :  { %3187 = vrsqrt.f32 %v500_v49  ;;  %v2565_v49 = vld [vmem:[%s3869_s1 + $0x98] sm:$0xff] }
 0x5e0   :  { %v3186_v50 = vpop.eup %3185 }
 0x5e1   :  { %v3188_v52 = vpop.eup %3187  ;;  %v505_v53 = vmul.f32 %v3186_v50, %v489_v26  ;;  %v2557_v26 = vld [vmem:[%s3873_s4 + $0x3] ss:$0 sm:$0xff]  ;;  %v3078_v50 = vpack.c.bf16 %v2565_v49, %v2564_v48  ;;  %v2603_v48 = vld [vmem:[%s3869_s1 + $0xc8] sm:$0xff] }
 0x5e2   :  { %v504_v54 = vmul.f32 %v3188_v52, %v488_v27  ;;  %v2568_v52 = vld [vmem:[%s3871_s3 + $0x88] sm:$0xff] }
 0x5e3   :  { %v513_v56 = vmul.f32 %v2520_v51, %v505_v53 }
 0x5e4   :  { %v512_v57 = vmul.f32 %v2520_v51, %v504_v54  ;;  %v2567_v51 = vld [vmem:[%s3871_s3 + $0x80] sm:$0xff] }
 0x5e5   :  { %v3424_v61 = vadd.f32 %v2521_v55, %v513_v56  ;;  %v3082_v53 = vpack.c.bf16 %v2568_v52, %v2567_v51  ;;  %v2588_v51 = vld [vmem:[%s3871_s3 + $0xa8] sm:$0xff] }
 0x5e6   :  { %v3422_v60 = vadd.f32 %v2521_v55, %v512_v57 }
 0x5e8   :  { %2842 = vmatprep.mubr.msk.f32.mxu0 %vm68_vm0, %v3422_v60 }
 0x5e9   :  { %2843 = vmatmul.mubr.msk.f32.vlgmr.msra.gmra.mrb[4].mxu0 %vm68_vm0, %v3424_v61 }
 0x5ea   :  { %3061 = vmatpush3.bf16.msra.mxu0 %v3058_v40  ;;  %2864 = vmatprep.mubr.msk.f32.mxu0 %vm68_vm0, %v3305_v5 }
 0x5eb   :  { %3063 = vmatprep.subr.bf16.mxu0 %v3062_v62 }
 0x5ee   :  { %3065 = vmatpush3.bf16.msra.mxu0 %v3062_v62 }
 0x5ef   :  { %3075 = vmatprep.subr.bf16.mxu0 %v3074_v47 }
 0x5f1   :  { %2865 = vmatmul.mubr.msk.f32.vlgmr.msra.gmra.mrb[6].mxu0 %vm68_vm0, %v3318_v10 }
 0x5f2   :  { %3077 = vmatpush3.bf16.msra.mxu0 %v3074_v47  ;;  %v2602_v47 = vld [vmem:[%s3869_s1 + $0xc0] sm:$0xff] }
 0x5f3   :  { %3079 = vmatprep.subr.bf16.mxu0 %v3078_v50  ;;  %v3106_v49 = vpack.c.bf16 %v2603_v48, %v2602_v47 }
 0x5f6   :  { %3081 = vmatpush3.bf16.msra.mxu0 %v3078_v50  ;;  %v2587_v50 = vld [vmem:[%s3871_s3 + $0xa0] sm:$0xff] }
 0x5f7   :  { %v3098_v52 = vpack.c.bf16 %v2588_v51, %v2587_v50 }
 0x6bc   :  { %v2844_v7 = vpop.f32.mrb[4].mxu0 }
 0x6bd   :  { %v624_v8 = vadd.f32 %v2844_v7, %v2534_v6  ;;  %v618_v9 = vpop.f32.mrb[5].mxu0 }
 0x6be   :  { %v619_v11 = vadd.f32 %v2534_v6, %v618_v9  ;;  %v2569_v9 = vld [vmem:[%s3871_s3 + $0x90] sm:$0xff] }
 0x6bf   :  { %v628_v15 = vmax.f32 %v624_v8, 0.0 }
 0x6c0   :  { %v627_v14 = vmax.f32 %v619_v11, 0.0  ;;  %v2570_v11 = vld [vmem:[%s3871_s3 + $0x98] sm:$0xff] }
 0x6c1   :  { %v3086_v12 = vpack.c.bf16 %v2570_v11, %v2569_v9 }
 0x6c2   :  { %2853 = vmatprep.mubr.msk.f32.mxu1 %vm68_vm0, %v627_v14 }
 0x6c3   :  { %2854 = vmatmul.mubr.msk.f32.vlgmr.msra.gmra.mrb[4].mxu1 %vm68_vm0, %v628_v15 }
 0x6c4   :  { %v2866_v18 = vpop.f32.mrb[6].mxu0  ;;  %3069 = vmatpush3.bf16.msra.mxu1 %v3066_v4 }
 0x6c5   :  { %v856_v19 = vadd.f32 %v2866_v18, %v2554_v17  ;;  %v850_v20 = vpop.f32.mrb[7].mxu0  ;;  %3071 = vmatprep.subr.bf16.mxu1 %v3070_v16 }
 0x6c6   :  { %v851_v21 = vadd.f32 %v2554_v17, %v850_v20  ;;  %v2577_v20 = vld [vmem:[%s3873_s4 + $0x4] ss:$0 sm:$0xff] }
 0x6c7   :  { %v860_v23 = vmax.f32 %v856_v19, 0.0 }
 0x6c8   :  { %v859_v22 = vmax.f32 %v851_v21, 0.0  ;;  %3073 = vmatpush3.bf16.msra.mxu1 %v3070_v16 }
 0x6c9   :  { %3083 = vmatprep.subr.bf16.mxu1 %v3082_v53 }
 0x6ca   :  { %2875 = vmatprep.mubr.msk.f32.mxu1 %vm68_vm0, %v859_v22 }
 0x6cb   :  { %2876 = vmatmul.mubr.msk.f32.vlgmr.msra.gmra.mrb[6].mxu1 %vm68_vm0, %v860_v23 }
 0x6cc   :  { %3085 = vmatpush3.bf16.msra.mxu1 %v3082_v53 }
 0x6cd   :  { %3087 = vmatprep.subr.bf16.mxu1 %v3086_v12 }
 0x6d0   :  { %3089 = vmatpush3.bf16.msra.mxu1 %v3086_v12  ;;  %v2589_v12 = vld [vmem:[%s3871_s3 + $0xb0] sm:$0xff] }
 0x6d1   :  { %3099 = vmatprep.subr.bf16.mxu1 %v3098_v52 }
 0x796   :  { %v3462_v24 = vpop.f32.mrb[4].mxu1 }
 0x797   :  { %v3464_v25 = vpop.f32.mrb[5].mxu1 }
 0x79e   :  { %v2877_v27 = vpop.f32.mrb[6].mxu1 }
 0x79f   :  { %v945_v28 = vadd.f32 %v2877_v27, %v2557_v26  ;;  %v939_v29 = vpop.f32.mrb[7].mxu1 }
 0x7a0   :  { %v940_v30 = vadd.f32 %v2557_v26, %v939_v29 }
 0x7a1   :  { %v949_v31 = vadd.f32 %v945_v28, %v3318_v10 }
 0x7a2   :  { %v948_v32 = vadd.f32 %v940_v30, %v3305_v5 }
 0x7a3   :  { %v953_v33 = vsel %vm68_vm0, %v949_v31, 0.0 }
 0x7a4   :  { %954 = vadd.xlane.f32.xlu1 %v953_v33  ;;  %v950_v34 = vsel %vm68_vm0, %v948_v32, 0.0 }
 0x7a5   :  { %951 = vadd.xlane.f32.xlu0 %v950_v34 }
 0x831   :  { %v955_v35 = vpop.xlane.xlu1 %954 }
 0x832   :  { %v957_v36 = vmul.f32 0.03125, %v955_v35  ;;  %v952_v37 = vpop.xlane.xlu0 %951 }
 0x833   :  { %v956_v38 = vmul.f32 0.03125, %v952_v37 }
 0x834   :  { %v959_v39 = vsub.f32 %v949_v31, %v957_v36 }
 0x835   :  { %v958_v40 = vsub.f32 %v948_v32, %v956_v38 }
 0x836   :  { %v961_v41 = vmul.f32 %v959_v39, %v959_v39 }
 0x837   :  { %v960_v42 = vmul.f32 %v958_v40, %v958_v40 }
 0x838   :  { %v965_v43 = vsel %vm68_vm0, %v961_v41, 0.0  ;;  %v2582_v41 = vld [vmem:[%s3869_s1 + $0xa0] sm:$0xff] }
 0x839   :  { %966 = vadd.xlane.f32.xlu1 %v965_v43  ;;  %v962_v44 = vsel %vm68_vm0, %v960_v42, 0.0  ;;  %v2583_v42 = vld [vmem:[%s3869_s1 + $0xa8] sm:$0xff] }
 0x83a   :  { %963 = vadd.xlane.f32.xlu0 %v962_v44  ;;  %v3090_v43 = vpack.c.bf16 %v2583_v42, %v2582_v41  ;;  %v2584_v44 = vld [vmem:[%s3869_s1 + $0xb0] sm:$0xff] }
 0x83b   :  { %v3094_v46 = vpack.c.bf16 %v2585_v45, %v2584_v44 }
 0x83c   :  { %3091 = vmatprep.subr.bf16.mxu0 %v3090_v43 }
 0x8c6   :  { %v967_v54 = vpop.xlane.xlu1 %966 }
 0x8c7   :  { %v969_v55 = vmul.f32 0.03125, %v967_v54  ;;  %v964_v56 = vpop.xlane.xlu0 %963 }
 0x8c8   :  { %v968_v57 = vmul.f32 0.03125, %v964_v56 }
 0x8c9   :  { %v971_v58 = vadd.f32 1e-05, %v969_v55 }
 0x8ca   :  { %v970_v59 = vadd.f32 1e-05, %v968_v57 }
 0x8cb   :  { %3189 = vrsqrt.f32 %v971_v58 }
 0x8cc   :  { %3191 = vrsqrt.f32 %v970_v59 }
 0x8d5   :  { %v3190_v62 = vpop.eup %3189 }
 0x8d6   :  { %v3192_v0 = vpop.eup %3191  ;;  %v975_v1 = vmul.f32 %v3190_v62, %v959_v39  ;;  %v2580_v62 = vld [vmem:[%s3874_s5 + $0x4] ss:$0 sm:$0xff] }
 0x8d7   :  { %v974_v2 = vmul.f32 %v3192_v0, %v958_v40 }
 0x8d8   :  { %v983_v4 = vmul.f32 %v2560_v63, %v975_v1 }
 0x8d9   :  { %v982_v6 = vmul.f32 %v2560_v63, %v974_v2  ;;  %v2581_v2 = vld [vmem:[%s3875_s6 + $0x4] ss:$0 sm:$0xff] }
 0x8da   :  { %v991_v8 = vadd.f32 %v2561_v3, %v983_v4 }
 0x8db   :  { %v990_v7 = vadd.f32 %v2561_v3, %v982_v6  ;;  %v2604_v6 = vld [vmem:[%s3869_s1 + $0xd0] sm:$0xff] }
 0x8dd   :  { %2886 = vmatprep.mubr.msk.f32.mxu0 %vm68_vm0, %v990_v7 }
 0x8de   :  { %2887 = vmatmul.mubr.msk.f32.vlgmr.msra.gmra.mrb[8].mxu0 %vm68_vm0, %v991_v8 }
 0x8df   :  { %3093 = vmatpush3.bf16.msra.mxu0 %v3090_v43 }
 0x8e0   :  { %3095 = vmatprep.subr.bf16.mxu0 %v3094_v46 }
 0x8e3   :  { %3097 = vmatpush3.bf16.msra.mxu0 %v3094_v46 }
 0x8e4   :  { %3107 = vmatprep.subr.bf16.mxu0 %v3106_v49 }
 0x9b1   :  { %v2888_v14 = vpop.f32.mrb[8].mxu0 }
 0x9b2   :  { %v1094_v15 = vadd.f32 %v2888_v14, %v2574_v13  ;;  %v1088_v16 = vpop.f32.mrb[9].mxu0 }
 0x9b3   :  { %v1089_v17 = vadd.f32 %v2574_v13, %v1088_v16  ;;  %v2590_v13 = vld [vmem:[%s3871_s3 + $0xb8] sm:$0xff]  ;;  %v2608_v16 = vld [vmem:[%s3871_s3 + $0xc8] sm:$0xff] }
 0x9b4   :  { %v1098_v19 = vmax.f32 %v1094_v15, 0.0  ;;  %v3102_v14 = vpack.c.bf16 %v2590_v13, %v2589_v12  ;;  %v2607_v15 = vld [vmem:[%s3871_s3 + $0xc0] sm:$0xff] }
 0x9b5   :  { %v1097_v18 = vmax.f32 %v1089_v17, 0.0  ;;  %v3114_v17 = vpack.c.bf16 %v2608_v16, %v2607_v15 }
 0x9b7   :  { %2897 = vmatprep.mubr.msk.f32.mxu1 %vm68_vm0, %v1097_v18  ;;  %v2594_v18 = vld [vmem:[%s3872_s2 + $0x5] ss:$0 sm:$0xff] }
 0x9b8   :  { %2898 = vmatmul.mubr.msk.f32.vlgmr.msra.gmra.mrb[8].mxu1 %vm68_vm0, %v1098_v19 }
 0x9b9   :  { %3101 = vmatpush3.bf16.msra.mxu1 %v3098_v52 }
 0x9ba   :  { %3103 = vmatprep.subr.bf16.mxu1 %v3102_v14 }
 0x9bd   :  { %3105 = vmatpush3.bf16.msra.mxu1 %v3102_v14  ;;  %v2620_v14 = vld [vmem:[%s3874_s5 + $0x6] ss:$0 sm:$0xff] }
 0x9be   :  { %3115 = vmatprep.subr.bf16.mxu1 %v3114_v17 }
 0xa8b   :  { %v2899_v21 = vpop.f32.mrb[8].mxu1 }
 0xa8c   :  { %v1183_v22 = vadd.f32 %v2899_v21, %v2577_v20  ;;  %v1177_v23 = vpop.f32.mrb[9].mxu1 }
 0xa8d   :  { %v1178_v26 = vadd.f32 %v2577_v20, %v1177_v23  ;;  %v2609_v23 = vld [vmem:[%s3871_s3 + $0xd0] sm:$0xff] }
 0xa8e   :  { %v1187_v27 = vadd.f32 %v1183_v22, %v991_v8 }
 0xa8f   :  { %v1186_v28 = vadd.f32 %v1178_v26, %v990_v7  ;;  %v2605_v7 = vld [vmem:[%s3869_s1 + $0xd8] sm:$0xff] }
 0xa90   :  { %v1191_v29 = vsel %vm68_vm0, %v1187_v27, 0.0  ;;  %v3110_v11 = vpack.c.bf16 %v2605_v7, %v2604_v6  ;;  %v2610_v26 = vld [vmem:[%s3871_s3 + $0xd8] sm:$0xff] }
 0xa91   :  { %1192 = vadd.xlane.f32.xlu1 %v1191_v29  ;;  %v1188_v30 = vsel %vm68_vm0, %v1186_v28, 0.0  ;;  %v3118_v29 = vpack.c.bf16 %v2610_v26, %v2609_v23  ;;  %v2629_v23 = vld [vmem:[%s3871_s3 + $0xf0] sm:$0xff]  ;;  %v2630_v26 = vld [vmem:[%s3871_s3 + $0xf8] sm:$0xff] }
 0xa92   :  { %1189 = vadd.xlane.f32.xlu0 %v1188_v30  ;;  %v2614_v30 = vld [vmem:[%s3872_s2 + $0x6] ss:$0 sm:$0xff] }
 0xb1e   :  { %v1193_v31 = vpop.xlane.xlu1 %1192 }
 0xb1f   :  { %v1195_v32 = vmul.f32 0.03125, %v1193_v31  ;;  %v1190_v33 = vpop.xlane.xlu0 %1189 }
 0xb20   :  { %v1194_v34 = vmul.f32 0.03125, %v1190_v33 }
 0xb21   :  { %v1197_v35 = vsub.f32 %v1187_v27, %v1195_v32 }
 0xb22   :  { %v1196_v36 = vsub.f32 %v1186_v28, %v1194_v34 }
 0xb23   :  { %v1199_v37 = vmul.f32 %v1197_v35, %v1197_v35 }
 0xb24   :  { %v1198_v38 = vmul.f32 %v1196_v36, %v1196_v36 }
 0xb25   :  { %v1203_v39 = vsel %vm68_vm0, %v1199_v37, 0.0 }
 0xb26   :  { %1204 = vadd.xlane.f32.xlu1 %v1203_v39  ;;  %v1200_v40 = vsel %vm68_vm0, %v1198_v38, 0.0  ;;  %v2617_v39 = vld [vmem:[%s3873_s4 + $0x6] ss:$0 sm:$0xff] }
 0xb27   :  { %1201 = vadd.xlane.f32.xlu0 %v1200_v40 }
 0xbb3   :  { %v1205_v53 = vpop.xlane.xlu1 %1204 }
 0xbb4   :  { %v1207_v54 = vmul.f32 0.03125, %v1205_v53  ;;  %v1202_v55 = vpop.xlane.xlu0 %1201 }
 0xbb5   :  { %v1206_v56 = vmul.f32 0.03125, %v1202_v55 }
 0xbb6   :  { %v1209_v57 = vadd.f32 1e-05, %v1207_v54 }
 0xbb7   :  { %v1208_v58 = vadd.f32 1e-05, %v1206_v56 }
 0xbb8   :  { %3193 = vrsqrt.f32 %v1209_v57  ;;  %v2623_v57 = vld [vmem:[%s3869_s1 + $0xe8] sm:$0xff] }
 0xbb9   :  { %3195 = vrsqrt.f32 %v1208_v58 }
 0xbc2   :  { %v3194_v59 = vpop.eup %3193 }
 0xbc3   :  { %v3196_v63 = vpop.eup %3195  ;;  %v1213_v0 = vmul.f32 %v3194_v59, %v1197_v35  ;;  %v2624_v59 = vld [vmem:[%s3869_s1 + $0xf0] sm:$0xff] }
 0xbc4   :  { %v1212_v1 = vmul.f32 %v3196_v63, %v1196_v36 }
 0xbc5   :  { %v1221_v3 = vmul.f32 %v2580_v62, %v1213_v0  ;;  %v2627_v0 = vld [vmem:[%s3871_s3 + $0xe0] sm:$0xff] }
 0xbc6   :  { %v1220_v4 = vmul.f32 %v2580_v62, %v1212_v1  ;;  %v2625_v62 = vld [vmem:[%s3869_s1 + $0xf8] sm:$0xff]  ;;  %v2628_v1 = vld [vmem:[%s3871_s3 + $0xe8] sm:$0xff] }
 0xbc7   :  { %v3557_v9 = vadd.f32 %v2581_v2, %v1221_v3  ;;  %v3126_v63 = vpack.c.bf16 %v2625_v62, %v2624_v59 }
 0xbc8   :  { %v3555_v8 = vadd.f32 %v2581_v2, %v1220_v4  ;;  %v3130_v2 = vpack.c.bf16 %v2628_v1, %v2627_v0  ;;  %v2643_v0 = vld [vmem:[%s3869_s1 + $0x108] sm:$0xff] }
 0xbca   :  { %2908 = vmatprep.mubr.msk.f32.mxu0 %vm68_vm0, %v3555_v8 }
 0xbcb   :  { %2909 = vmatmul.mubr.msk.f32.vlgmr.msra.gmra.mrb[10].mxu0 %vm68_vm0, %v3557_v9 }
 0xbcc   :  { %3109 = vmatpush3.bf16.msra.mxu0 %v3106_v49  ;;  %2930 = vmatprep.mubr.msk.f32.mxu0 %vm68_vm0, %v3305_v5 }
 0xbcd   :  { %3111 = vmatprep.subr.bf16.mxu0 %v3110_v11 }
 0xbd0   :  { %3113 = vmatpush3.bf16.msra.mxu0 %v3110_v11 }
 0xbd3   :  { %2931 = vmatmul.mubr.msk.f32.vlgmr.msra.gmra.mrb[12].mxu0 %vm68_vm0, %v3318_v10 }
 0xc9e   :  { %v2910_v19 = vpop.f32.mrb[10].mxu0 }
 0xc9f   :  { %v1332_v20 = vadd.f32 %v2910_v19, %v2594_v18  ;;  %v1326_v21 = vpop.f32.mrb[11].mxu0 }
 0xca0   :  { %v1327_v22 = vadd.f32 %v2594_v18, %v1326_v21  ;;  %v2621_v18 = vld [vmem:[%s3875_s6 + $0x6] ss:$0 sm:$0xff] }
 0xca1   :  { %v1336_v28 = vmax.f32 %v1332_v20, 0.0 }
 0xca2   :  { %v1335_v27 = vmax.f32 %v1327_v22, 0.0 }
 0xca4   :  { %2919 = vmatprep.mubr.msk.f32.mxu1 %vm68_vm0, %v1335_v27  ;;  %v3134_v27 = vpack.c.bf16 %v2630_v26, %v2629_v23 }
 0xca5   :  { %2920 = vmatmul.mubr.msk.f32.vlgmr.msra.gmra.mrb[10].mxu1 %vm68_vm0, %v1336_v28  ;;  %v2634_v28 = vld [vmem:[%s3872_s2 + $0x7] ss:$0 sm:$0xff] }
 0xca6   :  { %v2932_v31 = vpop.f32.mrb[12].mxu0  ;;  %3117 = vmatpush3.bf16.msra.mxu1 %v3114_v17 }
 0xca7   :  { %v1564_v32 = vadd.f32 %v2932_v31, %v2614_v30  ;;  %v1558_v33 = vpop.f32.mrb[13].mxu0  ;;  %3119 = vmatprep.subr.bf16.mxu1 %v3118_v29 }
 0xca8   :  { %v1559_v34 = vadd.f32 %v2614_v30, %v1558_v33 }
 0xca9   :  { %v1568_v36 = vmax.f32 %v1564_v32, 0.0 }
 0xcaa   :  { %v1567_v35 = vmax.f32 %v1559_v34, 0.0  ;;  %3121 = vmatpush3.bf16.msra.mxu1 %v3118_v29 }
 0xcab   :  { %3131 = vmatprep.subr.bf16.mxu1 %v3130_v2 }
 0xcac   :  { %2941 = vmatprep.mubr.msk.f32.mxu1 %vm68_vm0, %v1567_v35  ;;  %v2637_v35 = vld [vmem:[%s3873_s4 + $0x7] ss:$0 sm:$0xff] }
 0xcad   :  { %2942 = vmatmul.mubr.msk.f32.vlgmr.msra.gmra.mrb[12].mxu1 %vm68_vm0, %v1568_v36 }
 0xcae   :  { %3133 = vmatpush3.bf16.msra.mxu1 %v3130_v2  ;;  %v2645_v2 = vld [vmem:[%s3869_s1 + $0x118] sm:$0xff] }
 0xcaf   :  { %3135 = vmatprep.subr.bf16.mxu1 %v3134_v27 }
 0xcb2   :  { %3137 = vmatpush3.bf16.msra.mxu1 %v3134_v27 }
 0xd78   :  { %v3595_v37 = vpop.f32.mrb[10].mxu1 }
 0xd79   :  { %v3597_v38 = vpop.f32.mrb[11].mxu1 }
 0xd80   :  { %v2943_v40 = vpop.f32.mrb[12].mxu1 }
 0xd81   :  { %v1653_v41 = vadd.f32 %v2943_v40, %v2617_v39  ;;  %v1647_v42 = vpop.f32.mrb[13].mxu1 }
 0xd82   :  { %v1648_v43 = vadd.f32 %v2617_v39, %v1647_v42 }
 0xd83   :  { %v1657_v44 = vadd.f32 %v1653_v41, %v3318_v10 }
 0xd84   :  { %v1656_v45 = vadd.f32 %v1648_v43, %v3305_v5  ;;  %v2622_v5 = vld [vmem:[%s3869_s1 + $0xe0] sm:$0xff] }
 0xd85   :  { %v1661_v46 = vsel %vm68_vm0, %v1657_v44, 0.0  ;;  %v3122_v58 = vpack.c.bf16 %v2623_v57, %v2622_v5 }
 0xd86   :  { %1662 = vadd.xlane.f32.xlu1 %v1661_v46  ;;  %v1658_v47 = vsel %vm68_vm0, %v1656_v45, 0.0  ;;  %v2537_v46 = vld [vmem:[%s3873_s4 + $0x2] ss:$0 sm:$0xff] }
 0xd87   :  { %1659 = vadd.xlane.f32.xlu0 %v1658_v47  ;;  %3123 = vmatprep.subr.bf16.mxu0 %v3122_v58 }
 0xd88   :  { %3125 = vmatpush3.bf16.msra.mxu0 %v3122_v58 }
 0xd89   :  { %3127 = vmatprep.subr.bf16.mxu0 %v3126_v63 }
 0xd8c   :  { %3129 = vmatpush3.bf16.msra.mxu0 %v3126_v63 }
 0xe13   :  { %v1663_v48 = vpop.xlane.xlu1 %1662 }
 0xe14   :  { %v1665_v49 = vmul.f32 0.03125, %v1663_v48  ;;  %v1660_v50 = vpop.xlane.xlu0 %1659 }
 0xe15   :  { %v1664_v51 = vmul.f32 0.03125, %v1660_v50 }
 0xe16   :  { %v1667_v52 = vsub.f32 %v1657_v44, %v1665_v49 }
 0xe17   :  { %v1666_v53 = vsub.f32 %v1656_v45, %v1664_v51  ;;  %v713_v51 = vadd.f32 %v3462_v24, %v2537_v46 }
 0xe18   :  { %v1669_v54 = vmul.f32 %v1667_v52, %v1667_v52 }
 0xe19   :  { %v1668_v55 = vmul.f32 %v1666_v53, %v1666_v53  ;;  %v3661_v58 = vadd.f32 %v713_v51, %v3424_v61 }
 0xe1a   :  { %v1673_v56 = vsel %vm68_vm0, %v1669_v54, 0.0  ;;  %v2597_v54 = vld [vmem:[%s3873_s4 + $0x5] ss:$0 sm:$0xff] }
 0xe1b   :  { %1674 = vadd.xlane.f32.xlu1 %v1673_v56  ;;  %v1670_v10 = vsel %vm68_vm0, %v1668_v55, 0.0  ;;  %v1421_v5 = vadd.f32 %v3595_v37, %v2597_v54  ;;  %v1416_v59 = vadd.f32 %v2597_v54, %v3597_v38  ;;  %v721_v62 = vsel %vm68_vm0, %v3661_v58, 0.0 }
 0xe1c   :  { %1671 = vadd.xlane.f32.xlu0 %v1670_v10 }
 0xe1d   :  { %v3671_v63 = vadd.f32 %v1421_v5, %v3557_v9  ;;  %v3676_v37 = vadd.f32 %v1416_v59, %v3555_v8  ;;  %v2642_v9 = vld [vmem:[%s3869_s1 + $0x100] sm:$0xff]  ;;  %v2644_v8 = vld [vmem:[%s3869_s1 + $0x110] sm:$0xff] }
 0xe1e   :  { %v3138_v1 = vpack.c.bf16 %v2643_v0, %v2642_v9  ;;  %v2177_v9 = vld [vmem:[%s3876_s7 + $0x8] sm:$0xff]  ;;  %v2179_v0 = vld [vmem:[%s3876_s7 + $0x18] sm:$0xff] }
 0xe1f   :  { %v1429_v38 = vsel %vm68_vm0, %v3671_v63, 0.0 }
 0xe20   :  { %3139 = vmatprep.subr.bf16.mxu0 %v3138_v1 }
 0xea8   :  { %v1675_v3 = vpop.xlane.xlu1 %1674 }
 0xea9   :  { %v1677_v4 = vmul.f32 0.03125, %v1675_v3  ;;  %v1672_v6 = vpop.xlane.xlu0 %1671  ;;  %v3142_v3 = vpack.c.bf16 %v2645_v2, %v2644_v8  ;;  %v2176_v8 = vld [vmem:[%s3876_s7] sm:$0xff]  ;;  %v2178_v2 = vld [vmem:[%s3876_s7 + $0x10] sm:$0xff] }
 0xeaa   :  { %v1676_v7 = vmul.f32 0.03125, %v1672_v6  ;;  %v2648_v6 = vld [vmem:[%s3871_s3 + $0x108] sm:$0xff] }
 0xeab   :  { %v1679_v11 = vadd.f32 1e-05, %v1677_v4  ;;  %v2647_v4 = vld [vmem:[%s3871_s3 + $0x100] sm:$0xff] }
 0xeac   :  { %v1678_v12 = vadd.f32 1e-05, %v1676_v7  ;;  %v3146_v7 = vpack.c.bf16 %v2648_v6, %v2647_v4  ;;  %v2181_v4 = vld [vmem:[%s3876_s7 + $0x28] sm:$0xff]  ;;  %v2183_v6 = vld [vmem:[%s3876_s7 + $0x38] sm:$0xff] }
 0xead   :  { %3197 = vrsqrt.f32 %v1679_v11 }
 0xeae   :  { %3199 = vrsqrt.f32 %v1678_v12  ;;  %3147 = vmatprep.subr.bf16.mxu1 %v3146_v7 }
 0xeb7   :  { %v3198_v13 = vpop.eup %3197 }
 0xeb8   :  { %v3200_v15 = vpop.eup %3199  ;;  %v1683_v16 = vmul.f32 %v3198_v13, %v1667_v52 }
 0xeb9   :  { %v1682_v17 = vmul.f32 %v3200_v15, %v1666_v53  ;;  %v708_v53 = vadd.f32 %v2537_v46, %v3464_v25  ;;  %v2657_v46 = vld [vmem:[%s3873_s4 + $0x8] ss:$0 sm:$0xff] }
 0xeba   :  { %v1691_v19 = vmul.f32 %v2620_v14, %v1683_v16 }
 0xebb   :  { %v1690_v20 = vmul.f32 %v2620_v14, %v1682_v17  ;;  %v3666_v25 = vadd.f32 %v708_v53, %v3422_v60  ;;  %v1426_v60 = vsel %vm68_vm0, %v3676_v37, 0.0 }
 0xebc   :  { %v1699_v22 = vadd.f32 %v2621_v18, %v1691_v19 }
 0xebd   :  { %v1698_v21 = vadd.f32 %v2621_v18, %v1690_v20  ;;  %v718_v61 = vsel %vm68_vm0, %v3666_v25, 0.0  ;;  %v2640_v18 = vld [vmem:[%s3874_s5 + $0x7] ss:$0 sm:$0xff] }
 0xebf   :  { %2952 = vmatprep.mubr.msk.f32.mxu0 %vm68_vm0, %v1698_v21 }
 0xec0   :  { %2953 = vmatmul.mubr.msk.f32.vlgmr.msra.gmra.mrb[14].mxu0 %vm68_vm0, %v1699_v22 }
 0xec1   :  { %3141 = vmatpush3.bf16.msra.mxu0 %v3138_v1  ;;  %v3154_v1 = vpack.c.bf16 %v2179_v0, %v2177_v9  ;;  %v2389_v9 = vld [vmem:[%s3878_s11 + $0x10] sm:$0xff]  ;;  %v2390_v0 = vld [vmem:[%s3878_s11 + $0x18] sm:$0xff] }
 0xec2   :  { %3143 = vmatprep.subr.bf16.mxu0 %v3142_v3 }
 0xec5   :  { %3145 = vmatpush3.bf16.msra.mxu0 %v3142_v3  ;;  %v3156_v3 = vpack.c.bf16 %v2178_v2, %v2176_v8  ;;  %v18_v8 = vstv %s3879_s10 }
 0xec6   :  { %3155 = vmatprep.subr.bf16.mxu0 %v3154_v1  ;;  %v3174_v1 = vpack.c.bf16 %v2390_v0, %v2389_v9  ;;  %19 = vst [vmem:[#allocation2] sm:$0x1] %v18_v8 }
 0xf93   :  { %v2954_v29 = vpop.f32.mrb[14].mxu0 }
 0xf94   :  { %v1802_v30 = vadd.f32 %v2954_v29, %v2634_v28  ;;  %v1796_v31 = vpop.f32.mrb[15].mxu0  ;;  %v2649_v29 = vld [vmem:[%s3871_s3 + $0x110] sm:$0xff] }
 0xf95   :  { %v1797_v32 = vadd.f32 %v2634_v28, %v1796_v31 }
 0xf96   :  { %v1806_v34 = vmax.f32 %v1802_v30, 0.0  ;;  %v2650_v30 = vld [vmem:[%s3871_s3 + $0x118] sm:$0xff] }
 0xf97   :  { %v1805_v33 = vmax.f32 %v1797_v32, 0.0  ;;  %v3150_v31 = vpack.c.bf16 %v2650_v30, %v2649_v29  ;;  %v2654_v32 = vld [vmem:[%s3872_s2 + $0x8] ss:$0 sm:$0xff] }
 0xf99   :  { %2963 = vmatprep.mubr.msk.f32.mxu1 %vm68_vm0, %v1805_v33 }
 0xf9a   :  { %2964 = vmatmul.mubr.msk.f32.vlgmr.msra.gmra.mrb[14].mxu1 %vm68_vm0, %v1806_v34 }
 0xf9b   :  { %3149 = vmatpush3.bf16.msra.mxu1 %v3146_v7  ;;  %v3158_v7 = vpack.c.bf16 %v2183_v6, %v2181_v4 }
 0xf9c   :  { %3151 = vmatprep.subr.bf16.mxu1 %v3150_v31 }
 0xf9f   :  { %3153 = vmatpush3.bf16.msra.mxu1 %v3150_v31 }
0x106d   :  { %v2965_v36 = vpop.f32.mrb[14].mxu1 }
0x106e   :  { %v1891_v39 = vadd.f32 %v2965_v36, %v2637_v35  ;;  %v1885_v40 = vpop.f32.mrb[15].mxu1 }
0x106f   :  { %v1886_v41 = vadd.f32 %v2637_v35, %v1885_v40 }
0x1070   :  { %v1895_v42 = vadd.f32 %v1891_v39, %v1699_v22  ;;  %v2641_v22 = vld [vmem:[%s3875_s6 + $0x7] ss:$0 sm:$0xff] }
0x1071   :  { %v1894_v43 = vadd.f32 %v1886_v41, %v1698_v21 }
0x1072   :  { %v1899_v44 = vsel %vm68_vm0, %v1895_v42, 0.0 }
0x1073   :  { %1900 = vadd.xlane.f32.xlu1 %v1899_v44  ;;  %v1896_v45 = vsel %vm68_vm0, %v1894_v43, 0.0 }
0x1074   :  { %1897 = vadd.xlane.f32.xlu0 %v1896_v45 }
0x1100   :  { %v1901_v47 = vpop.xlane.xlu1 %1900 }
0x1101   :  { %v1903_v48 = vmul.f32 0.03125, %v1901_v47  ;;  %v1898_v49 = vpop.xlane.xlu0 %1897 }
0x1102   :  { %v1902_v50 = vmul.f32 0.03125, %v1898_v49 }
0x1103   :  { %v1905_v52 = vsub.f32 %v1895_v42, %v1903_v48 }
0x1104   :  { %v1904_v55 = vsub.f32 %v1894_v43, %v1902_v50 }
0x1105   :  { %v1907_v56 = vmul.f32 %v1905_v52, %v1905_v52 }
0x1106   :  { %v1906_v10 = vmul.f32 %v1904_v55, %v1904_v55 }
0x1107   :  { %v1911_v57 = vsel %vm68_vm0, %v1907_v56, 0.0 }
0x1108   :  { %1912 = vadd.xlane.f32.xlu1 %v1911_v57  ;;  %v1908_v24 = vsel %vm68_vm0, %v1906_v10, 0.0 }
0x1109   :  { %1909 = vadd.xlane.f32.xlu0 %v1908_v24 }
0x110c   :  { %722 = vadd.xlane.f32.xlu1 %v721_v62 }
0x110d   :  { %719 = vadd.xlane.f32.xlu0 %v718_v61 }
0x1110   :  { %1430 = vadd.xlane.f32.xlu1 %v1429_v38 }
0x1111   :  { %1427 = vadd.xlane.f32.xlu0 %v1426_v60 }
0x1195   :  { %v1913_v11 = vpop.xlane.xlu1 %1912 }
0x1196   :  { %v1915_v12 = vmul.f32 0.03125, %v1913_v11  ;;  %v1910_v13 = vpop.xlane.xlu0 %1909  ;;  %v2180_v11 = vld [vmem:[%s3876_s7 + $0x20] sm:$0xff] }
0x1197   :  { %v1914_v14 = vmul.f32 0.03125, %v1910_v13  ;;  %v2284_v13 = vld [vmem:[%s3877_s9] sm:$0xff] }
0x1198   :  { %v1917_v15 = vadd.f32 1e-05, %v1915_v12  ;;  %v2182_v12 = vld [vmem:[%s3876_s7 + $0x30] sm:$0xff] }
0x1199   :  { %v1916_v16 = vadd.f32 1e-05, %v1914_v14  ;;  %v723_v41 = vpop.xlane.xlu1 %722  ;;  %v3160_v14 = vpack.c.bf16 %v2182_v12, %v2180_v11 }
0x119a   :  { %3201 = vrsqrt.f32 %v1917_v15  ;;  %v720_v42 = vpop.xlane.xlu0 %719  ;;  %v725_v43 = vmul.f32 0.03125, %v723_v41  ;;  %v2285_v15 = vld [vmem:[%s3877_s9 + $0x8] sm:$0xff] }
0x119b   :  { %3203 = vrsqrt.f32 %v1916_v16  ;;  %v724_v44 = vmul.f32 0.03125, %v720_v42  ;;  %v3162_v16 = vpack.c.bf16 %v2285_v15, %v2284_v13  ;;  %v2660_v13 = vld [vmem:[%s3874_s5 + $0x8] ss:$0 sm:$0xff] }
0x119c   :  { %v3723_v49 = vsub.f32 %v3661_v58, %v725_v43 }
0x119d   :  { %v1431_v45 = vpop.xlane.xlu1 %1430  ;;  %v3726_v53 = vsub.f32 %v3666_v25, %v724_v44  ;;  %3163 = vmatprep.subr.bf16.mxu1 %v3162_v16 }
0x119e   :  { %v1428_v47 = vpop.xlane.xlu0 %1427  ;;  %v1433_v50 = vmul.f32 0.03125, %v1431_v45  ;;  %v729_v59 = vmul.f32 %v3723_v49, %v3723_v49 }
0x119f   :  { %v1432_v54 = vmul.f32 0.03125, %v1428_v47  ;;  %v728_v25 = vmul.f32 %v3726_v53, %v3726_v53 }
0x11a0   :  { %v3729_v5 = vsub.f32 %v3671_v63, %v1433_v50  ;;  %v733_v62 = vsel %vm68_vm0, %v729_v59, 0.0  ;;  %v2540_v50 = vld [vmem:[%s3874_s5 + $0x2] ss:$0 sm:$0xff] }
0x11a1   :  { %v3735_v58 = vsub.f32 %v3676_v37, %v1432_v54  ;;  %v730_v61 = vsel %vm68_vm0, %v728_v25, 0.0  ;;  %v2541_v54 = vld [vmem:[%s3875_s6 + $0x2] ss:$0 sm:$0xff] }
0x11a2   :  { %v1437_v63 = vmul.f32 %v3729_v5, %v3729_v5 }
0x11a3   :  { %v1436_v38 = vmul.f32 %v3735_v58, %v3735_v58 }
0x11a4   :  { %v3202_v17 = vpop.eup %3201  ;;  %v1441_v37 = vsel %vm68_vm0, %v1437_v63, 0.0 }
0x11a5   :  { %v3204_v19 = vpop.eup %3203  ;;  %v1921_v20 = vmul.f32 %v3202_v17, %v1905_v52  ;;  %v1438_v60 = vsel %vm68_vm0, %v1436_v38, 0.0  ;;  %v3217_v17 = vmov 0.0  }
0x11a6   :  { %v1920_v21 = vmul.f32 %v3204_v19, %v1904_v55  ;;  %v2287_v19 = vld [vmem:[%s3877_s9 + $0x18] sm:$0xff] }
0x11a7   :  { %v1929_v23 = vmul.f32 %v2640_v18, %v1921_v20 }
0x11a8   :  { %v1928_v26 = vmul.f32 %v2640_v18, %v1920_v21  ;;  %v2286_v18 = vld [vmem:[%s3877_s9 + $0x10] sm:$0xff] }
0x11a9   :  { %v1937_v28 = vadd.f32 %v2641_v22, %v1929_v23  ;;  %v3166_v20 = vpack.c.bf16 %v2287_v19, %v2286_v18 }
0x11aa   :  { %v1936_v27 = vadd.f32 %v2641_v22, %v1928_v26 }
0x11ac   :  { %2974 = vmatprep.mubr.msk.f32.mxu0 %vm68_vm0, %v1936_v27 }
0x11ad   :  { %2975 = vmatmul.mubr.msk.f32.vlgmr.msra.gmra.mrb[16].mxu0 %vm68_vm0, %v1937_v28 }
0x11ae   :  { %3157 = vmatpush1.bf16.msra.mxu0 %v3156_v3  ;;  %2266 = vmatprep.mubr.f32.mxu0 %v3217_v17 }
0x11af   :  { %3159 = vmatprep.subr.bf16.mxu0 %v3158_v7 }
0x11b2   :  { %3161 = vmatpush1.bf16.msra.mxu0 %v3160_v14 }
0x1280   :  { %v2976_v33 = vpop.f32.mrb[16].mxu0 }
0x1281   :  { %v2040_v34 = vadd.f32 %v2976_v33, %v2654_v32  ;;  %v2034_v35 = vpop.f32.mrb[17].mxu0 }
0x1282   :  { %v2035_v36 = vadd.f32 %v2654_v32, %v2034_v35 }
0x1283   :  { %v2044_v40 = vmax.f32 %v2040_v34, 0.0 }
0x1284   :  { %v2043_v39 = vmax.f32 %v2035_v36, 0.0 }
0x1286   :  { %2985 = vmatprep.mubr.msk.f32.mxu1 %vm68_vm0, %v2043_v39 }
0x1287   :  { %2986 = vmatmul.mubr.msk.f32.vlgmr.msra.gmra.mrb[16].mxu1 %vm68_vm0, %v2044_v40 }
0x1288   :  { %3165 = vmatpush3.bf16.msra.mxu1 %v3162_v16 }
0x1289   :  { %3167 = vmatprep.subr.bf16.mxu1 %v3166_v20 }
0x128c   :  { %3169 = vmatpush3.bf16.msra.mxu1 %v3166_v20 }
0x135a   :  { %v2987_v48 = vpop.f32.mrb[16].mxu1 }
0x135b   :  { %v2129_v51 = vadd.f32 %v2987_v48, %v2657_v46  ;;  %v2123_v52 = vpop.f32.mrb[17].mxu1 }
0x135c   :  { %v2124_v55 = vadd.f32 %v2657_v46, %v2123_v52 }
0x135d   :  { %v2133_v56 = vadd.f32 %v2129_v51, %v1937_v28 }
0x135e   :  { %v2132_v10 = vadd.f32 %v2124_v55, %v1936_v27 }
0x135f   :  { %v2137_v57 = vsel %vm68_vm0, %v2133_v56, 0.0 }
0x1360   :  { %2138 = vadd.xlane.f32.xlu1 %v2137_v57  ;;  %v2134_v24 = vsel %vm68_vm0, %v2132_v10, 0.0 }
0x1361   :  { %2135 = vadd.xlane.f32.xlu0 %v2134_v24 }
0x1364   :  { %734 = vadd.xlane.f32.xlu1 %v733_v62 }
0x1365   :  { %731 = vadd.xlane.f32.xlu0 %v730_v61 }
0x1368   :  { %1442 = vadd.xlane.f32.xlu1 %v1441_v37 }
0x1369   :  { %1439 = vadd.xlane.f32.xlu0 %v1438_v60 }
0x13ed   :  { %v2139_v21 = vpop.xlane.xlu1 %2138 }
0x13ee   :  { %v2141_v22 = vmul.f32 0.03125, %v2139_v21  ;;  %v2136_v23 = vpop.xlane.xlu0 %2135 }
0x13ef   :  { %v2140_v26 = vmul.f32 0.03125, %v2136_v23 }
0x13f0   :  { %v3784_v27 = vsub.f32 %v2133_v56, %v2141_v22  ;;  %v2186_v22 = vlaneseq }
0x13f1   :  { %v3786_v28 = vsub.f32 %v2132_v10, %v2140_v26  ;;  %v735_v29 = vpop.xlane.xlu1 %734  ;;  %v2600_v10 = vld [vmem:[%s3874_s5 + $0x5] ss:$0 sm:$0xff] }
0x13f2   :  { %v737_v30 = vmul.f32 0.03125, %v735_v29  ;;  %v732_v31 = vpop.xlane.xlu0 %731  ;;  %v2145_v32 = vmul.f32 %v3784_v27, %v3784_v27  ;;  %v2187_v23 = vshrl.u32 %v2186_v22, 7 }
0x13f3   :  { %v736_v33 = vmul.f32 0.03125, %v732_v31  ;;  %v2144_v34 = vmul.f32 %v3786_v28, %v3786_v28 }
0x13f4   :  { %v739_v35 = vadd.f32 1e-05, %v737_v30  ;;  %v2149_v36 = vsel %vm68_vm0, %v2145_v32, 0.0  ;;  %v2188_v26 = vsub.s32 0, %v2187_v23  ;;  %v20_v30 = vstv %s3881_s12 }
0x13f5   :  { %v738_v39 = vadd.f32 1e-05, %v736_v33  ;;  %2150 = vadd.xlane.f32.xlu1 %v2149_v36  ;;  %v1443_v40 = vpop.xlane.xlu1 %1442  ;;  %v2146_v41 = vsel %vm68_vm0, %v2144_v34, 0.0  ;;  %21 = vst [vmem:[#allocation3] sm:$0x1] %v20_v30 }
0x13f6   :  { %3205 = vrsqrt.f32 %v739_v35  ;;  %v1445_v42 = vmul.f32 0.03125, %v1443_v40  ;;  %2147 = vadd.xlane.f32.xlu0 %v2146_v41  ;;  %v1440_v43 = vpop.xlane.xlu0 %1439  ;;  %v2664_v36 = vld [vmem:[#allocation2] ss:$0 sm:$0xff] }
0x13f7   :  { %3207 = vrsqrt.f32 %v738_v39  ;;  %v1444_v44 = vmul.f32 0.03125, %v1440_v43 }
0x13f8   :  { %v1447_v45 = vadd.f32 1e-05, %v1445_v42 }
0x13f9   :  { %v1446_v46 = vadd.f32 1e-05, %v1444_v44 }
0x13fa   :  { %3209 = vrsqrt.f32 %v1447_v45 }
0x13fb   :  { %3211 = vrsqrt.f32 %v1446_v46 }
0x1400   :  { %v3206_v47 = vpop.eup %3205 }
0x1401   :  { %v3208_v48 = vpop.eup %3207  ;;  %v743_v52 = vmul.f32 %v3206_v47, %v3723_v49  ;;  %v2601_v49 = vld [vmem:[%s3875_s6 + $0x5] ss:$0 sm:$0xff] }
0x1402   :  { %v742_v51 = vmul.f32 %v3208_v48, %v3726_v53 }
0x1403   :  { %v751_v25 = vmul.f32 %v2540_v50, %v743_v52 }
0x1404   :  { %v3210_v55 = vpop.eup %3209  ;;  %v750_v56 = vmul.f32 %v2540_v50, %v742_v51  ;;  %v2667_v50 = vld [vmem:[#allocation3] ss:$0 sm:$0xff] }
0x1405   :  { %v3212_v57 = vpop.eup %3211  ;;  %v1451_v59 = vmul.f32 %v3210_v55, %v3729_v5  ;;  %v759_v61 = vadd.f32 %v2541_v54, %v751_v25  ;;  %v2387_v5 = vld [vmem:[%s3878_s11] sm:$0xff] }
0x1406   :  { %v758_v24 = vadd.f32 %v2541_v54, %v750_v56  ;;  %v1450_v62 = vmul.f32 %v3212_v57, %v3735_v58  ;;  %v2388_v58 = vld [vmem:[%s3878_s11 + $0x8] sm:$0xff] }
0x1407   :  { %v1459_v53 = vmul.f32 %v2600_v10, %v1451_v59  ;;  %v3170_v60 = vpack.c.bf16 %v2388_v58, %v2387_v5 }
0x1408   :  { %2662 = vmatmul.mubr.msk.f32.vlgmr.msra.gmra.mrb[18].mxu0 %vm68_vm0, %v758_v24  ;;  %v1458_v63 = vmul.f32 %v2600_v10, %v1450_v62 }
0x1409   :  { %2272 = vmatprep.mubr.f32.mxu0 %v3217_v17  ;;  %v1467_v37 = vadd.f32 %v2601_v49, %v1459_v53  ;;  %3171 = vmatprep.subr.bf16.mxu0 %v3170_v60  ;;  %v2661_v17 = vld [vmem:[%s3875_s6 + $0x8] ss:$0 sm:$0xff] }
0x140a   :  { %v1466_v38 = vadd.f32 %v2601_v49, %v1458_v63  ;;  %3173 = vmatpush3.bf16.msra.mxu0 %v3170_v60 }
0x140b   :  { %3175 = vmatprep.subr.bf16.mxu0 %v3174_v1 }
0x140c   :  { %2663 = vmatmul.mubr.msk.f32.gmra.mrb[20].mxu0 %vm68_vm0, %v759_v61  ;;  %2996 = vmatprep.mubr.msk.f32.mxu1 %vm68_vm0, %v1466_v38 }
0x140d   :  { %2997 = vmatmul.mubr.msk.f32.vlgmr.msra.gmra.mrb[18].mxu1 %vm68_vm0, %v1467_v37 }
0x140e   :  { %3177 = vmatpush3.bf16.msra.mxu0 %v3174_v1 }
0x1482   :  { %v2151_v2 = vpop.xlane.xlu1 %2150 }
0x1483   :  { %v2153_v3 = vmul.f32 0.03125, %v2151_v2  ;;  %v2148_v4 = vpop.xlane.xlu0 %2147 }
0x1484   :  { %v2152_v6 = vmul.f32 0.03125, %v2148_v4 }
0x1485   :  { %v2155_v7 = vadd.f32 1e-05, %v2153_v3 }
0x1486   :  { %v2154_v11 = vadd.f32 1e-05, %v2152_v6 }
0x1487   :  { %3213 = vrsqrt.f32 %v2155_v7 }
0x1488   :  { %3215 = vrsqrt.f32 %v2154_v11 }
0x1491   :  { %v3214_v12 = vpop.eup %3213 }
0x1492   :  { %v3216_v14 = vpop.eup %3215  ;;  %v2159_v15 = vmul.f32 %v3214_v12, %v3784_v27  ;;  %v2184_v27 = vld [vmem:[%s3880_s8] sm:$0x3] }
0x1493   :  { %v2158_v16 = vmul.f32 %v3216_v14, %v3786_v28  ;;  %v2192_v28 = vsub.s32 1, %v2187_v23  ;;  %v2189_v29 = vrot.slane %v2184_v27, %v2188_v26 }
0x1494   :  { %v2167_v18 = vmul.f32 %v2660_v13, %v2159_v15 }
0x1495   :  { %v2166_v19 = vmul.f32 %v2660_v13, %v2158_v16  ;;  %v2193_v31 = vrot.slane %v2184_v27, %v2192_v28 }
0x1496   :  { %v2175_v21 = vadd.f32 %v2661_v17, %v2167_v18 }
0x1497   :  { %v2174_v20 = vadd.f32 %v2661_v17, %v2166_v19 }
0x1499   :  { %3007 = vmatprep.mubr.msk.f32.mxu0 %vm68_vm0, %v2174_v20 }
0x149a   :  { %3008 = vmatmul.mubr.msk.f32.vlgmr.msra.gmra.mrb[22].mxu0 %vm68_vm0, %v2175_v21 }
0x14db   :  { %v2268_v32 = vpop.f32.mrb[18].mxu0 }
0x14dc   :  { %v2269_v33 = vadd.f32 %v2268_v32, %v2189_v29  ;;  %v2270_v34 = vpop.f32.mrb[19].mxu0 }
0x14dd   :  { %v2271_v35 = vadd.f32 %v2270_v34, %v2193_v31 }
0x14de   :  { %2279 = vst [vmem:[%s3882_s13] sm:$0xff] %v2269_v33 }
0x14df   :  { %2281 = vst.msk [vmem:[%s3882_s13 + $0x8] sm:$0xff] %vm2280_vm1, %v2271_v35  ;;  %v2274_v39 = vpop.f32.mrb[20].mxu0 }
0x14e0   :  { %v2275_v40 = vadd.f32 %v2274_v39, %v2189_v29  ;;  %v2276_v41 = vpop.f32.mrb[21].mxu0  ;;  %v2998_v42 = vpop.f32.mrb[18].mxu1 }
0x14e1   :  { %v2277_v43 = vadd.f32 %v2276_v41, %v2193_v31  ;;  %v2373_v44 = vadd.f32 %v2998_v42, %v2664_v36  ;;  %v2367_v45 = vpop.f32.mrb[19].mxu1 }
0x14e2   :  { %2282 = vst [vmem:[%s3882_s13 + $0x10] sm:$0xff] %v2275_v40  ;;  %v2368_v46 = vadd.f32 %v2664_v36, %v2367_v45 }
0x14e3   :  { %2283 = vst.msk [vmem:[%s3882_s13 + $0x18] sm:$0xff] %vm2280_vm1, %v2277_v43  ;;  %2380 = vrot.lane.b32.xlu1 %v2373_v44, %s3218_s18 }
0x14e4   :  { %2378 = vrot.lane.b32.xlu0 %v2368_v46, %s3218_s18 }
0x1555   :  { %v2381_v47 = vpop.permute.xlu1 %2380 }
0x1556   :  { %2386 = vst.msk [vmem:[%s3882_s13 + $0x18] sm:$0xff] %vm2384_vm2, %v2381_v47  ;;  %v2379_v48 = vpop.permute.xlu0 %2378 }
0x1557   :  { %2385 = vst.msk [vmem:[%s3882_s13 + $0x8] sm:$0xff] %vm2384_vm2, %v2379_v48 }
0x156d   :  { %v3009_v51 = vpop.f32.mrb[22].mxu0 }
0x156e   :  { %v2470_v52 = vpop.f32.mrb[23].mxu0  ;;  %v2476_v55 = vadd.f32 %v3009_v51, %v2667_v50 }
0x156f   :  { %v2471_v54 = vadd.f32 %v2667_v50, %v2470_v52 }
0x1571   :  { %2481 = vrot.lane.b32.xlu1 %v2471_v54, %s3219_s23 }
0x1575   :  { %2483 = vrot.lane.b32.xlu1 %v2476_v55, %s3219_s23 }
0x15e3   :  { %v2482_v56 = vpop.permute.xlu1 %2481 }
0x15e4   :  { %2488 = vst.msk [vmem:[%s3882_s13 + $0x8] sm:$0xff] %vm2487_vm3, %v2482_v56 }
0x15e7   :  { %v2484_v10 = vpop.permute.xlu1 %2483 }
0x15e8   :  { %2489 = vst.msk [vmem:[%s3882_s13 + $0x18] sm:$0xff] %vm2487_vm3, %v2484_v10 }

</bundles_post_ra>
